<compile_context>
chip_gen: v5e
topology: v5e:2x2
jax: 0.10.0
libtpu: 0.0.40
codegen_flags: <defaults>
</compile_context>

<pallas_src>
import functools
import math

import jax
import jax.numpy as jnp
import numpy as np
from jax.experimental import pallas as pl
from jax.experimental.pallas import tpu as pltpu


def _round_up(x, m):
    return ((x + m - 1) // m) * m


# ----------------------------------------------------------------------------
# Pallas kernels
# ----------------------------------------------------------------------------
def _matmul_bias_relu_kernel(x_ref, w_ref, b_ref, o_ref):
    # x: [tm, K] bf16, w: [K, N] bf16, b: [1, N] f32 -> o: [tm, N] bf16
    y = jnp.dot(x_ref[...], w_ref[...], preferred_element_type=jnp.float32)
    o_ref[...] = jnp.maximum(y + b_ref[...], 0.0).astype(o_ref.dtype)


def pallas_matmul_bias_relu(x, w, b2):
    """x: [M, K] bf16, w: [K, N] bf16 (pre-transposed), b2: [1, N] f32."""
    M, K = x.shape
    N = w.shape[1]
    # Split M into two parallel tiles when it divides cleanly into
    # multiple-of-16 halves (lets v7x use both TensorCores); otherwise use a
    # single full-array block.
    if M % 32 == 0 and M >= 256:
        tm = M // 2
    else:
        tm = M
    grid = (pl.cdiv(M, tm),)
    return pl.pallas_call(
        _matmul_bias_relu_kernel,
        out_shape=jax.ShapeDtypeStruct((M, N), x.dtype),
        grid=grid,
        in_specs=[
            pl.BlockSpec((tm, K), lambda i: (i, 0)),
            pl.BlockSpec((K, N), lambda i: (0, 0)),   # weight stays resident
            pl.BlockSpec((1, N), lambda i: (0, 0)),
        ],
        out_specs=pl.BlockSpec((tm, N), lambda i: (i, 0)),
        compiler_params=pltpu.CompilerParams(
            dimension_semantics=("parallel",)),
    )(x, w, b2)


def _fc_head_kernel(x_ref, wh_ref, bh_ref, wz_ref, bz_ref, o_ref, *,
                    action_space, atoms, atoms_pad, log):
    # x : [B, 3136] bf16
    # wh: [3136, 2H] bf16   (fc_h_v | fc_h_a concatenated along N)
    # wz: [2H, (1+A)*atoms_pad] bf16  block-diagonal, 128-lane-aligned blocks
    h = jnp.dot(x_ref[...], wh_ref[...], preferred_element_type=jnp.float32)
    h = jnp.maximum(h + bh_ref[...], 0.0)                       # [B, 2H] f32

    z = jnp.dot(h.astype(wz_ref.dtype), wz_ref[...],
                preferred_element_type=jnp.float32)
    z = z + bz_ref[...]                                         # [B,(1+A)*AP] f32

    B = z.shape[0]
    v = z[:, :atoms_pad]                                        # 128-aligned
    a = [z[:, (1 + i) * atoms_pad:(2 + i) * atoms_pad]          # 128-aligned
         for i in range(action_space)]

    mean_a = a[0]
    for i in range(1, action_space):
        mean_a = mean_a + a[i]
    mean_a = mean_a * (1.0 / action_space)

    # Mask padded lanes (>= atoms) out of the softmax.
    lane = jax.lax.broadcasted_iota(jnp.int32, (B, atoms_pad), 1)
    valid = lane < atoms
    neg = jnp.float32(-1e30)

    outs = []
    for i in range(action_space):
        q = v + a[i] - mean_a                                   # [B, AP] f32
        q = jnp.where(valid, q, neg)
        m = jnp.max(q, axis=-1, keepdims=True)
        e = jnp.exp(q - m)
        s = jnp.sum(e, axis=-1, keepdims=True)
        if log:
            outs.append(q - m - jnp.log(s))
        else:
            outs.append(e / s)
    # Single lane-dense store: [B, A*atoms_pad] (every piece 128-aligned).
    o_ref[...] = jnp.concatenate(outs, axis=-1)


def pallas_fc_head(x, wh, bh, wz, bz, action_space, atoms, log=False):
    """Fused FC head: hidden noisy layers + z noisy layers + dueling softmax."""
    B, K = x.shape
    H2 = wh.shape[1]
    Z = wz.shape[1]
    atoms_pad = Z // (1 + action_space)
    kern = functools.partial(_fc_head_kernel, action_space=action_space,
                             atoms=atoms, atoms_pad=atoms_pad, log=log)
    out = pl.pallas_call(
        kern,
        out_shape=jax.ShapeDtypeStruct((B, action_space * atoms_pad),
                                       jnp.float32),
        in_specs=[
            pl.BlockSpec((B, K), lambda: (0, 0)),
            pl.BlockSpec((K, H2), lambda: (0, 0)),
            pl.BlockSpec((1, H2), lambda: (0, 0)),
            pl.BlockSpec((H2, Z), lambda: (0, 0)),
            pl.BlockSpec((1, Z), lambda: (0, 0)),
        ],
        out_specs=pl.BlockSpec((B, action_space * atoms_pad), lambda: (0, 0)),
    )(x, wh, bh, wz, bz)
    # Strip the lane padding outside the kernel (tiny array, cheap XLA glue).
    return out.reshape(B, action_space, atoms_pad)[:, :, :atoms]


# ----------------------------------------------------------------------------
# Glue: NHWC im2col (conv -> matmul); activations stay NHWC, bf16 throughout.
# ----------------------------------------------------------------------------
def im2col_nhwc(x, kh, kw, stride, padding):
    """x: [B, H, W, C] -> patches [B*Ho*Wo, kh*kw*C] with (kh, kw, C) K-order."""
    B, H, W, C = x.shape
    if padding:
        x = jnp.pad(x, ((0, 0), (padding, padding), (padding, padding), (0, 0)))
    Hp, Wp = x.shape[1], x.shape[2]
    Ho = (Hp - kh) // stride + 1
    Wo = (Wp - kw) // stride + 1
    cols = []
    for i in range(kh):
        for j in range(kw):
            cols.append(x[:, i:i + stride * (Ho - 1) + 1:stride,
                          j:j + stride * (Wo - 1) + 1:stride, :])  # [B,Ho,Wo,C]
    p = jnp.stack(cols, axis=3)                    # [B, Ho, Wo, kh*kw, C]
    return p.reshape(B * Ho * Wo, kh * kw * C), Ho, Wo


def conv2d_relu_nhwc(x, w_mat, b2, k, stride, padding):
    """x: [B, H, W, C_in] NHWC bf16; w_mat: [k*k*C_in, C_out] bf16; b2: [1,C_out] f32."""
    B = x.shape[0]
    patches, Ho, Wo = im2col_nhwc(x, k, k, stride, padding)
    y = pallas_matmul_bias_relu(patches, w_mat, b2)      # [B*Ho*Wo, C_out] bf16
    return y.reshape(B, Ho, Wo, w_mat.shape[1])          # stays NHWC


# ----------------------------------------------------------------------------
# Parameter construction (deterministic, mirrors torch init semantics).
# Weights are pre-transposed / pre-permuted into kernel layout and cast to
# bf16 at init; biases stay f32.
# ----------------------------------------------------------------------------
def make_conv_params(key, c_out, c_in, k):
    k1, k2 = jax.random.split(key)
    bound = 1.0 / math.sqrt(c_in * k * k)
    w = jax.random.uniform(k1, (c_out, c_in, k, k), jnp.float32, -bound, bound)
    b = jax.random.uniform(k2, (c_out,), jnp.float32, -bound, bound)
    # PyTorch [C_out, C_in, kh, kw] -> NHWC-im2col matmul layout [kh*kw*C_in, C_out].
    w_mat = w.transpose(2, 3, 1, 0).reshape(k * k * c_in, c_out)
    return w_mat.astype(jnp.bfloat16), b.reshape(1, c_out)


def _scale_noise(key, size):
    x = jax.random.normal(key, (size,), jnp.float32)
    return jnp.sign(x) * jnp.sqrt(jnp.abs(x))


def make_noisy_linear_params(key, in_features, out_features, std_init=0.4):
    """Effective (weight [out,in], bias [out]) in *training* mode:
       w = mu + sigma * eps (factorized Gaussian noise, sampled once)."""
    k1, k2, k3, k4 = jax.random.split(key, 4)
    mu_range = 1.0 / math.sqrt(in_features)
    weight_mu = jax.random.uniform(k1, (out_features, in_features), jnp.float32,
                                   -mu_range, mu_range)
    bias_mu = jax.random.uniform(k2, (out_features,), jnp.float32,
                                 -mu_range, mu_range)
    weight_sigma = jnp.full((out_features, in_features),
                            std_init / math.sqrt(in_features), jnp.float32)
    bias_sigma = jnp.full((out_features,),
                          std_init / math.sqrt(out_features), jnp.float32)
    eps_in = _scale_noise(k3, in_features)
    eps_out = _scale_noise(k4, out_features)
    w_eff = weight_mu + weight_sigma * jnp.outer(eps_out, eps_in)
    b_eff = bias_mu + bias_sigma * eps_out
    return w_eff, b_eff


def _permute_fc_h_weight(w, c=64, h=7, ww=7):
    """PyTorch flattens conv output (C,H,W)-major; our NHWC flatten is
    (H,W,C)-major.  Permute the K axis of the fc_h weight once at init."""
    out = w.shape[0]
    return w.reshape(out, c, h, ww).transpose(0, 2, 3, 1).reshape(out, c * h * ww)


def build_params(root_key, history_length, hidden_size, atoms, action_space,
                 noisy_std):
    keys = jax.random.split(root_key, 8)
    conv1_w, conv1_b = make_conv_params(keys[0], 32, history_length, 8)
    conv2_w, conv2_b = make_conv_params(keys[1], 64, 32, 4)
    conv3_w, conv3_b = make_conv_params(keys[2], 64, 64, 3)

    fc_h_v_w, fc_h_v_b = make_noisy_linear_params(keys[3], 3136, hidden_size, noisy_std)
    fc_h_a_w, fc_h_a_b = make_noisy_linear_params(keys[4], 3136, hidden_size, noisy_std)
    fc_z_v_w, fc_z_v_b = make_noisy_linear_params(keys[5], hidden_size, atoms, noisy_std)
    fc_z_a_w, fc_z_a_b = make_noisy_linear_params(
        keys[6], hidden_size, action_space * atoms, noisy_std)

    # Fused hidden layer: [3136, 2H]  (columns 0..H-1 = fc_h_v, H.. = fc_h_a).
    fc_h_w = jnp.concatenate([_permute_fc_h_weight(fc_h_v_w).T,
                              _permute_fc_h_weight(fc_h_a_w).T], axis=1)
    fc_h_b = jnp.concatenate([fc_h_v_b, fc_h_a_b]).reshape(1, 2 * hidden_size)

    # Fused block-diagonal z layer, atoms padded to 128 lanes per block so all
    # in-kernel slices are lane-aligned. Padded weight columns / biases are 0;
    # the kernel masks the padded lanes out of the softmax.
    atoms_pad = _round_up(atoms, 128)
    Z = atoms_pad * (1 + action_space)
    fc_z_w = jnp.zeros((2 * hidden_size, Z), jnp.float32)
    fc_z_b = jnp.zeros((1, Z), jnp.float32)
    fc_z_w = fc_z_w.at[:hidden_size, :atoms].set(fc_z_v_w.T)
    fc_z_b = fc_z_b.at[0, :atoms].set(fc_z_v_b)
    for i in range(action_space):
        col = (1 + i) * atoms_pad
        fc_z_w = fc_z_w.at[hidden_size:, col:col + atoms].set(
            fc_z_a_w.T[:, i * atoms:(i + 1) * atoms])
        fc_z_b = fc_z_b.at[0, col:col + atoms].set(
            fc_z_a_b[i * atoms:(i + 1) * atoms])

    return dict(
        conv1_w=conv1_w, conv1_b=conv1_b,
        conv2_w=conv2_w, conv2_b=conv2_b,
        conv3_w=conv3_w, conv3_b=conv3_b,
        fc_h_w=fc_h_w.astype(jnp.bfloat16), fc_h_b=fc_h_b,
        fc_z_w=fc_z_w.astype(jnp.bfloat16), fc_z_b=fc_z_b,
    ), keys[7]


# ----------------------------------------------------------------------------
# DQN forward
# ----------------------------------------------------------------------------
def dqn_forward(params, x_nchw, *, action_space, atoms, log=False):
    # One-time layout change: NCHW -> NHWC (kept NHWC, bf16 through the convs).
    x = jnp.transpose(x_nchw, (0, 2, 3, 1)).astype(jnp.bfloat16)
    x = conv2d_relu_nhwc(x, params["conv1_w"], params["conv1_b"], 8, 4, 1)
    x = conv2d_relu_nhwc(x, params["conv2_w"], params["conv2_b"], 4, 2, 0)
    x = conv2d_relu_nhwc(x, params["conv3_w"], params["conv3_b"], 3, 1, 0)
    B = x.shape[0]
    x = x.reshape(B, -1)          # NHWC flatten; fc_h weights pre-permuted to match.
    return pallas_fc_head(x, params["fc_h_w"], params["fc_h_b"],
                          params["fc_z_w"], params["fc_z_b"],
                          action_space, atoms, log=log)


# ----------------------------------------------------------------------------
# Main
# ----------------------------------------------------------------------------
if __name__ == "__main__":
    # Hyperparameters (3136 = 64*7*7 forces 84x84 spatial input).
    batch = 2
    history_length = 4
    H = W = 84
    hidden_size = 128
    atoms = 51
    action_space = 6
    noisy_std = 0.4

    params, x_key = build_params(jax.random.PRNGKey(0), history_length,
                                 hidden_size, atoms, action_space, noisy_std)
    x = jax.random.uniform(x_key, (batch, history_length, H, W), jnp.float32)

    fwd = jax.jit(functools.partial(dqn_forward, action_space=action_space,
                                    atoms=atoms, log=False))
    fwd_log = jax.jit(functools.partial(dqn_forward, action_space=action_space,
                                        atoms=atoms, log=True))
    q = jax.block_until_ready(fwd(params, x))
    lq = jax.block_until_ready(fwd_log(params, x))

    # Sanity checks: shapes, softmax normalization over atoms, log path.
    assert q.shape == (batch, action_space, atoms), q.shape
    q_np = np.asarray(q, dtype=np.float64)
    assert np.allclose(q_np.sum(axis=-1), 1.0, atol=1e-4), q_np.sum(axis=-1)
    assert np.all(np.isfinite(q_np))
    assert np.all(q_np >= 0.0)

    assert lq.shape == (batch, action_space, atoms), lq.shape
    lq_np = np.asarray(lq, dtype=np.float64)
    assert np.all(np.isfinite(lq_np))
    assert np.all(lq_np <= 1e-5)
    assert np.allclose(np.exp(lq_np).sum(axis=-1), 1.0, atol=1e-4)
    assert np.allclose(np.exp(lq_np), q_np, atol=1e-4)

    print("KERNEL_OK")
</pallas_src>

<mosaic_0001>
module attributes {stable_mosaic.version = 11 : i64} {
  func.func @_matmul_bias_relu_kernel(%arg0: i32, %arg1: memref<400x256xbf16, #tpu.memory_space<vmem>>, %arg2: memref<256x32xbf16, #tpu.memory_space<vmem>>, %arg3: memref<1x32xf32, #tpu.memory_space<vmem>>, %arg4: memref<400x32xbf16, #tpu.memory_space<vmem>>) attributes {dimension_semantics = [#tpu.dimension_semantics<parallel>], iteration_bounds = array<i64: 2>, scalar_prefetch = 0 : i64, scratch_operands = 0 : i64, tpu.core_type = #tpu.core_type<tc>, window_params = [{transform_indices = @transform_0, window_bounds = array<i64: 400, 256>}, {pipeline_mode = #tpu.pipeline_mode<synchronous>, transform_indices = @transform_1, window_bounds = array<i64: 256, 32>}, {pipeline_mode = #tpu.pipeline_mode<synchronous>, transform_indices = @transform_2, window_bounds = array<i64: 1, 32>}, {transform_indices = @transform_3, window_bounds = array<i64: 400, 32>}]} {
    %c0 = arith.constant 0 : index
    %c0_0 = arith.constant 0 : index
    %0 = vector.load %arg1[%c0, %c0_0] : memref<400x256xbf16, #tpu.memory_space<vmem>>, vector<400x256xbf16>
    %c0_1 = arith.constant 0 : index
    %c0_2 = arith.constant 0 : index
    %1 = vector.load %arg2[%c0_1, %c0_2] : memref<256x32xbf16, #tpu.memory_space<vmem>>, vector<256x32xbf16>
    %cst = arith.constant dense<0.000000e+00> : vector<400x32xf32>
    %2 = tpu.matmul %0, %1, %cst {dimension_numbers = #tpu.dot_dimension_numbers<[1], [0], [0], [1], [0, 0, 1, 1], [], []>} : vector<400x256xbf16>, vector<256x32xbf16>, vector<400x32xf32> -> vector<400x32xf32>
    %c0_3 = arith.constant 0 : index
    %c0_4 = arith.constant 0 : index
    %3 = vector.load %arg3[%c0_3, %c0_4] : memref<1x32xf32, #tpu.memory_space<vmem>>, vector<1x32xf32>
    %4 = vector.broadcast %3 : vector<1x32xf32> to vector<400x32xf32>
    %5 = arith.addf %2, %4 : vector<400x32xf32>
    %cst_5 = arith.constant 0.000000e+00 : f32
    %6 = vector.broadcast %cst_5 : f32 to vector<400x32xf32>
    %7 = arith.maximumf %5, %6 : vector<400x32xf32>
    %8 = arith.truncf %7 : vector<400x32xf32> to vector<400x32xbf16>
    %c0_6 = arith.constant 0 : index
    %c0_7 = arith.constant 0 : index
    %9 = vector.load %arg4[%c0_6, %c0_7] : memref<400x32xbf16, #tpu.memory_space<vmem>>, vector<400x32xbf16>
    tpu.vector_store %arg4[%c0_6, %c0_7], %8 {strides = array<i32>} : memref<400x32xbf16, #tpu.memory_space<vmem>>, vector<400x32xbf16>,
    return
  }
  func.func @transform_0(%arg0: i32) -> (i32, i32) {
    %c0_i32 = arith.constant 0 : i32
    %c0_i32_0 = arith.constant 0 : i32
    return %arg0, %c0_i32 : i32, i32
  }
  func.func @transform_1(%arg0: i32) -> (i32, i32) {
    %c0_i32 = arith.constant 0 : i32
    %c0_i32_0 = arith.constant 0 : i32
    %c0_i32_1 = arith.constant 0 : i32
    return %c0_i32, %c0_i32_0 : i32, i32
  }
  func.func @transform_2(%arg0: i32) -> (i32, i32) {
    %c0_i32 = arith.constant 0 : i32
    %c0_i32_0 = arith.constant 0 : i32
    %c0_i32_1 = arith.constant 0 : i32
    return %c0_i32, %c0_i32_0 : i32, i32
  }
  func.func @transform_3(%arg0: i32) -> (i32, i32) {
    %c0_i32 = arith.constant 0 : i32
    %c0_i32_0 = arith.constant 0 : i32
    return %arg0, %c0_i32 : i32, i32
  }
}

module attributes {stable_mosaic.version = 11 : i64} {
  func.func @_matmul_bias_relu_kernel(%arg0: i32, %arg1: memref<162x512xbf16, #tpu.memory_space<vmem>>, %arg2: memref<512x64xbf16, #tpu.memory_space<vmem>>, %arg3: memref<1x64xf32, #tpu.memory_space<vmem>>, %arg4: memref<162x64xbf16, #tpu.memory_space<vmem>>) attributes {dimension_semantics = [#tpu.dimension_semantics<parallel>], iteration_bounds = array<i64: 1>, scalar_prefetch = 0 : i64, scratch_operands = 0 : i64, tpu.core_type = #tpu.core_type<tc>, window_params = [{transform_indices = @transform_0, window_bounds = array<i64: 162, 512>}, {pipeline_mode = #tpu.pipeline_mode<synchronous>, transform_indices = @transform_1, window_bounds = array<i64: 512, 64>}, {pipeline_mode = #tpu.pipeline_mode<synchronous>, transform_indices = @transform_2, window_bounds = array<i64: 1, 64>}, {transform_indices = @transform_3, window_bounds = array<i64: 162, 64>}]} {
    %c0 = arith.constant 0 : index
    %c0_0 = arith.constant 0 : index
    %0 = vector.load %arg1[%c0, %c0_0] : memref<162x512xbf16, #tpu.memory_space<vmem>>, vector<162x512xbf16>
    %c0_1 = arith.constant 0 : index
    %c0_2 = arith.constant 0 : index
    %1 = vector.load %arg2[%c0_1, %c0_2] : memref<512x64xbf16, #tpu.memory_space<vmem>>, vector<512x64xbf16>
    %cst = arith.constant dense<0.000000e+00> : vector<162x64xf32>
    %2 = tpu.matmul %0, %1, %cst {dimension_numbers = #tpu.dot_dimension_numbers<[1], [0], [0], [1], [0, 0, 1, 1], [], []>} : vector<162x512xbf16>, vector<512x64xbf16>, vector<162x64xf32> -> vector<162x64xf32>
    %c0_3 = arith.constant 0 : index
    %c0_4 = arith.constant 0 : index
    %3 = vector.load %arg3[%c0_3, %c0_4] : memref<1x64xf32, #tpu.memory_space<vmem>>, vector<1x64xf32>
    %4 = vector.broadcast %3 : vector<1x64xf32> to vector<162x64xf32>
    %5 = arith.addf %2, %4 : vector<162x64xf32>
    %cst_5 = arith.constant 0.000000e+00 : f32
    %6 = vector.broadcast %cst_5 : f32 to vector<162x64xf32>
    %7 = arith.maximumf %5, %6 : vector<162x64xf32>
    %8 = arith.truncf %7 : vector<162x64xf32> to vector<162x64xbf16>
    %c0_6 = arith.constant 0 : index
    %c0_7 = arith.constant 0 : index
    %9 = vector.load %arg4[%c0_6, %c0_7] : memref<162x64xbf16, #tpu.memory_space<vmem>>, vector<162x64xbf16>
    tpu.vector_store %arg4[%c0_6, %c0_7], %8 {strides = array<i32>} : memref<162x64xbf16, #tpu.memory_space<vmem>>, vector<162x64xbf16>,
    return
  }
  func.func @transform_0(%arg0: i32) -> (i32, i32) {
    %c0_i32 = arith.constant 0 : i32
    %c0_i32_0 = arith.constant 0 : i32
    return %arg0, %c0_i32 : i32, i32
  }
  func.func @transform_1(%arg0: i32) -> (i32, i32) {
    %c0_i32 = arith.constant 0 : i32
    %c0_i32_0 = arith.constant 0 : i32
    %c0_i32_1 = arith.constant 0 : i32
    return %c0_i32, %c0_i32_0 : i32, i32
  }
  func.func @transform_2(%arg0: i32) -> (i32, i32) {
    %c0_i32 = arith.constant 0 : i32
    %c0_i32_0 = arith.constant 0 : i32
    %c0_i32_1 = arith.constant 0 : i32
    return %c0_i32, %c0_i32_0 : i32, i32
  }
  func.func @transform_3(%arg0: i32) -> (i32, i32) {
    %c0_i32 = arith.constant 0 : i32
    %c0_i32_0 = arith.constant 0 : i32
    return %arg0, %c0_i32 : i32, i32
  }
}

module attributes {stable_mosaic.version = 11 : i64} {
  func.func @_matmul_bias_relu_kernel(%arg0: i32, %arg1: memref<98x576xbf16, #tpu.memory_space<vmem>>, %arg2: memref<576x64xbf16, #tpu.memory_space<vmem>>, %arg3: memref<1x64xf32, #tpu.memory_space<vmem>>, %arg4: memref<98x64xbf16, #tpu.memory_space<vmem>>) attributes {dimension_semantics = [#tpu.dimension_semantics<parallel>], iteration_bounds = array<i64: 1>, scalar_prefetch = 0 : i64, scratch_operands = 0 : i64, tpu.core_type = #tpu.core_type<tc>, window_params = [{transform_indices = @transform_0, window_bounds = array<i64: 98, 576>}, {pipeline_mode = #tpu.pipeline_mode<synchronous>, transform_indices = @transform_1, window_bounds = array<i64: 576, 64>}, {pipeline_mode = #tpu.pipeline_mode<synchronous>, transform_indices = @transform_2, window_bounds = array<i64: 1, 64>}, {transform_indices = @transform_3, window_bounds = array<i64: 98, 64>}]} {
    %c0 = arith.constant 0 : index
    %c0_0 = arith.constant 0 : index
    %0 = vector.load %arg1[%c0, %c0_0] : memref<98x576xbf16, #tpu.memory_space<vmem>>, vector<98x576xbf16>
    %c0_1 = arith.constant 0 : index
    %c0_2 = arith.constant 0 : index
    %1 = vector.load %arg2[%c0_1, %c0_2] : memref<576x64xbf16, #tpu.memory_space<vmem>>, vector<576x64xbf16>
    %cst = arith.constant dense<0.000000e+00> : vector<98x64xf32>
    %2 = tpu.matmul %0, %1, %cst {dimension_numbers = #tpu.dot_dimension_numbers<[1], [0], [0], [1], [0, 0, 1, 1], [], []>} : vector<98x576xbf16>, vector<576x64xbf16>, vector<98x64xf32> -> vector<98x64xf32>
    %c0_3 = arith.constant 0 : index
    %c0_4 = arith.constant 0 : index
    %3 = vector.load %arg3[%c0_3, %c0_4] : memref<1x64xf32, #tpu.memory_space<vmem>>, vector<1x64xf32>
    %4 = vector.broadcast %3 : vector<1x64xf32> to vector<98x64xf32>
    %5 = arith.addf %2, %4 : vector<98x64xf32>
    %cst_5 = arith.constant 0.000000e+00 : f32
    %6 = vector.broadcast %cst_5 : f32 to vector<98x64xf32>
    %7 = arith.maximumf %5, %6 : vector<98x64xf32>
    %8 = arith.truncf %7 : vector<98x64xf32> to vector<98x64xbf16>
    %c0_6 = arith.constant 0 : index
    %c0_7 = arith.constant 0 : index
    %9 = vector.load %arg4[%c0_6, %c0_7] : memref<98x64xbf16, #tpu.memory_space<vmem>>, vector<98x64xbf16>
    tpu.vector_store %arg4[%c0_6, %c0_7], %8 {strides = array<i32>} : memref<98x64xbf16, #tpu.memory_space<vmem>>, vector<98x64xbf16>,
    return
  }
  func.func @transform_0(%arg0: i32) -> (i32, i32) {
    %c0_i32 = arith.constant 0 : i32
    %c0_i32_0 = arith.constant 0 : i32
    return %arg0, %c0_i32 : i32, i32
  }
  func.func @transform_1(%arg0: i32) -> (i32, i32) {
    %c0_i32 = arith.constant 0 : i32
    %c0_i32_0 = arith.constant 0 : i32
    %c0_i32_1 = arith.constant 0 : i32
    return %c0_i32, %c0_i32_0 : i32, i32
  }
  func.func @transform_2(%arg0: i32) -> (i32, i32) {
    %c0_i32 = arith.constant 0 : i32
    %c0_i32_0 = arith.constant 0 : i32
    %c0_i32_1 = arith.constant 0 : i32
    return %c0_i32, %c0_i32_0 : i32, i32
  }
  func.func @transform_3(%arg0: i32) -> (i32, i32) {
    %c0_i32 = arith.constant 0 : i32
    %c0_i32_0 = arith.constant 0 : i32
    return %arg0, %c0_i32 : i32, i32
  }
}

module attributes {stable_mosaic.version = 11 : i64} {
  func.func @_fc_head_kernel(%arg0: memref<2x3136xbf16, #tpu.memory_space<vmem>>, %arg1: memref<3136x256xbf16, #tpu.memory_space<vmem>>, %arg2: memref<1x256xf32, #tpu.memory_space<vmem>>, %arg3: memref<256x896xbf16, #tpu.memory_space<vmem>>, %arg4: memref<1x896xf32, #tpu.memory_space<vmem>>, %arg5: memref<2x768xf32, #tpu.memory_space<vmem>>) attributes {dimension_semantics = [], scalar_prefetch = 0 : i64, scratch_operands = 0 : i64, tpu.core_type = #tpu.core_type<tc>} {
    %c0 = arith.constant 0 : index
    %c0_0 = arith.constant 0 : index
    %0 = vector.load %arg0[%c0, %c0_0] : memref<2x3136xbf16, #tpu.memory_space<vmem>>, vector<2x3136xbf16>
    %c0_1 = arith.constant 0 : index
    %c0_2 = arith.constant 0 : index
    %1 = vector.load %arg1[%c0_1, %c0_2] : memref<3136x256xbf16, #tpu.memory_space<vmem>>, vector<3136x256xbf16>
    %cst = arith.constant dense<0.000000e+00> : vector<2x256xf32>
    %2 = tpu.matmul %0, %1, %cst {dimension_numbers = #tpu.dot_dimension_numbers<[1], [0], [0], [1], [0, 0, 1, 1], [], []>} : vector<2x3136xbf16>, vector<3136x256xbf16>, vector<2x256xf32> -> vector<2x256xf32>
    %c0_3 = arith.constant 0 : index
    %c0_4 = arith.constant 0 : index
    %3 = vector.load %arg2[%c0_3, %c0_4] : memref<1x256xf32, #tpu.memory_space<vmem>>, vector<1x256xf32>
    %4 = vector.broadcast %3 : vector<1x256xf32> to vector<2x256xf32>
    %5 = arith.addf %2, %4 : vector<2x256xf32>
    %cst_5 = arith.constant 0.000000e+00 : f32
    %6 = vector.broadcast %cst_5 : f32 to vector<2x256xf32>
    %7 = arith.maximumf %5, %6 : vector<2x256xf32>
    %8 = arith.truncf %7 : vector<2x256xf32> to vector<2x256xbf16>
    %c0_6 = arith.constant 0 : index
    %c0_7 = arith.constant 0 : index
    %9 = vector.load %arg3[%c0_6, %c0_7] : memref<256x896xbf16, #tpu.memory_space<vmem>>, vector<256x896xbf16>
    %cst_8 = arith.constant dense<0.000000e+00> : vector<2x896xf32>
    %10 = tpu.matmul %8, %9, %cst_8 {dimension_numbers = #tpu.dot_dimension_numbers<[1], [0], [0], [1], [0, 0, 1, 1], [], []>} : vector<2x256xbf16>, vector<256x896xbf16>, vector<2x896xf32> -> vector<2x896xf32>
    %c0_9 = arith.constant 0 : index
    %c0_10 = arith.constant 0 : index
    %11 = vector.load %arg4[%c0_9, %c0_10] : memref<1x896xf32, #tpu.memory_space<vmem>>, vector<1x896xf32>
    %12 = vector.broadcast %11 : vector<1x896xf32> to vector<2x896xf32>
    %13 = arith.addf %10, %12 : vector<2x896xf32>
    %14 = vector.extract_strided_slice %13 {offsets = [0, 0], sizes = [2, 128], strides = [1, 1]} : vector<2x896xf32> to vector<2x128xf32>
    %15 = vector.extract_strided_slice %13 {offsets = [0, 128], sizes = [2, 128], strides = [1, 1]} : vector<2x896xf32> to vector<2x128xf32>
    %16 = vector.extract_strided_slice %13 {offsets = [0, 256], sizes = [2, 128], strides = [1, 1]} : vector<2x896xf32> to vector<2x128xf32>
    %17 = vector.extract_strided_slice %13 {offsets = [0, 384], sizes = [2, 128], strides = [1, 1]} : vector<2x896xf32> to vector<2x128xf32>
    %18 = vector.extract_strided_slice %13 {offsets = [0, 512], sizes = [2, 128], strides = [1, 1]} : vector<2x896xf32> to vector<2x128xf32>
    %19 = vector.extract_strided_slice %13 {offsets = [0, 640], sizes = [2, 128], strides = [1, 1]} : vector<2x896xf32> to vector<2x128xf32>
    %20 = vector.extract_strided_slice %13 {offsets = [0, 768], sizes = [2, 128], strides = [1, 1]} : vector<2x896xf32> to vector<2x128xf32>
    %21 = arith.addf %15, %16 : vector<2x128xf32>
    %22 = arith.addf %21, %17 : vector<2x128xf32>
    %23 = arith.addf %22, %18 : vector<2x128xf32>
    %24 = arith.addf %23, %19 : vector<2x128xf32>
    %25 = arith.addf %24, %20 : vector<2x128xf32>
    %cst_11 = arith.constant 0.166666672 : f32
    %26 = vector.broadcast %cst_11 : f32 to vector<2x128xf32>
    %27 = arith.mulf %25, %26 : vector<2x128xf32>
    %28 = tpu.iota {dimensions = array<i32: 1>} : vector<2x128xi32>
    %c51_i32 = arith.constant 51 : i32
    %29 = vector.broadcast %c51_i32 : i32 to vector<2x128xi32>
    %30 = arith.cmpi slt, %28, %29 : vector<2x128xi32>
    %31 = arith.addf %14, %15 : vector<2x128xf32>
    %32 = arith.subf %31, %27 : vector<2x128xf32>
    %cst_12 = arith.constant -1.000000e+30 : f32
    %33 = vector.broadcast %cst_12 : f32 to vector<2x128xf32>
    %34 = arith.select %30, %32, %33 : vector<2x128xi1>, vector<2x128xf32>
    %cst_13 = arith.constant dense<0xFF800000> : vector<2xf32>
    %35 = vector.multi_reduction <maximumf>, %34, %cst_13 [1] : vector<2x128xf32> to vector<2xf32>
    %36 = vector.shape_cast %35 : vector<2xf32> to vector<2x1xf32>
    %37 = vector.broadcast %36 : vector<2x1xf32> to vector<2x128xf32>
    %38 = arith.subf %34, %37 : vector<2x128xf32>
    %39 = math.exp %38 : vector<2x128xf32>
    %cst_14 = arith.constant dense<0.000000e+00> : vector<2xf32>
    %40 = vector.multi_reduction <add>, %39, %cst_14 [1] : vector<2x128xf32> to vector<2xf32>
    %41 = vector.shape_cast %40 : vector<2xf32> to vector<2x1xf32>
    %42 = vector.broadcast %41 : vector<2x1xf32> to vector<2x128xf32>
    %43 = arith.divf %39, %42 : vector<2x128xf32>
    %44 = arith.addf %14, %16 : vector<2x128xf32>
    %45 = arith.subf %44, %27 : vector<2x128xf32>
    %cst_15 = arith.constant -1.000000e+30 : f32
    %46 = vector.broadcast %cst_15 : f32 to vector<2x128xf32>
    %47 = arith.select %30, %45, %46 : vector<2x128xi1>, vector<2x128xf32>
    %cst_16 = arith.constant dense<0xFF800000> : vector<2xf32>
    %48 = vector.multi_reduction <maximumf>, %47, %cst_16 [1] : vector<2x128xf32> to vector<2xf32>
    %49 = vector.shape_cast %48 : vector<2xf32> to vector<2x1xf32>
    %50 = vector.broadcast %49 : vector<2x1xf32> to vector<2x128xf32>
    %51 = arith.subf %47, %50 : vector<2x128xf32>
    %52 = math.exp %51 : vector<2x128xf32>
    %cst_17 = arith.constant dense<0.000000e+00> : vector<2xf32>
    %53 = vector.multi_reduction <add>, %52, %cst_17 [1] : vector<2x128xf32> to vector<2xf32>
    %54 = vector.shape_cast %53 : vector<2xf32> to vector<2x1xf32>
    %55 = vector.broadcast %54 : vector<2x1xf32> to vector<2x128xf32>
    %56 = arith.divf %52, %55 : vector<2x128xf32>
    %57 = arith.addf %14, %17 : vector<2x128xf32>
    %58 = arith.subf %57, %27 : vector<2x128xf32>
    %cst_18 = arith.constant -1.000000e+30 : f32
    %59 = vector.broadcast %cst_18 : f32 to vector<2x128xf32>
    %60 = arith.select %30, %58, %59 : vector<2x128xi1>, vector<2x128xf32>
    %cst_19 = arith.constant dense<0xFF800000> : vector<2xf32>
    %61 = vector.multi_reduction <maximumf>, %60, %cst_19 [1] : vector<2x128xf32> to vector<2xf32>
    %62 = vector.shape_cast %61 : vector<2xf32> to vector<2x1xf32>
    %63 = vector.broadcast %62 : vector<2x1xf32> to vector<2x128xf32>
    %64 = arith.subf %60, %63 : vector<2x128xf32>
    %65 = math.exp %64 : vector<2x128xf32>
    %cst_20 = arith.constant dense<0.000000e+00> : vector<2xf32>
    %66 = vector.multi_reduction <add>, %65, %cst_20 [1] : vector<2x128xf32> to vector<2xf32>
    %67 = vector.shape_cast %66 : vector<2xf32> to vector<2x1xf32>
    %68 = vector.broadcast %67 : vector<2x1xf32> to vector<2x128xf32>
    %69 = arith.divf %65, %68 : vector<2x128xf32>
    %70 = arith.addf %14, %18 : vector<2x128xf32>
    %71 = arith.subf %70, %27 : vector<2x128xf32>
    %cst_21 = arith.constant -1.000000e+30 : f32
    %72 = vector.broadcast %cst_21 : f32 to vector<2x128xf32>
    %73 = arith.select %30, %71, %72 : vector<2x128xi1>, vector<2x128xf32>
    %cst_22 = arith.constant dense<0xFF800000> : vector<2xf32>
    %74 = vector.multi_reduction <maximumf>, %73, %cst_22 [1] : vector<2x128xf32> to vector<2xf32>
    %75 = vector.shape_cast %74 : vector<2xf32> to vector<2x1xf32>
    %76 = vector.broadcast %75 : vector<2x1xf32> to vector<2x128xf32>
    %77 = arith.subf %73, %76 : vector<2x128xf32>
    %78 = math.exp %77 : vector<2x128xf32>
    %cst_23 = arith.constant dense<0.000000e+00> : vector<2xf32>
    %79 = vector.multi_reduction <add>, %78, %cst_23 [1] : vector<2x128xf32> to vector<2xf32>
    %80 = vector.shape_cast %79 : vector<2xf32> to vector<2x1xf32>
    %81 = vector.broadcast %80 : vector<2x1xf32> to vector<2x128xf32>
    %82 = arith.divf %78, %81 : vector<2x128xf32>
    %83 = arith.addf %14, %19 : vector<2x128xf32>
    %84 = arith.subf %83, %27 : vector<2x128xf32>
    %cst_24 = arith.constant -1.000000e+30 : f32
    %85 = vector.broadcast %cst_24 : f32 to vector<2x128xf32>
    %86 = arith.select %30, %84, %85 : vector<2x128xi1>, vector<2x128xf32>
    %cst_25 = arith.constant dense<0xFF800000> : vector<2xf32>
    %87 = vector.multi_reduction <maximumf>, %86, %cst_25 [1] : vector<2x128xf32> to vector<2xf32>
    %88 = vector.shape_cast %87 : vector<2xf32> to vector<2x1xf32>
    %89 = vector.broadcast %88 : vector<2x1xf32> to vector<2x128xf32>
    %90 = arith.subf %86, %89 : vector<2x128xf32>
    %91 = math.exp %90 : vector<2x128xf32>
    %cst_26 = arith.constant dense<0.000000e+00> : vector<2xf32>
    %92 = vector.multi_reduction <add>, %91, %cst_26 [1] : vector<2x128xf32> to vector<2xf32>
    %93 = vector.shape_cast %92 : vector<2xf32> to vector<2x1xf32>
    %94 = vector.broadcast %93 : vector<2x1xf32> to vector<2x128xf32>
    %95 = arith.divf %91, %94 : vector<2x128xf32>
    %96 = arith.addf %14, %20 : vector<2x128xf32>
    %97 = arith.subf %96, %27 : vector<2x128xf32>
    %cst_27 = arith.constant -1.000000e+30 : f32
    %98 = vector.broadcast %cst_27 : f32 to vector<2x128xf32>
    %99 = arith.select %30, %97, %98 : vector<2x128xi1>, vector<2x128xf32>
    %cst_28 = arith.constant dense<0xFF800000> : vector<2xf32>
    %100 = vector.multi_reduction <maximumf>, %99, %cst_28 [1] : vector<2x128xf32> to vector<2xf32>
    %101 = vector.shape_cast %100 : vector<2xf32> to vector<2x1xf32>
    %102 = vector.broadcast %101 : vector<2x1xf32> to vector<2x128xf32>
    %103 = arith.subf %99, %102 : vector<2x128xf32>
    %104 = math.exp %103 : vector<2x128xf32>
    %cst_29 = arith.constant dense<0.000000e+00> : vector<2xf32>
    %105 = vector.multi_reduction <add>, %104, %cst_29 [1] : vector<2x128xf32> to vector<2xf32>
    %106 = vector.shape_cast %105 : vector<2xf32> to vector<2x1xf32>
    %107 = vector.broadcast %106 : vector<2x1xf32> to vector<2x128xf32>
    %108 = arith.divf %104, %107 : vector<2x128xf32>
    %109 = tpu.concatenate %43, %56, %69, %82, %95, %108 in 1 : vector<2x128xf32>, vector<2x128xf32>, vector<2x128xf32>, vector<2x128xf32>, vector<2x128xf32>, vector<2x128xf32> -> vector<2x768xf32>
    %c0_30 = arith.constant 0 : index
    %c0_31 = arith.constant 0 : index
    %110 = vector.load %arg5[%c0_30, %c0_31] : memref<2x768xf32, #tpu.memory_space<vmem>>, vector<2x768xf32>
    tpu.vector_store %arg5[%c0_30, %c0_31], %109 {strides = array<i32>} : memref<2x768xf32, #tpu.memory_space<vmem>>, vector<2x768xf32>,
    return
  }
}

</mosaic_0001>

<bundles_post_ra>
// kernel: dqn_forward.4
= control target key start
LH: loop header
LB: loop body
LE: loop exit
PB: predicated region body
PF: predicated region fallthrough
CT: control target
= control target key end

     0   :  { %s1478_s12 = smov 0   ;;  %s1812_s0 = inlined_call_operand.vmem [shape: bf16[800,256], index: 0, kind: input, shape index: {}]   ;;  %s1813_s1 = inlined_call_operand.vmem [shape: bf16[256,32], index: 1, kind: input, shape index: {}]   ;;  %s1814_s2 = inlined_call_operand.vmem [shape: f32[1,32], index: 2, kind: input, shape index: {}]   ;;  %s1815_s3 = inlined_call_operand.vmem [shape: bf16[800,32], index: 3, kind: output, shape index: {}]  }
   0x1 LB: > { %s1084_s13 = sadd.s32 4294967295, %s1456_s12   ;;  %p1088_p0 = scmp.ge.s32.totalorder %s1456_s12, 1  ;;  %s1456_s12 = sphi %s1478_s12, %s13_s12  }
   0x2   : > { %p139_p1 = scmp.lt.s32.totalorder %s1456_s12, 3 }
   0x4   : > { %p140_p2 = pnand %p1088_p0, %p139_p1 }
   0x5   : > { %s164_s26 = smul.u32 (!%p140_p2), 50, %s1084_s13 }
   0x6   : > { %143 = sbr.rel (%p140_p2) target bundleno = 384 (0x180), region = 32 }
   0x7   : > { %p165_p3 = scmp.lt.s32.totalorder (!%p140_p2), %s164_s26, 99 }
   0xb   : > { %v1416_v0 = vld [vmem:[%s1813_s1 + $0x38] sm:$0xff]  ;;  %v1415_v2 = vld [vmem:[%s1813_s1 + $0x30] sm:$0xff]  ;;  %v1414_v4 = vld [vmem:[%s1813_s1 + $0x28] sm:$0xff]  ;;  %s1817_s26 = smov (!%p165_p3, %s164_s26), 99  ;;  %vm977_vm0 = vcmask 257024  }
   0xc   : > { %v1424_v1 = vld [vmem:[%s1813_s1 + $0x78] sm:$0xff]  ;;  %609 = vmatpush.bf16.msra.mxu0 %v1416_v0  ;;  %1425 = vmatpush.bf16.msra.mxu2 %v1416_v0  ;;  %v1423_v3 = vld [vmem:[%s1813_s1 + $0x70] sm:$0xff]  ;;  %v1422_v5 = vld [vmem:[%s1813_s1 + $0x68] sm:$0xff]  ;;  %s1358_s13 = sshll.u32 %s1817_s26, 3  ;;  %s1091_s28 = sshll.u32 %s1817_s26, 2 }
   0xd   : > { %743 = vmatpush.bf16.msra.mxu1 %v1424_v1  ;;  %1433 = vmatpush.bf16.msra.mxu3 %v1424_v1  ;;  %v1413_v6 = vld [vmem:[%s1813_s1 + $0x20] sm:$0xff]  ;;  %v1412_v8 = vld [vmem:[%s1813_s1 + $0x18] sm:$0xff]  ;;  %v1411_v10 = vld [vmem:[%s1813_s1 + $0x10] sm:$0xff]  ;;  %s1531_s18 = scalar_lea.vmem %s1812_s0, %s1358_s13  ;;  %s1624_s4 = scalar_lea.vmem %s1815_s3, %s1091_s28 }
   0xe   : > { %v1421_v7 = vld [vmem:[%s1813_s1 + $0x60] sm:$0xff]  ;;  %v1420_v9 = vld [vmem:[%s1813_s1 + $0x58] sm:$0xff]  ;;  %v1419_v11 = vld [vmem:[%s1813_s1 + $0x50] sm:$0xff] }
   0xf   : > { %v1410_v12 = vld [vmem:[%s1813_s1 + $0x8] sm:$0xff]  ;;  %v1409_v14 = vld [vmem:[%s1813_s1] sm:$0xff]  ;;  %v1385_v22 = vld [vmem:[%s1531_s18 + $0xd4] sm:$0xf] }
  0x10   : > { %610 = vmatpush.bf16.msra.mxu0 %v1415_v2  ;;  %1426 = vmatpush.bf16.msra.mxu2 %v1415_v2  ;;  %v1418_v13 = vld [vmem:[%s1813_s1 + $0x48] sm:$0xff]  ;;  %v1417_v15 = vld [vmem:[%s1813_s1 + $0x40] sm:$0xff]  ;;  %v1200_v23 = vld [vmem:[%s1531_s18 + $0xd8] sm:$0xf0] }
  0x11   : > { %744 = vmatpush.bf16.msra.mxu1 %v1423_v3  ;;  %1434 = vmatpush.bf16.msra.mxu3 %v1423_v3  ;;  %v1094_v16 = vld [vmem:[%s1531_s18] sm:$0xf]  ;;  %v1360_v17 = vld [vmem:[%s1531_s18 + $0x4] sm:$0xf0]  ;;  %v1359_v20 = vld [vmem:[%s1531_s18 + $0x4] sm:$0xf]  ;;  %v1203_v27 = vor.u32 %v1385_v22, %v1200_v23 }
  0x12   : > { %v1190_v18 = vld [vmem:[%s1531_s18 + $0xc0] sm:$0xf]  ;;  %v1384_v19 = vld [vmem:[%s1531_s18 + $0xc4] sm:$0xf0]  ;;  %v1096_v21 = vld [vmem:[%s1531_s18 + $0x8] sm:$0xf0]  ;;  %v1095_v24 = vor.u32 %v1360_v17, %v1094_v16 }
  0x13   : > { %v1191_v25 = vor.u32 %v1384_v19, %v1190_v18  ;;  %v1099_v26 = vor.u32 %v1359_v20, %v1096_v21  ;;  %v1102_v28 = vld [vmem:[%s1531_s18 + $0x10] sm:$0xf]  ;;  %v1362_v29 = vld [vmem:[%s1531_s18 + $0x14] sm:$0xf0]  ;;  %v1361_v32 = vld [vmem:[%s1531_s18 + $0x14] sm:$0xf] }
  0x14   : > { %611 = vmatpush.bf16.msra.mxu0 %v1414_v4  ;;  %1427 = vmatpush.bf16.msra.mxu2 %v1414_v4  ;;  %v1198_v30 = vld [vmem:[%s1531_s18 + $0xd0] sm:$0xf]  ;;  %v1386_v31 = vld [vmem:[%s1531_s18 + $0xd4] sm:$0xf0]  ;;  %v1104_v33 = vld [vmem:[%s1531_s18 + $0x18] sm:$0xf0]  ;;  %v1103_v36 = vor.u32 %v1362_v29, %v1102_v28 }
  0x15   : > { %745 = vmatpush.bf16.msra.mxu1 %v1422_v5  ;;  %1435 = vmatpush.bf16.msra.mxu3 %v1422_v5  ;;  %v1387_v34 = vld [vmem:[%s1531_s18 + $0xe4] sm:$0xf]  ;;  %v1208_v35 = vld [vmem:[%s1531_s18 + $0xe8] sm:$0xf0]  ;;  %v1199_v37 = vor.u32 %v1386_v31, %v1198_v30  ;;  %v1107_v38 = vor.u32 %v1361_v32, %v1104_v33  ;;  %v1110_v40 = vld [vmem:[%s1531_s18 + $0x20] sm:$0xf] }
  0x16   : > { %v1211_v39 = vor.u32 %v1387_v34, %v1208_v35  ;;  %v1364_v41 = vld [vmem:[%s1531_s18 + $0x24] sm:$0xf0]  ;;  %v1206_v42 = vld [vmem:[%s1531_s18 + $0xe0] sm:$0xf]  ;;  %v1363_v44 = vld [vmem:[%s1531_s18 + $0x24] sm:$0xf] }
  0x17   : > { %v1388_v43 = vld [vmem:[%s1531_s18 + $0xe4] sm:$0xf0]  ;;  %v1112_v45 = vld [vmem:[%s1531_s18 + $0x28] sm:$0xf0]  ;;  %v1389_v46 = vld [vmem:[%s1531_s18 + $0xf4] sm:$0xf]  ;;  %v1111_v48 = vor.u32 %v1364_v41, %v1110_v40 }
  0x18   : > { %612 = vmatpush.bf16.msra.mxu0 %v1413_v6  ;;  %1428 = vmatpush.bf16.msra.mxu2 %v1413_v6  ;;  %v1216_v47 = vld [vmem:[%s1531_s18 + $0xf8] sm:$0xf0]  ;;  %v1207_v49 = vor.u32 %v1388_v43, %v1206_v42  ;;  %v1115_v50 = vor.u32 %v1363_v44, %v1112_v45  ;;  %v1118_v52 = vld [vmem:[%s1531_s18 + $0x30] sm:$0xf]  ;;  %v1366_v53 = vld [vmem:[%s1531_s18 + $0x34] sm:$0xf0] }
  0x19   : > { %746 = vmatpush.bf16.msra.mxu1 %v1421_v7  ;;  %1436 = vmatpush.bf16.msra.mxu3 %v1421_v7  ;;  %v1219_v51 = vor.u32 %v1389_v46, %v1216_v47  ;;  %v1214_v54 = vld [vmem:[%s1531_s18 + $0xf0] sm:$0xf]  ;;  %v1390_v55 = vld [vmem:[%s1531_s18 + $0xf4] sm:$0xf0]  ;;  %v1365_v56 = vld [vmem:[%s1531_s18 + $0x34] sm:$0xf]  ;;  %v1119_v60 = vor.u32 %v1366_v53, %v1118_v52 }
  0x1a   : > { %v1120_v57 = vld [vmem:[%s1531_s18 + $0x38] sm:$0xf0]  ;;  %v1391_v58 = vld [vmem:[%s1531_s18 + $0x104] sm:$0xf]  ;;  %v1224_v59 = vld [vmem:[%s1531_s18 + $0x108] sm:$0xf0]  ;;  %v1215_v61 = vor.u32 %v1390_v55, %v1214_v54 }
  0x1b   : > { %v1123_v62 = vor.u32 %v1365_v56, %v1120_v57  ;;  %v1227_v63 = vor.u32 %v1391_v58, %v1224_v59  ;;  %v1126_v0 = vld [vmem:[%s1531_s18 + $0x40] sm:$0xf]  ;;  %v1368_v1 = vld [vmem:[%s1531_s18 + $0x44] sm:$0xf0]  ;;  %v1367_v4 = vld [vmem:[%s1531_s18 + $0x44] sm:$0xf] }
  0x1c   : > { %613 = vmatpush.bf16.msra.mxu0 %v1412_v8  ;;  %1429 = vmatpush.bf16.msra.mxu2 %v1412_v8  ;;  %v1222_v2 = vld [vmem:[%s1531_s18 + $0x100] sm:$0xf]  ;;  %v1392_v3 = vld [vmem:[%s1531_s18 + $0x104] sm:$0xf0]  ;;  %v1128_v5 = vld [vmem:[%s1531_s18 + $0x48] sm:$0xf0]  ;;  %v1127_v8 = vor.u32 %v1368_v1, %v1126_v0 }
  0x1d   : > { %747 = vmatpush.bf16.msra.mxu1 %v1420_v9  ;;  %1437 = vmatpush.bf16.msra.mxu3 %v1420_v9  ;;  %v1393_v6 = vld [vmem:[%s1531_s18 + $0x114] sm:$0xf]  ;;  %v1232_v7 = vld [vmem:[%s1531_s18 + $0x118] sm:$0xf0]  ;;  %v1223_v9 = vor.u32 %v1392_v3, %v1222_v2  ;;  %v1395_v18 = vld [vmem:[%s1531_s18 + $0x124] sm:$0xf] }
  0x1e   : > { %v1369_v16 = vld [vmem:[%s1531_s18 + $0x54] sm:$0xf]  ;;  %v1136_v17 = vld [vmem:[%s1531_s18 + $0x58] sm:$0xf0]  ;;  %v1240_v19 = vld [vmem:[%s1531_s18 + $0x128] sm:$0xf0] }
  0x1f   : > { %v1139_v22 = vor.u32 %v1369_v16, %v1136_v17  ;;  %v1243_v23 = vor.u32 %v1395_v18, %v1240_v19  ;;  %v1371_v28 = vld [vmem:[%s1531_s18 + $0x64] sm:$0xf]  ;;  %v1144_v29 = vld [vmem:[%s1531_s18 + $0x68] sm:$0xf0]  ;;  %v1397_v30 = vld [vmem:[%s1531_s18 + $0x134] sm:$0xf] }
  0x20   : > { %614 = vmatpush.bf16.msra.mxu0 %v1411_v10  ;;  %1430 = vmatpush.bf16.msra.mxu2 %v1411_v10  ;;  %v1131_v10 = vor.u32 %v1367_v4, %v1128_v5  ;;  %v1248_v31 = vld [vmem:[%s1531_s18 + $0x138] sm:$0xf0]  ;;  %v1147_v34 = vor.u32 %v1371_v28, %v1144_v29  ;;  %v1373_v40 = vld [vmem:[%s1531_s18 + $0x74] sm:$0xf]  ;;  %v1399_v42 = vld [vmem:[%s1531_s18 + $0x144] sm:$0xf] }
  0x21   : > { %748 = vmatpush.bf16.msra.mxu1 %v1419_v11  ;;  %1438 = vmatpush.bf16.msra.mxu3 %v1419_v11  ;;  %v1235_v11 = vor.u32 %v1393_v6, %v1232_v7  ;;  %v1251_v35 = vor.u32 %v1397_v30, %v1248_v31  ;;  %v1152_v41 = vld [vmem:[%s1531_s18 + $0x78] sm:$0xf0]  ;;  %v1256_v43 = vld [vmem:[%s1531_s18 + $0x148] sm:$0xf0]  ;;  %v1400_v52 = vld [vmem:[%s1531_s18 + $0x144] sm:$0xf0] }
  0x22   : > { %v1155_v46 = vor.u32 %v1373_v40, %v1152_v41  ;;  %v1259_v47 = vor.u32 %v1399_v42, %v1256_v43  ;;  %v1375_v53 = vld [vmem:[%s1531_s18 + $0x84] sm:$0xf]  ;;  %v1160_v54 = vld [vmem:[%s1531_s18 + $0x88] sm:$0xf0]  ;;  %v1401_v55 = vld [vmem:[%s1531_s18 + $0x154] sm:$0xf] }
  0x23   : > { %v1264_v56 = vld [vmem:[%s1531_s18 + $0x158] sm:$0xf0]  ;;  %v1403_v16 = vld [vmem:[%s1531_s18 + $0x164] sm:$0xf]  ;;  %v1272_v17 = vld [vmem:[%s1531_s18 + $0x168] sm:$0xf0] }
  0x24   : > { %615 = vmatpush.bf16.msra.mxu0 %v1410_v12  ;;  %1431 = vmatpush.bf16.msra.mxu2 %v1410_v12  ;;  %v1134_v12 = vld [vmem:[%s1531_s18 + $0x50] sm:$0xf]  ;;  %v1380_v41 = vld [vmem:[%s1531_s18 + $0xa4] sm:$0xf0]  ;;  %v1270_v42 = vld [vmem:[%s1531_s18 + $0x160] sm:$0xf] }
  0x25   : > { %749 = vmatpush.bf16.msra.mxu1 %v1418_v13  ;;  %1439 = vmatpush.bf16.msra.mxu3 %v1418_v13  ;;  %v1370_v13 = vld [vmem:[%s1531_s18 + $0x54] sm:$0xf0]  ;;  %v1404_v43 = vld [vmem:[%s1531_s18 + $0x164] sm:$0xf0] }
  0x26   : > { %v1135_v20 = vor.u32 %v1370_v13, %v1134_v12  ;;  %v1402_v12 = vld [vmem:[%s1531_s18 + $0x154] sm:$0xf0]  ;;  %v1377_v13 = vld [vmem:[%s1531_s18 + $0x94] sm:$0xf] }
  0x28   : > { %616 = vmatpush.bf16.msra.mxu0 %v1409_v14  ;;  %1432 = vmatpush.bf16.msra.mxu2 %v1409_v14  ;;  %v1230_v14 = vld [vmem:[%s1531_s18 + $0x110] sm:$0xf] }
  0x29   : > { %750 = vmatpush.bf16.msra.mxu1 %v1417_v15  ;;  %1440 = vmatpush.bf16.msra.mxu3 %v1417_v15  ;;  %v1394_v15 = vld [vmem:[%s1531_s18 + $0x114] sm:$0xf0] }
  0x2a   : > { %v1231_v21 = vor.u32 %v1394_v15, %v1230_v14  ;;  %v1168_v14 = vld [vmem:[%s1531_s18 + $0x98] sm:$0xf0] }
  0x2b   : > { %617 = vmatmul.bf16.vlgmr.msra.gmra.mxu0 %v1095_v24  ;;  %677 = vmatmul.bf16.vlgmr.msra.gmra.mxu2 %v1191_v25  ;;  %v1142_v24 = vld [vmem:[%s1531_s18 + $0x60] sm:$0xf]  ;;  %v1372_v25 = vld [vmem:[%s1531_s18 + $0x64] sm:$0xf0] }
  0x2c   : > { %751 = vmatmul.bf16.vlgmr.msra.gmra.mxu1 %v1099_v26  ;;  %816 = vmatmul.bf16.vlgmr.msra.gmra.mxu3 %v1203_v27  ;;  %v1238_v26 = vld [vmem:[%s1531_s18 + $0x120] sm:$0xf]  ;;  %v1396_v27 = vld [vmem:[%s1531_s18 + $0x124] sm:$0xf0]  ;;  %v1143_v32 = vor.u32 %v1372_v25, %v1142_v24  ;;  %v1171_v24 = vor.u32 %v1377_v13, %v1168_v14  ;;  %v1275_v25 = vor.u32 %v1403_v16, %v1272_v17  ;;  %v1278_v16 = vld [vmem:[%s1531_s18 + $0x170] sm:$0xf] }
  0x2d   : > { %v1239_v33 = vor.u32 %v1396_v27, %v1238_v26  ;;  %v1406_v17 = vld [vmem:[%s1531_s18 + $0x174] sm:$0xf0] }
  0x3b   : > { %622 = vmatmul.bf16.gmra.mxu0 %v1103_v36  ;;  %682 = vmatmul.bf16.gmra.mxu2 %v1199_v37  ;;  %v1150_v36 = vld [vmem:[%s1531_s18 + $0x70] sm:$0xf]  ;;  %v1374_v37 = vld [vmem:[%s1531_s18 + $0x74] sm:$0xf0] }
  0x3c   : > { %756 = vmatmul.bf16.gmra.mxu1 %v1107_v38  ;;  %821 = vmatmul.bf16.gmra.mxu3 %v1211_v39  ;;  %v1246_v38 = vld [vmem:[%s1531_s18 + $0x130] sm:$0xf]  ;;  %v1398_v39 = vld [vmem:[%s1531_s18 + $0x134] sm:$0xf0]  ;;  %v1151_v44 = vor.u32 %v1374_v37, %v1150_v36 }
  0x3d   : > { %v1247_v45 = vor.u32 %v1398_v39, %v1246_v38  ;;  %v1174_v38 = vld [vmem:[%s1531_s18 + $0xa0] sm:$0xf] }
  0x4b   : > { %627 = vmatmul.bf16.gmra.mxu0 %v1111_v48  ;;  %687 = vmatmul.bf16.gmra.mxu2 %v1207_v49  ;;  %v1609_v48 = vld [vmem:[%s1814_s2] ss:$0 sm:$0xff] }
  0x4c   : > { %761 = vmatmul.bf16.gmra.mxu1 %v1115_v50  ;;  %826 = vmatmul.bf16.gmra.mxu3 %v1219_v51  ;;  %v1158_v49 = vld [vmem:[%s1531_s18 + $0x80] sm:$0xf]  ;;  %v1376_v50 = vld [vmem:[%s1531_s18 + $0x84] sm:$0xf0] }
  0x4d   : > { %v1254_v51 = vld [vmem:[%s1531_s18 + $0x140] sm:$0xf]  ;;  %v1159_v57 = vor.u32 %v1376_v50, %v1158_v49  ;;  %v1405_v49 = vld [vmem:[%s1531_s18 + $0x174] sm:$0xf]  ;;  %v1280_v50 = vld [vmem:[%s1531_s18 + $0x178] sm:$0xf0] }
  0x4e   : > { %v1255_v58 = vor.u32 %v1400_v52, %v1254_v51 }
  0x5b   : > { %632 = vmatmul.bf16.gmra.mxu0 %v1119_v60  ;;  %692 = vmatmul.bf16.gmra.mxu2 %v1215_v61  ;;  %v1163_v60 = vor.u32 %v1375_v53, %v1160_v54  ;;  %v1267_v61 = vor.u32 %v1401_v55, %v1264_v56  ;;  %v1175_v54 = vor.u32 %v1380_v41, %v1174_v38 }
  0x5c   : > { %766 = vmatmul.bf16.gmra.mxu1 %v1123_v62  ;;  %831 = vmatmul.bf16.gmra.mxu3 %v1227_v63  ;;  %v1271_v55 = vor.u32 %v1404_v43, %v1270_v42 }
  0x6b   : > { %637 = vmatmul.bf16.gmra.mxu0 %v1127_v8  ;;  %697 = vmatmul.bf16.gmra.mxu2 %v1223_v9  ;;  %v1166_v9 = vld [vmem:[%s1531_s18 + $0x90] sm:$0xf] }
  0x6c   : > { %771 = vmatmul.bf16.gmra.mxu1 %v1131_v10  ;;  %836 = vmatmul.bf16.gmra.mxu3 %v1235_v11  ;;  %v1378_v10 = vld [vmem:[%s1531_s18 + $0x94] sm:$0xf0]  ;;  %v1262_v11 = vld [vmem:[%s1531_s18 + $0x150] sm:$0xf] }
  0x7b   : > { %642 = vmatmul.bf16.gmra.mxu0 %v1135_v20  ;;  %702 = vmatmul.bf16.gmra.mxu2 %v1231_v21  ;;  %v1167_v20 = vor.u32 %v1378_v10, %v1166_v9  ;;  %v1263_v21 = vor.u32 %v1402_v12, %v1262_v11  ;;  %v1182_v12 = vld [vmem:[%s1531_s18 + $0xb0] sm:$0xf] }
  0x7c   : > { %776 = vmatmul.bf16.gmra.mxu1 %v1139_v22  ;;  %841 = vmatmul.bf16.gmra.mxu3 %v1243_v23 }
  0x8b   : > { %647 = vmatmul.bf16.gmra.mxu0 %v1143_v32  ;;  %707 = vmatmul.bf16.gmra.mxu2 %v1239_v33 }
  0x8c   : > { %781 = vmatmul.bf16.gmra.mxu1 %v1147_v34  ;;  %846 = vmatmul.bf16.gmra.mxu3 %v1251_v35 }
  0x9b   : > { %652 = vmatmul.bf16.gmra.mxu0 %v1151_v44  ;;  %712 = vmatmul.bf16.gmra.mxu2 %v1247_v45  ;;  %v1379_v44 = vld [vmem:[%s1531_s18 + $0xa4] sm:$0xf]  ;;  %v1176_v45 = vld [vmem:[%s1531_s18 + $0xa8] sm:$0xf0] }
  0x9c   : > { %786 = vmatmul.bf16.gmra.mxu1 %v1155_v46  ;;  %851 = vmatmul.bf16.gmra.mxu3 %v1259_v47 }
  0xa8   : > { %v618_v59 = vpop.f32.mrf.mxu0 }
  0xa9   : > { %v619_v62 = vadd.f32 %v1609_v48, %v618_v59  ;;  %v752_v63 = vpop.f32.mrf.mxu1  ;;  %v1283_v59 = vor.u32 %v1405_v49, %v1280_v50 }
  0xab   : > { %v753_v0 = vadd.f32 %v752_v63, %v619_v62  ;;  %657 = vmatmul.bf16.gmra.mxu0 %v1159_v57  ;;  %717 = vmatmul.bf16.gmra.mxu2 %v1255_v58  ;;  %v1179_v58 = vor.u32 %v1379_v44, %v1176_v45 }
  0xac   : > { %791 = vmatmul.bf16.gmra.mxu1 %v1163_v60  ;;  %856 = vmatmul.bf16.gmra.mxu3 %v1267_v61 }
  0xad   : > { %v877_v1 = vmax.f32 %v753_v0, 0.0 }
  0xae   : > { %v1626_v2 = vpop.f32.mrf.mxu2 }
  0xaf   : > { %v927_v3 = vpack.c.bf16 %v877_v1, %v877_v1  ;;  %v817_v4 = vpop.f32.mrf.mxu3 }
  0xb0   : > { %v620_v5 = vpop.f32.mrf.mxu0 }
  0xb1   : > { %978 = vst.msk [vmem:[%s1624_s4] sm:$0xf] %vm977_vm0, %v927_v3  ;;  %v621_v6 = vadd.f32 %v1609_v48, %v620_v5  ;;  %v754_v7 = vpop.f32.mrf.mxu1 }
  0xb3   : > { %v755_v8 = vadd.f32 %v754_v7, %v621_v6 }
  0xb5   : > { %v878_v15 = vmax.f32 %v755_v8, 0.0 }
  0xb6   : > { %v1639_v18 = vpop.f32.mrf.mxu2 }
  0xb7   : > { %v928_v19 = vpack.c.bf16 %v878_v15, %v878_v15  ;;  %v819_v22 = vpop.f32.mrf.mxu3  ;;  %v1382_v15 = vld [vmem:[%s1531_s18 + $0xb4] sm:$0xf0] }
  0xb8   : > { %v623_v23 = vpop.f32.mrf.mxu0 }
  0xb9   : > { %979 = vst.msk [vmem:[%s1624_s4 + $0x4] sm:$0xf] %vm977_vm0, %v928_v19  ;;  %v624_v26 = vadd.f32 %v1609_v48, %v623_v23  ;;  %v757_v27 = vpop.f32.mrf.mxu1  ;;  %v1381_v19 = vld [vmem:[%s1531_s18 + $0xb4] sm:$0xf]  ;;  %v1407_v23 = vld [vmem:[%s1531_s18 + $0x184] sm:$0xf] }
  0xbb   : > { %v758_v28 = vadd.f32 %v757_v27, %v624_v26  ;;  %662 = vmatmul.bf16.gmra.mxu0 %v1167_v20  ;;  %722 = vmatmul.bf16.gmra.mxu2 %v1263_v21  ;;  %v1184_v20 = vld [vmem:[%s1531_s18 + $0xb8] sm:$0xf0] }
  0xbc   : > { %796 = vmatmul.bf16.gmra.mxu1 %v1171_v24  ;;  %861 = vmatmul.bf16.gmra.mxu3 %v1275_v25  ;;  %v1288_v24 = vld [vmem:[%s1531_s18 + $0x188] sm:$0xf0] }
  0xbd   : > { %v879_v29 = vmax.f32 %v758_v28, 0.0  ;;  %v1183_v28 = vor.u32 %v1382_v15, %v1182_v12 }
  0xbe   : > { %v683_v30 = vpop.f32.mrf.mxu2 }
  0xbf   : > { %v929_v31 = vpack.c.bf16 %v879_v29, %v879_v29  ;;  %v684_v32 = vadd.f32 %v1609_v48, %v683_v30  ;;  %v822_v33 = vpop.f32.mrf.mxu3  ;;  %v1279_v29 = vor.u32 %v1406_v17, %v1278_v16 }
  0xc0   : > { %v625_v34 = vpop.f32.mrf.mxu0 }
  0xc1   : > { %980 = vst.msk [vmem:[%s1624_s4 + $0x8] sm:$0xf] %vm977_vm0, %v929_v31  ;;  %v818_v35 = vadd.f32 %v817_v4, %v684_v32  ;;  %v626_v36 = vadd.f32 %v1609_v48, %v625_v34  ;;  %v759_v37 = vpop.f32.mrf.mxu1  ;;  %v1187_v32 = vor.u32 %v1381_v19, %v1184_v20 }
  0xc3   : > { %v903_v39 = vmax.f32 %v818_v35, 0.0  ;;  %v760_v40 = vadd.f32 %v759_v37, %v626_v36 }
  0xc5   : > { %v953_v46 = vpack.c.bf16 %v903_v39, %v903_v39  ;;  %v880_v47 = vmax.f32 %v760_v40, 0.0 }
  0xc6   : > { %v685_v51 = vpop.f32.mrf.mxu2 }
  0xc7   : > { %1004 = vst.msk [vmem:[%s1624_s4 + $0x68] sm:$0xf] %vm977_vm0, %v953_v46  ;;  %v930_v52 = vpack.c.bf16 %v880_v47, %v880_v47  ;;  %v686_v53 = vadd.f32 %v1609_v48, %v685_v51  ;;  %v824_v56 = vpop.f32.mrf.mxu3 }
  0xc8   : > { %v628_v57 = vpop.f32.mrf.mxu0 }
  0xc9   : > { %981 = vst.msk [vmem:[%s1624_s4 + $0xc] sm:$0xf] %vm977_vm0, %v930_v52  ;;  %v820_v60 = vadd.f32 %v819_v22, %v686_v53  ;;  %v629_v61 = vadd.f32 %v1609_v48, %v628_v57  ;;  %v762_v62 = vpop.f32.mrf.mxu1  ;;  %v1286_v52 = vld [vmem:[%s1531_s18 + $0x180] sm:$0xf]  ;;  %v1408_v53 = vld [vmem:[%s1531_s18 + $0x184] sm:$0xf0] }
  0xca   : > { %v1192_v57 = vld [vmem:[%s1531_s18 + $0xc8] sm:$0xf0] }
  0xcb   : > { %v904_v63 = vmax.f32 %v820_v60, 0.0  ;;  %v763_v0 = vadd.f32 %v762_v62, %v629_v61  ;;  %667 = vmatmul.bf16.gmra.mxu0 %v1175_v54  ;;  %727 = vmatmul.bf16.gmra.mxu2 %v1271_v55  ;;  %v1287_v61 = vor.u32 %v1408_v53, %v1286_v52 }
  0xcc   : > { %801 = vmatmul.bf16.gmra.mxu1 %v1179_v58  ;;  %866 = vmatmul.bf16.gmra.mxu3 %v1283_v59 }
  0xcd   : > { %v954_v1 = vpack.c.bf16 %v904_v63, %v904_v63  ;;  %v881_v3 = vmax.f32 %v763_v0, 0.0 }
  0xce   : > { %v688_v4 = vpop.f32.mrf.mxu2 }
  0xcf   : > { %1005 = vst.msk [vmem:[%s1624_s4 + $0x6c] sm:$0xf] %vm977_vm0, %v954_v1  ;;  %v931_v5 = vpack.c.bf16 %v881_v3, %v881_v3  ;;  %v689_v6 = vadd.f32 %v1609_v48, %v688_v4  ;;  %v827_v7 = vpop.f32.mrf.mxu3 }
  0xd0   : > { %v630_v8 = vpop.f32.mrf.mxu0 }
  0xd1   : > { %982 = vst.msk [vmem:[%s1624_s4 + $0x10] sm:$0xf] %vm977_vm0, %v931_v5  ;;  %v823_v9 = vadd.f32 %v822_v33, %v689_v6  ;;  %v631_v10 = vadd.f32 %v1609_v48, %v630_v8  ;;  %v764_v11 = vpop.f32.mrf.mxu1  ;;  %v1291_v33 = vor.u32 %v1407_v23, %v1288_v24 }
  0xd3   : > { %v905_v13 = vmax.f32 %v823_v9, 0.0  ;;  %v765_v14 = vadd.f32 %v764_v11, %v631_v10 }
  0xd5   : > { %v955_v21 = vpack.c.bf16 %v905_v13, %v905_v13  ;;  %v882_v22 = vmax.f32 %v765_v14, 0.0 }
  0xd6   : > { %v690_v25 = vpop.f32.mrf.mxu2 }
  0xd7   : > { %1006 = vst.msk [vmem:[%s1624_s4 + $0x70] sm:$0xf] %vm977_vm0, %v955_v21  ;;  %v932_v26 = vpack.c.bf16 %v882_v22, %v882_v22  ;;  %v691_v27 = vadd.f32 %v1609_v48, %v690_v25  ;;  %v829_v30 = vpop.f32.mrf.mxu3 }
  0xd8   : > { %v633_v31 = vpop.f32.mrf.mxu0 }
  0xd9   : > { %983 = vst.msk [vmem:[%s1624_s4 + $0x14] sm:$0xf] %vm977_vm0, %v932_v26  ;;  %v825_v34 = vadd.f32 %v824_v56, %v691_v27  ;;  %v634_v35 = vadd.f32 %v1609_v48, %v633_v31  ;;  %v767_v36 = vpop.f32.mrf.mxu1  ;;  %v1383_v56 = vld [vmem:[%s1531_s18 + $0xc4] sm:$0xf] }
  0xda   : > { %v1195_v0 = vor.u32 %v1383_v56, %v1192_v57 }
  0xdb   : > { %v906_v37 = vmax.f32 %v825_v34, 0.0  ;;  %v768_v38 = vadd.f32 %v767_v36, %v634_v35  ;;  %672 = vmatmul.bf16.gmra.mxu0 %v1183_v28  ;;  %732 = vmatmul.bf16.gmra.mxu2 %v1279_v29 }
  0xdc   : > { %806 = vmatmul.bf16.gmra.mxu1 %v1187_v32  ;;  %871 = vmatmul.bf16.gmra.mxu3 %v1291_v33 }
  0xdd   : > { %v956_v39 = vpack.c.bf16 %v906_v37, %v906_v37  ;;  %v883_v40 = vmax.f32 %v768_v38, 0.0 }
  0xde   : > { %v693_v41 = vpop.f32.mrf.mxu2 }
  0xdf   : > { %1007 = vst.msk [vmem:[%s1624_s4 + $0x74] sm:$0xf] %vm977_vm0, %v956_v39  ;;  %v933_v42 = vpack.c.bf16 %v883_v40, %v883_v40  ;;  %v694_v43 = vadd.f32 %v1609_v48, %v693_v41  ;;  %v832_v44 = vpop.f32.mrf.mxu3 }
  0xe0   : > { %v635_v45 = vpop.f32.mrf.mxu0 }
  0xe1   : > { %984 = vst.msk [vmem:[%s1624_s4 + $0x18] sm:$0xf] %vm977_vm0, %v933_v42  ;;  %v828_v46 = vadd.f32 %v827_v7, %v694_v43  ;;  %v636_v47 = vadd.f32 %v1609_v48, %v635_v45  ;;  %v769_v49 = vpop.f32.mrf.mxu1 }
  0xe3   : > { %v907_v50 = vmax.f32 %v828_v46, 0.0  ;;  %v770_v51 = vadd.f32 %v769_v49, %v636_v47 }
  0xe5   : > { %v957_v54 = vpack.c.bf16 %v907_v50, %v907_v50  ;;  %v884_v55 = vmax.f32 %v770_v51, 0.0 }
  0xe6   : > { %v695_v58 = vpop.f32.mrf.mxu2 }
  0xe7   : > { %1008 = vst.msk [vmem:[%s1624_s4 + $0x78] sm:$0xf] %vm977_vm0, %v957_v54  ;;  %v934_v59 = vpack.c.bf16 %v884_v55, %v884_v55  ;;  %v696_v60 = vadd.f32 %v1609_v48, %v695_v58  ;;  %v834_v62 = vpop.f32.mrf.mxu3 }
  0xe8   : > { %v638_v63 = vpop.f32.mrf.mxu0 }
  0xe9   : > { %985 = vst.msk [vmem:[%s1624_s4 + $0x1c] sm:$0xf] %vm977_vm0, %v934_v59  ;;  %v830_v1 = vadd.f32 %v829_v30, %v696_v60  ;;  %v639_v3 = vadd.f32 %v1609_v48, %v638_v63  ;;  %v772_v4 = vpop.f32.mrf.mxu1 }
  0xeb   : > { %v908_v5 = vmax.f32 %v830_v1, 0.0  ;;  %v773_v6 = vadd.f32 %v772_v4, %v639_v3  ;;  %737 = vmatmul.bf16.gmra.mxu2 %v1287_v61 }
  0xec   : > { %811 = vmatmul.bf16.gmra.mxu1 %v1195_v0 }
  0xed   : > { %v958_v7 = vpack.c.bf16 %v908_v5, %v908_v5  ;;  %v885_v8 = vmax.f32 %v773_v6, 0.0 }
  0xee   : > { %v698_v9 = vpop.f32.mrf.mxu2 }
  0xef   : > { %1009 = vst.msk [vmem:[%s1624_s4 + $0x7c] sm:$0xf] %vm977_vm0, %v958_v7  ;;  %v935_v10 = vpack.c.bf16 %v885_v8, %v885_v8  ;;  %v699_v11 = vadd.f32 %v1609_v48, %v698_v9  ;;  %v837_v12 = vpop.f32.mrf.mxu3 }
  0xf0   : > { %v640_v13 = vpop.f32.mrf.mxu0 }
  0xf1   : > { %986 = vst.msk [vmem:[%s1624_s4 + $0x20] sm:$0xf] %vm977_vm0, %v935_v10  ;;  %v833_v14 = vadd.f32 %v832_v44, %v699_v11  ;;  %v641_v15 = vadd.f32 %v1609_v48, %v640_v13  ;;  %v774_v16 = vpop.f32.mrf.mxu1 }
  0xf3   : > { %v909_v17 = vmax.f32 %v833_v14, 0.0  ;;  %v775_v19 = vadd.f32 %v774_v16, %v641_v15 }
  0xf5   : > { %v959_v20 = vpack.c.bf16 %v909_v17, %v909_v17  ;;  %v886_v21 = vmax.f32 %v775_v19, 0.0 }
  0xf6   : > { %v700_v22 = vpop.f32.mrf.mxu2 }
  0xf7   : > { %1010 = vst.msk [vmem:[%s1624_s4 + $0x80] sm:$0xf] %vm977_vm0, %v959_v20  ;;  %v936_v23 = vpack.c.bf16 %v886_v21, %v886_v21  ;;  %v701_v24 = vadd.f32 %v1609_v48, %v700_v22  ;;  %v839_v25 = vpop.f32.mrf.mxu3 }
  0xf8   : > { %v643_v26 = vpop.f32.mrf.mxu0 }
  0xf9   : > { %987 = vst.msk [vmem:[%s1624_s4 + $0x24] sm:$0xf] %vm977_vm0, %v936_v23  ;;  %v835_v27 = vadd.f32 %v834_v62, %v701_v24  ;;  %v644_v28 = vadd.f32 %v1609_v48, %v643_v26  ;;  %v777_v29 = vpop.f32.mrf.mxu1 }
  0xfb   : > { %v910_v30 = vmax.f32 %v835_v27, 0.0  ;;  %v778_v31 = vadd.f32 %v777_v29, %v644_v28 }
  0xfd   : > { %v960_v32 = vpack.c.bf16 %v910_v30, %v910_v30  ;;  %v887_v33 = vmax.f32 %v778_v31, 0.0 }
  0xfe   : > { %v703_v34 = vpop.f32.mrf.mxu2 }
  0xff   : > { %1011 = vst.msk [vmem:[%s1624_s4 + $0x84] sm:$0xf] %vm977_vm0, %v960_v32  ;;  %v937_v35 = vpack.c.bf16 %v887_v33, %v887_v33  ;;  %v704_v36 = vadd.f32 %v1609_v48, %v703_v34  ;;  %v842_v37 = vpop.f32.mrf.mxu3 }
 0x100   : > { %v645_v38 = vpop.f32.mrf.mxu0 }
 0x101   : > { %988 = vst.msk [vmem:[%s1624_s4 + $0x28] sm:$0xf] %vm977_vm0, %v937_v35  ;;  %v838_v39 = vadd.f32 %v837_v12, %v704_v36  ;;  %v646_v40 = vadd.f32 %v1609_v48, %v645_v38  ;;  %v779_v41 = vpop.f32.mrf.mxu1 }
 0x103   : > { %v911_v42 = vmax.f32 %v838_v39, 0.0  ;;  %v780_v43 = vadd.f32 %v779_v41, %v646_v40 }
 0x105   : > { %v961_v44 = vpack.c.bf16 %v911_v42, %v911_v42  ;;  %v888_v45 = vmax.f32 %v780_v43, 0.0 }
 0x106   : > { %v705_v46 = vpop.f32.mrf.mxu2 }
 0x107   : > { %1012 = vst.msk [vmem:[%s1624_s4 + $0x88] sm:$0xf] %vm977_vm0, %v961_v44  ;;  %v938_v47 = vpack.c.bf16 %v888_v45, %v888_v45  ;;  %v706_v49 = vadd.f32 %v1609_v48, %v705_v46  ;;  %v844_v50 = vpop.f32.mrf.mxu3 }
 0x108   : > { %v648_v51 = vpop.f32.mrf.mxu0 }
 0x109   : > { %989 = vst.msk [vmem:[%s1624_s4 + $0x2c] sm:$0xf] %vm977_vm0, %v938_v47  ;;  %v840_v52 = vadd.f32 %v839_v25, %v706_v49  ;;  %v649_v53 = vadd.f32 %v1609_v48, %v648_v51  ;;  %v782_v54 = vpop.f32.mrf.mxu1 }
 0x10b   : > { %v912_v55 = vmax.f32 %v840_v52, 0.0  ;;  %v783_v56 = vadd.f32 %v782_v54, %v649_v53 }
 0x10d   : > { %v962_v57 = vpack.c.bf16 %v912_v55, %v912_v55  ;;  %v889_v58 = vmax.f32 %v783_v56, 0.0 }
 0x10e   : > { %v708_v59 = vpop.f32.mrf.mxu2 }
 0x10f   : > { %1013 = vst.msk [vmem:[%s1624_s4 + $0x8c] sm:$0xf] %vm977_vm0, %v962_v57  ;;  %v939_v60 = vpack.c.bf16 %v889_v58, %v889_v58  ;;  %v709_v61 = vadd.f32 %v1609_v48, %v708_v59  ;;  %v847_v62 = vpop.f32.mrf.mxu3 }
 0x110   : > { %v650_v63 = vpop.f32.mrf.mxu0 }
 0x111   : > { %990 = vst.msk [vmem:[%s1624_s4 + $0x30] sm:$0xf] %vm977_vm0, %v939_v60  ;;  %v843_v0 = vadd.f32 %v842_v37, %v709_v61  ;;  %v651_v1 = vadd.f32 %v1609_v48, %v650_v63  ;;  %v784_v3 = vpop.f32.mrf.mxu1 }
 0x113   : > { %v913_v4 = vmax.f32 %v843_v0, 0.0  ;;  %v785_v5 = vadd.f32 %v784_v3, %v651_v1 }
 0x115   : > { %v963_v6 = vpack.c.bf16 %v913_v4, %v913_v4  ;;  %v890_v7 = vmax.f32 %v785_v5, 0.0 }
 0x116   : > { %v710_v8 = vpop.f32.mrf.mxu2 }
 0x117   : > { %1014 = vst.msk [vmem:[%s1624_s4 + $0x90] sm:$0xf] %vm977_vm0, %v963_v6  ;;  %v940_v9 = vpack.c.bf16 %v890_v7, %v890_v7  ;;  %v711_v10 = vadd.f32 %v1609_v48, %v710_v8  ;;  %v849_v11 = vpop.f32.mrf.mxu3 }
 0x118   : > { %v653_v12 = vpop.f32.mrf.mxu0 }
 0x119   : > { %991 = vst.msk [vmem:[%s1624_s4 + $0x34] sm:$0xf] %vm977_vm0, %v940_v9  ;;  %v845_v13 = vadd.f32 %v844_v50, %v711_v10  ;;  %v654_v14 = vadd.f32 %v1609_v48, %v653_v12  ;;  %v787_v15 = vpop.f32.mrf.mxu1 }
 0x11b   : > { %v914_v16 = vmax.f32 %v845_v13, 0.0  ;;  %v788_v17 = vadd.f32 %v787_v15, %v654_v14 }
 0x11d   : > { %v964_v19 = vpack.c.bf16 %v914_v16, %v914_v16  ;;  %v891_v20 = vmax.f32 %v788_v17, 0.0 }
 0x11e   : > { %v713_v21 = vpop.f32.mrf.mxu2 }
 0x11f   : > { %1015 = vst.msk [vmem:[%s1624_s4 + $0x94] sm:$0xf] %vm977_vm0, %v964_v19  ;;  %v941_v22 = vpack.c.bf16 %v891_v20, %v891_v20  ;;  %v714_v23 = vadd.f32 %v1609_v48, %v713_v21  ;;  %v852_v24 = vpop.f32.mrf.mxu3 }
 0x120   : > { %v655_v25 = vpop.f32.mrf.mxu0 }
 0x121   : > { %992 = vst.msk [vmem:[%s1624_s4 + $0x38] sm:$0xf] %vm977_vm0, %v941_v22  ;;  %v848_v26 = vadd.f32 %v847_v62, %v714_v23  ;;  %v656_v27 = vadd.f32 %v1609_v48, %v655_v25  ;;  %v789_v28 = vpop.f32.mrf.mxu1 }
 0x123   : > { %v915_v29 = vmax.f32 %v848_v26, 0.0  ;;  %v790_v30 = vadd.f32 %v789_v28, %v656_v27 }
 0x125   : > { %v965_v31 = vpack.c.bf16 %v915_v29, %v915_v29  ;;  %v892_v32 = vmax.f32 %v790_v30, 0.0 }
 0x126   : > { %v715_v33 = vpop.f32.mrf.mxu2 }
 0x127   : > { %1016 = vst.msk [vmem:[%s1624_s4 + $0x98] sm:$0xf] %vm977_vm0, %v965_v31  ;;  %v942_v34 = vpack.c.bf16 %v892_v32, %v892_v32  ;;  %v716_v35 = vadd.f32 %v1609_v48, %v715_v33  ;;  %v854_v37 = vpop.f32.mrf.mxu3 }
 0x128   : > { %v658_v36 = vpop.f32.mrf.mxu0 }
 0x129   : > { %993 = vst.msk [vmem:[%s1624_s4 + $0x3c] sm:$0xf] %vm977_vm0, %v942_v34  ;;  %v850_v38 = vadd.f32 %v849_v11, %v716_v35  ;;  %v659_v39 = vadd.f32 %v1609_v48, %v658_v36  ;;  %v792_v40 = vpop.f32.mrf.mxu1 }
 0x12b   : > { %v916_v41 = vmax.f32 %v850_v38, 0.0  ;;  %v793_v42 = vadd.f32 %v792_v40, %v659_v39 }
 0x12d   : > { %v966_v43 = vpack.c.bf16 %v916_v41, %v916_v41  ;;  %v893_v44 = vmax.f32 %v793_v42, 0.0 }
 0x12e   : > { %v718_v45 = vpop.f32.mrf.mxu2 }
 0x12f   : > { %1017 = vst.msk [vmem:[%s1624_s4 + $0x9c] sm:$0xf] %vm977_vm0, %v966_v43  ;;  %v943_v46 = vpack.c.bf16 %v893_v44, %v893_v44  ;;  %v719_v47 = vadd.f32 %v1609_v48, %v718_v45  ;;  %v857_v53 = vpop.f32.mrf.mxu3 }
 0x130   : > { %v660_v49 = vpop.f32.mrf.mxu0 }
 0x131   : > { %994 = vst.msk [vmem:[%s1624_s4 + $0x40] sm:$0xf] %vm977_vm0, %v943_v46  ;;  %v853_v50 = vadd.f32 %v852_v24, %v719_v47  ;;  %v661_v51 = vadd.f32 %v1609_v48, %v660_v49  ;;  %v794_v52 = vpop.f32.mrf.mxu1 }
 0x133   : > { %v917_v54 = vmax.f32 %v853_v50, 0.0  ;;  %v795_v55 = vadd.f32 %v794_v52, %v661_v51 }
 0x135   : > { %v967_v56 = vpack.c.bf16 %v917_v54, %v917_v54  ;;  %v894_v57 = vmax.f32 %v795_v55, 0.0 }
 0x136   : > { %v720_v58 = vpop.f32.mrf.mxu2 }
 0x137   : > { %1018 = vst.msk [vmem:[%s1624_s4 + $0xa0] sm:$0xf] %vm977_vm0, %v967_v56  ;;  %v944_v59 = vpack.c.bf16 %v894_v57, %v894_v57  ;;  %v721_v60 = vadd.f32 %v1609_v48, %v720_v58  ;;  %v859_v4 = vpop.f32.mrf.mxu3 }
 0x138   : > { %v663_v61 = vpop.f32.mrf.mxu0 }
 0x139   : > { %995 = vst.msk [vmem:[%s1624_s4 + $0x44] sm:$0xf] %vm977_vm0, %v944_v59  ;;  %v855_v62 = vadd.f32 %v854_v37, %v721_v60  ;;  %v664_v63 = vadd.f32 %v1609_v48, %v663_v61  ;;  %v797_v0 = vpop.f32.mrf.mxu1 }
 0x13b   : > { %v918_v1 = vmax.f32 %v855_v62, 0.0  ;;  %v798_v3 = vadd.f32 %v797_v0, %v664_v63 }
 0x13d   : > { %v968_v5 = vpack.c.bf16 %v918_v1, %v918_v1  ;;  %v895_v6 = vmax.f32 %v798_v3, 0.0 }
 0x13e   : > { %v723_v7 = vpop.f32.mrf.mxu2 }
 0x13f   : > { %1019 = vst.msk [vmem:[%s1624_s4 + $0xa4] sm:$0xf] %vm977_vm0, %v968_v5  ;;  %v945_v8 = vpack.c.bf16 %v895_v6, %v895_v6  ;;  %v724_v9 = vadd.f32 %v1609_v48, %v723_v7  ;;  %v862_v20 = vpop.f32.mrf.mxu3 }
 0x140   : > { %v665_v10 = vpop.f32.mrf.mxu0 }
 0x141   : > { %996 = vst.msk [vmem:[%s1624_s4 + $0x48] sm:$0xf] %vm977_vm0, %v945_v8  ;;  %v858_v11 = vadd.f32 %v857_v53, %v724_v9  ;;  %v666_v12 = vadd.f32 %v1609_v48, %v665_v10  ;;  %v799_v13 = vpop.f32.mrf.mxu1  ;;  %v679_v8 = vadd.f32 %v1609_v48, %v1626_v2  ;;  %v681_v2 = vadd.f32 %v1609_v48, %v1639_v18 }
 0x143   : > { %v919_v14 = vmax.f32 %v858_v11, 0.0  ;;  %v800_v15 = vadd.f32 %v799_v13, %v666_v12 }
 0x145   : > { %v969_v16 = vpack.c.bf16 %v919_v14, %v919_v14  ;;  %v896_v17 = vmax.f32 %v800_v15, 0.0 }
 0x146   : > { %v725_v19 = vpop.f32.mrf.mxu2 }
 0x147   : > { %1020 = vst.msk [vmem:[%s1624_s4 + $0xa8] sm:$0xf] %vm977_vm0, %v969_v16  ;;  %v946_v21 = vpack.c.bf16 %v896_v17, %v896_v17  ;;  %v726_v22 = vadd.f32 %v1609_v48, %v725_v19  ;;  %v864_v35 = vpop.f32.mrf.mxu3 }
 0x148   : > { %v668_v23 = vpop.f32.mrf.mxu0 }
 0x149   : > { %997 = vst.msk [vmem:[%s1624_s4 + $0x4c] sm:$0xf] %vm977_vm0, %v946_v21  ;;  %v860_v24 = vadd.f32 %v859_v4, %v726_v22  ;;  %v669_v25 = vadd.f32 %v1609_v48, %v668_v23  ;;  %v802_v26 = vpop.f32.mrf.mxu1 }
 0x14b   : > { %v920_v27 = vmax.f32 %v860_v24, 0.0  ;;  %v803_v28 = vadd.f32 %v802_v26, %v669_v25 }
 0x14d   : > { %v970_v29 = vpack.c.bf16 %v920_v27, %v920_v27  ;;  %v897_v30 = vmax.f32 %v803_v28, 0.0 }
 0x14e   : > { %v728_v31 = vpop.f32.mrf.mxu2 }
 0x14f   : > { %1021 = vst.msk [vmem:[%s1624_s4 + $0xac] sm:$0xf] %vm977_vm0, %v970_v29  ;;  %v947_v32 = vpack.c.bf16 %v897_v30, %v897_v30  ;;  %v729_v33 = vadd.f32 %v1609_v48, %v728_v31  ;;  %v867_v51 = vpop.f32.mrf.mxu3 }
 0x150   : > { %v670_v34 = vpop.f32.mrf.mxu0 }
 0x151   : > { %998 = vst.msk [vmem:[%s1624_s4 + $0x50] sm:$0xf] %vm977_vm0, %v947_v32  ;;  %v863_v36 = vadd.f32 %v862_v20, %v729_v33  ;;  %v671_v37 = vadd.f32 %v1609_v48, %v670_v34  ;;  %v804_v38 = vpop.f32.mrf.mxu1 }
 0x153   : > { %v921_v39 = vmax.f32 %v863_v36, 0.0  ;;  %v805_v40 = vadd.f32 %v804_v38, %v671_v37 }
 0x155   : > { %v971_v41 = vpack.c.bf16 %v921_v39, %v921_v39  ;;  %v898_v42 = vmax.f32 %v805_v40, 0.0 }
 0x156   : > { %v730_v43 = vpop.f32.mrf.mxu2 }
 0x157   : > { %1022 = vst.msk [vmem:[%s1624_s4 + $0xb0] sm:$0xf] %vm977_vm0, %v971_v41  ;;  %v948_v44 = vpack.c.bf16 %v898_v42, %v898_v42  ;;  %v731_v45 = vadd.f32 %v1609_v48, %v730_v43  ;;  %v869_v1 = vpop.f32.mrf.mxu3 }
 0x158   : > { %v673_v46 = vpop.f32.mrf.mxu0 }
 0x159   : > { %999 = vst.msk [vmem:[%s1624_s4 + $0x54] sm:$0xf] %vm977_vm0, %v948_v44  ;;  %v865_v47 = vadd.f32 %v864_v35, %v731_v45  ;;  %v674_v49 = vadd.f32 %v1609_v48, %v673_v46  ;;  %v807_v50 = vpop.f32.mrf.mxu1 }
 0x15b   : > { %v922_v52 = vmax.f32 %v865_v47, 0.0  ;;  %v808_v53 = vadd.f32 %v807_v50, %v674_v49 }
 0x15d   : > { %v972_v54 = vpack.c.bf16 %v922_v52, %v922_v52  ;;  %v899_v55 = vmax.f32 %v808_v53, 0.0 }
 0x15e   : > { %v733_v56 = vpop.f32.mrf.mxu2 }
 0x15f   : > { %1023 = vst.msk [vmem:[%s1624_s4 + $0xb4] sm:$0xf] %vm977_vm0, %v972_v54  ;;  %v949_v57 = vpack.c.bf16 %v899_v55, %v899_v55  ;;  %v734_v58 = vadd.f32 %v1609_v48, %v733_v56  ;;  %v872_v16 = vpop.f32.mrf.mxu3 }
 0x160   : > { %v675_v59 = vpop.f32.mrf.mxu0 }
 0x161   : > { %1000 = vst.msk [vmem:[%s1624_s4 + $0x58] sm:$0xf] %vm977_vm0, %v949_v57  ;;  %v868_v60 = vadd.f32 %v867_v51, %v734_v58  ;;  %v676_v61 = vadd.f32 %v1609_v48, %v675_v59  ;;  %v809_v62 = vpop.f32.mrf.mxu1 }
 0x163   : > { %v923_v63 = vmax.f32 %v868_v60, 0.0  ;;  %v810_v0 = vadd.f32 %v809_v62, %v676_v61 }
 0x165   : > { %v973_v3 = vpack.c.bf16 %v923_v63, %v923_v63  ;;  %v900_v4 = vmax.f32 %v810_v0, 0.0 }
 0x166   : > { %v735_v5 = vpop.f32.mrf.mxu2 }
 0x167   : > { %1024 = vst.msk [vmem:[%s1624_s4 + $0xb8] sm:$0xf] %vm977_vm0, %v973_v3  ;;  %v950_v6 = vpack.c.bf16 %v900_v4, %v900_v4  ;;  %v736_v7 = vadd.f32 %v1609_v48, %v735_v5  ;;  %v874_v29 = vpop.f32.mrf.mxu3 }
 0x169   : > { %1001 = vst.msk [vmem:[%s1624_s4 + $0x5c] sm:$0xf] %vm977_vm0, %v950_v6  ;;  %v870_v9 = vadd.f32 %v869_v1, %v736_v7  ;;  %v812_v10 = vpop.f32.mrf.mxu1 }
 0x16a   : > { %v813_v11 = vadd.f32 %v812_v10, %v679_v8 }
 0x16b   : > { %v924_v12 = vmax.f32 %v870_v9, 0.0 }
 0x16c   : > { %v901_v13 = vmax.f32 %v813_v11, 0.0 }
 0x16d   : > { %v974_v14 = vpack.c.bf16 %v924_v12, %v924_v12 }
 0x16e   : > { %v951_v15 = vpack.c.bf16 %v901_v13, %v901_v13  ;;  %v738_v17 = vpop.f32.mrf.mxu2 }
 0x16f   : > { %1025 = vst.msk [vmem:[%s1624_s4 + $0xbc] sm:$0xf] %vm977_vm0, %v974_v14  ;;  %v739_v19 = vadd.f32 %v1609_v48, %v738_v17 }
 0x170   : > { %1002 = vst.msk [vmem:[%s1624_s4 + $0x60] sm:$0xf] %vm977_vm0, %v951_v15 }
 0x171   : > { %v873_v20 = vadd.f32 %v872_v16, %v739_v19  ;;  %v814_v21 = vpop.f32.mrf.mxu1 }
 0x172   : > { %v815_v22 = vadd.f32 %v814_v21, %v681_v2 }
 0x173   : > { %v925_v23 = vmax.f32 %v873_v20, 0.0 }
 0x174   : > { %v902_v24 = vmax.f32 %v815_v22, 0.0 }
 0x175   : > { %v975_v25 = vpack.c.bf16 %v925_v23, %v925_v23 }
 0x176   : > { %v952_v26 = vpack.c.bf16 %v902_v24, %v902_v24  ;;  %v740_v27 = vpop.f32.mrf.mxu2 }
 0x177   : > { %1026 = vst.msk [vmem:[%s1624_s4 + $0xc0] sm:$0xf] %vm977_vm0, %v975_v25  ;;  %v741_v28 = vadd.f32 %v1609_v48, %v740_v27 }
 0x178   : > { %1003 = vst.msk [vmem:[%s1624_s4 + $0x64] sm:$0xf] %vm977_vm0, %v952_v26 }
 0x179   : > { %v875_v30 = vadd.f32 %v874_v29, %v741_v28 }
 0x17b   : > { %v926_v18 = vmax.f32 %v875_v30, 0.0 }
 0x17d   : > { %v976_v31 = vpack.c.bf16 %v926_v18, %v926_v18 }
 0x17f   : > { %1027 = vst.msk [vmem:[%s1624_s4 + $0xc4] sm:$0xf] %vm977_vm0, %v976_v31 }
 0x180 PF: > { %s13_s12 = sadd.s32 1, %s1456_s12  }
 0x181   : > { %p10_p4 = scmp.ge.s32.totalorder %s13_s12, 4  }
 0x183   :  { %12 = sbr.rel (!%p10_p4) target bundleno = 1 (0x1), region = 62 }

// kernel: dqn_forward.5
= control target key start
LH: loop header
LB: loop body
LE: loop exit
PB: predicated region body
PF: predicated region fallthrough
CT: control target
= control target key end

     0   :  { %vm824_vm0 = vcmask 519168   ;;  %vm845_vm1 = vcmask 516096   ;;  %s1683_s1 = inlined_call_operand.vmem [shape: bf16[512,64], index: 1, kind: input, shape index: {}]   ;;  %s1684_s2 = inlined_call_operand.vmem [shape: f32[1,64], index: 2, kind: input, shape index: {}]   ;;  %s1685_s0 = inlined_call_operand.vmem [shape: bf16[162,512], index: 0, kind: input, shape index: {}]   ;;  %s1686_s3 = inlined_call_operand.vmem [shape: bf16[162,64], index: 3, kind: output, shape index: {}]  }
   0x1   :  { %v1186_v0 = vld [vmem:[%s1683_s1 + $0x38] sm:$0xff]  ;;  %v1185_v4 = vld [vmem:[%s1683_s1 + $0x30] sm:$0xff]  ;;  %v1184_v8 = vld [vmem:[%s1683_s1 + $0x28] sm:$0xff] }
   0x2   :  { %v1194_v1 = vld [vmem:[%s1683_s1 + $0x78] sm:$0xff]  ;;  %530 = vmatpush.bf16.msra.mxu0 %v1186_v0  ;;  %v1193_v5 = vld [vmem:[%s1683_s1 + $0x70] sm:$0xff]  ;;  %v1192_v9 = vld [vmem:[%s1683_s1 + $0x68] sm:$0xff] }
   0x3   :  { %v1202_v2 = vld [vmem:[%s1683_s1 + $0xb8] sm:$0xff]  ;;  %593 = vmatpush.bf16.msra.mxu1 %v1194_v1  ;;  %v1201_v6 = vld [vmem:[%s1683_s1 + $0xb0] sm:$0xff]  ;;  %v1200_v10 = vld [vmem:[%s1683_s1 + $0xa8] sm:$0xff] }
   0x4   :  { %v1210_v3 = vld [vmem:[%s1683_s1 + $0xf8] sm:$0xff]  ;;  %656 = vmatpush.bf16.msra.mxu2 %v1202_v2  ;;  %v1209_v7 = vld [vmem:[%s1683_s1 + $0xf0] sm:$0xff]  ;;  %v1208_v11 = vld [vmem:[%s1683_s1 + $0xe8] sm:$0xff] }
   0x5   :  { %719 = vmatpush.bf16.msra.mxu3 %v1210_v3  ;;  %v1183_v12 = vld [vmem:[%s1683_s1 + $0x20] sm:$0xff]  ;;  %v1182_v16 = vld [vmem:[%s1683_s1 + $0x18] sm:$0xff]  ;;  %v1181_v20 = vld [vmem:[%s1683_s1 + $0x10] sm:$0xff] }
   0x6   :  { %531 = vmatpush.bf16.msra.mxu0 %v1185_v4  ;;  %v1191_v13 = vld [vmem:[%s1683_s1 + $0x60] sm:$0xff]  ;;  %v1190_v17 = vld [vmem:[%s1683_s1 + $0x58] sm:$0xff]  ;;  %v1189_v21 = vld [vmem:[%s1683_s1 + $0x50] sm:$0xff] }
   0x7   :  { %594 = vmatpush.bf16.msra.mxu1 %v1193_v5  ;;  %v1199_v14 = vld [vmem:[%s1683_s1 + $0xa0] sm:$0xff]  ;;  %v1198_v18 = vld [vmem:[%s1683_s1 + $0x98] sm:$0xff]  ;;  %v1197_v22 = vld [vmem:[%s1683_s1 + $0x90] sm:$0xff] }
   0x8   :  { %657 = vmatpush.bf16.msra.mxu2 %v1201_v6  ;;  %v1207_v15 = vld [vmem:[%s1683_s1 + $0xe0] sm:$0xff]  ;;  %v1206_v19 = vld [vmem:[%s1683_s1 + $0xd8] sm:$0xff]  ;;  %v1205_v23 = vld [vmem:[%s1683_s1 + $0xd0] sm:$0xff] }
   0x9   :  { %720 = vmatpush.bf16.msra.mxu3 %v1209_v7  ;;  %v1180_v24 = vld [vmem:[%s1683_s1 + $0x8] sm:$0xff]  ;;  %v1179_v28 = vld [vmem:[%s1683_s1] sm:$0xff]  ;;  %v1141_v33 = vld [vmem:[%s1685_s0 + $0xc] sm:$0xf0] }
   0xa   :  { %532 = vmatpush.bf16.msra.mxu0 %v1184_v8  ;;  %v1188_v25 = vld [vmem:[%s1683_s1 + $0x48] sm:$0xff]  ;;  %v1187_v29 = vld [vmem:[%s1683_s1 + $0x40] sm:$0xff]  ;;  %v855_v35 = vld [vmem:[%s1685_s0 + $0x10] sm:$0xf0] }
   0xb   :  { %595 = vmatpush.bf16.msra.mxu1 %v1192_v9  ;;  %v1196_v26 = vld [vmem:[%s1683_s1 + $0x88] sm:$0xff]  ;;  %v1195_v30 = vld [vmem:[%s1683_s1 + $0x80] sm:$0xff]  ;;  %v1142_v37 = vld [vmem:[%s1685_s0 + $0x14] sm:$0xf0] }
   0xc   :  { %658 = vmatpush.bf16.msra.mxu2 %v1200_v10  ;;  %v1204_v27 = vld [vmem:[%s1683_s1 + $0xc8] sm:$0xff]  ;;  %v1203_v31 = vld [vmem:[%s1683_s1 + $0xc0] sm:$0xff]  ;;  %v863_v39 = vld [vmem:[%s1685_s0 + $0x18] sm:$0xf0] }
   0xd   :  { %721 = vmatpush.bf16.msra.mxu3 %v1208_v11  ;;  %v853_v32 = vld [vmem:[%s1685_s0] sm:$0xf]  ;;  %v1139_v34 = vld [vmem:[%s1685_s0 + $0x4] sm:$0xf]  ;;  %v861_v36 = vld [vmem:[%s1685_s0 + $0x8] sm:$0xf] }
   0xe   :  { %533 = vmatpush.bf16.msra.mxu0 %v1183_v12  ;;  %v1140_v38 = vld [vmem:[%s1685_s0 + $0xc] sm:$0xf]  ;;  %v854_v40 = vor.u32 %v1141_v33, %v853_v32  ;;  %v858_v41 = vor.u32 %v1139_v34, %v855_v35  ;;  %v862_v42 = vor.u32 %v1142_v37, %v861_v36  ;;  %v869_v44 = vld [vmem:[%s1685_s0 + $0x20] sm:$0xf]  ;;  %v1145_v45 = vld [vmem:[%s1685_s0 + $0x2c] sm:$0xf0] }
   0xf   :  { %596 = vmatpush.bf16.msra.mxu1 %v1191_v13  ;;  %v866_v43 = vor.u32 %v1140_v38, %v863_v39  ;;  %v1143_v46 = vld [vmem:[%s1685_s0 + $0x24] sm:$0xf]  ;;  %v871_v47 = vld [vmem:[%s1685_s0 + $0x30] sm:$0xf0]  ;;  %v877_v48 = vld [vmem:[%s1685_s0 + $0x28] sm:$0xf]  ;;  %v870_v52 = vor.u32 %v1145_v45, %v869_v44 }
  0x10   :  { %659 = vmatpush.bf16.msra.mxu2 %v1199_v14  ;;  %v1146_v49 = vld [vmem:[%s1685_s0 + $0x34] sm:$0xf0]  ;;  %v1144_v50 = vld [vmem:[%s1685_s0 + $0x2c] sm:$0xf]  ;;  %v879_v51 = vld [vmem:[%s1685_s0 + $0x38] sm:$0xf0]  ;;  %v874_v53 = vor.u32 %v1143_v46, %v871_v47 }
  0x11   :  { %722 = vmatpush.bf16.msra.mxu3 %v1207_v15  ;;  %v878_v54 = vor.u32 %v1146_v49, %v877_v48  ;;  %v882_v55 = vor.u32 %v1144_v50, %v879_v51  ;;  %v885_v56 = vld [vmem:[%s1685_s0 + $0x40] sm:$0xf]  ;;  %v1149_v57 = vld [vmem:[%s1685_s0 + $0x4c] sm:$0xf0]  ;;  %v1147_v58 = vld [vmem:[%s1685_s0 + $0x44] sm:$0xf] }
  0x12   :  { %534 = vmatpush.bf16.msra.mxu0 %v1182_v16  ;;  %v887_v59 = vld [vmem:[%s1685_s0 + $0x50] sm:$0xf0]  ;;  %v893_v60 = vld [vmem:[%s1685_s0 + $0x48] sm:$0xf]  ;;  %v1150_v61 = vld [vmem:[%s1685_s0 + $0x54] sm:$0xf0]  ;;  %v886_v0 = vor.u32 %v1149_v57, %v885_v56 }
  0x13   :  { %597 = vmatpush.bf16.msra.mxu1 %v1190_v17  ;;  %v1148_v62 = vld [vmem:[%s1685_s0 + $0x4c] sm:$0xf]  ;;  %v895_v63 = vld [vmem:[%s1685_s0 + $0x58] sm:$0xf0]  ;;  %v890_v1 = vor.u32 %v1147_v58, %v887_v59  ;;  %v894_v2 = vor.u32 %v1150_v61, %v893_v60  ;;  %v901_v4 = vld [vmem:[%s1685_s0 + $0x60] sm:$0xf] }
  0x14   :  { %660 = vmatpush.bf16.msra.mxu2 %v1198_v18  ;;  %v898_v3 = vor.u32 %v1148_v62, %v895_v63  ;;  %v1153_v5 = vld [vmem:[%s1685_s0 + $0x6c] sm:$0xf0]  ;;  %v1151_v6 = vld [vmem:[%s1685_s0 + $0x64] sm:$0xf]  ;;  %v903_v7 = vld [vmem:[%s1685_s0 + $0x70] sm:$0xf0] }
  0x15   :  { %723 = vmatpush.bf16.msra.mxu3 %v1206_v19  ;;  %v909_v8 = vld [vmem:[%s1685_s0 + $0x68] sm:$0xf]  ;;  %v1154_v9 = vld [vmem:[%s1685_s0 + $0x74] sm:$0xf0]  ;;  %v1152_v10 = vld [vmem:[%s1685_s0 + $0x6c] sm:$0xf]  ;;  %v902_v12 = vor.u32 %v1153_v5, %v901_v4  ;;  %v906_v13 = vor.u32 %v1151_v6, %v903_v7 }
  0x16   :  { %535 = vmatpush.bf16.msra.mxu0 %v1181_v20  ;;  %v911_v11 = vld [vmem:[%s1685_s0 + $0x78] sm:$0xf0]  ;;  %v910_v14 = vor.u32 %v1154_v9, %v909_v8  ;;  %v917_v16 = vld [vmem:[%s1685_s0 + $0x80] sm:$0xf]  ;;  %v1157_v17 = vld [vmem:[%s1685_s0 + $0x8c] sm:$0xf0] }
  0x17   :  { %598 = vmatpush.bf16.msra.mxu1 %v1189_v21  ;;  %v914_v15 = vor.u32 %v1152_v10, %v911_v11  ;;  %v1155_v18 = vld [vmem:[%s1685_s0 + $0x84] sm:$0xf]  ;;  %v919_v19 = vld [vmem:[%s1685_s0 + $0x90] sm:$0xf0]  ;;  %v925_v20 = vld [vmem:[%s1685_s0 + $0x88] sm:$0xf] }
  0x18   :  { %661 = vmatpush.bf16.msra.mxu2 %v1197_v22  ;;  %v1158_v21 = vld [vmem:[%s1685_s0 + $0x94] sm:$0xf0]  ;;  %v1156_v22 = vld [vmem:[%s1685_s0 + $0x8c] sm:$0xf]  ;;  %v941_v32 = vld [vmem:[%s1685_s0 + $0xa8] sm:$0xf] }
  0x19   :  { %724 = vmatpush.bf16.msra.mxu3 %v1205_v23  ;;  %v927_v23 = vld [vmem:[%s1685_s0 + $0x98] sm:$0xf0]  ;;  %v1162_v33 = vld [vmem:[%s1685_s0 + $0xb4] sm:$0xf0]  ;;  %v1160_v34 = vld [vmem:[%s1685_s0 + $0xac] sm:$0xf] }
  0x1a   :  { %536 = vmatpush.bf16.msra.mxu0 %v1180_v24  ;;  %v918_v24 = vor.u32 %v1157_v17, %v917_v16  ;;  %v943_v35 = vld [vmem:[%s1685_s0 + $0xb8] sm:$0xf0]  ;;  %v942_v38 = vor.u32 %v1162_v33, %v941_v32  ;;  %v957_v44 = vld [vmem:[%s1685_s0 + $0xc8] sm:$0xf]  ;;  %v1166_v45 = vld [vmem:[%s1685_s0 + $0xd4] sm:$0xf0] }
  0x1b   :  { %599 = vmatpush.bf16.msra.mxu1 %v1188_v25  ;;  %v922_v25 = vor.u32 %v1155_v18, %v919_v19  ;;  %v946_v39 = vor.u32 %v1160_v34, %v943_v35  ;;  %v1164_v46 = vld [vmem:[%s1685_s0 + $0xcc] sm:$0xf]  ;;  %v959_v47 = vld [vmem:[%s1685_s0 + $0xd8] sm:$0xf0]  ;;  %v958_v50 = vor.u32 %v1166_v45, %v957_v44  ;;  %v973_v56 = vld [vmem:[%s1685_s0 + $0xe8] sm:$0xf] }
  0x1c   :  { %662 = vmatpush.bf16.msra.mxu2 %v1196_v26  ;;  %v926_v26 = vor.u32 %v1158_v21, %v925_v20  ;;  %v962_v51 = vor.u32 %v1164_v46, %v959_v47  ;;  %v1170_v57 = vld [vmem:[%s1685_s0 + $0xf4] sm:$0xf0]  ;;  %v1168_v58 = vld [vmem:[%s1685_s0 + $0xec] sm:$0xf]  ;;  %v975_v59 = vld [vmem:[%s1685_s0 + $0xf8] sm:$0xf0] }
  0x1d   :  { %725 = vmatpush.bf16.msra.mxu3 %v1204_v27  ;;  %v930_v27 = vor.u32 %v1156_v22, %v927_v23  ;;  %v974_v62 = vor.u32 %v1170_v57, %v973_v56  ;;  %v978_v63 = vor.u32 %v1168_v58, %v975_v59  ;;  %v983_v4 = vld [vmem:[%s1685_s0 + $0x110] sm:$0xf0]  ;;  %v989_v5 = vld [vmem:[%s1685_s0 + $0x108] sm:$0xf]  ;;  %v1174_v6 = vld [vmem:[%s1685_s0 + $0x114] sm:$0xf0] }
  0x1e   :  { %537 = vmatpush.bf16.msra.mxu0 %v1179_v28  ;;  %v933_v28 = vld [vmem:[%s1685_s0 + $0xa0] sm:$0xf]  ;;  %v1172_v7 = vld [vmem:[%s1685_s0 + $0x10c] sm:$0xf]  ;;  %v991_v8 = vld [vmem:[%s1685_s0 + $0x118] sm:$0xf0] }
  0x1f   :  { %600 = vmatpush.bf16.msra.mxu1 %v1187_v29  ;;  %v1161_v29 = vld [vmem:[%s1685_s0 + $0xac] sm:$0xf0]  ;;  %v1007_v32 = vld [vmem:[%s1685_s0 + $0x138] sm:$0xf0] }
  0x20   :  { %663 = vmatpush.bf16.msra.mxu2 %v1195_v30  ;;  %v1159_v30 = vld [vmem:[%s1685_s0 + $0xa4] sm:$0xf]  ;;  %v934_v36 = vor.u32 %v1161_v29, %v933_v28  ;;  %v999_v28 = vld [vmem:[%s1685_s0 + $0x130] sm:$0xf0]  ;;  %v1005_v29 = vld [vmem:[%s1685_s0 + $0x128] sm:$0xf] }
  0x21   :  { %726 = vmatpush.bf16.msra.mxu3 %v1203_v31  ;;  %538 = vmatmul.bf16.vlgmr.msra.gmra.mxu0 %v854_v40  ;;  %v935_v31 = vld [vmem:[%s1685_s0 + $0xb0] sm:$0xf0]  ;;  %v949_v40 = vld [vmem:[%s1685_s0 + $0xc0] sm:$0xf] }
  0x22   :  { %601 = vmatmul.bf16.vlgmr.msra.gmra.mxu1 %v858_v41  ;;  %v938_v37 = vor.u32 %v1159_v30, %v935_v31  ;;  %v1165_v41 = vld [vmem:[%s1685_s0 + $0xcc] sm:$0xf0]  ;;  %v1178_v30 = vld [vmem:[%s1685_s0 + $0x134] sm:$0xf0]  ;;  %v1176_v31 = vld [vmem:[%s1685_s0 + $0x12c] sm:$0xf] }
  0x23   :  { %664 = vmatmul.bf16.vlgmr.msra.gmra.mxu2 %v862_v42  ;;  %v1163_v42 = vld [vmem:[%s1685_s0 + $0xc4] sm:$0xf]  ;;  %v950_v48 = vor.u32 %v1165_v41, %v949_v40 }
  0x24   :  { %727 = vmatmul.bf16.vlgmr.msra.gmra.mxu3 %v866_v43  ;;  %v951_v43 = vld [vmem:[%s1685_s0 + $0xd0] sm:$0xf0] }
  0x25   :  { %v954_v49 = vor.u32 %v1163_v42, %v951_v43  ;;  %v1006_v42 = vor.u32 %v1178_v30, %v1005_v29  ;;  %v1010_v43 = vor.u32 %v1176_v31, %v1007_v32 }
  0x31   :  { %543 = vmatmul.bf16.gmra.mxu0 %v870_v52  ;;  %v965_v52 = vld [vmem:[%s1685_s0 + $0xe0] sm:$0xf] }
  0x32   :  { %606 = vmatmul.bf16.gmra.mxu1 %v874_v53  ;;  %v1169_v53 = vld [vmem:[%s1685_s0 + $0xec] sm:$0xf0] }
  0x33   :  { %669 = vmatmul.bf16.gmra.mxu2 %v878_v54  ;;  %v1167_v54 = vld [vmem:[%s1685_s0 + $0xe4] sm:$0xf]  ;;  %v966_v60 = vor.u32 %v1169_v53, %v965_v52 }
  0x34   :  { %732 = vmatmul.bf16.gmra.mxu3 %v882_v55  ;;  %v967_v55 = vld [vmem:[%s1685_s0 + $0xf0] sm:$0xf0] }
  0x35   :  { %v970_v61 = vor.u32 %v1167_v54, %v967_v55  ;;  %v54_v54 = vld [vmem:[%s1685_s0 + $0x140] sm:$0x11]  ;;  %v55_v55 = vld [vmem:[%s1685_s0 + $0x148] sm:$0x11] }
  0x36   :  { %v246_v58 = vunpack.c.l.b16 %v54_v54  ;;  %v247_v59 = vunpack.c.h.b16 %v54_v54 }
  0x41   :  { %548 = vmatmul.bf16.gmra.mxu0 %v886_v0  ;;  %v1523_v0 = vld [vmem:[%s1684_s2] ss:$0 sm:$0xff] }
  0x42   :  { %611 = vmatmul.bf16.gmra.mxu1 %v890_v1  ;;  %v981_v1 = vld [vmem:[%s1685_s0 + $0x100] sm:$0xf] }
  0x43   :  { %674 = vmatmul.bf16.gmra.mxu2 %v894_v2  ;;  %v1173_v2 = vld [vmem:[%s1685_s0 + $0x10c] sm:$0xf0] }
  0x44   :  { %737 = vmatmul.bf16.gmra.mxu3 %v898_v3  ;;  %v1171_v3 = vld [vmem:[%s1685_s0 + $0x104] sm:$0xf]  ;;  %v982_v9 = vor.u32 %v1173_v2, %v981_v1 }
  0x45   :  { %v986_v10 = vor.u32 %v1171_v3, %v983_v4  ;;  %v290_v4 = vpack.c.b16 %v246_v58, %v246_v58 }
  0x51   :  { %553 = vmatmul.bf16.gmra.mxu0 %v902_v12 }
  0x52   :  { %616 = vmatmul.bf16.gmra.mxu1 %v906_v13  ;;  %v990_v13 = vor.u32 %v1174_v6, %v989_v5  ;;  %v291_v5 = vpack.c.b16 %v247_v59, %v247_v59 }
  0x53   :  { %679 = vmatmul.bf16.gmra.mxu2 %v910_v14  ;;  %v994_v14 = vor.u32 %v1172_v7, %v991_v8 }
  0x54   :  { %742 = vmatmul.bf16.gmra.mxu3 %v914_v15 }
  0x61   :  { %558 = vmatmul.bf16.gmra.mxu0 %v918_v24  ;;  %v997_v24 = vld [vmem:[%s1685_s0 + $0x120] sm:$0xf] }
  0x62   :  { %621 = vmatmul.bf16.gmra.mxu1 %v922_v25  ;;  %v1177_v25 = vld [vmem:[%s1685_s0 + $0x12c] sm:$0xf0] }
  0x63   :  { %684 = vmatmul.bf16.gmra.mxu2 %v926_v26  ;;  %v1175_v26 = vld [vmem:[%s1685_s0 + $0x124] sm:$0xf] }
  0x64   :  { %747 = vmatmul.bf16.gmra.mxu3 %v930_v27 }
  0x71   :  { %563 = vmatmul.bf16.gmra.mxu0 %v934_v36 }
  0x72   :  { %626 = vmatmul.bf16.gmra.mxu1 %v938_v37  ;;  %v998_v37 = vor.u32 %v1177_v25, %v997_v24 }
  0x73   :  { %689 = vmatmul.bf16.gmra.mxu2 %v942_v38  ;;  %v1002_v38 = vor.u32 %v1175_v26, %v999_v28 }
  0x74   :  { %752 = vmatmul.bf16.gmra.mxu3 %v946_v39 }
  0x81   :  { %568 = vmatmul.bf16.gmra.mxu0 %v950_v48 }
  0x82   :  { %631 = vmatmul.bf16.gmra.mxu1 %v954_v49 }
  0x83   :  { %694 = vmatmul.bf16.gmra.mxu2 %v958_v50 }
  0x84   :  { %757 = vmatmul.bf16.gmra.mxu3 %v962_v51 }
  0x91   :  { %573 = vmatmul.bf16.gmra.mxu0 %v966_v60 }
  0x92   :  { %636 = vmatmul.bf16.gmra.mxu1 %v970_v61  ;;  %v248_v61 = vunpack.c.l.b16 %v55_v55 }
  0x93   :  { %699 = vmatmul.bf16.gmra.mxu2 %v974_v62  ;;  %v249_v62 = vunpack.c.h.b16 %v55_v55 }
  0x94   :  { %762 = vmatmul.bf16.gmra.mxu3 %v978_v63 }
  0x9e   :  { %v539_v11 = vpop.f32.mrf.mxu0 }
  0x9f   :  { %v602_v12 = vpop.f32.mrf.mxu1  ;;  %v540_v15 = vadd.f32 %v1523_v0, %v539_v11 }
  0xa1   :  { %578 = vmatmul.bf16.gmra.mxu0 %v982_v9  ;;  %v603_v16 = vadd.f32 %v602_v12, %v540_v15  ;;  %v292_v9 = vpack.c.b16 %v248_v61, %v248_v61 }
  0xa2   :  { %641 = vmatmul.bf16.gmra.mxu1 %v986_v10  ;;  %v293_v10 = vpack.c.b16 %v249_v62, %v249_v62 }
  0xa3   :  { %704 = vmatmul.bf16.gmra.mxu2 %v990_v13 }
  0xa4   :  { %767 = vmatmul.bf16.gmra.mxu3 %v994_v14 }
  0xa6   :  { %v665_v17 = vpop.f32.mrf.mxu2  ;;  %v541_v20 = vpop.f32.mrf.mxu0 }
  0xa7   :  { %v728_v18 = vpop.f32.mrf.mxu3  ;;  %v666_v19 = vadd.f32 %v665_v17, %v603_v16  ;;  %v604_v21 = vpop.f32.mrf.mxu1  ;;  %v542_v23 = vadd.f32 %v1523_v0, %v541_v20 }
  0xa9   :  { %v729_v22 = vadd.f32 %v728_v18, %v666_v19  ;;  %v605_v34 = vadd.f32 %v604_v21, %v542_v23 }
  0xab   :  { %v782_v27 = vmax.f32 %v729_v22, 0.0 }
  0xad   :  { %v803_v33 = vpack.c.bf16 %v782_v27, %v782_v27 }
  0xae   :  { %v667_v35 = vpop.f32.mrf.mxu2  ;;  %v544_v40 = vpop.f32.mrf.mxu0 }
  0xaf   :  { %v730_v36 = vpop.f32.mrf.mxu3  ;;  %825 = vst.msk [vmem:[%s1686_s3] sm:$0xf] %vm824_vm0, %v803_v33  ;;  %v668_v39 = vadd.f32 %v667_v35, %v605_v34  ;;  %v607_v41 = vpop.f32.mrf.mxu1  ;;  %v545_v44 = vadd.f32 %v1523_v0, %v544_v40 }
  0xb1   :  { %v731_v45 = vadd.f32 %v730_v36, %v668_v39  ;;  %583 = vmatmul.bf16.gmra.mxu0 %v998_v37  ;;  %v608_v47 = vadd.f32 %v607_v41, %v545_v44 }
  0xb2   :  { %646 = vmatmul.bf16.gmra.mxu1 %v1002_v38 }
  0xb3   :  { %v783_v46 = vmax.f32 %v731_v45, 0.0  ;;  %709 = vmatmul.bf16.gmra.mxu2 %v1006_v42 }
  0xb4   :  { %772 = vmatmul.bf16.gmra.mxu3 %v1010_v43 }
  0xb5   :  { %v804_v48 = vpack.c.bf16 %v783_v46, %v783_v46 }
  0xb6   :  { %v670_v49 = vpop.f32.mrf.mxu2  ;;  %v546_v52 = vpop.f32.mrf.mxu0 }
  0xb7   :  { %v733_v50 = vpop.f32.mrf.mxu3  ;;  %826 = vst.msk [vmem:[%s1686_s3 + $0x4] sm:$0xf] %vm824_vm0, %v804_v48  ;;  %v671_v51 = vadd.f32 %v670_v49, %v608_v47  ;;  %v609_v53 = vpop.f32.mrf.mxu1  ;;  %v547_v57 = vadd.f32 %v1523_v0, %v546_v52 }
  0xb9   :  { %v734_v56 = vadd.f32 %v733_v50, %v671_v51  ;;  %v610_v1 = vadd.f32 %v609_v53, %v547_v57 }
  0xbb   :  { %v784_v60 = vmax.f32 %v734_v56, 0.0 }
  0xbd   :  { %v805_v63 = vpack.c.bf16 %v784_v60, %v784_v60 }
  0xbe   :  { %v672_v2 = vpop.f32.mrf.mxu2  ;;  %v549_v7 = vpop.f32.mrf.mxu0 }
  0xbf   :  { %v735_v3 = vpop.f32.mrf.mxu3  ;;  %827 = vst.msk [vmem:[%s1686_s3 + $0x8] sm:$0xf] %vm824_vm0, %v805_v63  ;;  %v673_v6 = vadd.f32 %v672_v2, %v610_v1  ;;  %v612_v8 = vpop.f32.mrf.mxu1  ;;  %v550_v11 = vadd.f32 %v1523_v0, %v549_v7 }
  0xc1   :  { %v736_v12 = vadd.f32 %v735_v3, %v673_v6  ;;  %588 = vmatmul.bf16.gmra.mxu0 %v290_v4  ;;  %v613_v14 = vadd.f32 %v612_v8, %v550_v11 }
  0xc2   :  { %651 = vmatmul.bf16.gmra.mxu1 %v291_v5 }
  0xc3   :  { %v785_v13 = vmax.f32 %v736_v12, 0.0  ;;  %714 = vmatmul.bf16.gmra.mxu2 %v292_v9 }
  0xc4   :  { %777 = vmatmul.bf16.gmra.mxu3 %v293_v10 }
  0xc5   :  { %v806_v15 = vpack.c.bf16 %v785_v13, %v785_v13 }
  0xc6   :  { %v675_v16 = vpop.f32.mrf.mxu2  ;;  %v551_v19 = vpop.f32.mrf.mxu0 }
  0xc7   :  { %v738_v17 = vpop.f32.mrf.mxu3  ;;  %828 = vst.msk [vmem:[%s1686_s3 + $0xc] sm:$0xf] %vm824_vm0, %v806_v15  ;;  %v676_v18 = vadd.f32 %v675_v16, %v613_v14  ;;  %v614_v20 = vpop.f32.mrf.mxu1  ;;  %v552_v22 = vadd.f32 %v1523_v0, %v551_v19 }
  0xc9   :  { %v739_v21 = vadd.f32 %v738_v17, %v676_v18  ;;  %v615_v25 = vadd.f32 %v614_v20, %v552_v22 }
  0xcb   :  { %v786_v23 = vmax.f32 %v739_v21, 0.0 }
  0xcd   :  { %v807_v24 = vpack.c.bf16 %v786_v23, %v786_v23 }
  0xce   :  { %v677_v26 = vpop.f32.mrf.mxu2  ;;  %v554_v29 = vpop.f32.mrf.mxu0 }
  0xcf   :  { %v740_v27 = vpop.f32.mrf.mxu3  ;;  %829 = vst.msk [vmem:[%s1686_s3 + $0x10] sm:$0xf] %vm824_vm0, %v807_v24  ;;  %v678_v28 = vadd.f32 %v677_v26, %v615_v25  ;;  %v617_v30 = vpop.f32.mrf.mxu1  ;;  %v555_v31 = vadd.f32 %v1523_v0, %v554_v29 }
  0xd1   :  { %v741_v32 = vadd.f32 %v740_v27, %v678_v28  ;;  %v618_v34 = vadd.f32 %v617_v30, %v555_v31 }
  0xd3   :  { %v787_v33 = vmax.f32 %v741_v32, 0.0 }
  0xd5   :  { %v808_v35 = vpack.c.bf16 %v787_v33, %v787_v33 }
  0xd6   :  { %v680_v36 = vpop.f32.mrf.mxu2  ;;  %v556_v39 = vpop.f32.mrf.mxu0 }
  0xd7   :  { %v743_v37 = vpop.f32.mrf.mxu3  ;;  %830 = vst.msk [vmem:[%s1686_s3 + $0x14] sm:$0xf] %vm824_vm0, %v808_v35  ;;  %v681_v38 = vadd.f32 %v680_v36, %v618_v34  ;;  %v619_v40 = vpop.f32.mrf.mxu1  ;;  %v557_v42 = vadd.f32 %v1523_v0, %v556_v39 }
  0xd9   :  { %v744_v41 = vadd.f32 %v743_v37, %v681_v38  ;;  %v620_v45 = vadd.f32 %v619_v40, %v557_v42 }
  0xdb   :  { %v788_v43 = vmax.f32 %v744_v41, 0.0 }
  0xdd   :  { %v809_v44 = vpack.c.bf16 %v788_v43, %v788_v43 }
  0xde   :  { %v682_v46 = vpop.f32.mrf.mxu2  ;;  %v559_v49 = vpop.f32.mrf.mxu0 }
  0xdf   :  { %v745_v47 = vpop.f32.mrf.mxu3  ;;  %831 = vst.msk [vmem:[%s1686_s3 + $0x18] sm:$0xf] %vm824_vm0, %v809_v44  ;;  %v683_v48 = vadd.f32 %v682_v46, %v620_v45  ;;  %v622_v50 = vpop.f32.mrf.mxu1  ;;  %v560_v51 = vadd.f32 %v1523_v0, %v559_v49 }
  0xe1   :  { %v746_v52 = vadd.f32 %v745_v47, %v683_v48  ;;  %v623_v54 = vadd.f32 %v622_v50, %v560_v51 }
  0xe3   :  { %v789_v53 = vmax.f32 %v746_v52, 0.0 }
  0xe5   :  { %v810_v55 = vpack.c.bf16 %v789_v53, %v789_v53 }
  0xe6   :  { %v685_v56 = vpop.f32.mrf.mxu2  ;;  %v561_v59 = vpop.f32.mrf.mxu0 }
  0xe7   :  { %v748_v57 = vpop.f32.mrf.mxu3  ;;  %832 = vst.msk [vmem:[%s1686_s3 + $0x1c] sm:$0xf] %vm824_vm0, %v810_v55  ;;  %v686_v58 = vadd.f32 %v685_v56, %v623_v54  ;;  %v624_v60 = vpop.f32.mrf.mxu1  ;;  %v562_v62 = vadd.f32 %v1523_v0, %v561_v59 }
  0xe9   :  { %v749_v61 = vadd.f32 %v748_v57, %v686_v58  ;;  %v625_v2 = vadd.f32 %v624_v60, %v562_v62 }
  0xeb   :  { %v790_v63 = vmax.f32 %v749_v61, 0.0 }
  0xed   :  { %v811_v1 = vpack.c.bf16 %v790_v63, %v790_v63 }
  0xee   :  { %v687_v3 = vpop.f32.mrf.mxu2  ;;  %v564_v6 = vpop.f32.mrf.mxu0 }
  0xef   :  { %v750_v4 = vpop.f32.mrf.mxu3  ;;  %833 = vst.msk [vmem:[%s1686_s3 + $0x20] sm:$0xf] %vm824_vm0, %v811_v1  ;;  %v688_v5 = vadd.f32 %v687_v3, %v625_v2  ;;  %v627_v7 = vpop.f32.mrf.mxu1  ;;  %v565_v8 = vadd.f32 %v1523_v0, %v564_v6 }
  0xf1   :  { %v751_v9 = vadd.f32 %v750_v4, %v688_v5  ;;  %v628_v11 = vadd.f32 %v627_v7, %v565_v8 }
  0xf3   :  { %v791_v10 = vmax.f32 %v751_v9, 0.0 }
  0xf5   :  { %v812_v12 = vpack.c.bf16 %v791_v10, %v791_v10 }
  0xf6   :  { %v690_v13 = vpop.f32.mrf.mxu2  ;;  %v566_v16 = vpop.f32.mrf.mxu0 }
  0xf7   :  { %v753_v14 = vpop.f32.mrf.mxu3  ;;  %834 = vst.msk [vmem:[%s1686_s3 + $0x24] sm:$0xf] %vm824_vm0, %v812_v12  ;;  %v691_v15 = vadd.f32 %v690_v13, %v628_v11  ;;  %v629_v17 = vpop.f32.mrf.mxu1  ;;  %v567_v19 = vadd.f32 %v1523_v0, %v566_v16 }
  0xf9   :  { %v754_v18 = vadd.f32 %v753_v14, %v691_v15  ;;  %v630_v22 = vadd.f32 %v629_v17, %v567_v19 }
  0xfb   :  { %v792_v20 = vmax.f32 %v754_v18, 0.0 }
  0xfd   :  { %v813_v21 = vpack.c.bf16 %v792_v20, %v792_v20 }
  0xfe   :  { %v692_v23 = vpop.f32.mrf.mxu2  ;;  %v569_v26 = vpop.f32.mrf.mxu0 }
  0xff   :  { %v755_v24 = vpop.f32.mrf.mxu3  ;;  %835 = vst.msk [vmem:[%s1686_s3 + $0x28] sm:$0xf] %vm824_vm0, %v813_v21  ;;  %v693_v25 = vadd.f32 %v692_v23, %v630_v22  ;;  %v632_v27 = vpop.f32.mrf.mxu1  ;;  %v570_v28 = vadd.f32 %v1523_v0, %v569_v26 }
 0x101   :  { %v756_v29 = vadd.f32 %v755_v24, %v693_v25  ;;  %v633_v31 = vadd.f32 %v632_v27, %v570_v28 }
 0x103   :  { %v793_v30 = vmax.f32 %v756_v29, 0.0 }
 0x105   :  { %v814_v32 = vpack.c.bf16 %v793_v30, %v793_v30 }
 0x106   :  { %v695_v33 = vpop.f32.mrf.mxu2  ;;  %v571_v36 = vpop.f32.mrf.mxu0 }
 0x107   :  { %v758_v34 = vpop.f32.mrf.mxu3  ;;  %836 = vst.msk [vmem:[%s1686_s3 + $0x2c] sm:$0xf] %vm824_vm0, %v814_v32  ;;  %v696_v35 = vadd.f32 %v695_v33, %v633_v31  ;;  %v634_v37 = vpop.f32.mrf.mxu1  ;;  %v572_v39 = vadd.f32 %v1523_v0, %v571_v36 }
 0x109   :  { %v759_v38 = vadd.f32 %v758_v34, %v696_v35  ;;  %v635_v42 = vadd.f32 %v634_v37, %v572_v39 }
 0x10b   :  { %v794_v40 = vmax.f32 %v759_v38, 0.0 }
 0x10d   :  { %v815_v41 = vpack.c.bf16 %v794_v40, %v794_v40 }
 0x10e   :  { %v697_v43 = vpop.f32.mrf.mxu2  ;;  %v574_v46 = vpop.f32.mrf.mxu0 }
 0x10f   :  { %v760_v44 = vpop.f32.mrf.mxu3  ;;  %837 = vst.msk [vmem:[%s1686_s3 + $0x30] sm:$0xf] %vm824_vm0, %v815_v41  ;;  %v698_v45 = vadd.f32 %v697_v43, %v635_v42  ;;  %v637_v47 = vpop.f32.mrf.mxu1  ;;  %v575_v48 = vadd.f32 %v1523_v0, %v574_v46 }
 0x111   :  { %v761_v49 = vadd.f32 %v760_v44, %v698_v45  ;;  %v638_v51 = vadd.f32 %v637_v47, %v575_v48 }
 0x113   :  { %v795_v50 = vmax.f32 %v761_v49, 0.0 }
 0x115   :  { %v816_v52 = vpack.c.bf16 %v795_v50, %v795_v50 }
 0x116   :  { %v700_v53 = vpop.f32.mrf.mxu2  ;;  %v576_v56 = vpop.f32.mrf.mxu0 }
 0x117   :  { %v763_v54 = vpop.f32.mrf.mxu3  ;;  %838 = vst.msk [vmem:[%s1686_s3 + $0x34] sm:$0xf] %vm824_vm0, %v816_v52  ;;  %v701_v55 = vadd.f32 %v700_v53, %v638_v51  ;;  %v639_v57 = vpop.f32.mrf.mxu1  ;;  %v577_v59 = vadd.f32 %v1523_v0, %v576_v56 }
 0x119   :  { %v764_v58 = vadd.f32 %v763_v54, %v701_v55  ;;  %v640_v62 = vadd.f32 %v639_v57, %v577_v59 }
 0x11b   :  { %v796_v60 = vmax.f32 %v764_v58, 0.0 }
 0x11d   :  { %v817_v61 = vpack.c.bf16 %v796_v60, %v796_v60 }
 0x11e   :  { %v702_v63 = vpop.f32.mrf.mxu2  ;;  %v579_v3 = vpop.f32.mrf.mxu0 }
 0x11f   :  { %v765_v1 = vpop.f32.mrf.mxu3  ;;  %839 = vst.msk [vmem:[%s1686_s3 + $0x38] sm:$0xf] %vm824_vm0, %v817_v61  ;;  %v703_v2 = vadd.f32 %v702_v63, %v640_v62  ;;  %v642_v4 = vpop.f32.mrf.mxu1  ;;  %v580_v5 = vadd.f32 %v1523_v0, %v579_v3 }
 0x121   :  { %v766_v6 = vadd.f32 %v765_v1, %v703_v2  ;;  %v643_v8 = vadd.f32 %v642_v4, %v580_v5 }
 0x123   :  { %v797_v7 = vmax.f32 %v766_v6, 0.0 }
 0x125   :  { %v818_v9 = vpack.c.bf16 %v797_v7, %v797_v7 }
 0x126   :  { %v705_v10 = vpop.f32.mrf.mxu2  ;;  %v581_v13 = vpop.f32.mrf.mxu0 }
 0x127   :  { %v768_v11 = vpop.f32.mrf.mxu3  ;;  %840 = vst.msk [vmem:[%s1686_s3 + $0x3c] sm:$0xf] %vm824_vm0, %v818_v9  ;;  %v706_v12 = vadd.f32 %v705_v10, %v643_v8  ;;  %v644_v14 = vpop.f32.mrf.mxu1  ;;  %v582_v16 = vadd.f32 %v1523_v0, %v581_v13 }
 0x129   :  { %v769_v15 = vadd.f32 %v768_v11, %v706_v12  ;;  %v645_v19 = vadd.f32 %v644_v14, %v582_v16 }
 0x12b   :  { %v798_v17 = vmax.f32 %v769_v15, 0.0 }
 0x12d   :  { %v819_v18 = vpack.c.bf16 %v798_v17, %v798_v17 }
 0x12e   :  { %v707_v20 = vpop.f32.mrf.mxu2  ;;  %v584_v23 = vpop.f32.mrf.mxu0 }
 0x12f   :  { %v770_v21 = vpop.f32.mrf.mxu3  ;;  %841 = vst.msk [vmem:[%s1686_s3 + $0x40] sm:$0xf] %vm824_vm0, %v819_v18  ;;  %v708_v22 = vadd.f32 %v707_v20, %v645_v19  ;;  %v647_v24 = vpop.f32.mrf.mxu1  ;;  %v585_v25 = vadd.f32 %v1523_v0, %v584_v23 }
 0x131   :  { %v771_v26 = vadd.f32 %v770_v21, %v708_v22  ;;  %v648_v28 = vadd.f32 %v647_v24, %v585_v25 }
 0x133   :  { %v799_v27 = vmax.f32 %v771_v26, 0.0 }
 0x135   :  { %v820_v29 = vpack.c.bf16 %v799_v27, %v799_v27 }
 0x136   :  { %v710_v30 = vpop.f32.mrf.mxu2  ;;  %v586_v33 = vpop.f32.mrf.mxu0 }
 0x137   :  { %v773_v31 = vpop.f32.mrf.mxu3  ;;  %842 = vst.msk [vmem:[%s1686_s3 + $0x44] sm:$0xf] %vm824_vm0, %v820_v29  ;;  %v711_v32 = vadd.f32 %v710_v30, %v648_v28  ;;  %v649_v34 = vpop.f32.mrf.mxu1  ;;  %v587_v36 = vadd.f32 %v1523_v0, %v586_v33 }
 0x139   :  { %v774_v35 = vadd.f32 %v773_v31, %v711_v32  ;;  %v650_v39 = vadd.f32 %v649_v34, %v587_v36 }
 0x13b   :  { %v800_v37 = vmax.f32 %v774_v35, 0.0 }
 0x13d   :  { %v821_v38 = vpack.c.bf16 %v800_v37, %v800_v37 }
 0x13e   :  { %v712_v40 = vpop.f32.mrf.mxu2  ;;  %v589_v43 = vpop.f32.mrf.mxu0 }
 0x13f   :  { %v775_v41 = vpop.f32.mrf.mxu3  ;;  %843 = vst.msk [vmem:[%s1686_s3 + $0x48] sm:$0xf] %vm824_vm0, %v821_v38  ;;  %v713_v42 = vadd.f32 %v712_v40, %v650_v39  ;;  %v652_v44 = vpop.f32.mrf.mxu1  ;;  %v590_v45 = vadd.f32 %v1523_v0, %v589_v43 }
 0x141   :  { %v776_v46 = vadd.f32 %v775_v41, %v713_v42  ;;  %v653_v48 = vadd.f32 %v652_v44, %v590_v45 }
 0x143   :  { %v801_v47 = vmax.f32 %v776_v46, 0.0 }
 0x145   :  { %v822_v49 = vpack.c.bf16 %v801_v47, %v801_v47 }
 0x146   :  { %v715_v50 = vpop.f32.mrf.mxu2  ;;  %v591_v53 = vpop.f32.mrf.mxu0 }
 0x147   :  { %v778_v51 = vpop.f32.mrf.mxu3  ;;  %844 = vst.msk [vmem:[%s1686_s3 + $0x4c] sm:$0xf] %vm824_vm0, %v822_v49  ;;  %v716_v52 = vadd.f32 %v715_v50, %v653_v48  ;;  %v654_v54 = vpop.f32.mrf.mxu1 }
 0x149   :  { %v779_v55 = vadd.f32 %v778_v51, %v716_v52 }
 0x14b   :  { %v802_v56 = vmax.f32 %v779_v55, 0.0 }
 0x14d   :  { %v823_v57 = vpack.c.bf16 %v802_v56, %v802_v56 }
 0x14e   :  { %v717_v58 = vpop.f32.mrf.mxu2 }
 0x14f   :  { %v780_v0 = vpop.f32.mrf.mxu3  ;;  %846 = vst.msk [vmem:[%s1686_s3 + $0x50] sm:$0x1] %vm845_vm1, %v823_v57 }

// kernel: dqn_forward.6
= control target key start
LH: loop header
LB: loop body
LE: loop exit
PB: predicated region body
PF: predicated region fallthrough
CT: control target
= control target key end

     0   :  { %vm513_vm0 = vcmask 523264   ;;  %vm776_vm1 = vcmask 519168   ;;  %vm789_vm2 = vcmask 516096   ;;  %s1581_s1 = inlined_call_operand.vmem [shape: bf16[576,64], index: 1, kind: input, shape index: {}]   ;;  %s1582_s2 = inlined_call_operand.vmem [shape: f32[1,64], index: 2, kind: input, shape index: {}]   ;;  %s1583_s0 = inlined_call_operand.vmem [shape: bf16[98,576], index: 0, kind: input, shape index: {}]   ;;  %s1584_s3 = inlined_call_operand.vmem [shape: bf16[98,64], index: 3, kind: output, shape index: {}]  }
   0x1   :  { %v1103_v0 = vld [vmem:[%s1581_s1 + $0x38] sm:$0xff]  ;;  %v1102_v1 = vld [vmem:[%s1581_s1 + $0x30] sm:$0xff]  ;;  %v1101_v2 = vld [vmem:[%s1581_s1 + $0x28] sm:$0xff] }
   0x2   :  { %1132 = vmatpush.bf16.msra.mxu1 %v1103_v0  ;;  %1133 = vmatpush.bf16.msra.mxu2 %v1103_v0  ;;  %v1100_v3 = vld [vmem:[%s1581_s1 + $0x20] sm:$0xff]  ;;  %v1099_v4 = vld [vmem:[%s1581_s1 + $0x18] sm:$0xff]  ;;  %v1098_v5 = vld [vmem:[%s1581_s1 + $0x10] sm:$0xff] }
   0x3   :  { %1134 = vmatpush.bf16.msra.mxu3 %v1103_v0  ;;  %535 = vmatpush.bf16.msra.mxu0 %v1103_v0  ;;  %v1097_v6 = vld [vmem:[%s1581_s1 + $0x8] sm:$0xff]  ;;  %v1201_v7 = vld [vmem:[%s1583_s0 + $0xf0] sm:$0x11]  ;;  %v1096_v8 = vld [vmem:[%s1581_s1] sm:$0xff] }
   0x4   :  { %v837_v9 = vld [vmem:[%s1583_s0 + $0x50] sm:$0xf]  ;;  %v1078_v10 = vld [vmem:[%s1583_s0 + $0x60] sm:$0xf0]  ;;  %v877_v11 = vld [vmem:[%s1583_s0 + $0xa0] sm:$0xf]  ;;  %v229_v15 = vunpack.c.l.b16 %v1201_v7 }
   0x5   :  { %v1088_v12 = vld [vmem:[%s1583_s0 + $0xb0] sm:$0xf0]  ;;  %v797_v13 = vld [vmem:[%s1583_s0] sm:$0xf]  ;;  %v1127_v16 = vld [vmem:[%s1581_s1 + $0xf8] sm:$0xff]  ;;  %v838_v18 = vor.u32 %v1078_v10, %v837_v9 }
   0x6   :  { %1135 = vmatpush.bf16.msra.mxu1 %v1102_v1  ;;  %1136 = vmatpush.bf16.msra.mxu2 %v1102_v1  ;;  %v1068_v14 = vld [vmem:[%s1583_s0 + $0x10] sm:$0xf0]  ;;  %v1119_v17 = vld [vmem:[%s1581_s1 + $0xb8] sm:$0xff]  ;;  %v878_v19 = vor.u32 %v1088_v12, %v877_v11  ;;  %v264_v23 = vpack.c.b16 %v229_v15, %v229_v15  ;;  %v1125_v28 = vld [vmem:[%s1581_s1 + $0xe8] sm:$0xff] }
   0x7   :  { %1137 = vmatpush.bf16.msra.mxu3 %v1102_v1  ;;  %536 = vmatpush.bf16.msra.mxu0 %v1102_v1  ;;  %v798_v20 = vor.u32 %v1068_v14, %v797_v13  ;;  %v1111_v21 = vld [vmem:[%s1581_s1 + $0x78] sm:$0xff]  ;;  %v1126_v24 = vld [vmem:[%s1581_s1 + $0xf0] sm:$0xff]  ;;  %v1117_v29 = vld [vmem:[%s1581_s1 + $0xa8] sm:$0xff] }
   0x8   :  { %v1131_v22 = vld [vmem:[%s1581_s1 + $0x118] sm:$0xff]  ;;  %v1118_v25 = vld [vmem:[%s1581_s1 + $0xb0] sm:$0xff]  ;;  %v1109_v30 = vld [vmem:[%s1581_s1 + $0x68] sm:$0xff] }
   0x9   :  { %v1110_v26 = vld [vmem:[%s1581_s1 + $0x70] sm:$0xff]  ;;  %v1129_v31 = vld [vmem:[%s1581_s1 + $0x108] sm:$0xff]  ;;  %v1124_v32 = vld [vmem:[%s1581_s1 + $0xe0] sm:$0xff] }
   0xa   :  { %1138 = vmatpush.bf16.msra.mxu1 %v1101_v2  ;;  %1139 = vmatpush.bf16.msra.mxu2 %v1101_v2  ;;  %v1130_v27 = vld [vmem:[%s1581_s1 + $0x110] sm:$0xff]  ;;  %v1116_v33 = vld [vmem:[%s1581_s1 + $0xa0] sm:$0xff]  ;;  %v857_v35 = vld [vmem:[%s1583_s0 + $0x78] sm:$0xf] }
   0xb   :  { %1140 = vmatpush.bf16.msra.mxu3 %v1101_v2  ;;  %537 = vmatpush.bf16.msra.mxu0 %v1101_v2  ;;  %v1108_v34 = vld [vmem:[%s1581_s1 + $0x60] sm:$0xff]  ;;  %v1083_v36 = vld [vmem:[%s1583_s0 + $0x88] sm:$0xf0]  ;;  %v897_v37 = vld [vmem:[%s1583_s0 + $0xc8] sm:$0xf] }
   0xc   :  { %v1093_v38 = vld [vmem:[%s1583_s0 + $0xd8] sm:$0xf0]  ;;  %v817_v39 = vld [vmem:[%s1583_s0 + $0x28] sm:$0xf]  ;;  %v1128_v41 = vld [vmem:[%s1581_s1 + $0x100] sm:$0xff]  ;;  %v858_v44 = vor.u32 %v1083_v36, %v857_v35 }
   0xd   :  { %v1073_v40 = vld [vmem:[%s1583_s0 + $0x38] sm:$0xf0]  ;;  %v898_v45 = vor.u32 %v1093_v38, %v897_v37  ;;  %v1122_v48 = vld [vmem:[%s1581_s1 + $0xd0] sm:$0xff]  ;;  %v1121_v51 = vld [vmem:[%s1581_s1 + $0xc8] sm:$0xff] }
   0xe   :  { %1141 = vmatpush.bf16.msra.mxu1 %v1100_v3  ;;  %1142 = vmatpush.bf16.msra.mxu2 %v1100_v3  ;;  %v1123_v42 = vld [vmem:[%s1581_s1 + $0xd8] sm:$0xff]  ;;  %v818_v46 = vor.u32 %v1073_v40, %v817_v39  ;;  %v1114_v49 = vld [vmem:[%s1581_s1 + $0x90] sm:$0xff]  ;;  %v1113_v52 = vld [vmem:[%s1581_s1 + $0x88] sm:$0xff] }
   0xf   :  { %1143 = vmatpush.bf16.msra.mxu3 %v1100_v3  ;;  %538 = vmatpush.bf16.msra.mxu0 %v1100_v3  ;;  %v1115_v43 = vld [vmem:[%s1581_s1 + $0x98] sm:$0xff]  ;;  %v1106_v50 = vld [vmem:[%s1581_s1 + $0x50] sm:$0xff]  ;;  %v1105_v53 = vld [vmem:[%s1581_s1 + $0x48] sm:$0xff] }
  0x10   :  { %v1107_v47 = vld [vmem:[%s1581_s1 + $0x58] sm:$0xff]  ;;  %v1120_v54 = vld [vmem:[%s1581_s1 + $0xc0] sm:$0xff]  ;;  %v1067_v56 = vld [vmem:[%s1583_s0 + $0xc] sm:$0xf] }
  0x11   :  { %v1112_v55 = vld [vmem:[%s1581_s1 + $0x80] sm:$0xff]  ;;  %v799_v60 = vld [vmem:[%s1583_s0 + $0x14] sm:$0xf0]  ;;  %v805_v61 = vld [vmem:[%s1583_s0 + $0x8] sm:$0xf] }
  0x12   :  { %1144 = vmatpush.bf16.msra.mxu1 %v1099_v4  ;;  %1145 = vmatpush.bf16.msra.mxu2 %v1099_v4  ;;  %v807_v57 = vld [vmem:[%s1583_s0 + $0x1c] sm:$0xf0]  ;;  %v1066_v59 = vld [vmem:[%s1583_s0 + $0x4] sm:$0xf]  ;;  %v1069_v62 = vld [vmem:[%s1583_s0 + $0x18] sm:$0xf0] }
  0x13   :  { %1146 = vmatpush.bf16.msra.mxu3 %v1099_v4  ;;  %539 = vmatpush.bf16.msra.mxu0 %v1099_v4  ;;  %v1104_v58 = vld [vmem:[%s1581_s1 + $0x40] sm:$0xff]  ;;  %v810_v63 = vor.u32 %v1067_v56, %v807_v57  ;;  %v813_v0 = vld [vmem:[%s1583_s0 + $0x10] sm:$0xf]  ;;  %v802_v2 = vor.u32 %v1066_v59, %v799_v60  ;;  %v806_v3 = vor.u32 %v1069_v62, %v805_v61  ;;  %v833_v13 = vld [vmem:[%s1583_s0 + $0x38] sm:$0xf] }
  0x14   :  { %v1070_v1 = vld [vmem:[%s1583_s0 + $0x20] sm:$0xf0]  ;;  %v819_v9 = vld [vmem:[%s1583_s0 + $0x3c] sm:$0xf0]  ;;  %v825_v10 = vld [vmem:[%s1583_s0 + $0x30] sm:$0xf] }
  0x15   :  { %v814_v4 = vor.u32 %v1070_v1, %v813_v0  ;;  %v1074_v11 = vld [vmem:[%s1583_s0 + $0x40] sm:$0xf0]  ;;  %v1075_v14 = vld [vmem:[%s1583_s0 + $0x48] sm:$0xf0]  ;;  %v1084_v35 = vld [vmem:[%s1583_s0 + $0x90] sm:$0xf0] }
  0x16   :  { %1147 = vmatpush.bf16.msra.mxu1 %v1098_v5  ;;  %1148 = vmatpush.bf16.msra.mxu2 %v1098_v5  ;;  %v873_v37 = vld [vmem:[%s1583_s0 + $0x88] sm:$0xf]  ;;  %v1085_v38 = vld [vmem:[%s1583_s0 + $0x98] sm:$0xf0]  ;;  %v1091_v56 = vld [vmem:[%s1583_s0 + $0xcc] sm:$0xf] }
  0x17   :  { %1149 = vmatpush.bf16.msra.mxu3 %v1098_v5  ;;  %540 = vmatpush.bf16.msra.mxu0 %v1098_v5  ;;  %v1072_v5 = vld [vmem:[%s1583_s0 + $0x34] sm:$0xf]  ;;  %v899_v57 = vld [vmem:[%s1583_s0 + $0xdc] sm:$0xf0]  ;;  %v1094_v59 = vld [vmem:[%s1583_s0 + $0xe0] sm:$0xf0] }
  0x18   :  { %v913_v61 = vld [vmem:[%s1583_s0 + $0xd8] sm:$0xf]  ;;  %v1095_v62 = vld [vmem:[%s1583_s0 + $0xe8] sm:$0xf0] }
  0x19   :  { %v914_v1 = vor.u32 %v1095_v62, %v913_v61 }
  0x1a   :  { %1150 = vmatpush.bf16.msra.mxu1 %v1097_v6  ;;  %1151 = vmatpush.bf16.msra.mxu2 %v1097_v6 }
  0x1b   :  { %1152 = vmatpush.bf16.msra.mxu3 %v1097_v6  ;;  %541 = vmatpush.bf16.msra.mxu0 %v1097_v6  ;;  %v827_v6 = vld [vmem:[%s1583_s0 + $0x44] sm:$0xf0] }
  0x1c   :  { %v830_v12 = vor.u32 %v1072_v5, %v827_v6  ;;  %v230_v5 = vunpack.c.h.b16 %v1201_v7 }
  0x1e   :  { %1153 = vmatpush.bf16.msra.mxu1 %v1096_v8  ;;  %1154 = vmatpush.bf16.msra.mxu2 %v1096_v8 }
  0x1f   :  { %1155 = vmatpush.bf16.msra.mxu3 %v1096_v8  ;;  %542 = vmatpush.bf16.msra.mxu0 %v1096_v8  ;;  %v1071_v8 = vld [vmem:[%s1583_s0 + $0x2c] sm:$0xf] }
  0x20   :  { %v822_v15 = vor.u32 %v1071_v8, %v819_v9 }
  0x21   :  { %553 = vmatmul.bf16.vlgmr.msra.gmra.mxu1 %v838_v18  ;;  %563 = vmatmul.bf16.vlgmr.msra.gmra.mxu2 %v878_v19  ;;  %v1077_v18 = vld [vmem:[%s1583_s0 + $0x5c] sm:$0xf]  ;;  %v847_v19 = vld [vmem:[%s1583_s0 + $0x6c] sm:$0xf0] }
  0x22   :  { %621 = vmatpush.bf16.msrb.mxu2 %v1119_v17  ;;  %543 = vmatmul.bf16.vlgmr.msra.gmra.mxu0 %v798_v20  ;;  %v834_v17 = vor.u32 %v1075_v14, %v833_v13  ;;  %v1076_v20 = vld [vmem:[%s1583_s0 + $0x54] sm:$0xf] }
  0x23   :  { %664 = vmatpush.bf16.msrb.mxu3 %v1127_v16  ;;  %578 = vmatpush.bf16.msrb.mxu1 %v1111_v21  ;;  %v826_v16 = vor.u32 %v1074_v11, %v825_v10  ;;  %v839_v21 = vld [vmem:[%s1583_s0 + $0x64] sm:$0xf0]  ;;  %v265_v10 = vpack.c.b16 %v230_v5, %v230_v5 }
  0x24   :  { %711 = vmatpush.bf16.msrb.mxu0 %v1131_v22  ;;  %573 = vmatmul.bf16.vlgmr.msra.gmra.mxu3 %v264_v23  ;;  %v845_v22 = vld [vmem:[%s1583_s0 + $0x58] sm:$0xf]  ;;  %v1079_v23 = vld [vmem:[%s1583_s0 + $0x68] sm:$0xf0] }
  0x26   :  { %622 = vmatpush.bf16.msrb.mxu2 %v1118_v25  ;;  %v853_v25 = vld [vmem:[%s1583_s0 + $0x60] sm:$0xf] }
  0x27   :  { %665 = vmatpush.bf16.msrb.mxu3 %v1126_v24  ;;  %579 = vmatpush.bf16.msrb.mxu1 %v1110_v26  ;;  %v850_v24 = vor.u32 %v1077_v18, %v847_v19  ;;  %v1080_v26 = vld [vmem:[%s1583_s0 + $0x70] sm:$0xf0] }
  0x28   :  { %712 = vmatpush.bf16.msrb.mxu0 %v1130_v27  ;;  %v842_v27 = vor.u32 %v1076_v20, %v839_v21 }
  0x2a   :  { %623 = vmatpush.bf16.msrb.mxu2 %v1117_v29  ;;  %v854_v29 = vor.u32 %v1080_v26, %v853_v25 }
  0x2b   :  { %666 = vmatpush.bf16.msrb.mxu3 %v1125_v28  ;;  %580 = vmatpush.bf16.msrb.mxu1 %v1109_v30  ;;  %v846_v28 = vor.u32 %v1079_v23, %v845_v22  ;;  %v1082_v30 = vld [vmem:[%s1583_s0 + $0x84] sm:$0xf] }
  0x2c   :  { %713 = vmatpush.bf16.msrb.mxu0 %v1129_v31  ;;  %v867_v31 = vld [vmem:[%s1583_s0 + $0x94] sm:$0xf0] }
  0x2d   :  { %v870_v36 = vor.u32 %v1082_v30, %v867_v31 }
  0x2e   :  { %624 = vmatpush.bf16.msrb.mxu2 %v1116_v33  ;;  %v859_v33 = vld [vmem:[%s1583_s0 + $0x8c] sm:$0xf0] }
  0x2f   :  { %667 = vmatpush.bf16.msrb.mxu3 %v1124_v32  ;;  %581 = vmatpush.bf16.msrb.mxu1 %v1108_v34  ;;  %v1081_v32 = vld [vmem:[%s1583_s0 + $0x7c] sm:$0xf]  ;;  %v865_v34 = vld [vmem:[%s1583_s0 + $0x80] sm:$0xf] }
  0x30   :  { %714 = vmatpush.bf16.msrb.mxu0 %v1128_v41  ;;  %v862_v39 = vor.u32 %v1081_v32, %v859_v33  ;;  %v866_v40 = vor.u32 %v1084_v35, %v865_v34  ;;  %v874_v41 = vor.u32 %v1085_v38, %v873_v37 }
  0x31   :  { %558 = vmatmul.bf16.gmra.mxu1 %v858_v44  ;;  %568 = vmatmul.bf16.gmra.mxu2 %v898_v45  ;;  %v1086_v44 = vld [vmem:[%s1583_s0 + $0xa4] sm:$0xf]  ;;  %v879_v45 = vld [vmem:[%s1583_s0 + $0xb4] sm:$0xf0] }
  0x32   :  { %625 = vmatpush.bf16.msrb.mxu2 %v1115_v43  ;;  %548 = vmatmul.bf16.gmra.mxu0 %v818_v46  ;;  %v887_v43 = vld [vmem:[%s1583_s0 + $0xbc] sm:$0xf0]  ;;  %v885_v46 = vld [vmem:[%s1583_s0 + $0xa8] sm:$0xf] }
  0x33   :  { %668 = vmatpush.bf16.msrb.mxu3 %v1123_v42  ;;  %582 = vmatpush.bf16.msrb.mxu1 %v1107_v47  ;;  %v1087_v42 = vld [vmem:[%s1583_s0 + $0xac] sm:$0xf]  ;;  %v1089_v47 = vld [vmem:[%s1583_s0 + $0xb8] sm:$0xf0] }
  0x36   :  { %626 = vmatpush.bf16.msrb.mxu2 %v1114_v49  ;;  %v893_v49 = vld [vmem:[%s1583_s0 + $0xb0] sm:$0xf] }
  0x37   :  { %669 = vmatpush.bf16.msrb.mxu3 %v1122_v48  ;;  %583 = vmatpush.bf16.msrb.mxu1 %v1106_v50  ;;  %v890_v48 = vor.u32 %v1087_v42, %v887_v43  ;;  %v1090_v50 = vld [vmem:[%s1583_s0 + $0xc0] sm:$0xf0] }
  0x3a   :  { %627 = vmatpush.bf16.msrb.mxu2 %v1113_v52  ;;  %v886_v52 = vor.u32 %v1089_v47, %v885_v46 }
  0x3b   :  { %670 = vmatpush.bf16.msrb.mxu3 %v1121_v51  ;;  %584 = vmatpush.bf16.msrb.mxu1 %v1105_v53  ;;  %v882_v51 = vor.u32 %v1086_v44, %v879_v45  ;;  %v894_v53 = vor.u32 %v1090_v50, %v893_v49 }
  0x3e   :  { %628 = vmatpush.bf16.msrb.mxu2 %v1112_v55  ;;  %v907_v55 = vld [vmem:[%s1583_s0 + $0xe4] sm:$0xf0] }
  0x3f   :  { %671 = vmatpush.bf16.msrb.mxu3 %v1120_v54  ;;  %585 = vmatpush.bf16.msrb.mxu1 %v1104_v58  ;;  %v1092_v54 = vld [vmem:[%s1583_s0 + $0xd4] sm:$0xf]  ;;  %v905_v58 = vld [vmem:[%s1583_s0 + $0xd0] sm:$0xf] }
  0x40   :  { %v910_v60 = vor.u32 %v1092_v54, %v907_v55  ;;  %v906_v0 = vor.u32 %v1094_v59, %v905_v58 }
  0x41   :  { %629 = vmatmul.bf16.vlgmr.msrb.gmra.mxu2 %v806_v3 }
  0x42   :  { %672 = vmatmul.bf16.vlgmr.msrb.gmra.mxu3 %v810_v63  ;;  %586 = vmatmul.bf16.vlgmr.msrb.gmra.mxu1 %v802_v2  ;;  %v902_v63 = vor.u32 %v1091_v56, %v899_v57  ;;  %v52_v2 = vld [vmem:[%s1583_s0 + $0xf8] sm:$0x11] }
  0x43   :  { %1059 = vmatmul.msk.bf16.vlgmr.msrb.gmra.mxu0 %vm513_vm0, %v814_v4  ;;  %v232_v3 = vunpack.c.h.b16 %v52_v2  ;;  %v53_v4 = vld [vmem:[%s1583_s0 + $0x100] sm:$0x1]  ;;  %v231_v6 = vunpack.c.l.b16 %v52_v2 }
  0x44   :  { %v233_v8 = vunpack.c.l.b16 %v53_v4 }
  0x45   :  { %v267_v9 = vpack.c.b16 %v232_v3, %v232_v3  ;;  %v266_v11 = vpack.c.b16 %v231_v6, %v231_v6 }
  0x46   :  { %v268_v13 = vpack.c.b16 %v233_v8, %v233_v8 }
  0x51   :  { %634 = vmatmul.bf16.gmra.mxu2 %v826_v16 }
  0x52   :  { %677 = vmatmul.bf16.gmra.mxu3 %v830_v12  ;;  %591 = vmatmul.bf16.gmra.mxu1 %v822_v15  ;;  %v1490_v15 = vld [vmem:[%s1582_s2] ss:$0 sm:$0xff] }
  0x53   :  { %1060 = vmatmul.msk.bf16.gmra.mxu0 %vm513_vm0, %v834_v17 }
  0x61   :  { %639 = vmatmul.bf16.gmra.mxu2 %v846_v28 }
  0x62   :  { %682 = vmatmul.bf16.gmra.mxu3 %v850_v24  ;;  %596 = vmatmul.bf16.gmra.mxu1 %v842_v27 }
  0x63   :  { %1061 = vmatmul.msk.bf16.gmra.mxu0 %vm513_vm0, %v854_v29 }
  0x71   :  { %644 = vmatmul.bf16.gmra.mxu2 %v866_v40 }
  0x72   :  { %687 = vmatmul.bf16.gmra.mxu3 %v870_v36  ;;  %601 = vmatmul.bf16.gmra.mxu1 %v862_v39 }
  0x73   :  { %1062 = vmatmul.msk.bf16.gmra.mxu0 %vm513_vm0, %v874_v41 }
  0x81   :  { %649 = vmatmul.bf16.gmra.mxu2 %v886_v52 }
  0x82   :  { %692 = vmatmul.bf16.gmra.mxu3 %v890_v48  ;;  %606 = vmatmul.bf16.gmra.mxu1 %v882_v51 }
  0x83   :  { %1063 = vmatmul.msk.bf16.gmra.mxu0 %vm513_vm0, %v894_v53 }
  0x91   :  { %654 = vmatmul.bf16.gmra.mxu2 %v906_v0 }
  0x92   :  { %697 = vmatmul.bf16.gmra.mxu3 %v910_v60  ;;  %611 = vmatmul.bf16.gmra.mxu1 %v902_v63 }
  0x93   :  { %1064 = vmatmul.msk.bf16.gmra.mxu0 %vm513_vm0, %v914_v1 }
  0x9e   :  { %v1484_v12 = vpop.f32.mrf.mxu1 }
  0x9f   :  { %v544_v14 = vpop.f32.mrf.mxu0 }
  0xa0   :  { %v545_v34 = vadd.f32 %v1490_v15, %v544_v14 }
  0xa1   :  { %659 = vmatmul.bf16.gmra.mxu2 %v266_v11 }
  0xa2   :  { %702 = vmatmul.bf16.gmra.mxu3 %v267_v9  ;;  %616 = vmatmul.bf16.gmra.mxu1 %v265_v10 }
  0xa3   :  { %1065 = vmatmul.msk.bf16.gmra.mxu0 %vm513_vm0, %v268_v13  ;;  %v555_v13 = vadd.f32 %v1490_v15, %v1484_v12 }
  0xa4   :  { %v564_v7 = vpop.f32.mrf.mxu2 }
  0xa5   :  { %v1493_v16 = vadd.f32 %v1490_v15, %v564_v7 }
  0xa6   :  { %v1495_v17 = vpop.f32.mrf.mxu1 }
  0xa7   :  { %v574_v18 = vpop.f32.mrf.mxu3  ;;  %v546_v19 = vpop.f32.mrf.mxu0 }
  0xa8   :  { %v1498_v20 = vadd.f32 %v1490_v15, %v574_v18  ;;  %v547_v42 = vadd.f32 %v1490_v15, %v546_v19 }
  0xac   :  { %v566_v21 = vpop.f32.mrf.mxu2 }
  0xad   :  { %v1501_v22 = vadd.f32 %v1490_v15, %v566_v21 }
  0xae   :  { %v1503_v23 = vpop.f32.mrf.mxu1 }
  0xaf   :  { %v576_v24 = vpop.f32.mrf.mxu3  ;;  %v549_v25 = vpop.f32.mrf.mxu0 }
  0xb0   :  { %v550_v53 = vadd.f32 %v1490_v15, %v549_v25 }
  0xb4   :  { %v569_v26 = vpop.f32.mrf.mxu2 }
  0xb5   :  { %v1506_v27 = vadd.f32 %v1490_v15, %v569_v26 }
  0xb6   :  { %v1508_v28 = vpop.f32.mrf.mxu1 }
  0xb7   :  { %v551_v29 = vpop.f32.mrf.mxu0 }
  0xb8   :  { %v552_v0 = vadd.f32 %v1490_v15, %v551_v29 }
  0xbc   :  { %v571_v30 = vpop.f32.mrf.mxu2 }
  0xbd   :  { %v1511_v31 = vadd.f32 %v1490_v15, %v571_v30 }
  0xbf   :  { %v587_v32 = vpop.f32.mrf.mxu1 }
  0xc0   :  { %v716_v33 = vpop.f32.mrf.mxu0  ;;  %v588_v36 = vadd.f32 %v587_v32, %v545_v34  ;;  %v557_v32 = vadd.f32 %v1490_v15, %v1495_v17 }
  0xc4   :  { %v630_v37 = vpop.f32.mrf.mxu2 }
  0xc5   :  { %v673_v35 = vpop.f32.mrf.mxu3  ;;  %v631_v38 = vadd.f32 %v630_v37, %v588_v36 }
  0xc7   :  { %v589_v39 = vpop.f32.mrf.mxu1  ;;  %v674_v40 = vadd.f32 %v673_v35, %v631_v38 }
  0xc8   :  { %v718_v41 = vpop.f32.mrf.mxu0  ;;  %v590_v46 = vadd.f32 %v589_v39, %v547_v42  ;;  %v560_v42 = vadd.f32 %v1490_v15, %v1503_v23 }
  0xc9   :  { %v717_v43 = vadd.f32 %v716_v33, %v674_v40 }
  0xcb   :  { %v750_v45 = vmax.f32 %v717_v43, 0.0 }
  0xcc   :  { %v632_v47 = vpop.f32.mrf.mxu2 }
  0xcd   :  { %v675_v44 = vpop.f32.mrf.mxu3  ;;  %v763_v48 = vpack.c.bf16 %v750_v45, %v750_v45  ;;  %v633_v49 = vadd.f32 %v632_v47, %v590_v46 }
  0xcf   :  { %v592_v50 = vpop.f32.mrf.mxu1  ;;  %777 = vst.msk [vmem:[%s1584_s3] sm:$0xf] %vm776_vm1, %v763_v48  ;;  %v676_v51 = vadd.f32 %v675_v44, %v633_v49 }
  0xd0   :  { %v721_v52 = vpop.f32.mrf.mxu0  ;;  %v593_v57 = vadd.f32 %v592_v50, %v550_v53 }
  0xd1   :  { %v719_v54 = vadd.f32 %v718_v41, %v676_v51 }
  0xd3   :  { %v751_v56 = vmax.f32 %v719_v54, 0.0 }
  0xd4   :  { %v635_v58 = vpop.f32.mrf.mxu2 }
  0xd5   :  { %v678_v55 = vpop.f32.mrf.mxu3  ;;  %v764_v59 = vpack.c.bf16 %v751_v56, %v751_v56  ;;  %v636_v60 = vadd.f32 %v635_v58, %v593_v57 }
  0xd7   :  { %v594_v61 = vpop.f32.mrf.mxu1  ;;  %778 = vst.msk [vmem:[%s1584_s3 + $0x4] sm:$0xf] %vm776_vm1, %v764_v59  ;;  %v679_v62 = vadd.f32 %v678_v55, %v636_v60 }
  0xd8   :  { %v723_v63 = vpop.f32.mrf.mxu0  ;;  %v595_v4 = vadd.f32 %v594_v61, %v552_v0 }
  0xd9   :  { %v722_v1 = vadd.f32 %v721_v52, %v679_v62  ;;  %v562_v52 = vadd.f32 %v1490_v15, %v1508_v28 }
  0xdb   :  { %v752_v3 = vmax.f32 %v722_v1, 0.0 }
  0xdc   :  { %v637_v5 = vpop.f32.mrf.mxu2 }
  0xdd   :  { %v680_v2 = vpop.f32.mrf.mxu3  ;;  %v765_v6 = vpack.c.bf16 %v752_v3, %v752_v3  ;;  %v638_v8 = vadd.f32 %v637_v5, %v595_v4 }
  0xdf   :  { %v597_v9 = vpop.f32.mrf.mxu1  ;;  %779 = vst.msk [vmem:[%s1584_s3 + $0x8] sm:$0xf] %vm776_vm1, %v765_v6  ;;  %v681_v10 = vadd.f32 %v680_v2, %v638_v8 }
  0xe0   :  { %v726_v11 = vpop.f32.mrf.mxu0  ;;  %v598_v19 = vadd.f32 %v597_v9, %v555_v13 }
  0xe1   :  { %v724_v14 = vadd.f32 %v723_v63, %v681_v10 }
  0xe3   :  { %v753_v18 = vmax.f32 %v724_v14, 0.0 }
  0xe4   :  { %v640_v21 = vpop.f32.mrf.mxu2 }
  0xe5   :  { %v683_v7 = vpop.f32.mrf.mxu3  ;;  %v766_v24 = vpack.c.bf16 %v753_v18, %v753_v18  ;;  %v641_v25 = vadd.f32 %v640_v21, %v598_v19 }
  0xe7   :  { %v599_v26 = vpop.f32.mrf.mxu1  ;;  %780 = vst.msk [vmem:[%s1584_s3 + $0xc] sm:$0xf] %vm776_vm1, %v766_v24  ;;  %v684_v29 = vadd.f32 %v683_v7, %v641_v25 }
  0xe8   :  { %v728_v30 = vpop.f32.mrf.mxu0  ;;  %v600_v35 = vadd.f32 %v599_v26, %v557_v32 }
  0xe9   :  { %v727_v33 = vadd.f32 %v726_v11, %v684_v29 }
  0xeb   :  { %v754_v34 = vmax.f32 %v727_v33, 0.0 }
  0xec   :  { %v642_v36 = vpop.f32.mrf.mxu2 }
  0xed   :  { %v685_v12 = vpop.f32.mrf.mxu3  ;;  %v767_v37 = vpack.c.bf16 %v754_v34, %v754_v34  ;;  %v643_v38 = vadd.f32 %v642_v36, %v600_v35 }
  0xef   :  { %v602_v39 = vpop.f32.mrf.mxu1  ;;  %781 = vst.msk [vmem:[%s1584_s3 + $0x10] sm:$0xf] %vm776_vm1, %v767_v37  ;;  %v686_v40 = vadd.f32 %v685_v12, %v643_v38 }
  0xf0   :  { %v731_v41 = vpop.f32.mrf.mxu0  ;;  %v603_v45 = vadd.f32 %v602_v39, %v560_v42 }
  0xf1   :  { %v729_v43 = vadd.f32 %v728_v30, %v686_v40 }
  0xf3   :  { %v755_v44 = vmax.f32 %v729_v43, 0.0 }
  0xf4   :  { %v645_v46 = vpop.f32.mrf.mxu2 }
  0xf5   :  { %v688_v17 = vpop.f32.mrf.mxu3  ;;  %v768_v47 = vpack.c.bf16 %v755_v44, %v755_v44  ;;  %v646_v48 = vadd.f32 %v645_v46, %v603_v45 }
  0xf7   :  { %v604_v49 = vpop.f32.mrf.mxu1  ;;  %782 = vst.msk [vmem:[%s1584_s3 + $0x14] sm:$0xf] %vm776_vm1, %v768_v47  ;;  %v689_v50 = vadd.f32 %v688_v17, %v646_v48 }
  0xf8   :  { %v733_v51 = vpop.f32.mrf.mxu0  ;;  %v605_v55 = vadd.f32 %v604_v49, %v562_v52 }
  0xf9   :  { %v732_v53 = vadd.f32 %v731_v41, %v689_v50 }
  0xfb   :  { %v756_v54 = vmax.f32 %v732_v53, 0.0 }
  0xfc   :  { %v647_v56 = vpop.f32.mrf.mxu2 }
  0xfd   :  { %v690_v23 = vpop.f32.mrf.mxu3  ;;  %v769_v57 = vpack.c.bf16 %v756_v54, %v756_v54  ;;  %v648_v58 = vadd.f32 %v647_v56, %v605_v55 }
  0xff   :  { %v607_v59 = vpop.f32.mrf.mxu1  ;;  %783 = vst.msk [vmem:[%s1584_s3 + $0x18] sm:$0xf] %vm776_vm1, %v769_v57  ;;  %v691_v60 = vadd.f32 %v690_v23, %v648_v58 }
 0x100   :  { %v736_v61 = vpop.f32.mrf.mxu0  ;;  %v608_v15 = vadd.f32 %v607_v59, %v1493_v16 }
 0x101   :  { %v734_v62 = vadd.f32 %v733_v51, %v691_v60 }
 0x103   :  { %v757_v0 = vmax.f32 %v734_v62, 0.0 }
 0x104   :  { %v650_v28 = vpop.f32.mrf.mxu2 }
 0x105   :  { %v693_v63 = vpop.f32.mrf.mxu3  ;;  %v770_v1 = vpack.c.bf16 %v757_v0, %v757_v0  ;;  %v651_v2 = vadd.f32 %v650_v28, %v608_v15 }
 0x107   :  { %v609_v3 = vpop.f32.mrf.mxu1  ;;  %784 = vst.msk [vmem:[%s1584_s3 + $0x1c] sm:$0xf] %vm776_vm1, %v770_v1  ;;  %v694_v4 = vadd.f32 %v693_v63, %v651_v2 }
 0x108   :  { %v738_v5 = vpop.f32.mrf.mxu0  ;;  %v610_v10 = vadd.f32 %v609_v3, %v1501_v22 }
 0x109   :  { %v737_v6 = vadd.f32 %v736_v61, %v694_v4 }
 0x10b   :  { %v758_v9 = vmax.f32 %v737_v6, 0.0 }
 0x10c   :  { %v652_v11 = vpop.f32.mrf.mxu2 }
 0x10d   :  { %v695_v8 = vpop.f32.mrf.mxu3  ;;  %v771_v13 = vpack.c.bf16 %v758_v9, %v758_v9  ;;  %v653_v14 = vadd.f32 %v652_v11, %v610_v10 }
 0x10f   :  { %v612_v16 = vpop.f32.mrf.mxu1  ;;  %785 = vst.msk [vmem:[%s1584_s3 + $0x20] sm:$0xf] %vm776_vm1, %v771_v13  ;;  %v696_v7 = vadd.f32 %v695_v8, %v653_v14 }
 0x110   :  { %v741_v18 = vpop.f32.mrf.mxu0  ;;  %v613_v25 = vadd.f32 %v612_v16, %v1506_v27 }
 0x111   :  { %v739_v19 = vadd.f32 %v738_v5, %v696_v7 }
 0x113   :  { %v759_v24 = vmax.f32 %v739_v19, 0.0 }
 0x114   :  { %v655_v26 = vpop.f32.mrf.mxu2 }
 0x115   :  { %v698_v21 = vpop.f32.mrf.mxu3  ;;  %v772_v29 = vpack.c.bf16 %v759_v24, %v759_v24  ;;  %v656_v30 = vadd.f32 %v655_v26, %v613_v25 }
 0x117   :  { %v614_v22 = vpop.f32.mrf.mxu1  ;;  %786 = vst.msk [vmem:[%s1584_s3 + $0x24] sm:$0xf] %vm776_vm1, %v772_v29  ;;  %v699_v32 = vadd.f32 %v698_v21, %v656_v30 }
 0x118   :  { %v743_v33 = vpop.f32.mrf.mxu0  ;;  %v615_v36 = vadd.f32 %v614_v22, %v1511_v31 }
 0x119   :  { %v742_v12 = vadd.f32 %v741_v18, %v699_v32 }
 0x11b   :  { %v760_v35 = vmax.f32 %v742_v12, 0.0 }
 0x11c   :  { %v657_v37 = vpop.f32.mrf.mxu2 }
 0x11d   :  { %v700_v34 = vpop.f32.mrf.mxu3  ;;  %v773_v38 = vpack.c.bf16 %v760_v35, %v760_v35  ;;  %v658_v39 = vadd.f32 %v657_v37, %v615_v36 }
 0x11f   :  { %v617_v27 = vpop.f32.mrf.mxu1  ;;  %787 = vst.msk [vmem:[%s1584_s3 + $0x28] sm:$0xf] %vm776_vm1, %v773_v38  ;;  %v701_v40 = vadd.f32 %v700_v34, %v658_v39 }
 0x120   :  { %v746_v41 = vpop.f32.mrf.mxu0  ;;  %v618_v44 = vadd.f32 %v617_v27, %v1498_v20 }
 0x121   :  { %v744_v42 = vadd.f32 %v743_v33, %v701_v40 }
 0x123   :  { %v761_v17 = vmax.f32 %v744_v42, 0.0 }
 0x124   :  { %v660_v45 = vpop.f32.mrf.mxu2 }
 0x125   :  { %v703_v43 = vpop.f32.mrf.mxu3  ;;  %v774_v46 = vpack.c.bf16 %v761_v17, %v761_v17  ;;  %v661_v47 = vadd.f32 %v660_v45, %v618_v44 }
 0x127   :  { %v619_v31 = vpop.f32.mrf.mxu1  ;;  %788 = vst.msk [vmem:[%s1584_s3 + $0x2c] sm:$0xf] %vm776_vm1, %v774_v46  ;;  %v704_v48 = vadd.f32 %v703_v43, %v661_v47 }
 0x128   :  { %v748_v49 = vpop.f32.mrf.mxu0 }
 0x129   :  { %v747_v50 = vadd.f32 %v746_v41, %v704_v48 }
 0x12b   :  { %v762_v52 = vmax.f32 %v747_v50, 0.0 }
 0x12c   :  { %v662_v53 = vpop.f32.mrf.mxu2 }
 0x12d   :  { %v705_v51 = vpop.f32.mrf.mxu3  ;;  %v775_v23 = vpack.c.bf16 %v762_v52, %v762_v52 }
 0x12f   :  { %790 = vst.msk [vmem:[%s1584_s3 + $0x30] sm:$0x1] %vm789_vm2, %v775_v23 }

// kernel: dqn_forward.7
= control target key start
LH: loop header
LB: loop body
LE: loop exit
PB: predicated region body
PF: predicated region fallthrough
CT: control target
= control target key end

     0   :  { %vm2440_vm0 = vcmask 523264   ;;  %vm4011_vm2 = vcmask 1041408   ;;  %s10101_s1 = inlined_call_operand.vmem [shape: bf16[3136,256], index: 1, kind: input, shape index: {}]   ;;  %s10102_s0 = inlined_call_operand.vmem [shape: bf16[2,3136], index: 0, kind: input, shape index: {}]   ;;  %s10103_s2 = inlined_call_operand.vmem [shape: f32[1,256], index: 2, kind: input, shape index: {}]   ;;  %s10104_s3 = inlined_call_operand.vmem [shape: bf16[256,896], index: 3, kind: input, shape index: {}]   ;;  %s10105_s4 = inlined_call_operand.vmem [shape: f32[1,896], index: 4, kind: input, shape index: {}]   ;;  %s10106_s5 = inlined_call_operand.vmem [shape: f32[2,768], index: 5, kind: output, shape index: {}]  }
   0x1   :  { %v4253_v0 = vld [vmem:[%s10101_s1 + $0x70] sm:$0xf]  ;;  %v6228_v1 = vld [vmem:[%s10101_s1 + $0x74] sm:$0xf0]  ;;  %v4245_v11 = vld [vmem:[%s10101_s1 + $0x60] sm:$0xf] }
   0x2   :  { %v4317_v2 = vld [vmem:[%s10101_s1 + $0xf0] sm:$0xf]  ;;  %v4254_v3 = vor.u32 %v6228_v1, %v4253_v0  ;;  %v6244_v4 = vld [vmem:[%s10101_s1 + $0xf4] sm:$0xf0]  ;;  %v6226_v13 = vld [vmem:[%s10101_s1 + $0x64] sm:$0xf0] }
   0x3   :  { %v4381_v5 = vld [vmem:[%s10101_s1 + $0x170] sm:$0xf]  ;;  %v6260_v6 = vld [vmem:[%s10101_s1 + $0x174] sm:$0xf0]  ;;  %v4318_v7 = vor.u32 %v6244_v4, %v4317_v2  ;;  %v4309_v14 = vld [vmem:[%s10101_s1 + $0xe0] sm:$0xf]  ;;  %v4246_v16 = vor.u32 %v6226_v13, %v4245_v11 }
   0x4   :  { %v4382_v8 = vor.u32 %v6260_v6, %v4381_v5  ;;  %v4445_v9 = vld [vmem:[%s10101_s1 + $0x1f0] sm:$0xf]  ;;  %v6276_v10 = vld [vmem:[%s10101_s1 + $0x1f4] sm:$0xf0]  ;;  %2443 = vmatpush.bf16.msra.mxu0 %v4254_v3  ;;  %v6242_v15 = vld [vmem:[%s10101_s1 + $0xe4] sm:$0xf0] }
   0x5   :  { %v4446_v12 = vor.u32 %v6276_v10, %v4445_v9  ;;  %2456 = vmatpush.bf16.msra.mxu1 %v4318_v7  ;;  %v4310_v17 = vor.u32 %v6242_v15, %v4309_v14  ;;  %v4373_v18 = vld [vmem:[%s10101_s1 + $0x160] sm:$0xf]  ;;  %v6258_v19 = vld [vmem:[%s10101_s1 + $0x164] sm:$0xf0]  ;;  %v4237_v23 = vld [vmem:[%s10101_s1 + $0x50] sm:$0xf] }
   0x6   :  { %2469 = vmatpush.bf16.msra.mxu2 %v4382_v8  ;;  %v4437_v20 = vld [vmem:[%s10101_s1 + $0x1e0] sm:$0xf]  ;;  %v4374_v21 = vor.u32 %v6258_v19, %v4373_v18  ;;  %v6274_v22 = vld [vmem:[%s10101_s1 + $0x1e4] sm:$0xf0]  ;;  %v6224_v24 = vld [vmem:[%s10101_s1 + $0x54] sm:$0xf0] }
   0x7   :  { %2482 = vmatpush.bf16.msra.mxu3 %v4446_v12  ;;  %v4438_v25 = vor.u32 %v6274_v22, %v4437_v20  ;;  %v4301_v26 = vld [vmem:[%s10101_s1 + $0xd0] sm:$0xf]  ;;  %v6240_v27 = vld [vmem:[%s10101_s1 + $0xd4] sm:$0xf0]  ;;  %v4238_v29 = vor.u32 %v6224_v24, %v4237_v23  ;;  %v4229_v35 = vld [vmem:[%s10101_s1 + $0x40] sm:$0xf] }
   0x8   :  { %v4365_v28 = vld [vmem:[%s10101_s1 + $0x150] sm:$0xf]  ;;  %2444 = vmatpush.bf16.msra.mxu0 %v4246_v16  ;;  %v6256_v30 = vld [vmem:[%s10101_s1 + $0x154] sm:$0xf0]  ;;  %v4302_v33 = vor.u32 %v6240_v27, %v4301_v26  ;;  %v6222_v36 = vld [vmem:[%s10101_s1 + $0x44] sm:$0xf0] }
   0x9   :  { %v4429_v31 = vld [vmem:[%s10101_s1 + $0x1d0] sm:$0xf]  ;;  %v6272_v32 = vld [vmem:[%s10101_s1 + $0x1d4] sm:$0xf0]  ;;  %2457 = vmatpush.bf16.msra.mxu1 %v4310_v17  ;;  %v4366_v34 = vor.u32 %v6256_v30, %v4365_v28  ;;  %v4293_v37 = vld [vmem:[%s10101_s1 + $0xc0] sm:$0xf]  ;;  %v4230_v44 = vor.u32 %v6222_v36, %v4229_v35 }
   0xa   :  { %2470 = vmatpush.bf16.msra.mxu2 %v4374_v21  ;;  %v4430_v38 = vor.u32 %v6272_v32, %v4429_v31  ;;  %v6238_v39 = vld [vmem:[%s10101_s1 + $0xc4] sm:$0xf0]  ;;  %v4357_v40 = vld [vmem:[%s10101_s1 + $0x140] sm:$0xf]  ;;  %v4221_v47 = vld [vmem:[%s10101_s1 + $0x30] sm:$0xf] }
   0xb   :  { %2483 = vmatpush.bf16.msra.mxu3 %v4438_v25  ;;  %v6254_v41 = vld [vmem:[%s10101_s1 + $0x144] sm:$0xf0]  ;;  %v4421_v42 = vld [vmem:[%s10101_s1 + $0x1c0] sm:$0xf]  ;;  %v4294_v45 = vor.u32 %v6238_v39, %v4293_v37  ;;  %v6220_v48 = vld [vmem:[%s10101_s1 + $0x34] sm:$0xf0] }
   0xc   :  { %v6270_v43 = vld [vmem:[%s10101_s1 + $0x1c4] sm:$0xf0]  ;;  %2445 = vmatpush.bf16.msra.mxu0 %v4238_v29  ;;  %v4358_v46 = vor.u32 %v6254_v41, %v4357_v40  ;;  %v4285_v49 = vld [vmem:[%s10101_s1 + $0xb0] sm:$0xf]  ;;  %v6236_v51 = vld [vmem:[%s10101_s1 + $0xb4] sm:$0xf0]  ;;  %v4222_v56 = vor.u32 %v6220_v48, %v4221_v47 }
   0xd   :  { %2458 = vmatpush.bf16.msra.mxu1 %v4302_v33  ;;  %v4422_v50 = vor.u32 %v6270_v43, %v4421_v42  ;;  %v4349_v52 = vld [vmem:[%s10101_s1 + $0x130] sm:$0xf]  ;;  %v6252_v53 = vld [vmem:[%s10101_s1 + $0x134] sm:$0xf0]  ;;  %v4286_v57 = vor.u32 %v6236_v51, %v4285_v49  ;;  %v4213_v59 = vld [vmem:[%s10101_s1 + $0x20] sm:$0xf] }
   0xe   :  { %2471 = vmatpush.bf16.msra.mxu2 %v4366_v34  ;;  %v4413_v54 = vld [vmem:[%s10101_s1 + $0x1b0] sm:$0xf]  ;;  %v6268_v55 = vld [vmem:[%s10101_s1 + $0x1b4] sm:$0xf0]  ;;  %v4350_v58 = vor.u32 %v6252_v53, %v4349_v52  ;;  %v6218_v60 = vld [vmem:[%s10101_s1 + $0x24] sm:$0xf0] }
   0xf   :  { %2484 = vmatpush.bf16.msra.mxu3 %v4430_v38  ;;  %v4277_v61 = vld [vmem:[%s10101_s1 + $0xa0] sm:$0xf]  ;;  %v4414_v62 = vor.u32 %v6268_v55, %v4413_v54  ;;  %v6234_v63 = vld [vmem:[%s10101_s1 + $0xa4] sm:$0xf0]  ;;  %v4214_v4 = vor.u32 %v6218_v60, %v4213_v59  ;;  %v4205_v7 = vld [vmem:[%s10101_s1 + $0x10] sm:$0xf] }
  0x10   :  { %2446 = vmatpush.bf16.msra.mxu0 %v4230_v44  ;;  %v4341_v0 = vld [vmem:[%s10101_s1 + $0x120] sm:$0xf]  ;;  %v6250_v1 = vld [vmem:[%s10101_s1 + $0x124] sm:$0xf0]  ;;  %v4278_v5 = vor.u32 %v6234_v63, %v4277_v61  ;;  %v6216_v8 = vld [vmem:[%s10101_s1 + $0x14] sm:$0xf0] }
  0x11   :  { %2459 = vmatpush.bf16.msra.mxu1 %v4294_v45  ;;  %v4405_v2 = vld [vmem:[%s10101_s1 + $0x1a0] sm:$0xf]  ;;  %v6266_v3 = vld [vmem:[%s10101_s1 + $0x1a4] sm:$0xf0]  ;;  %v4342_v6 = vor.u32 %v6250_v1, %v4341_v0  ;;  %v4269_v9 = vld [vmem:[%s10101_s1 + $0x90] sm:$0xf]  ;;  %v4206_v16 = vor.u32 %v6216_v8, %v4205_v7 }
  0x12   :  { %2472 = vmatpush.bf16.msra.mxu2 %v4358_v46  ;;  %v4406_v10 = vor.u32 %v6266_v3, %v4405_v2  ;;  %v6232_v11 = vld [vmem:[%s10101_s1 + $0x94] sm:$0xf0]  ;;  %v4333_v12 = vld [vmem:[%s10101_s1 + $0x110] sm:$0xf]  ;;  %v4197_v17 = vld [vmem:[%s10101_s1] sm:$0xf] }
  0x13   :  { %2485 = vmatpush.bf16.msra.mxu3 %v4422_v50  ;;  %v6248_v13 = vld [vmem:[%s10101_s1 + $0x114] sm:$0xf0]  ;;  %v4397_v14 = vld [vmem:[%s10101_s1 + $0x190] sm:$0xf]  ;;  %v6214_v18 = vld [vmem:[%s10101_s1 + $0x4] sm:$0xf0]  ;;  %v4270_v19 = vor.u32 %v6232_v11, %v4269_v9 }
  0x14   :  { %2447 = vmatpush.bf16.msra.mxu0 %v4222_v56  ;;  %v6264_v15 = vld [vmem:[%s10101_s1 + $0x194] sm:$0xf0]  ;;  %v4334_v20 = vor.u32 %v6248_v13, %v4333_v12  ;;  %v4261_v21 = vld [vmem:[%s10101_s1 + $0x80] sm:$0xf]  ;;  %v6230_v22 = vld [vmem:[%s10101_s1 + $0x84] sm:$0xf0]  ;;  %v4198_v31 = vor.u32 %v6214_v18, %v4197_v17 }
  0x15   :  { %2460 = vmatpush.bf16.msra.mxu1 %v4286_v57  ;;  %v4325_v23 = vld [vmem:[%s10101_s1 + $0x100] sm:$0xf]  ;;  %v4398_v24 = vor.u32 %v6264_v15, %v4397_v14  ;;  %v6246_v25 = vld [vmem:[%s10101_s1 + $0x104] sm:$0xf0]  ;;  %v4509_v28 = vld [vmem:[%s10101_s1 + $0x270] sm:$0xf]  ;;  %v4262_v35 = vor.u32 %v6230_v22, %v4261_v21 }
  0x16   :  { %2473 = vmatpush.bf16.msra.mxu2 %v4350_v58  ;;  %v4389_v26 = vld [vmem:[%s10101_s1 + $0x180] sm:$0xf]  ;;  %v6262_v27 = vld [vmem:[%s10101_s1 + $0x184] sm:$0xf0]  ;;  %v6292_v29 = vld [vmem:[%s10101_s1 + $0x274] sm:$0xf0]  ;;  %v4326_v36 = vor.u32 %v6246_v25, %v4325_v23 }
  0x17   :  { %2486 = vmatpush.bf16.msra.mxu3 %v4414_v62  ;;  %v4573_v30 = vld [vmem:[%s10101_s1 + $0x2f0] sm:$0xf]  ;;  %v6308_v32 = vld [vmem:[%s10101_s1 + $0x2f4] sm:$0xf0]  ;;  %v4390_v39 = vor.u32 %v6262_v27, %v4389_v26  ;;  %v4510_v40 = vor.u32 %v6292_v29, %v4509_v28  ;;  %v4501_v43 = vld [vmem:[%s10101_s1 + $0x260] sm:$0xf] }
  0x18   :  { %2448 = vmatpush.bf16.msra.mxu0 %v4214_v4  ;;  %v4637_v33 = vld [vmem:[%s10101_s1 + $0x370] sm:$0xf]  ;;  %v6324_v34 = vld [vmem:[%s10101_s1 + $0x374] sm:$0xf0]  ;;  %v4574_v41 = vor.u32 %v6308_v32, %v4573_v30  ;;  %v6290_v44 = vld [vmem:[%s10101_s1 + $0x264] sm:$0xf0] }
  0x19   :  { %2461 = vmatpush.bf16.msra.mxu1 %v4278_v5  ;;  %v4701_v37 = vld [vmem:[%s10101_s1 + $0x3f0] sm:$0xf]  ;;  %v6340_v38 = vld [vmem:[%s10101_s1 + $0x3f4] sm:$0xf0]  ;;  %v4638_v42 = vor.u32 %v6324_v34, %v4637_v33  ;;  %v4565_v45 = vld [vmem:[%s10101_s1 + $0x2e0] sm:$0xf]  ;;  %v4502_v52 = vor.u32 %v6290_v44, %v4501_v43 }
  0x1a   :  { %2474 = vmatpush.bf16.msra.mxu2 %v4342_v6  ;;  %v4702_v46 = vor.u32 %v6340_v38, %v4701_v37  ;;  %v6306_v47 = vld [vmem:[%s10101_s1 + $0x2e4] sm:$0xf0]  ;;  %v4629_v48 = vld [vmem:[%s10101_s1 + $0x360] sm:$0xf]  ;;  %v4493_v53 = vld [vmem:[%s10101_s1 + $0x250] sm:$0xf] }
  0x1b   :  { %2487 = vmatpush.bf16.msra.mxu3 %v4406_v10  ;;  %v6322_v49 = vld [vmem:[%s10101_s1 + $0x364] sm:$0xf0]  ;;  %v4693_v50 = vld [vmem:[%s10101_s1 + $0x3e0] sm:$0xf]  ;;  %v6288_v54 = vld [vmem:[%s10101_s1 + $0x254] sm:$0xf0]  ;;  %v4566_v55 = vor.u32 %v6306_v47, %v4565_v45 }
  0x1c   :  { %2449 = vmatpush.bf16.msra.mxu0 %v4206_v16  ;;  %v6338_v51 = vld [vmem:[%s10101_s1 + $0x3e4] sm:$0xf0]  ;;  %v4630_v56 = vor.u32 %v6322_v49, %v4629_v48  ;;  %v4557_v57 = vld [vmem:[%s10101_s1 + $0x2d0] sm:$0xf]  ;;  %v6304_v58 = vld [vmem:[%s10101_s1 + $0x2d4] sm:$0xf0]  ;;  %v4494_v1 = vor.u32 %v6288_v54, %v4493_v53 }
  0x1d   :  { %2462 = vmatpush.bf16.msra.mxu1 %v4270_v19  ;;  %v21_v59 = vld [vmem:[%s10102_s0] sm:$0xff]  ;;  %v4694_v60 = vor.u32 %v6338_v51, %v4693_v50  ;;  %v4621_v61 = vld [vmem:[%s10101_s1 + $0x350] sm:$0xf]  ;;  %v6320_v62 = vld [vmem:[%s10101_s1 + $0x354] sm:$0xf0]  ;;  %v4558_v2 = vor.u32 %v6304_v58, %v4557_v57 }
  0x1e   :  { %2475 = vmatpush.bf16.msra.mxu2 %v4334_v20  ;;  %424 = vst [vmem:[#allocation1] ss:$9 sm:$0xff] %v21_v59  ;;  %v4685_v63 = vld [vmem:[%s10101_s1 + $0x3d0] sm:$0xf]  ;;  %v6336_v0 = vld [vmem:[%s10101_s1 + $0x3d4] sm:$0xf0]  ;;  %v4622_v3 = vor.u32 %v6320_v62, %v4621_v61 }
  0x1f   :  { %2488 = vmatpush.bf16.msra.mxu3 %v4398_v24  ;;  %v4485_v4 = vld [vmem:[%s10101_s1 + $0x240] sm:$0xf]  ;;  %v6286_v5 = vld [vmem:[%s10101_s1 + $0x244] sm:$0xf0]  ;;  %v4686_v7 = vor.u32 %v6336_v0, %v4685_v63  ;;  %v4477_v13 = vld [vmem:[%s10101_s1 + $0x230] sm:$0xf] }
  0x20   :  { %2450 = vmatpush.bf16.msra.mxu0 %v4198_v31  ;;  %v4549_v6 = vld [vmem:[%s10101_s1 + $0x2c0] sm:$0xf]  ;;  %v6302_v8 = vld [vmem:[%s10101_s1 + $0x2c4] sm:$0xf0]  ;;  %v4486_v14 = vor.u32 %v6286_v5, %v4485_v4  ;;  %v6284_v15 = vld [vmem:[%s10101_s1 + $0x234] sm:$0xf0] }
  0x21   :  { %2463 = vmatpush.bf16.msra.mxu1 %v4262_v35  ;;  %v4613_v9 = vld [vmem:[%s10101_s1 + $0x340] sm:$0xf]  ;;  %v6318_v10 = vld [vmem:[%s10101_s1 + $0x344] sm:$0xf0]  ;;  %v4541_v16 = vld [vmem:[%s10101_s1 + $0x2b0] sm:$0xf]  ;;  %v4550_v18 = vor.u32 %v6302_v8, %v4549_v6  ;;  %v4478_v29 = vor.u32 %v6284_v15, %v4477_v13 }
  0x22   :  { %2476 = vmatpush.bf16.msra.mxu2 %v4326_v36  ;;  %v4677_v11 = vld [vmem:[%s10101_s1 + $0x3c0] sm:$0xf]  ;;  %v6334_v12 = vld [vmem:[%s10101_s1 + $0x3c4] sm:$0xf0]  ;;  %v6300_v17 = vld [vmem:[%s10101_s1 + $0x2b4] sm:$0xf0]  ;;  %v4614_v19 = vor.u32 %v6318_v10, %v4613_v9 }
  0x23   :  { %2489 = vmatpush.bf16.msra.mxu3 %v4390_v39  ;;  %v4678_v23 = vor.u32 %v6334_v12, %v4677_v11  ;;  %v4605_v24 = vld [vmem:[%s10101_s1 + $0x330] sm:$0xf]  ;;  %v6316_v25 = vld [vmem:[%s10101_s1 + $0x334] sm:$0xf0]  ;;  %v4542_v30 = vor.u32 %v6300_v17, %v4541_v16  ;;  %v4469_v32 = vld [vmem:[%s10101_s1 + $0x220] sm:$0xf] }
  0x24   :  { %2495 = vmatpush.bf16.msrb.mxu0 %v4510_v40  ;;  %v4669_v27 = vld [vmem:[%s10101_s1 + $0x3b0] sm:$0xf]  ;;  %v6332_v28 = vld [vmem:[%s10101_s1 + $0x3b4] sm:$0xf0]  ;;  %v4606_v31 = vor.u32 %v6316_v25, %v4605_v24  ;;  %v6282_v33 = vld [vmem:[%s10101_s1 + $0x224] sm:$0xf0] }
  0x25   :  { %2508 = vmatpush.bf16.msrb.mxu1 %v4574_v41  ;;  %v7076_v20 = vld [vmem:[#allocation1 + $0x12] sm:$0xff]  ;;  %v7078_v21 = vld [vmem:[#allocation1] sm:$0xff]  ;;  %v7089_v26 = vld [vmem:[#allocation1 + $0x9] sm:$0xff]  ;;  %v4670_v35 = vor.u32 %v6332_v28, %v4669_v27  ;;  %v4470_v43 = vor.u32 %v6282_v33, %v4469_v32 }
  0x26   :  { %2521 = vmatpush.bf16.msrb.mxu2 %v4638_v42  ;;  %v7080_v22 = vld [vmem:[#allocation1 + $0x1b] sm:$0xff]  ;;  %2451 = vmatmul.bf16.vlgmr.msra.gmra.mxu0 %v7078_v21  ;;  %v22_v36 = vld [vmem:[%s10102_s0 + $0x8] sm:$0xff]  ;;  %v4461_v42 = vld [vmem:[%s10101_s1 + $0x210] sm:$0xf] }
  0x27   :  { %2534 = vmatpush.bf16.msrb.mxu3 %v4702_v46  ;;  %2477 = vmatmul.bf16.vlgmr.msra.gmra.mxu2 %v7076_v20  ;;  %v4533_v34 = vld [vmem:[%s10101_s1 + $0x2a0] sm:$0xf]  ;;  %v6298_v37 = vld [vmem:[%s10101_s1 + $0x2a4] sm:$0xf0]  ;;  %v6280_v44 = vld [vmem:[%s10101_s1 + $0x214] sm:$0xf0] }
  0x28   :  { %2496 = vmatpush.bf16.msrb.mxu0 %v4502_v52  ;;  %2490 = vmatmul.bf16.vlgmr.msra.gmra.mxu3 %v7080_v22  ;;  %v4597_v38 = vld [vmem:[%s10101_s1 + $0x320] sm:$0xf]  ;;  %v6314_v39 = vld [vmem:[%s10101_s1 + $0x324] sm:$0xf0]  ;;  %v4525_v45 = vld [vmem:[%s10101_s1 + $0x290] sm:$0xf]  ;;  %v4534_v47 = vor.u32 %v6298_v37, %v4533_v34  ;;  %v4462_v58 = vor.u32 %v6280_v44, %v4461_v42 }
  0x29   :  { %2509 = vmatpush.bf16.msrb.mxu1 %v4566_v55  ;;  %v4661_v40 = vld [vmem:[%s10101_s1 + $0x3a0] sm:$0xf]  ;;  %v6330_v41 = vld [vmem:[%s10101_s1 + $0x3a4] sm:$0xf0]  ;;  %v6296_v46 = vld [vmem:[%s10101_s1 + $0x294] sm:$0xf0]  ;;  %v4598_v48 = vor.u32 %v6314_v39, %v4597_v38 }
  0x2a   :  { %2522 = vmatpush.bf16.msrb.mxu2 %v4630_v56  ;;  %2464 = vmatmul.bf16.vlgmr.msra.gmra.mxu1 %v7089_v26  ;;  %v4589_v49 = vld [vmem:[%s10101_s1 + $0x310] sm:$0xf]  ;;  %v6312_v50 = vld [vmem:[%s10101_s1 + $0x314] sm:$0xf0]  ;;  %v4662_v52 = vor.u32 %v6330_v41, %v4661_v40  ;;  %v7147_v53 = vld [vmem:[#allocation1 + $0x24] sm:$0xff]  ;;  %v4526_v61 = vor.u32 %v6296_v46, %v4525_v45 }
  0x2b   :  { %2535 = vmatpush.bf16.msrb.mxu3 %v4694_v60  ;;  %v7145_v51 = vld [vmem:[#allocation1 + $0x36] sm:$0xff]  ;;  %v7149_v54 = vld [vmem:[#allocation1 + $0x3f] sm:$0xff]  ;;  %v7151_v55 = vld [vmem:[#allocation1 + $0x2d] sm:$0xff]  ;;  %v4590_v62 = vor.u32 %v6312_v50, %v4589_v49 }
  0x2c   :  { %2497 = vmatpush.bf16.msrb.mxu0 %v4494_v1  ;;  %v4653_v56 = vld [vmem:[%s10101_s1 + $0x390] sm:$0xf]  ;;  %v6328_v57 = vld [vmem:[%s10101_s1 + $0x394] sm:$0xf0]  ;;  %434 = vst [vmem:[#allocation1] ss:$9 sm:$0xff] %v22_v36 }
  0x2d   :  { %2510 = vmatpush.bf16.msrb.mxu1 %v4558_v2  ;;  %v4453_v59 = vld [vmem:[%s10101_s1 + $0x200] sm:$0xf]  ;;  %v6278_v60 = vld [vmem:[%s10101_s1 + $0x204] sm:$0xf0]  ;;  %v4654_v2 = vor.u32 %v6328_v57, %v4653_v56  ;;  %v4765_v6 = vld [vmem:[%s10101_s1 + $0x470] sm:$0xf] }
  0x2e   :  { %2523 = vmatpush.bf16.msrb.mxu2 %v4622_v3  ;;  %v4517_v63 = vld [vmem:[%s10101_s1 + $0x280] sm:$0xf]  ;;  %v6294_v0 = vld [vmem:[%s10101_s1 + $0x284] sm:$0xf0]  ;;  %v4829_v8 = vld [vmem:[%s10101_s1 + $0x4f0] sm:$0xf]  ;;  %v4454_v9 = vor.u32 %v6278_v60, %v4453_v59 }
  0x2f   :  { %2536 = vmatpush.bf16.msrb.mxu3 %v4686_v7  ;;  %v4581_v1 = vld [vmem:[%s10101_s1 + $0x300] sm:$0xf]  ;;  %v6310_v3 = vld [vmem:[%s10101_s1 + $0x304] sm:$0xf0]  ;;  %v6356_v7 = vld [vmem:[%s10101_s1 + $0x474] sm:$0xf0]  ;;  %v4518_v13 = vor.u32 %v6294_v0, %v4517_v63 }
  0x30   :  { %2498 = vmatpush.bf16.msrb.mxu0 %v4486_v14  ;;  %v4645_v4 = vld [vmem:[%s10101_s1 + $0x380] sm:$0xf]  ;;  %v6326_v5 = vld [vmem:[%s10101_s1 + $0x384] sm:$0xf0]  ;;  %v6372_v10 = vld [vmem:[%s10101_s1 + $0x4f4] sm:$0xf0]  ;;  %v4582_v14 = vor.u32 %v6310_v3, %v4581_v1 }
  0x31   :  { %2511 = vmatpush.bf16.msrb.mxu1 %v4550_v18  ;;  %v4893_v11 = vld [vmem:[%s10101_s1 + $0x570] sm:$0xf]  ;;  %v6388_v12 = vld [vmem:[%s10101_s1 + $0x574] sm:$0xf0]  ;;  %v4646_v17 = vor.u32 %v6326_v5, %v4645_v4  ;;  %v4766_v18 = vor.u32 %v6356_v7, %v4765_v6  ;;  %v4757_v24 = vld [vmem:[%s10101_s1 + $0x460] sm:$0xf] }
  0x32   :  { %2524 = vmatpush.bf16.msrb.mxu2 %v4614_v19  ;;  %v4957_v15 = vld [vmem:[%s10101_s1 + $0x5f0] sm:$0xf]  ;;  %v6404_v16 = vld [vmem:[%s10101_s1 + $0x5f4] sm:$0xf0]  ;;  %v4830_v19 = vor.u32 %v6372_v10, %v4829_v8  ;;  %v6354_v25 = vld [vmem:[%s10101_s1 + $0x464] sm:$0xf0] }
  0x33   :  { %2537 = vmatpush.bf16.msrb.mxu3 %v4678_v23  ;;  %v4894_v23 = vor.u32 %v6388_v12, %v4893_v11  ;;  %v4821_v27 = vld [vmem:[%s10101_s1 + $0x4e0] sm:$0xf]  ;;  %v4958_v28 = vor.u32 %v6404_v16, %v4957_v15  ;;  %v6402_v33 = vld [vmem:[%s10101_s1 + $0x5e4] sm:$0xf0]  ;;  %v4758_v34 = vor.u32 %v6354_v25, %v4757_v24  ;;  %v4749_v37 = vld [vmem:[%s10101_s1 + $0x450] sm:$0xf] }
  0x34   :  { %2499 = vmatpush.bf16.msrb.mxu0 %v4478_v29  ;;  %v6370_v29 = vld [vmem:[%s10101_s1 + $0x4e4] sm:$0xf0]  ;;  %v4949_v32 = vld [vmem:[%s10101_s1 + $0x5e0] sm:$0xf]  ;;  %v6352_v38 = vld [vmem:[%s10101_s1 + $0x454] sm:$0xf0] }
  0x35   :  { %2512 = vmatpush.bf16.msrb.mxu1 %v4542_v30  ;;  %v4885_v30 = vld [vmem:[%s10101_s1 + $0x560] sm:$0xf]  ;;  %v4813_v39 = vld [vmem:[%s10101_s1 + $0x4d0] sm:$0xf]  ;;  %v4950_v40 = vor.u32 %v6402_v33, %v4949_v32  ;;  %v6368_v41 = vld [vmem:[%s10101_s1 + $0x4d4] sm:$0xf0]  ;;  %v4750_v46 = vor.u32 %v6352_v38, %v4749_v37 }
  0x36   :  { %2525 = vmatpush.bf16.msrb.mxu2 %v4606_v31  ;;  %v6386_v31 = vld [vmem:[%s10101_s1 + $0x564] sm:$0xf0]  ;;  %v4877_v42 = vld [vmem:[%s10101_s1 + $0x550] sm:$0xf]  ;;  %v6400_v45 = vld [vmem:[%s10101_s1 + $0x5d4] sm:$0xf0] }
  0x37   :  { %2538 = vmatpush.bf16.msrb.mxu3 %v4670_v35  ;;  %v4822_v35 = vor.u32 %v6370_v29, %v4821_v27  ;;  %v4886_v36 = vor.u32 %v6386_v31, %v4885_v30  ;;  %v4941_v44 = vld [vmem:[%s10101_s1 + $0x5d0] sm:$0xf]  ;;  %v4741_v49 = vld [vmem:[%s10101_s1 + $0x440] sm:$0xf]  ;;  %v6350_v50 = vld [vmem:[%s10101_s1 + $0x444] sm:$0xf0] }
  0x38   :  { %2500 = vmatpush.bf16.msrb.mxu0 %v4470_v43  ;;  %v6384_v43 = vld [vmem:[%s10101_s1 + $0x554] sm:$0xf0]  ;;  %v4942_v56 = vor.u32 %v6400_v45, %v4941_v44  ;;  %v6366_v57 = vld [vmem:[%s10101_s1 + $0x4c4] sm:$0xf0]  ;;  %v4933_v60 = vld [vmem:[%s10101_s1 + $0x5c0] sm:$0xf] }
  0x39   :  { %2513 = vmatpush.bf16.msrb.mxu1 %v4534_v47  ;;  %v4814_v47 = vor.u32 %v6368_v41, %v4813_v39  ;;  %v6382_v59 = vld [vmem:[%s10101_s1 + $0x544] sm:$0xf0]  ;;  %v4733_v1 = vld [vmem:[%s10101_s1 + $0x430] sm:$0xf]  ;;  %v6364_v5 = vld [vmem:[%s10101_s1 + $0x4b4] sm:$0xf0] }
  0x3a   :  { %2526 = vmatpush.bf16.msrb.mxu2 %v4598_v48  ;;  %v4878_v48 = vor.u32 %v6384_v43, %v4877_v42  ;;  %v4797_v3 = vld [vmem:[%s10101_s1 + $0x4b0] sm:$0xf]  ;;  %v6380_v7 = vld [vmem:[%s10101_s1 + $0x534] sm:$0xf0]  ;;  %v4789_v15 = vld [vmem:[%s10101_s1 + $0x4a0] sm:$0xf] }
  0x3b   :  { %2539 = vmatpush.bf16.msrb.mxu3 %v4662_v52  ;;  %v4805_v52 = vld [vmem:[%s10101_s1 + $0x4c0] sm:$0xf]  ;;  %v4861_v6 = vld [vmem:[%s10101_s1 + $0x530] sm:$0xf]  ;;  %v4798_v11 = vor.u32 %v6364_v5, %v4797_v3  ;;  %v6394_v24 = vld [vmem:[%s10101_s1 + $0x5a4] sm:$0xf0] }
  0x3c   :  { %2501 = vmatpush.bf16.msrb.mxu0 %v4462_v58  ;;  %v4869_v58 = vld [vmem:[%s10101_s1 + $0x540] sm:$0xf]  ;;  %v4806_v63 = vor.u32 %v6366_v57, %v4805_v52  ;;  %v4925_v8 = vld [vmem:[%s10101_s1 + $0x5b0] sm:$0xf]  ;;  %v4862_v12 = vor.u32 %v6380_v7, %v4861_v6  ;;  %v6344_v30 = vld [vmem:[%s10101_s1 + $0x414] sm:$0xf0] }
  0x3d   :  { %2514 = vmatpush.bf16.msrb.mxu1 %v4526_v61  ;;  %v6398_v61 = vld [vmem:[%s10101_s1 + $0x5c4] sm:$0xf0]  ;;  %v4870_v0 = vor.u32 %v6382_v59, %v4869_v58  ;;  %v4717_v29 = vld [vmem:[%s10101_s1 + $0x410] sm:$0xf]  ;;  %v6360_v33 = vld [vmem:[%s10101_s1 + $0x494] sm:$0xf0] }
  0x3e   :  { %2527 = vmatpush.bf16.msrb.mxu2 %v4590_v62  ;;  %v4742_v62 = vor.u32 %v6350_v50, %v4741_v49  ;;  %v4934_v4 = vor.u32 %v6398_v61, %v4933_v60  ;;  %v4781_v31 = vld [vmem:[%s10101_s1 + $0x490] sm:$0xf]  ;;  %v6392_v37 = vld [vmem:[%s10101_s1 + $0x594] sm:$0xf0]  ;;  %v4718_v38 = vor.u32 %v6344_v30, %v4717_v29  ;;  %v4709_v39 = vld [vmem:[%s10101_s1 + $0x400] sm:$0xf] }
  0x3f   :  { %2540 = vmatpush.bf16.msrb.mxu3 %v4654_v2  ;;  %v6348_v2 = vld [vmem:[%s10101_s1 + $0x434] sm:$0xf0]  ;;  %v4782_v41 = vor.u32 %v6360_v33, %v4781_v31  ;;  %v4773_v43 = vld [vmem:[%s10101_s1 + $0x480] sm:$0xf]  ;;  %v6358_v44 = vld [vmem:[%s10101_s1 + $0x484] sm:$0xf0] }
  0x40   :  { %2502 = vmatpush.bf16.msrb.mxu0 %v4454_v9  ;;  %v6396_v9 = vld [vmem:[%s10101_s1 + $0x5b4] sm:$0xf0]  ;;  %v4734_v10 = vor.u32 %v6348_v2, %v4733_v1  ;;  %v4837_v45 = vld [vmem:[%s10101_s1 + $0x500] sm:$0xf]  ;;  %v6390_v49 = vld [vmem:[%s10101_s1 + $0x584] sm:$0xf0]  ;;  %v4774_v61 = vor.u32 %v6358_v44, %v4773_v43 }
  0x41   :  { %2515 = vmatpush.bf16.msrb.mxu1 %v4518_v13  ;;  %v4725_v13 = vld [vmem:[%s10101_s1 + $0x420] sm:$0xf]  ;;  %v4926_v16 = vor.u32 %v6396_v9, %v4925_v8  ;;  %v5021_v50 = vld [vmem:[%s10101_s1 + $0x670] sm:$0xf]  ;;  %v6420_v52 = vld [vmem:[%s10101_s1 + $0x674] sm:$0xf0] }
  0x42   :  { %2528 = vmatpush.bf16.msrb.mxu2 %v4582_v14  ;;  %v6346_v14 = vld [vmem:[%s10101_s1 + $0x424] sm:$0xf0]  ;;  %v6436_v58 = vld [vmem:[%s10101_s1 + $0x6f4] sm:$0xf0]  ;;  %v5149_v59 = vld [vmem:[%s10101_s1 + $0x770] sm:$0xf]  ;;  %v5022_v2 = vor.u32 %v6420_v52, %v5021_v50 }
  0x43   :  { %2541 = vmatpush.bf16.msrb.mxu3 %v4646_v17  ;;  %2503 = vmatmul.bf16.vlgmr.msrb.gmra.mxu0 %v7147_v53  ;;  %v6362_v17 = vld [vmem:[%s10101_s1 + $0x4a4] sm:$0xf0]  ;;  %v4726_v25 = vor.u32 %v6346_v14, %v4725_v13  ;;  %v6452_v60 = vld [vmem:[%s10101_s1 + $0x774] sm:$0xf0]  ;;  %v5013_v3 = vld [vmem:[%s10101_s1 + $0x660] sm:$0xf] }
  0x44   :  { %2547 = vmatpush.bf16.msra.mxu0 %v4766_v18  ;;  %2516 = vmatmul.bf16.vlgmr.msrb.gmra.mxu1 %v7151_v55  ;;  %v4853_v18 = vld [vmem:[%s10101_s1 + $0x520] sm:$0xf]  ;;  %v4790_v27 = vor.u32 %v6362_v17, %v4789_v15  ;;  %v5150_v6 = vor.u32 %v6452_v60, %v5149_v59  ;;  %v6418_v8 = vld [vmem:[%s10101_s1 + $0x664] sm:$0xf0]  ;;  %v7452_v31 = vld [vmem:[#allocation1 + $0x36] sm:$0xff] }
  0x45   :  { %2560 = vmatpush.bf16.msra.mxu1 %v4830_v19  ;;  %2529 = vmatmul.bf16.vlgmr.msrb.gmra.mxu2 %v7145_v51  ;;  %v6378_v19 = vld [vmem:[%s10101_s1 + $0x524] sm:$0xf0]  ;;  %v7409_v7 = vld [vmem:[#allocation1] sm:$0xff]  ;;  %v6412_v59 = vld [vmem:[%s10101_s1 + $0x634] sm:$0xf0] }
  0x46   :  { %2573 = vmatpush.bf16.msra.mxu2 %v4894_v23  ;;  %2542 = vmatmul.bf16.vlgmr.msrb.gmra.mxu3 %v7149_v54  ;;  %v4917_v23 = vld [vmem:[%s10101_s1 + $0x5a0] sm:$0xf]  ;;  %v7422_v13 = vld [vmem:[#allocation1 + $0x9] sm:$0xff] }
  0x47   :  { %2586 = vmatpush.bf16.msra.mxu3 %v4958_v28  ;;  %v4854_v28 = vor.u32 %v6378_v19, %v4853_v18  ;;  %v4918_v32 = vor.u32 %v6394_v24, %v4917_v23  ;;  %v5077_v9 = vld [vmem:[%s10101_s1 + $0x6e0] sm:$0xf]  ;;  %v6450_v15 = vld [vmem:[%s10101_s1 + $0x764] sm:$0xf0]  ;;  %v5005_v19 = vld [vmem:[%s10101_s1 + $0x650] sm:$0xf]  ;;  %v5014_v24 = vor.u32 %v6418_v8, %v5013_v3 }
  0x48   :  { %2548 = vmatpush.bf16.msra.mxu0 %v4758_v34  ;;  %v4845_v34 = vld [vmem:[%s10101_s1 + $0x510] sm:$0xf]  ;;  %v5141_v14 = vld [vmem:[%s10101_s1 + $0x760] sm:$0xf]  ;;  %v6466_v18 = vld [vmem:[%s10101_s1 + $0x7e4] sm:$0xf0] }
  0x49   :  { %2561 = vmatpush.bf16.msra.mxu1 %v4822_v35  ;;  %v6376_v35 = vld [vmem:[%s10101_s1 + $0x514] sm:$0xf0]  ;;  %v5142_v30 = vor.u32 %v6450_v15, %v5141_v14  ;;  %v7456_v33 = vld [vmem:[#allocation1 + $0x3f] sm:$0xff]  ;;  %v6414_v43 = vld [vmem:[%s10101_s1 + $0x644] sm:$0xf0] }
  0x4a   :  { %2574 = vmatpush.bf16.msra.mxu2 %v4886_v36  ;;  %v4909_v36 = vld [vmem:[%s10101_s1 + $0x590] sm:$0xf]  ;;  %v4846_v42 = vor.u32 %v6376_v35, %v4845_v34  ;;  %v7433_v17 = vld [vmem:[#allocation1 + $0x1b] sm:$0xff]  ;;  %v6462_v50 = vld [vmem:[%s10101_s1 + $0x7c4] sm:$0xf0] }
  0x4b   :  { %2587 = vmatpush.bf16.msra.mxu3 %v4950_v40  ;;  %v6342_v40 = vld [vmem:[%s10101_s1 + $0x404] sm:$0xf0]  ;;  %v6416_v23 = vld [vmem:[%s10101_s1 + $0x654] sm:$0xf0]  ;;  %v5133_v35 = vld [vmem:[%s10101_s1 + $0x750] sm:$0xf] }
  0x4c   :  { %2549 = vmatpush.bf16.msra.mxu0 %v4750_v46  ;;  %v4910_v46 = vor.u32 %v6392_v37, %v4909_v36  ;;  %v4710_v57 = vor.u32 %v6342_v40, %v4709_v39  ;;  %v6448_v36 = vld [vmem:[%s10101_s1 + $0x754] sm:$0xf0]  ;;  %v5197_v37 = vld [vmem:[%s10101_s1 + $0x7d0] sm:$0xf]  ;;  %v5006_v39 = vor.u32 %v6416_v23, %v5005_v19  ;;  %v5061_v44 = vld [vmem:[%s10101_s1 + $0x6c0] sm:$0xf] }
  0x4d   :  { %2562 = vmatpush.bf16.msra.mxu1 %v4814_v47  ;;  %v6374_v47 = vld [vmem:[%s10101_s1 + $0x504] sm:$0xf0]  ;;  %v5053_v60 = vld [vmem:[%s10101_s1 + $0x6b0] sm:$0xf]  ;;  %v5109_v14 = vld [vmem:[%s10101_s1 + $0x720] sm:$0xf] }
  0x4e   :  { %2575 = vmatpush.bf16.msra.mxu2 %v4878_v48  ;;  %v4901_v48 = vld [vmem:[%s10101_s1 + $0x580] sm:$0xf]  ;;  %v6410_v8 = vld [vmem:[%s10101_s1 + $0x624] sm:$0xf0] }
  0x4f   :  { %2588 = vmatpush.bf16.msra.mxu3 %v4942_v56  ;;  %v5085_v56 = vld [vmem:[%s10101_s1 + $0x6f0] sm:$0xf]  ;;  %v4902_v1 = vor.u32 %v6390_v49, %v4901_v48  ;;  %v6446_v48 = vld [vmem:[%s10101_s1 + $0x744] sm:$0xf0]  ;;  %v5189_v49 = vld [vmem:[%s10101_s1 + $0x7c0] sm:$0xf] }
  0x50   :  { %2550 = vmatpush.bf16.msra.mxu0 %v4742_v62  ;;  %v4838_v62 = vor.u32 %v6374_v47, %v4837_v45  ;;  %v5086_v5 = vor.u32 %v6436_v58, %v5085_v56  ;;  %v5125_v47 = vld [vmem:[%s10101_s1 + $0x740] sm:$0xf]  ;;  %v4989_v58 = vld [vmem:[%s10101_s1 + $0x630] sm:$0xf]  ;;  %v6442_v15 = vld [vmem:[%s10101_s1 + $0x724] sm:$0xf0] }
  0x51   :  { %2563 = vmatpush.bf16.msra.mxu1 %v4806_v63  ;;  %v5213_v63 = vld [vmem:[%s10101_s1 + $0x7f0] sm:$0xf]  ;;  %v4990_v3 = vor.u32 %v6412_v59, %v4989_v58  ;;  %v6500_v59 = vld [vmem:[%s10101_s1 + $0x8f4] sm:$0xf0] }
  0x52   :  { %2576 = vmatpush.bf16.msra.mxu2 %v4870_v0  ;;  %v6468_v0 = vld [vmem:[%s10101_s1 + $0x7f4] sm:$0xf0] }
  0x53   :  { %2589 = vmatpush.bf16.msra.mxu3 %v4934_v4  ;;  %v23_v4 = vld [vmem:[%s10102_s0 + $0x10] sm:$0xff] }
  0x54   :  { %2551 = vmatpush.bf16.msra.mxu0 %v4734_v10  ;;  %v6434_v10 = vld [vmem:[%s10101_s1 + $0x6e4] sm:$0xf0] }
  0x55   :  { %2564 = vmatpush.bf16.msra.mxu1 %v4798_v11  ;;  %v5214_v11 = vor.u32 %v6468_v0, %v5213_v63  ;;  %v5078_v29 = vor.u32 %v6434_v10, %v5077_v9  ;;  %v5117_v63 = vld [vmem:[%s10101_s1 + $0x730] sm:$0xf]  ;;  %v6444_v0 = vld [vmem:[%s10101_s1 + $0x734] sm:$0xf0]  ;;  %v5045_v9 = vld [vmem:[%s10101_s1 + $0x6a0] sm:$0xf] }
  0x56   :  { %2577 = vmatpush.bf16.msra.mxu2 %v4862_v12  ;;  %v7420_v12 = vld [vmem:[#allocation1 + $0x12] sm:$0xff] }
  0x57   :  { %2590 = vmatpush.bf16.msra.mxu3 %v4926_v16  ;;  %v5205_v16 = vld [vmem:[%s10101_s1 + $0x7e0] sm:$0xf] }
  0x58   :  { %2552 = vmatpush.bf16.msra.mxu0 %v4726_v25  ;;  %v5069_v25 = vld [vmem:[%s10101_s1 + $0x6d0] sm:$0xf]  ;;  %v5206_v34 = vor.u32 %v6466_v18, %v5205_v16  ;;  %v5173_v16 = vld [vmem:[%s10101_s1 + $0x7a0] sm:$0xf]  ;;  %v6458_v18 = vld [vmem:[%s10101_s1 + $0x7a4] sm:$0xf0] }
  0x59   :  { %2565 = vmatpush.bf16.msra.mxu1 %v4790_v27  ;;  %v6432_v27 = vld [vmem:[%s10101_s1 + $0x6d4] sm:$0xf0] }
  0x5a   :  { %2578 = vmatpush.bf16.msra.mxu2 %v4854_v28  ;;  %v7450_v28 = vld [vmem:[#allocation1 + $0x24] sm:$0xff]  ;;  %v5070_v40 = vor.u32 %v6432_v27, %v5069_v25  ;;  %v4973_v25 = vld [vmem:[%s10101_s1 + $0x610] sm:$0xf]  ;;  %v6408_v27 = vld [vmem:[%s10101_s1 + $0x614] sm:$0xf0] }
  0x5b   :  { %2591 = vmatpush.bf16.msra.mxu3 %v4918_v32  ;;  %v7454_v32 = vld [vmem:[#allocation1 + $0x2d] sm:$0xff] }
  0x5c   :  { %2553 = vmatpush.bf16.msra.mxu0 %v4718_v38  ;;  %444 = vst [vmem:[#allocation1] ss:$9 sm:$0xff] %v23_v4  ;;  %v6464_v38 = vld [vmem:[%s10101_s1 + $0x7d4] sm:$0xf0] }
  0x5d   :  { %2566 = vmatpush.bf16.msra.mxu1 %v4782_v41  ;;  %v5134_v41 = vor.u32 %v6448_v36, %v5133_v35  ;;  %v5198_v45 = vor.u32 %v6464_v38, %v5197_v37  ;;  %v5101_v35 = vld [vmem:[%s10101_s1 + $0x710] sm:$0xf]  ;;  %v6440_v36 = vld [vmem:[%s10101_s1 + $0x714] sm:$0xf0] }
  0x5e   :  { %2579 = vmatpush.bf16.msra.mxu2 %v4846_v42  ;;  %v4997_v42 = vld [vmem:[%s10101_s1 + $0x640] sm:$0xf]  ;;  %v5165_v37 = vld [vmem:[%s10101_s1 + $0x790] sm:$0xf]  ;;  %v6456_v38 = vld [vmem:[%s10101_s1 + $0x794] sm:$0xf0] }
  0x5f   :  { %2592 = vmatpush.bf16.msra.mxu3 %v4910_v46  ;;  %v6430_v46 = vld [vmem:[%s10101_s1 + $0x6c4] sm:$0xf0]  ;;  %v4998_v52 = vor.u32 %v6414_v43, %v4997_v42  ;;  %v5102_v43 = vor.u32 %v6440_v36, %v5101_v35  ;;  %v5389_v35 = vld [vmem:[%s10101_s1 + $0x950] sm:$0xf]  ;;  %v6512_v36 = vld [vmem:[%s10101_s1 + $0x954] sm:$0xf0] }
  0x60   :  { %2554 = vmatpush.bf16.msra.mxu0 %v4710_v57  ;;  %v5062_v56 = vor.u32 %v6430_v46, %v5061_v44  ;;  %v5126_v57 = vor.u32 %v6446_v48, %v5125_v47  ;;  %v5029_v44 = vld [vmem:[%s10101_s1 + $0x680] sm:$0xf]  ;;  %v5166_v47 = vor.u32 %v6456_v38, %v5165_v37  ;;  %v6438_v48 = vld [vmem:[%s10101_s1 + $0x704] sm:$0xf0]  ;;  %v5453_v37 = vld [vmem:[%s10101_s1 + $0x9d0] sm:$0xf] }
  0x61   :  { %2567 = vmatpush.bf16.msra.mxu1 %v4774_v61  ;;  %v5190_v61 = vor.u32 %v6462_v50, %v5189_v49  ;;  %v5093_v46 = vld [vmem:[%s10101_s1 + $0x700] sm:$0xf]  ;;  %v6454_v50 = vld [vmem:[%s10101_s1 + $0x784] sm:$0xf0]  ;;  %v6528_v38 = vld [vmem:[%s10101_s1 + $0x9d4] sm:$0xf0] }
  0x62   :  { %2580 = vmatpush.bf16.msra.mxu2 %v4838_v62  ;;  %v6428_v62 = vld [vmem:[%s10101_s1 + $0x6b4] sm:$0xf0]  ;;  %v5157_v49 = vld [vmem:[%s10101_s1 + $0x780] sm:$0xf] }
  0x63   :  { %2593 = vmatpush.bf16.msra.mxu3 %v4902_v1  ;;  %2555 = vmatmul.bf16.vlgmr.msra.gmra.mxu0 %v7409_v7  ;;  %v5181_v1 = vld [vmem:[%s10101_s1 + $0x7b0] sm:$0xf]  ;;  %v5054_v4 = vor.u32 %v6428_v62, %v5053_v60 }
  0x64   :  { %2599 = vmatpush.bf16.msrb.mxu0 %v5022_v2  ;;  %2568 = vmatmul.bf16.vlgmr.msra.gmra.mxu1 %v7422_v13  ;;  %v6460_v2 = vld [vmem:[%s10101_s1 + $0x7b4] sm:$0xf0]  ;;  %v5405_v60 = vld [vmem:[%s10101_s1 + $0x970] sm:$0xf] }
  0x65   :  { %2612 = vmatpush.bf16.msrb.mxu1 %v5086_v5  ;;  %2581 = vmatmul.bf16.vlgmr.msra.gmra.mxu2 %v7420_v12  ;;  %v5118_v5 = vor.u32 %v6444_v0, %v5117_v63  ;;  %v5182_v10 = vor.u32 %v6460_v2, %v5181_v1  ;;  %v5094_v63 = vor.u32 %v6438_v48, %v5093_v46  ;;  %v5469_v0 = vld [vmem:[%s10101_s1 + $0x9f0] sm:$0xf]  ;;  %v6532_v1 = vld [vmem:[%s10101_s1 + $0x9f4] sm:$0xf0]  ;;  %v6494_v46 = vld [vmem:[%s10101_s1 + $0x8c4] sm:$0xf0] }
  0x66   :  { %2625 = vmatpush.bf16.msrb.mxu2 %v5150_v6  ;;  %2594 = vmatmul.bf16.vlgmr.msra.gmra.mxu3 %v7433_v17  ;;  %v4981_v6 = vld [vmem:[%s10101_s1 + $0x620] sm:$0xf]  ;;  %v5158_v2 = vor.u32 %v6454_v50, %v5157_v49  ;;  %v6510_v48 = vld [vmem:[%s10101_s1 + $0x944] sm:$0xf0] }
  0x67   :  { %2638 = vmatpush.bf16.msrb.mxu3 %v5214_v11  ;;  %v6426_v11 = vld [vmem:[%s10101_s1 + $0x6a4] sm:$0xf0]  ;;  %v4982_v19 = vor.u32 %v6410_v8, %v4981_v6  ;;  %v5269_v6 = vld [vmem:[%s10101_s1 + $0x860] sm:$0xf] }
  0x68   :  { %2600 = vmatpush.bf16.msrb.mxu0 %v5014_v24  ;;  %v5046_v23 = vor.u32 %v6426_v11, %v5045_v9  ;;  %v5110_v24 = vor.u32 %v6442_v15, %v5109_v14  ;;  %v6482_v8 = vld [vmem:[%s10101_s1 + $0x864] sm:$0xf0]  ;;  %v5333_v9 = vld [vmem:[%s10101_s1 + $0x8e0] sm:$0xf] }
  0x69   :  { %2613 = vmatpush.bf16.msrb.mxu1 %v5078_v29  ;;  %v5037_v29 = vld [vmem:[%s10101_s1 + $0x690] sm:$0xf]  ;;  %v6498_v11 = vld [vmem:[%s10101_s1 + $0x8e4] sm:$0xf0]  ;;  %v5397_v14 = vld [vmem:[%s10101_s1 + $0x960] sm:$0xf] }
  0x6a   :  { %2626 = vmatpush.bf16.msrb.mxu2 %v5142_v30  ;;  %v5174_v30 = vor.u32 %v6458_v18, %v5173_v16  ;;  %v6514_v15 = vld [vmem:[%s10101_s1 + $0x964] sm:$0xf0]  ;;  %v5461_v16 = vld [vmem:[%s10101_s1 + $0x9e0] sm:$0xf] }
  0x6b   :  { %2639 = vmatpush.bf16.msrb.mxu3 %v5206_v34  ;;  %v6424_v34 = vld [vmem:[%s10101_s1 + $0x694] sm:$0xf0]  ;;  %v6530_v18 = vld [vmem:[%s10101_s1 + $0x9e4] sm:$0xf0]  ;;  %v5445_v49 = vld [vmem:[%s10101_s1 + $0x9c0] sm:$0xf] }
  0x6c   :  { %2601 = vmatpush.bf16.msrb.mxu0 %v5006_v39  ;;  %v4974_v39 = vor.u32 %v6408_v27, %v4973_v25  ;;  %v5038_v42 = vor.u32 %v6424_v34, %v5037_v29  ;;  %v5261_v25 = vld [vmem:[%s10101_s1 + $0x850] sm:$0xf]  ;;  %v6480_v27 = vld [vmem:[%s10101_s1 + $0x854] sm:$0xf0]  ;;  %v6526_v50 = vld [vmem:[%s10101_s1 + $0x9c4] sm:$0xf0] }
  0x6d   :  { %2614 = vmatpush.bf16.msrb.mxu1 %v5070_v40  ;;  %v4965_v40 = vld [vmem:[%s10101_s1 + $0x600] sm:$0xf]  ;;  %v5325_v29 = vld [vmem:[%s10101_s1 + $0x8d0] sm:$0xf]  ;;  %v6496_v34 = vld [vmem:[%s10101_s1 + $0x8d4] sm:$0xf0] }
  0x6e   :  { %2627 = vmatpush.bf16.msrb.mxu2 %v5134_v41  ;;  %v6406_v41 = vld [vmem:[%s10101_s1 + $0x604] sm:$0xf0] }
  0x6f   :  { %2640 = vmatpush.bf16.msrb.mxu3 %v5198_v45  ;;  %v6422_v45 = vld [vmem:[%s10101_s1 + $0x684] sm:$0xf0]  ;;  %v4966_v58 = vor.u32 %v6406_v41, %v4965_v40  ;;  %v5326_v40 = vor.u32 %v6496_v34, %v5325_v29  ;;  %v5390_v41 = vor.u32 %v6512_v36, %v5389_v35  ;;  %v5293_v29 = vld [vmem:[%s10101_s1 + $0x890] sm:$0xf]  ;;  %v6488_v34 = vld [vmem:[%s10101_s1 + $0x894] sm:$0xf0] }
  0x70   :  { %2602 = vmatpush.bf16.msrb.mxu0 %v4998_v52  ;;  %v5277_v52 = vld [vmem:[%s10101_s1 + $0x870] sm:$0xf]  ;;  %v5030_v62 = vor.u32 %v6422_v45, %v5029_v44  ;;  %v5317_v44 = vld [vmem:[%s10101_s1 + $0x8c0] sm:$0xf]  ;;  %v5454_v45 = vor.u32 %v6528_v38, %v5453_v37  ;;  %v6504_v36 = vld [vmem:[%s10101_s1 + $0x914] sm:$0xf0] }
  0x71   :  { %2615 = vmatpush.bf16.msrb.mxu1 %v5062_v56  ;;  %v6484_v56 = vld [vmem:[%s10101_s1 + $0x874] sm:$0xf0]  ;;  %v5357_v35 = vld [vmem:[%s10101_s1 + $0x910] sm:$0xf] }
  0x72   :  { %2628 = vmatpush.bf16.msrb.mxu2 %v5126_v57  ;;  %v5341_v57 = vld [vmem:[%s10101_s1 + $0x8f0] sm:$0xf]  ;;  %v6520_v38 = vld [vmem:[%s10101_s1 + $0x994] sm:$0xf0] }
  0x73   :  { %2641 = vmatpush.bf16.msrb.mxu3 %v5190_v61  ;;  %v6516_v61 = vld [vmem:[%s10101_s1 + $0x974] sm:$0xf0]  ;;  %v5421_v37 = vld [vmem:[%s10101_s1 + $0x990] sm:$0xf] }
  0x74   :  { %2603 = vmatpush.bf16.msrb.mxu0 %v4990_v3  ;;  %v5278_v3 = vor.u32 %v6484_v56, %v5277_v52  ;;  %v5318_v56 = vor.u32 %v6494_v46, %v5317_v44  ;;  %v5285_v44 = vld [vmem:[%s10101_s1 + $0x880] sm:$0xf] }
  0x75   :  { %2616 = vmatpush.bf16.msrb.mxu1 %v5054_v4  ;;  %v5342_v4 = vor.u32 %v6500_v59, %v5341_v57  ;;  %v6476_v59 = vld [vmem:[%s10101_s1 + $0x834] sm:$0xf0]  ;;  %v5349_v46 = vld [vmem:[%s10101_s1 + $0x900] sm:$0xf] }
  0x76   :  { %2629 = vmatpush.bf16.msrb.mxu2 %v5118_v5  ;;  %v5406_v5 = vor.u32 %v6516_v61, %v5405_v60  ;;  %v5309_v60 = vld [vmem:[%s10101_s1 + $0x8b0] sm:$0xf]  ;;  %v5446_v61 = vor.u32 %v6526_v50, %v5445_v49  ;;  %v5413_v49 = vld [vmem:[%s10101_s1 + $0x980] sm:$0xf]  ;;  %v6518_v50 = vld [vmem:[%s10101_s1 + $0x984] sm:$0xf0] }
  0x77   :  { %2642 = vmatpush.bf16.msrb.mxu3 %v5182_v10  ;;  %v5470_v10 = vor.u32 %v6532_v1, %v5469_v0  ;;  %v6508_v0 = vld [vmem:[%s10101_s1 + $0x934] sm:$0xf0]  ;;  %v5437_v1 = vld [vmem:[%s10101_s1 + $0x9b0] sm:$0xf] }
  0x78   :  { %2604 = vmatpush.bf16.msrb.mxu0 %v4982_v19  ;;  %v5270_v19 = vor.u32 %v6482_v8, %v5269_v6  ;;  %v5237_v6 = vld [vmem:[%s10101_s1 + $0x820] sm:$0xf]  ;;  %v6474_v8 = vld [vmem:[%s10101_s1 + $0x824] sm:$0xf0] }
  0x79   :  { %2617 = vmatpush.bf16.msrb.mxu1 %v5046_v23  ;;  %v5334_v23 = vor.u32 %v6498_v11, %v5333_v9  ;;  %v5301_v9 = vld [vmem:[%s10101_s1 + $0x8a0] sm:$0xf]  ;;  %v6490_v11 = vld [vmem:[%s10101_s1 + $0x8a4] sm:$0xf0] }
  0x7a   :  { %2630 = vmatpush.bf16.msrb.mxu2 %v5110_v24  ;;  %v5398_v24 = vor.u32 %v6514_v15, %v5397_v14  ;;  %v5365_v14 = vld [vmem:[%s10101_s1 + $0x920] sm:$0xf]  ;;  %v6506_v15 = vld [vmem:[%s10101_s1 + $0x924] sm:$0xf0] }
  0x7b   :  { %2643 = vmatpush.bf16.msrb.mxu3 %v5174_v30  ;;  %v5462_v30 = vor.u32 %v6530_v18, %v5461_v16  ;;  %v5429_v16 = vld [vmem:[%s10101_s1 + $0x9a0] sm:$0xf]  ;;  %v6522_v18 = vld [vmem:[%s10101_s1 + $0x9a4] sm:$0xf0] }
  0x7c   :  { %2605 = vmatpush.bf16.msrb.mxu0 %v4974_v39  ;;  %v5262_v39 = vor.u32 %v6480_v27, %v5261_v25  ;;  %v5229_v25 = vld [vmem:[%s10101_s1 + $0x810] sm:$0xf]  ;;  %v6472_v27 = vld [vmem:[%s10101_s1 + $0x814] sm:$0xf0] }
  0x7d   :  { %2618 = vmatpush.bf16.msrb.mxu1 %v5038_v42  ;;  %v5253_v42 = vld [vmem:[%s10101_s1 + $0x840] sm:$0xf] }
  0x7e   :  { %2631 = vmatpush.bf16.msrb.mxu2 %v5102_v43  ;;  %v6478_v43 = vld [vmem:[%s10101_s1 + $0x844] sm:$0xf0] }
  0x7f   :  { %2644 = vmatpush.bf16.msrb.mxu3 %v5166_v47  ;;  %v5381_v47 = vld [vmem:[%s10101_s1 + $0x940] sm:$0xf]  ;;  %v5254_v52 = vor.u32 %v6478_v43, %v5253_v42  ;;  %v5294_v42 = vor.u32 %v6488_v34, %v5293_v29  ;;  %v5358_v43 = vor.u32 %v6504_v36, %v5357_v35  ;;  %v5517_v29 = vld [vmem:[%s10101_s1 + $0xa50] sm:$0xf]  ;;  %v6560_v36 = vld [vmem:[%s10101_s1 + $0xad4] sm:$0xf0] }
  0x80   :  { %2606 = vmatpush.bf16.msrb.mxu0 %v4966_v58  ;;  %v5382_v57 = vor.u32 %v6510_v48, %v5381_v47  ;;  %v5245_v58 = vld [vmem:[%s10101_s1 + $0x830] sm:$0xf]  ;;  %v5422_v47 = vor.u32 %v6520_v38, %v5421_v37  ;;  %v6502_v48 = vld [vmem:[%s10101_s1 + $0x904] sm:$0xf0] }
  0x81   :  { %2619 = vmatpush.bf16.msrb.mxu1 %v5030_v62  ;;  %v6492_v62 = vld [vmem:[%s10101_s1 + $0x8b4] sm:$0xf0]  ;;  %v5581_v35 = vld [vmem:[%s10101_s1 + $0xad0] sm:$0xf]  ;;  %v7861_v37 = vld [vmem:[#allocation1 + $0x24] sm:$0xff] }
  0x82   :  { %2632 = vmatpush.bf16.msrb.mxu2 %v5094_v63  ;;  %v5373_v63 = vld [vmem:[%s10101_s1 + $0x930] sm:$0xf] }
  0x83   :  { %2645 = vmatpush.bf16.msrb.mxu3 %v5158_v2  ;;  %2607 = vmatmul.bf16.vlgmr.msrb.gmra.mxu0 %v7450_v28  ;;  %v6524_v2 = vld [vmem:[%s10101_s1 + $0x9b4] sm:$0xf0] }
  0x84   :  { %2651 = vmatpush.bf16.msra.mxu0 %v5278_v3  ;;  %2620 = vmatmul.bf16.vlgmr.msrb.gmra.mxu1 %v7454_v32  ;;  %v5246_v3 = vor.u32 %v6476_v59, %v5245_v58  ;;  %v6564_v59 = vld [vmem:[%s10101_s1 + $0xaf4] sm:$0xf0] }
  0x85   :  { %2664 = vmatpush.bf16.msra.mxu1 %v5342_v4  ;;  %2633 = vmatmul.bf16.vlgmr.msrb.gmra.mxu2 %v7452_v31  ;;  %v5310_v4 = vor.u32 %v6492_v62, %v5309_v60  ;;  %v5661_v60 = vld [vmem:[%s10101_s1 + $0xb70] sm:$0xf] }
  0x86   :  { %2677 = vmatpush.bf16.msra.mxu2 %v5406_v5  ;;  %2646 = vmatmul.bf16.vlgmr.msrb.gmra.mxu3 %v7456_v33  ;;  %v5374_v5 = vor.u32 %v6508_v0, %v5373_v63  ;;  %v5350_v63 = vor.u32 %v6502_v48, %v5349_v46  ;;  %v5725_v0 = vld [vmem:[%s10101_s1 + $0xbf0] sm:$0xf] }
  0x87   :  { %2690 = vmatpush.bf16.msra.mxu3 %v5470_v10  ;;  %v5438_v10 = vor.u32 %v6524_v2, %v5437_v1  ;;  %v6596_v1 = vld [vmem:[%s10101_s1 + $0xbf4] sm:$0xf0]  ;;  %v5414_v2 = vor.u32 %v6518_v50, %v5413_v49  ;;  %v5709_v46 = vld [vmem:[%s10101_s1 + $0xbd0] sm:$0xf]  ;;  %v5582_v49 = vor.u32 %v6560_v36, %v5581_v35 }
  0x88   :  { %2652 = vmatpush.bf16.msra.mxu0 %v5270_v19  ;;  %v5238_v19 = vor.u32 %v6474_v8, %v5237_v6 }
  0x89   :  { %2665 = vmatpush.bf16.msra.mxu1 %v5334_v23  ;;  %v5302_v23 = vor.u32 %v6490_v11, %v5301_v9  ;;  %v7820_v9 = vld [vmem:[#allocation1] sm:$0xff] }
  0x8a   :  { %2678 = vmatpush.bf16.msra.mxu2 %v5398_v24  ;;  %v5366_v24 = vor.u32 %v6506_v15, %v5365_v14  ;;  %v5589_v11 = vld [vmem:[%s10101_s1 + $0xae0] sm:$0xf]  ;;  %v6562_v14 = vld [vmem:[%s10101_s1 + $0xae4] sm:$0xf0]  ;;  %v5726_v15 = vor.u32 %v6596_v1, %v5725_v0  ;;  %v5501_v1 = vld [vmem:[%s10101_s1 + $0xa30] sm:$0xf] }
  0x8b   :  { %2691 = vmatpush.bf16.msra.mxu3 %v5462_v30  ;;  %v5430_v30 = vor.u32 %v6522_v18, %v5429_v16  ;;  %v7831_v16 = vld [vmem:[#allocation1 + $0x12] sm:$0xff]  ;;  %v7833_v18 = vld [vmem:[#allocation1 + $0x9] sm:$0xff]  ;;  %v5590_v38 = vor.u32 %v6562_v14, %v5589_v11  ;;  %v417_v14 = vld [vmem:[%s10103_s2] sm:$0x3] }
  0x8c   :  { %2653 = vmatpush.bf16.msra.mxu0 %v5262_v39  ;;  %v5230_v39 = vor.u32 %v6472_v27, %v5229_v25  ;;  %v7844_v25 = vld [vmem:[#allocation1 + $0x1b] sm:$0xff]  ;;  %v6594_v27 = vld [vmem:[%s10101_s1 + $0xbe4] sm:$0xf0]  ;;  %v419_v35 = vperm.slane %v417_v14, 0 }
  0x8d   :  { %2666 = vmatpush.bf16.msra.mxu1 %v5326_v40  ;;  %v5221_v40 = vld [vmem:[%s10101_s1 + $0x800] sm:$0xf]  ;;  %v6572_v11 = vld [vmem:[%s10101_s1 + $0xb34] sm:$0xf0] }
  0x8e   :  { %2679 = vmatpush.bf16.msra.mxu2 %v5390_v41  ;;  %v6470_v41 = vld [vmem:[%s10101_s1 + $0x804] sm:$0xf0] }
  0x8f   :  { %2692 = vmatpush.bf16.msra.mxu3 %v5454_v45  ;;  %v6486_v45 = vld [vmem:[%s10101_s1 + $0x884] sm:$0xf0]  ;;  %v5222_v58 = vor.u32 %v6470_v41, %v5221_v40  ;;  %v7863_v40 = vld [vmem:[#allocation1 + $0x36] sm:$0xff]  ;;  %v7865_v41 = vld [vmem:[#allocation1 + $0x2d] sm:$0xff] }
  0x90   :  { %2654 = vmatpush.bf16.msra.mxu0 %v5254_v52  ;;  %v5533_v52 = vld [vmem:[%s10101_s1 + $0xa70] sm:$0xf]  ;;  %v5286_v62 = vor.u32 %v6486_v45, %v5285_v44  ;;  %v6576_v45 = vld [vmem:[%s10101_s1 + $0xb54] sm:$0xf0] }
  0x91   :  { %2667 = vmatpush.bf16.msra.mxu1 %v5318_v56  ;;  %v6548_v56 = vld [vmem:[%s10101_s1 + $0xa74] sm:$0xf0]  ;;  %v5645_v44 = vld [vmem:[%s10101_s1 + $0xb50] sm:$0xf] }
  0x92   :  { %2680 = vmatpush.bf16.msra.mxu2 %v5382_v57  ;;  %v5597_v57 = vld [vmem:[%s10101_s1 + $0xaf0] sm:$0xf]  ;;  %v5646_v50 = vor.u32 %v6576_v45, %v5645_v44  ;;  %v5685_v44 = vld [vmem:[%s10101_s1 + $0xba0] sm:$0xf]  ;;  %v6586_v45 = vld [vmem:[%s10101_s1 + $0xba4] sm:$0xf0] }
  0x93   :  { %2693 = vmatpush.bf16.msra.mxu3 %v5446_v61  ;;  %v6580_v61 = vld [vmem:[%s10101_s1 + $0xb74] sm:$0xf0]  ;;  %v5598_v6 = vor.u32 %v6564_v59, %v5597_v57  ;;  %v5573_v57 = vld [vmem:[%s10101_s1 + $0xac0] sm:$0xf]  ;;  %v6558_v59 = vld [vmem:[%s10101_s1 + $0xac4] sm:$0xf0] }
  0x94   :  { %2655 = vmatpush.bf16.msra.mxu0 %v5246_v3  ;;  %v5534_v3 = vor.u32 %v6548_v56, %v5533_v52  ;;  %v5662_v8 = vor.u32 %v6580_v61, %v5661_v60  ;;  %v5509_v52 = vld [vmem:[%s10101_s1 + $0xa40] sm:$0xf]  ;;  %v6542_v56 = vld [vmem:[%s10101_s1 + $0xa44] sm:$0xf0] }
  0x95   :  { %2668 = vmatpush.bf16.msra.mxu1 %v5310_v4  ;;  %v5525_v4 = vld [vmem:[%s10101_s1 + $0xa60] sm:$0xf]  ;;  %v6574_v61 = vld [vmem:[%s10101_s1 + $0xb44] sm:$0xf0]  ;;  %v5510_v0 = vor.u32 %v6542_v56, %v5509_v52  ;;  %v6536_v52 = vld [vmem:[%s10101_s1 + $0xa14] sm:$0xf0] }
  0x96   :  { %2681 = vmatpush.bf16.msra.mxu2 %v5374_v5  ;;  %v24_v5 = vld [vmem:[%s10102_s0 + $0x18] sm:$0x1]  ;;  %v5637_v60 = vld [vmem:[%s10101_s1 + $0xb40] sm:$0xf]  ;;  %v5549_v56 = vld [vmem:[%s10101_s1 + $0xa90] sm:$0xf] }
  0x97   :  { %2694 = vmatpush.bf16.msra.mxu3 %v5438_v10  ;;  %v6546_v10 = vld [vmem:[%s10101_s1 + $0xa64] sm:$0xf0] }
  0x98   :  { %2656 = vmatpush.bf16.msra.mxu0 %v5238_v19  ;;  %v5653_v19 = vld [vmem:[%s10101_s1 + $0xb60] sm:$0xf]  ;;  %v5526_v34 = vor.u32 %v6546_v10, %v5525_v4  ;;  %v6540_v4 = vld [vmem:[%s10101_s1 + $0xa34] sm:$0xf0]  ;;  %v5629_v10 = vld [vmem:[%s10101_s1 + $0xb30] sm:$0xf] }
  0x99   :  { %2669 = vmatpush.bf16.msra.mxu1 %v5302_v23  ;;  %v6578_v23 = vld [vmem:[%s10101_s1 + $0xb64] sm:$0xf0] }
  0x9a   :  { %2682 = vmatpush.bf16.msra.mxu2 %v5366_v24  ;;  %v5717_v24 = vld [vmem:[%s10101_s1 + $0xbe0] sm:$0xf] }
  0x9b   :  { %2695 = vmatpush.bf16.msra.mxu3 %v5430_v30  ;;  %v6544_v30 = vld [vmem:[%s10101_s1 + $0xa54] sm:$0xf0] }
  0x9c   :  { %2657 = vmatpush.bf16.msra.mxu0 %v5230_v39  ;;  %v5654_v39 = vor.u32 %v6578_v23, %v5653_v19  ;;  %v5518_v48 = vor.u32 %v6544_v30, %v5517_v29  ;;  %v6588_v19 = vld [vmem:[%s10101_s1 + $0xbb4] sm:$0xf0]  ;;  %v5502_v23 = vor.u32 %v6540_v4, %v5501_v1  ;;  %v5630_v29 = vor.u32 %v6572_v11, %v5629_v10  ;;  %v6538_v30 = vld [vmem:[%s10101_s1 + $0xa24] sm:$0xf0]  ;;  %v5605_v11 = vld [vmem:[%s10101_s1 + $0xb00] sm:$0xf] }
  0x9d   :  { %2670 = vmatpush.bf16.msra.mxu1 %v5294_v42  ;;  %v7867_v42 = vld [vmem:[#allocation1 + $0x3f] sm:$0xff]  ;;  %v6534_v4 = vld [vmem:[%s10101_s1 + $0xa04] sm:$0xf0] }
  0x9e   :  { %2683 = vmatpush.bf16.msra.mxu2 %v5358_v43  ;;  %v5718_v43 = vor.u32 %v6594_v27, %v5717_v24  ;;  %454 = vst [vmem:[#allocation1] ss:$9 sm:$0xff] %v24_v5  ;;  %v5565_v5 = vld [vmem:[%s10101_s1 + $0xab0] sm:$0xf]  ;;  %v5493_v24 = vld [vmem:[%s10101_s1 + $0xa20] sm:$0xf] }
  0x9f   :  { %2696 = vmatpush.bf16.msra.mxu3 %v5422_v47  ;;  %v6592_v47 = vld [vmem:[%s10101_s1 + $0xbd4] sm:$0xf0]  ;;  %v6550_v10 = vld [vmem:[%s10101_s1 + $0xa84] sm:$0xf0] }
  0xa0   :  { %2658 = vmatpush.bf16.msra.mxu0 %v5222_v58  ;;  %v5710_v58 = vor.u32 %v6592_v47, %v5709_v46  ;;  %v5494_v46 = vor.u32 %v6538_v30, %v5493_v24  ;;  %v6582_v24 = vld [vmem:[%s10101_s1 + $0xb84] sm:$0xf0]  ;;  %v5757_v30 = vld [vmem:[%s10101_s1 + $0xc30] sm:$0xf] }
  0xa1   :  { %2671 = vmatpush.bf16.msra.mxu1 %v5286_v62  ;;  %v5701_v62 = vld [vmem:[%s10101_s1 + $0xbc0] sm:$0xf] }
  0xa2   :  { %2684 = vmatpush.bf16.msra.mxu2 %v5350_v63  ;;  %v6590_v63 = vld [vmem:[%s10101_s1 + $0xbc4] sm:$0xf0] }
  0xa3   :  { %2697 = vmatpush.bf16.msra.mxu3 %v5414_v2  ;;  %2659 = vmatmul.bf16.vlgmr.msra.gmra.mxu0 %v7820_v9  ;;  %v5574_v2 = vor.u32 %v6558_v59, %v5573_v57  ;;  %v2452_v47 = vpop.f32.mrf.mxu0  ;;  %v5686_v59 = vor.u32 %v6586_v45, %v5685_v44 }
  0xa4   :  { %2703 = vmatpush.bf16.msrb.mxu0 %v5534_v3  ;;  %2672 = vmatmul.bf16.vlgmr.msra.gmra.mxu1 %v7833_v18  ;;  %v5638_v3 = vor.u32 %v6574_v61, %v5637_v60  ;;  %v2453_v57 = vadd.f32 %v2452_v47, %v419_v35  ;;  %v6552_v60 = vld [vmem:[%s10101_s1 + $0xa94] sm:$0xf0]  ;;  %v5613_v61 = vld [vmem:[%s10101_s1 + $0xb10] sm:$0xf]  ;;  %v6227_v35 = vld [vmem:[%s10101_s1 + $0x74] sm:$0xf] }
  0xa5   :  { %2716 = vmatpush.bf16.msrb.mxu1 %v5598_v6  ;;  %2685 = vmatmul.bf16.vlgmr.msra.gmra.mxu2 %v7831_v16  ;;  %v6556_v6 = vld [vmem:[%s10101_s1 + $0xab4] sm:$0xf0] }
  0xa6   :  { %2729 = vmatpush.bf16.msrb.mxu2 %v5662_v8  ;;  %2698 = vmatmul.bf16.vlgmr.msra.gmra.mxu3 %v7844_v25  ;;  %v5702_v8 = vor.u32 %v6590_v63, %v5701_v62  ;;  %v5566_v27 = vor.u32 %v6556_v6, %v5565_v5  ;;  %v6568_v62 = vld [vmem:[%s10101_s1 + $0xb14] sm:$0xf0]  ;;  %v5677_v63 = vld [vmem:[%s10101_s1 + $0xb90] sm:$0xf]  ;;  %v5550_v5 = vor.u32 %v6552_v60, %v5549_v56  ;;  %v6602_v60 = vld [vmem:[%s10101_s1 + $0xc24] sm:$0xf0] }
  0xa7   :  { %2742 = vmatpush.bf16.msrb.mxu3 %v5726_v15  ;;  %v5693_v15 = vld [vmem:[%s10101_s1 + $0xbb0] sm:$0xf]  ;;  %v5614_v6 = vor.u32 %v6568_v62, %v5613_v61  ;;  %v6225_v61 = vld [vmem:[%s10101_s1 + $0x64] sm:$0xf] }
  0xa8   :  { %2704 = vmatpush.bf16.msrb.mxu0 %v5526_v34  ;;  %v5557_v34 = vld [vmem:[%s10101_s1 + $0xaa0] sm:$0xf]  ;;  %v5694_v36 = vor.u32 %v6588_v19, %v5693_v15  ;;  %v6566_v19 = vld [vmem:[%s10101_s1 + $0xb04] sm:$0xf0] }
  0xa9   :  { %2717 = vmatpush.bf16.msrb.mxu1 %v5590_v38  ;;  %v6554_v38 = vld [vmem:[%s10101_s1 + $0xaa4] sm:$0xf0]  ;;  %v5606_v47 = vor.u32 %v6566_v19, %v5605_v11  ;;  %v5741_v11 = vld [vmem:[%s10101_s1 + $0xc10] sm:$0xf] }
  0xaa   :  { %2730 = vmatpush.bf16.msrb.mxu2 %v5654_v39  ;;  %v5621_v39 = vld [vmem:[%s10101_s1 + $0xb20] sm:$0xf]  ;;  %v2478_v14 = vpop.f32.mrf.mxu2 }
  0xab   :  { %2743 = vmatpush.bf16.msrb.mxu3 %v5718_v43  ;;  %v6570_v43 = vld [vmem:[%s10101_s1 + $0xb24] sm:$0xf0]  ;;  %v2454_v45 = vpop.f32.mrf.mxu0 }
  0xac   :  { %2705 = vmatpush.bf16.msrb.mxu0 %v5518_v48  ;;  %v5558_v48 = vor.u32 %v6554_v38, %v5557_v34  ;;  %v6604_v34 = vld [vmem:[%s10101_s1 + $0xc34] sm:$0xf0]  ;;  %v4255_v38 = vld [vmem:[%s10101_s1 + $0x78] sm:$0xf0]  ;;  %v4231_v45 = vld [vmem:[%s10101_s1 + $0x48] sm:$0xf0] }
  0xad   :  { %2718 = vmatpush.bf16.msrb.mxu1 %v5582_v49  ;;  %v5622_v49 = vor.u32 %v6570_v43, %v5621_v39  ;;  %v6243_v39 = vld [vmem:[%s10101_s1 + $0xf4] sm:$0xf]  ;;  %v4319_v43 = vld [vmem:[%s10101_s1 + $0xf8] sm:$0xf0]  ;;  %v5758_v56 = vor.u32 %v6604_v34, %v5757_v30 }
  0xae   :  { %2731 = vmatpush.bf16.msrb.mxu2 %v5646_v50  ;;  %v5485_v50 = vld [vmem:[%s10101_s1 + $0xa10] sm:$0xf]  ;;  %v4367_v30 = vld [vmem:[%s10101_s1 + $0x158] sm:$0xf0] }
  0xaf   :  { %2744 = vmatpush.bf16.msrb.mxu3 %v5710_v58  ;;  %v2465_v58 = vpop.f32.mrf.mxu1 }
  0xb0   :  { %2706 = vmatpush.bf16.msrb.mxu0 %v5510_v0  ;;  %v6584_v0 = vld [vmem:[%s10101_s1 + $0xb94] sm:$0xf0]  ;;  %v2466_v1 = vadd.f32 %v2465_v58, %v2453_v57  ;;  %v4258_v57 = vor.u32 %v6227_v35, %v4255_v38  ;;  %v4322_v58 = vor.u32 %v6243_v39, %v4319_v43  ;;  %v5733_v35 = vld [vmem:[%s10101_s1 + $0xc00] sm:$0xf]  ;;  %v6598_v39 = vld [vmem:[%s10101_s1 + $0xc04] sm:$0xf0] }
  0xb1   :  { %2719 = vmatpush.bf16.msrb.mxu1 %v5574_v2  ;;  %v5486_v2 = vor.u32 %v6536_v52, %v5485_v50  ;;  %v5678_v15 = vor.u32 %v6584_v0, %v5677_v63  ;;  %v4247_v63 = vld [vmem:[%s10101_s1 + $0x68] sm:$0xf0]  ;;  %v6241_v0 = vld [vmem:[%s10101_s1 + $0xe4] sm:$0xf] }
  0xb2   :  { %2732 = vmatpush.bf16.msrb.mxu2 %v5638_v3  ;;  %v5477_v3 = vld [vmem:[%s10101_s1 + $0xa00] sm:$0xf]  ;;  %v6221_v43 = vld [vmem:[%s10101_s1 + $0x44] sm:$0xf] }
  0xb3   :  { %2745 = vmatpush.bf16.msrb.mxu3 %v5702_v8  ;;  %v5541_v8 = vld [vmem:[%s10101_s1 + $0xa80] sm:$0xf] }
  0xb4   :  { %2707 = vmatpush.bf16.msrb.mxu0 %v5502_v23  ;;  %v5669_v23 = vld [vmem:[%s10101_s1 + $0xb80] sm:$0xf] }
  0xb5   :  { %2720 = vmatpush.bf16.msrb.mxu1 %v5566_v27  ;;  %v2479_v27 = vadd.f32 %v2478_v14, %v2466_v1  ;;  %v5670_v52 = vor.u32 %v6582_v24, %v5669_v23  ;;  %v4311_v1 = vld [vmem:[%s10101_s1 + $0xe8] sm:$0xf0]  ;;  %v6600_v14 = vld [vmem:[%s10101_s1 + $0xc14] sm:$0xf0]  ;;  %v4239_v23 = vld [vmem:[%s10101_s1 + $0x58] sm:$0xf0] }
  0xb6   :  { %2733 = vmatpush.bf16.msrb.mxu2 %v5630_v29  ;;  %v2491_v29 = vpop.f32.mrf.mxu3  ;;  %v6239_v24 = vld [vmem:[%s10101_s1 + $0xd4] sm:$0xf]  ;;  %v5742_v34 = vor.u32 %v6600_v14, %v5741_v11 }
  0xb7   :  { %2746 = vmatpush.bf16.msrb.mxu3 %v5694_v36  ;;  %v5478_v36 = vor.u32 %v6534_v4, %v5477_v3  ;;  %v8026_v44 = vadd.f32 %v2491_v29, %v2479_v27  ;;  %v2467_v50 = vpop.f32.mrf.mxu1  ;;  %v4375_v3 = vld [vmem:[%s10101_s1 + $0x168] sm:$0xf0]  ;;  %v2480_v4 = vpop.f32.mrf.mxu2  ;;  %v4303_v27 = vld [vmem:[%s10101_s1 + $0xd8] sm:$0xf0]  ;;  %v6255_v29 = vld [vmem:[%s10101_s1 + $0x154] sm:$0xf] }
  0xb8   :  { %2708 = vmatpush.bf16.msrb.mxu0 %v5494_v46  ;;  %v5542_v46 = vor.u32 %v6550_v10, %v5541_v8  ;;  %v4250_v8 = vor.u32 %v6225_v61, %v4247_v63  ;;  %v4314_v10 = vor.u32 %v6241_v0, %v4311_v1  ;;  %v4306_v38 = vor.u32 %v6239_v24, %v4303_v27  ;;  %v4359_v50 = vld [vmem:[%s10101_s1 + $0x148] sm:$0xf0]  ;;  %v4223_v63 = vld [vmem:[%s10101_s1 + $0x38] sm:$0xf0]  ;;  %v6251_v4 = vld [vmem:[%s10101_s1 + $0x134] sm:$0xf] }
  0xb9   :  { %2721 = vmatpush.bf16.msrb.mxu1 %v5558_v48  ;;  %v6259_v48 = vld [vmem:[%s10101_s1 + $0x174] sm:$0xf] }
  0xba   :  { %2734 = vmatpush.bf16.msrb.mxu2 %v5622_v49  ;;  %v4383_v49 = vld [vmem:[%s10101_s1 + $0x178] sm:$0xf0] }
  0xbb   :  { %2747 = vmatpush.bf16.msrb.mxu3 %v5686_v59  ;;  %v5749_v59 = vld [vmem:[%s10101_s1 + $0xc20] sm:$0xf]  ;;  %v4386_v62 = vor.u32 %v6259_v48, %v4383_v49  ;;  %v4295_v48 = vld [vmem:[%s10101_s1 + $0xc8] sm:$0xf0]  ;;  %v6253_v49 = vld [vmem:[%s10101_s1 + $0x144] sm:$0xf] }
  0xbc   :  { %2709 = vmatpush.bf16.msrb.mxu0 %v5486_v2  ;;  %v6257_v2 = vld [vmem:[%s10101_s1 + $0x164] sm:$0xf]  ;;  %v4362_v1 = vor.u32 %v6253_v49, %v4359_v50  ;;  %v6215_v50 = vld [vmem:[%s10101_s1 + $0x14] sm:$0xf] }
  0xbd   :  { %2722 = vmatpush.bf16.msrb.mxu1 %v5550_v5  ;;  %v5750_v5 = vor.u32 %v6602_v60, %v5749_v59  ;;  %v4378_v19 = vor.u32 %v6257_v2, %v4375_v3  ;;  %v4234_v59 = vor.u32 %v6221_v43, %v4231_v45  ;;  %v6235_v3 = vld [vmem:[%s10101_s1 + $0xb4] sm:$0xf]  ;;  %v4431_v43 = vld [vmem:[%s10101_s1 + $0x1d8] sm:$0xf0]  ;;  %v455_v45 = vld [vmem:[#allocation1] sm:$0xff] }
  0xbe   :  { %2735 = vmatpush.bf16.msrb.mxu2 %v5614_v6  ;;  %v2493_v6 = vpop.f32.mrf.mxu3 }
  0xbf   :  { %2748 = vmatpush.bf16.msrb.mxu3 %v5678_v15  ;;  %v6223_v15 = vld [vmem:[%s10101_s1 + $0x54] sm:$0xf] }
  0xc0   :  { %2710 = vmatpush.bf16.msrb.mxu0 %v5478_v36  ;;  %v4242_v36 = vor.u32 %v6223_v15, %v4239_v23  ;;  %v4215_v23 = vld [vmem:[%s10101_s1 + $0x28] sm:$0xf0] }
  0xc1   :  { %2723 = vmatpush.bf16.msrb.mxu1 %v5542_v46  ;;  %v4370_v46 = vor.u32 %v6255_v29, %v4367_v30  ;;  %v2517_v0 = vpop.f32.mrf.mxu1  ;;  %v6233_v30 = vld [vmem:[%s10101_s1 + $0xa4] sm:$0xf] }
  0xc2   :  { %2736 = vmatpush.bf16.msrb.mxu2 %v5606_v47  ;;  %v6237_v47 = vld [vmem:[%s10101_s1 + $0xc4] sm:$0xf] }
  0xc3   :  { %2749 = vmatpush.bf16.msrb.mxu3 %v5670_v52  ;;  %2711 = vmatmul.bf16.vlgmr.msrb.gmra.mxu0 %v7861_v37  ;;  %v6275_v52 = vld [vmem:[%s10101_s1 + $0x1f4] sm:$0xf]  ;;  %v4298_v60 = vor.u32 %v6237_v47, %v4295_v48 }
  0xc4   :  { %2759 = vmatpush.bf16.msra.mxu0 %v5758_v56  ;;  %2724 = vmatmul.bf16.vlgmr.msrb.gmra.mxu1 %v7865_v41  ;;  %v4447_v56 = vld [vmem:[%s10101_s1 + $0x1f8] sm:$0xf0] }
  0xc5   :  { %2768 = vmatpush.bf16.msra.mxu1 %v4258_v57  ;;  %2737 = vmatmul.bf16.vlgmr.msrb.gmra.mxu2 %v7863_v40  ;;  %v5734_v57 = vor.u32 %v6598_v39, %v5733_v35  ;;  %v4450_v2 = vor.u32 %v6275_v52, %v4447_v56  ;;  %v6249_v35 = vld [vmem:[%s10101_s1 + $0x124] sm:$0xf]  ;;  %v6271_v39 = vld [vmem:[%s10101_s1 + $0x1d4] sm:$0xf]  ;;  %v4207_v52 = vld [vmem:[%s10101_s1 + $0x18] sm:$0xf0] }
  0xc6   :  { %2781 = vmatpush.bf16.msra.mxu2 %v4322_v58  ;;  %2750 = vmatmul.bf16.vlgmr.msrb.gmra.mxu3 %v7867_v42  ;;  %v2504_v58 = vpop.f32.mrf.mxu0 }
  0xc7   :  { %2794 = vmatpush.bf16.msra.mxu3 %v4386_v62  ;;  %v2505_v61 = vadd.f32 %v2504_v58, %v8026_v44  ;;  %v6219_v62 = vld [vmem:[%s10101_s1 + $0x34] sm:$0xf]  ;;  %v4287_v44 = vld [vmem:[%s10101_s1 + $0xb8] sm:$0xf0]  ;;  %v4434_v58 = vor.u32 %v6271_v39, %v4431_v43 }
  0xc8   :  { %2760 = vmatpush.bf16.msra.mxu0 %v5750_v5  ;;  %v4351_v5 = vld [vmem:[%s10101_s1 + $0x138] sm:$0xf0]  ;;  %v4226_v11 = vor.u32 %v6219_v62, %v4223_v63  ;;  %v4290_v14 = vor.u32 %v6235_v3, %v4287_v44  ;;  %v2530_v15 = vpop.f32.mrf.mxu2  ;;  %v6269_v63 = vld [vmem:[%s10101_s1 + $0x1c4] sm:$0xf]  ;;  %v4199_v44 = vld [vmem:[%s10101_s1 + $0x8] sm:$0xf0] }
  0xc9   :  { %2769 = vmatpush.bf16.msra.mxu1 %v4250_v8  ;;  %v2518_v6 = vadd.f32 %v2517_v0, %v2505_v61  ;;  %v6273_v8 = vld [vmem:[%s10101_s1 + $0x1e4] sm:$0xf]  ;;  %v4354_v24 = vor.u32 %v6251_v4, %v4351_v5  ;;  %v2519_v56 = vpop.f32.mrf.mxu1  ;;  %v6247_v61 = vld [vmem:[%s10101_s1 + $0x114] sm:$0xf]  ;;  %v4335_v62 = vld [vmem:[%s10101_s1 + $0x118] sm:$0xf0] }
  0xca   :  { %2782 = vmatpush.bf16.msra.mxu2 %v4314_v10  ;;  %v4439_v10 = vld [vmem:[%s10101_s1 + $0x1e8] sm:$0xf0]  ;;  %v6213_v3 = vld [vmem:[%s10101_s1 + $0x4] sm:$0xf] }
  0xcb   :  { %2795 = vmatpush.bf16.msra.mxu3 %v4378_v19  ;;  %v6217_v19 = vld [vmem:[%s10101_s1 + $0x24] sm:$0xf]  ;;  %v4442_v27 = vor.u32 %v6273_v8, %v4439_v10  ;;  %v2531_v29 = vadd.f32 %v2530_v15, %v2518_v6  ;;  %v4423_v0 = vld [vmem:[%s10101_s1 + $0x1c8] sm:$0xf0]  ;;  %v4338_v6 = vor.u32 %v6247_v61, %v4335_v62 }
  0xcc   :  { %2761 = vmatpush.bf16.msra.mxu0 %v5742_v34  ;;  %v4279_v34 = vld [vmem:[%s10101_s1 + $0xa8] sm:$0xf0]  ;;  %v4218_v48 = vor.u32 %v6217_v19, %v4215_v23  ;;  %v6229_v4 = vld [vmem:[%s10101_s1 + $0x84] sm:$0xf]  ;;  %v4426_v8 = vor.u32 %v6269_v63, %v4423_v0  ;;  %v6267_v19 = vld [vmem:[%s10101_s1 + $0x1b4] sm:$0xf] }
  0xcd   :  { %2770 = vmatpush.bf16.msra.mxu1 %v4242_v36  ;;  %v2543_v36 = vpop.f32.mrf.mxu3  ;;  %v4282_v49 = vor.u32 %v6233_v30, %v4279_v34  ;;  %v4263_v10 = vld [vmem:[%s10101_s1 + $0x88] sm:$0xf0]  ;;  %v4415_v23 = vld [vmem:[%s10101_s1 + $0x1b8] sm:$0xf0]  ;;  %v4202_v34 = vor.u32 %v6213_v3, %v4199_v44  ;;  %v6263_v0 = vld [vmem:[%s10101_s1 + $0x194] sm:$0xf] }
  0xce   :  { %2783 = vmatpush.bf16.msra.mxu2 %v4306_v38  ;;  %v4343_v38 = vld [vmem:[%s10101_s1 + $0x128] sm:$0xf0]  ;;  %v2506_v47 = vpop.f32.mrf.mxu0  ;;  %v4575_v30 = vld [vmem:[%s10101_s1 + $0x2f8] sm:$0xf0]  ;;  %v4418_v43 = vor.u32 %v6267_v19, %v4415_v23  ;;  %v6301_v23 = vld [vmem:[%s10101_s1 + $0x2c4] sm:$0xf] }
  0xcf   :  { %2796 = vmatpush.bf16.msra.mxu3 %v4370_v46  ;;  %v8165_v46 = vadd.f32 %v2543_v36, %v2531_v29  ;;  %v6307_v29 = vld [vmem:[%s10101_s1 + $0x2f4] sm:$0xf]  ;;  %v4503_v56 = vld [vmem:[%s10101_s1 + $0x268] sm:$0xf0]  ;;  %v4495_v44 = vld [vmem:[%s10101_s1 + $0x258] sm:$0xf0] }
  0xd0   :  { %2762 = vmatpush.bf16.msra.mxu0 %v5734_v57  ;;  %v4346_v57 = vor.u32 %v6249_v35, %v4343_v38  ;;  %v2532_v5 = vpop.f32.mrf.mxu2  ;;  %v4266_v35 = vor.u32 %v6229_v4, %v4263_v10  ;;  %v6323_v36 = vld [vmem:[%s10101_s1 + $0x374] sm:$0xf]  ;;  %v4639_v38 = vld [vmem:[%s10101_s1 + $0x378] sm:$0xf0]  ;;  %v4578_v47 = vor.u32 %v6307_v29, %v4575_v30  ;;  %v4615_v30 = vld [vmem:[%s10101_s1 + $0x348] sm:$0xf0] }
  0xd1   :  { %2771 = vmatpush.bf16.msra.mxu1 %v4234_v59  ;;  %v6231_v59 = vld [vmem:[%s10101_s1 + $0x94] sm:$0xf]  ;;  %v4559_v5 = vld [vmem:[%s10101_s1 + $0x2d8] sm:$0xf0] }
  0xd2   :  { %2784 = vmatpush.bf16.msra.mxu2 %v4298_v60  ;;  %v4271_v60 = vld [vmem:[%s10101_s1 + $0x98] sm:$0xf0]  ;;  %v6303_v4 = vld [vmem:[%s10101_s1 + $0x2d4] sm:$0xf] }
  0xd3   :  { %2797 = vmatpush.bf16.msra.mxu3 %v4362_v1  ;;  %5763 = vmatmul.msk.bf16.vlgmr.msra.gmra.mxu0 %vm2440_vm0, %v455_v45  ;;  %v4210_v1 = vor.u32 %v6215_v50, %v4207_v52  ;;  %v6289_v50 = vld [vmem:[%s10101_s1 + $0x264] sm:$0xf]  ;;  %v4642_v52 = vor.u32 %v6323_v36, %v4639_v38 }
  0xd4   :  { %2807 = vmatpush.bf16.msrb.mxu0 %v4450_v2  ;;  %v4274_v2 = vor.u32 %v6231_v59, %v4271_v60  ;;  %v6321_v59 = vld [vmem:[%s10101_s1 + $0x364] sm:$0xf]  ;;  %v4631_v60 = vld [vmem:[%s10101_s1 + $0x368] sm:$0xf0]  ;;  %v4506_v62 = vor.u32 %v6289_v50, %v4503_v56  ;;  %v4543_v56 = vld [vmem:[%s10101_s1 + $0x2b8] sm:$0xf0] }
  0xd5   :  { %2772 = vmatpush.bf16.msra.mxu1 %v4226_v11  ;;  %v6245_v11 = vld [vmem:[%s10101_s1 + $0x104] sm:$0xf]  ;;  %v2545_v15 = vpop.f32.mrf.mxu3  ;;  %v4634_v3 = vor.u32 %v6321_v59, %v4631_v60  ;;  %v4695_v60 = vld [vmem:[%s10101_s1 + $0x3e8] sm:$0xf0] }
  0xd6   :  { %2785 = vmatpush.bf16.msra.mxu2 %v4290_v14  ;;  %v4327_v14 = vld [vmem:[%s10101_s1 + $0x108] sm:$0xf0]  ;;  %v6337_v59 = vld [vmem:[%s10101_s1 + $0x3e4] sm:$0xf] }
  0xd7   :  { %2798 = vmatpush.bf16.msra.mxu3 %v4354_v24  ;;  %v6291_v24 = vld [vmem:[%s10101_s1 + $0x274] sm:$0xf]  ;;  %v4330_v39 = vor.u32 %v6245_v11, %v4327_v14  ;;  %v6261_v11 = vld [vmem:[%s10101_s1 + $0x184] sm:$0xf]  ;;  %v4562_v14 = vor.u32 %v6303_v4, %v4559_v5  ;;  %v4391_v15 = vld [vmem:[%s10101_s1 + $0x188] sm:$0xf0] }
  0xd8   :  { %2808 = vmatpush.bf16.msrb.mxu0 %v4442_v27  ;;  %v4511_v27 = vld [vmem:[%s10101_s1 + $0x278] sm:$0xf0]  ;;  %v4394_v38 = vor.u32 %v6261_v11, %v4391_v15  ;;  %v4535_v4 = vld [vmem:[%s10101_s1 + $0x2a8] sm:$0xf0]  ;;  %v6313_v5 = vld [vmem:[%s10101_s1 + $0x324] sm:$0xf] }
  0xd9   :  { %2773 = vmatpush.bf16.msra.mxu1 %v4218_v48  ;;  %v4514_v45 = vor.u32 %v6291_v24, %v4511_v27  ;;  %v6265_v48 = vld [vmem:[%s10101_s1 + $0x1a4] sm:$0xf]  ;;  %v4551_v24 = vld [vmem:[%s10101_s1 + $0x2c8] sm:$0xf0]  ;;  %v6335_v11 = vld [vmem:[%s10101_s1 + $0x3d4] sm:$0xf] }
  0xda   :  { %2786 = vmatpush.bf16.msra.mxu2 %v4282_v49  ;;  %v4407_v49 = vld [vmem:[%s10101_s1 + $0x1a8] sm:$0xf0]  ;;  %v6317_v27 = vld [vmem:[%s10101_s1 + $0x344] sm:$0xf] }
  0xdb   :  { %2799 = vmatpush.bf16.msra.mxu3 %v4346_v57  ;;  %v6305_v57 = vld [vmem:[%s10101_s1 + $0x2e4] sm:$0xf]  ;;  %v4410_v61 = vor.u32 %v6265_v48, %v4407_v49  ;;  %v4479_v48 = vld [vmem:[%s10101_s1 + $0x238] sm:$0xf0]  ;;  %v4618_v49 = vor.u32 %v6317_v27, %v4615_v30 }
  0xdc   :  { %2809 = vmatpush.bf16.msrb.mxu0 %v4434_v58  ;;  %v4567_v58 = vld [vmem:[%s10101_s1 + $0x2e8] sm:$0xf0]  ;;  %v4527_v30 = vld [vmem:[%s10101_s1 + $0x298] sm:$0xf0] }
  0xdd   :  { %2774 = vmatpush.bf16.msra.mxu1 %v4210_v1  ;;  %v4570_v63 = vor.u32 %v6305_v57, %v4567_v58  ;;  %v4399_v1 = vld [vmem:[%s10101_s1 + $0x198] sm:$0xf0]  ;;  %v6315_v57 = vld [vmem:[%s10101_s1 + $0x334] sm:$0xf] }
  0xde   :  { %2787 = vmatpush.bf16.msra.mxu2 %v4274_v2  ;;  %v6287_v2 = vld [vmem:[%s10101_s1 + $0x254] sm:$0xf]  ;;  %v4402_v10 = vor.u32 %v6263_v0, %v4399_v1  ;;  %v4607_v58 = vld [vmem:[%s10101_s1 + $0x338] sm:$0xf0]  ;;  %v4471_v0 = vld [vmem:[%s10101_s1 + $0x228] sm:$0xf0] }
  0xdf   :  { %2800 = vmatpush.bf16.msra.mxu3 %v4338_v6  ;;  %v6319_v6 = vld [vmem:[%s10101_s1 + $0x354] sm:$0xf]  ;;  %v4610_v1 = vor.u32 %v6315_v57, %v4607_v58 }
  0xe0   :  { %2810 = vmatpush.bf16.msrb.mxu0 %v4426_v8  ;;  %v4623_v8 = vld [vmem:[%s10101_s1 + $0x358] sm:$0xf0]  ;;  %v2556_v29 = vpop.f32.mrf.mxu0  ;;  %v6331_v58 = vld [vmem:[%s10101_s1 + $0x3b4] sm:$0xf] }
  0xe1   :  { %2775 = vmatpush.bf16.msra.mxu1 %v4202_v34  ;;  %v4626_v19 = vor.u32 %v6319_v6, %v4623_v8  ;;  %v6339_v34 = vld [vmem:[%s10101_s1 + $0x3f4] sm:$0xf]  ;;  %v2557_v36 = vadd.f32 %v2556_v29, %v8165_v46 }
  0xe2   :  { %2788 = vmatpush.bf16.msra.mxu2 %v4266_v35  ;;  %v4703_v35 = vld [vmem:[%s10101_s1 + $0x3f8] sm:$0xf0]  ;;  %v6299_v46 = vld [vmem:[%s10101_s1 + $0x2b4] sm:$0xf] }
  0xe3   :  { %2801 = vmatpush.bf16.msra.mxu3 %v4330_v39  ;;  %v2569_v39 = vpop.f32.mrf.mxu1  ;;  %v6295_v29 = vld [vmem:[%s10101_s1 + $0x294] sm:$0xf] }
  0xe4   :  { %2811 = vmatpush.bf16.msrb.mxu0 %v4418_v43  ;;  %2776 = vmatmul.bf16.vlgmr.msra.gmra.mxu1 %v7078_v21  ;;  %v4487_v21 = vld [vmem:[%s10101_s1 + $0x248] sm:$0xf0]  ;;  %v2570_v50 = vadd.f32 %v2569_v39, %v2557_v36  ;;  %v6333_v36 = vld [vmem:[%s10101_s1 + $0x3c4] sm:$0xf] }
  0xe5   :  { %2820 = vmatpush.bf16.msrb.mxu1 %v4514_v45  ;;  %2789 = vmatmul.bf16.vlgmr.msra.gmra.mxu2 %v7089_v26  ;;  %v4498_v26 = vor.u32 %v6287_v2, %v4495_v44  ;;  %v4554_v45 = vor.u32 %v6301_v23, %v4551_v24  ;;  %v6297_v44 = vld [vmem:[%s10101_s1 + $0x2a4] sm:$0xf]  ;;  %v6279_v23 = vld [vmem:[%s10101_s1 + $0x214] sm:$0xf]  ;;  %v4463_v24 = vld [vmem:[%s10101_s1 + $0x218] sm:$0xf0] }
  0xe6   :  { %2833 = vmatpush.bf16.msrb.mxu2 %v4578_v47  ;;  %2802 = vmatmul.bf16.vlgmr.msra.gmra.mxu3 %v7076_v20  ;;  %v6285_v20 = vld [vmem:[%s10101_s1 + $0x244] sm:$0xf]  ;;  %v6283_v47 = vld [vmem:[%s10101_s1 + $0x234] sm:$0xf]  ;;  %v4466_v39 = vor.u32 %v6279_v23, %v4463_v24  ;;  %v4887_v24 = vld [vmem:[%s10101_s1 + $0x568] sm:$0xf0] }
  0xe7   :  { %2846 = vmatpush.bf16.msrb.mxu3 %v4642_v52  ;;  %v4490_v43 = vor.u32 %v6285_v20, %v4487_v21  ;;  %v4706_v52 = vor.u32 %v6339_v34, %v4703_v35  ;;  %v6311_v34 = vld [vmem:[%s10101_s1 + $0x314] sm:$0xf]  ;;  %v4591_v35 = vld [vmem:[%s10101_s1 + $0x318] sm:$0xf0]  ;;  %v6385_v23 = vld [vmem:[%s10101_s1 + $0x564] sm:$0xf] }
  0xe8   :  { %2812 = vmatpush.bf16.msrb.mxu0 %v4410_v61  ;;  %v4482_v61 = vor.u32 %v6283_v47, %v4479_v48  ;;  %v2582_v2 = vpop.f32.mrf.mxu2  ;;  %v4455_v47 = vld [vmem:[%s10101_s1 + $0x208] sm:$0xf0]  ;;  %v6293_v48 = vld [vmem:[%s10101_s1 + $0x284] sm:$0xf] }
  0xe9   :  { %2821 = vmatpush.bf16.msrb.mxu1 %v4506_v62  ;;  %v4546_v62 = vor.u32 %v6299_v46, %v4543_v56  ;;  %v2583_v6 = vadd.f32 %v2582_v2, %v2570_v50  ;;  %v2595_v8 = vpop.f32.mrf.mxu3  ;;  %v6309_v46 = vld [vmem:[%s10101_s1 + $0x304] sm:$0xf]  ;;  %v4583_v56 = vld [vmem:[%s10101_s1 + $0x308] sm:$0xf0] }
  0xea   :  { %2834 = vmatpush.bf16.msrb.mxu2 %v4570_v63  ;;  %v6281_v63 = vld [vmem:[%s10101_s1 + $0x224] sm:$0xf] }
  0xeb   :  { %2847 = vmatpush.bf16.msrb.mxu3 %v4634_v3  ;;  %v4698_v3 = vor.u32 %v6337_v59, %v4695_v60  ;;  %v2571_v15 = vpop.f32.mrf.mxu1  ;;  %v8365_v20 = vadd.f32 %v2595_v8, %v2583_v6  ;;  %v4474_v21 = vor.u32 %v6281_v63, %v4471_v0  ;;  %v4671_v59 = vld [vmem:[%s10101_s1 + $0x3b8] sm:$0xf0]  ;;  %v6355_v60 = vld [vmem:[%s10101_s1 + $0x474] sm:$0xf] }
  0xec   :  { %2813 = vmatpush.bf16.msrb.mxu0 %v4402_v10  ;;  %v4599_v10 = vld [vmem:[%s10101_s1 + $0x328] sm:$0xf0]  ;;  %v6371_v63 = vld [vmem:[%s10101_s1 + $0x4f4] sm:$0xf]  ;;  %v4831_v0 = vld [vmem:[%s10101_s1 + $0x4f8] sm:$0xf0] }
  0xed   :  { %2822 = vmatpush.bf16.msrb.mxu1 %v4498_v26  ;;  %v4687_v26 = vld [vmem:[%s10101_s1 + $0x3d8] sm:$0xf0]  ;;  %v4602_v27 = vor.u32 %v6313_v5, %v4599_v10  ;;  %v4674_v5 = vor.u32 %v6331_v58, %v4671_v59  ;;  %v4834_v8 = vor.u32 %v6371_v63, %v4831_v0  ;;  %v6329_v10 = vld [vmem:[%s10101_s1 + $0x3a4] sm:$0xf]  ;;  %v4759_v15 = vld [vmem:[%s10101_s1 + $0x468] sm:$0xf0] }
  0xee   :  { %2835 = vmatpush.bf16.msrb.mxu2 %v4562_v14  ;;  %v2558_v14 = vpop.f32.mrf.mxu0  ;;  %v6381_v58 = vld [vmem:[%s10101_s1 + $0x544] sm:$0xf] }
  0xef   :  { %2848 = vmatpush.bf16.msrb.mxu3 %v4626_v19  ;;  %v4538_v19 = vor.u32 %v6297_v44, %v4535_v4  ;;  %v4895_v44 = vld [vmem:[%s10101_s1 + $0x578] sm:$0xf0]  ;;  %v4586_v4 = vor.u32 %v6309_v46, %v4583_v56  ;;  %v6365_v56 = vld [vmem:[%s10101_s1 + $0x4c4] sm:$0xf] }
  0xf0   :  { %2814 = vmatpush.bf16.msrb.mxu0 %v4394_v38  ;;  %v4679_v38 = vld [vmem:[%s10101_s1 + $0x3c8] sm:$0xf0]  ;;  %v2584_v57 = vpop.f32.mrf.mxu2 }
  0xf1   :  { %2823 = vmatpush.bf16.msrb.mxu1 %v4490_v43  ;;  %v4530_v43 = vor.u32 %v6295_v29, %v4527_v30  ;;  %v4682_v50 = vor.u32 %v6333_v36, %v4679_v38  ;;  %v6327_v30 = vld [vmem:[%s10101_s1 + $0x394] sm:$0xf]  ;;  %v4890_v36 = vor.u32 %v6385_v23, %v4887_v24  ;;  %v4751_v38 = vld [vmem:[%s10101_s1 + $0x458] sm:$0xf0]  ;;  %v4807_v57 = vld [vmem:[%s10101_s1 + $0x4c8] sm:$0xf0] }
  0xf2   :  { %2836 = vmatpush.bf16.msrb.mxu2 %v4554_v45  ;;  %v6277_v45 = vld [vmem:[%s10101_s1 + $0x204] sm:$0xf]  ;;  %v4727_v24 = vld [vmem:[%s10101_s1 + $0x428] sm:$0xf0] }
  0xf3   :  { %2849 = vmatpush.bf16.msrb.mxu3 %v4618_v49  ;;  %2815 = vmatmul.bf16.vlgmr.msrb.gmra.mxu0 %v7080_v22  ;;  %v4690_v22 = vor.u32 %v6335_v11, %v4687_v26  ;;  %v4594_v49 = vor.u32 %v6311_v34, %v4591_v35  ;;  %v4663_v11 = vld [vmem:[%s10101_s1 + $0x3a8] sm:$0xf0]  ;;  %v6353_v26 = vld [vmem:[%s10101_s1 + $0x464] sm:$0xf]  ;;  %v4655_v34 = vld [vmem:[%s10101_s1 + $0x398] sm:$0xf0] }
  0xf4   :  { %2859 = vmatpush.bf16.msra.mxu0 %v4706_v52  ;;  %v4519_v52 = vld [vmem:[%s10101_s1 + $0x288] sm:$0xf0]  ;;  %v6351_v35 = vld [vmem:[%s10101_s1 + $0x454] sm:$0xf]  ;;  %v6345_v23 = vld [vmem:[%s10101_s1 + $0x424] sm:$0xf] }
  0xf5   :  { %2824 = vmatpush.bf16.msrb.mxu1 %v4482_v61  ;;  %v2597_v61 = vpop.f32.mrf.mxu3  ;;  %v4522_v2 = vor.u32 %v6293_v48, %v4519_v52  ;;  %v6325_v48 = vld [vmem:[%s10101_s1 + $0x384] sm:$0xf]  ;;  %v4743_v52 = vld [vmem:[%s10101_s1 + $0x448] sm:$0xf0] }
  0xf6   :  { %2837 = vmatpush.bf16.msrb.mxu2 %v4546_v62  ;;  %v4767_v62 = vld [vmem:[%s10101_s1 + $0x478] sm:$0xf0]  ;;  %v6403_v61 = vld [vmem:[%s10101_s1 + $0x5f4] sm:$0xf] }
  0xf7   :  { %2850 = vmatpush.bf16.msrb.mxu3 %v4610_v1  ;;  %v4458_v1 = vor.u32 %v6277_v45, %v4455_v47  ;;  %v4770_v6 = vor.u32 %v6355_v60, %v4767_v62  ;;  %v4879_v45 = vld [vmem:[%s10101_s1 + $0x558] sm:$0xf0]  ;;  %v4658_v47 = vor.u32 %v6327_v30, %v4655_v34  ;;  %v4871_v60 = vld [vmem:[%s10101_s1 + $0x548] sm:$0xf0]  ;;  %v6361_v30 = vld [vmem:[%s10101_s1 + $0x4a4] sm:$0xf] }
  0xf8   :  { %2860 = vmatpush.bf16.msra.mxu0 %v4698_v3  ;;  %v6387_v3 = vld [vmem:[%s10101_s1 + $0x574] sm:$0xf]  ;;  %v4959_v62 = vld [vmem:[%s10101_s1 + $0x5f8] sm:$0xf0]  ;;  %v4791_v34 = vld [vmem:[%s10101_s1 + $0x4a8] sm:$0xf0] }
  0xf9   :  { %2825 = vmatpush.bf16.msrb.mxu1 %v4474_v21  ;;  %v4898_v14 = vor.u32 %v6387_v3, %v4895_v44  ;;  %v6369_v21 = vld [vmem:[%s10101_s1 + $0x4e4] sm:$0xf]  ;;  %v4810_v3 = vor.u32 %v6365_v56, %v4807_v57  ;;  %v6347_v44 = vld [vmem:[%s10101_s1 + $0x434] sm:$0xf]  ;;  %v4783_v56 = vld [vmem:[%s10101_s1 + $0x498] sm:$0xf0] }
  0xfa   :  { %2838 = vmatpush.bf16.msrb.mxu2 %v4538_v19  ;;  %v4823_v19 = vld [vmem:[%s10101_s1 + $0x4e8] sm:$0xf0]  ;;  %v6375_v57 = vld [vmem:[%s10101_s1 + $0x514] sm:$0xf] }
  0xfb   :  { %2851 = vmatpush.bf16.msrb.mxu3 %v4602_v27  ;;  %v4666_v27 = vor.u32 %v6329_v10, %v4663_v11  ;;  %v4826_v29 = vor.u32 %v6369_v21, %v4823_v19  ;;  %v4799_v10 = vld [vmem:[%s10101_s1 + $0x4b8] sm:$0xf0]  ;;  %v6379_v11 = vld [vmem:[%s10101_s1 + $0x534] sm:$0xf] }
  0xfc   :  { %2861 = vmatpush.bf16.msra.mxu0 %v4690_v22  ;;  %v4762_v22 = vor.u32 %v6353_v26, %v4759_v15  ;;  %v4863_v26 = vld [vmem:[%s10101_s1 + $0x538] sm:$0xf0]  ;;  %v4951_v15 = vld [vmem:[%s10101_s1 + $0x5e8] sm:$0xf0] }
  0xfd   :  { %2826 = vmatpush.bf16.msrb.mxu1 %v4466_v39  ;;  %v6367_v39 = vld [vmem:[%s10101_s1 + $0x4d4] sm:$0xf] }
  0xfe   :  { %2839 = vmatpush.bf16.msrb.mxu2 %v4530_v43  ;;  %v4815_v43 = vld [vmem:[%s10101_s1 + $0x4d8] sm:$0xf0] }
  0xff   :  { %2852 = vmatpush.bf16.msrb.mxu3 %v4594_v49  ;;  %v4754_v49 = vor.u32 %v6351_v35, %v4751_v38  ;;  %v6377_v35 = vld [vmem:[%s10101_s1 + $0x524] sm:$0xf] }
 0x100   :  { %2862 = vmatpush.bf16.msra.mxu0 %v4682_v50  ;;  %v6349_v50 = vld [vmem:[%s10101_s1 + $0x444] sm:$0xf]  ;;  %v2608_v59 = vpop.f32.mrf.mxu0 }
 0x101   :  { %2827 = vmatpush.bf16.msrb.mxu1 %v4458_v1  ;;  %v2609_v63 = vadd.f32 %v2608_v59, %v8365_v20  ;;  %v2621_v1 = vpop.f32.mrf.mxu1  ;;  %v6363_v20 = vld [vmem:[%s10101_s1 + $0x4b4] sm:$0xf]  ;;  %v6397_v59 = vld [vmem:[%s10101_s1 + $0x5c4] sm:$0xf] }
 0x102   :  { %2840 = vmatpush.bf16.msrb.mxu2 %v4522_v2  ;;  %v4746_v2 = vor.u32 %v6349_v50, %v4743_v52  ;;  %v4802_v19 = vor.u32 %v6363_v20, %v4799_v10  ;;  %v4927_v20 = vld [vmem:[%s10101_s1 + $0x5b8] sm:$0xf0]  ;;  %v6419_v10 = vld [vmem:[%s10101_s1 + $0x674] sm:$0xf] }
 0x103   :  { %2853 = vmatpush.bf16.msrb.mxu3 %v4586_v4  ;;  %v4735_v4 = vld [vmem:[%s10101_s1 + $0x438] sm:$0xf0] }
 0x104   :  { %2863 = vmatpush.bf16.msra.mxu0 %v4674_v5  ;;  %2828 = vmatmul.bf16.vlgmr.msrb.gmra.mxu1 %v7147_v53  ;;  %v4647_v53 = vld [vmem:[%s10101_s1 + $0x388] sm:$0xf0]  ;;  %v4874_v5 = vor.u32 %v6381_v58, %v4871_v60  ;;  %v4738_v21 = vor.u32 %v6347_v44, %v4735_v4  ;;  %v4847_v58 = vld [vmem:[%s10101_s1 + $0x518] sm:$0xf0]  ;;  %v6373_v4 = vld [vmem:[%s10101_s1 + $0x504] sm:$0xf] }
 0x105   :  { %2872 = vmatpush.bf16.msra.mxu1 %v4770_v6  ;;  %2841 = vmatmul.bf16.vlgmr.msrb.gmra.mxu2 %v7151_v55  ;;  %v6383_v55 = vld [vmem:[%s10101_s1 + $0x554] sm:$0xf]  ;;  %v4650_v0 = vor.u32 %v6325_v48, %v4647_v53  ;;  %v2622_v6 = vadd.f32 %v2621_v1, %v2609_v63  ;;  %v4719_v53 = vld [vmem:[%s10101_s1 + $0x418] sm:$0xf0]  ;;  %v4935_v60 = vld [vmem:[%s10101_s1 + $0x5c8] sm:$0xf0] }
 0x106   :  { %2885 = vmatpush.bf16.msra.mxu2 %v4834_v8  ;;  %2854 = vmatmul.bf16.vlgmr.msrb.gmra.mxu3 %v7145_v51  ;;  %v4818_v51 = vor.u32 %v6367_v39, %v4815_v43  ;;  %v4882_v46 = vor.u32 %v6383_v55, %v4879_v45  ;;  %v4962_v8 = vor.u32 %v6403_v61, %v4959_v62  ;;  %v4855_v39 = vld [vmem:[%s10101_s1 + $0x528] sm:$0xf0]  ;;  %v6399_v43 = vld [vmem:[%s10101_s1 + $0x5d4] sm:$0xf]  ;;  %v4943_v55 = vld [vmem:[%s10101_s1 + $0x5d8] sm:$0xf0] }
 0x107   :  { %2898 = vmatpush.bf16.msra.mxu3 %v4898_v14  ;;  %v6401_v14 = vld [vmem:[%s10101_s1 + $0x5e4] sm:$0xf]  ;;  %v4858_v50 = vor.u32 %v6377_v35, %v4855_v39  ;;  %v4946_v52 = vor.u32 %v6399_v43, %v4943_v55  ;;  %v4775_v44 = vld [vmem:[%s10101_s1 + $0x488] sm:$0xf0] }
 0x108   :  { %2864 = vmatpush.bf16.msra.mxu0 %v4666_v27  ;;  %v4866_v27 = vor.u32 %v6379_v11, %v4863_v26  ;;  %v2610_v45 = vpop.f32.mrf.mxu0  ;;  %v6341_v63 = vld [vmem:[%s10101_s1 + $0x404] sm:$0xf]  ;;  %v5023_v26 = vld [vmem:[%s10101_s1 + $0x678] sm:$0xf0]  ;;  %v4919_v35 = vld [vmem:[%s10101_s1 + $0x5a8] sm:$0xf0] }
 0x109   :  { %2873 = vmatpush.bf16.msra.mxu1 %v4762_v22  ;;  %v2634_v22 = vpop.f32.mrf.mxu2  ;;  %v2647_v38 = vpop.f32.mrf.mxu3  ;;  %v6357_v1 = vld [vmem:[%s10101_s1 + $0x484] sm:$0xf]  ;;  %v5015_v39 = vld [vmem:[%s10101_s1 + $0x668] sm:$0xf0] }
 0x10a   :  { %2886 = vmatpush.bf16.msra.mxu2 %v4826_v29  ;;  %v4954_v29 = vor.u32 %v6401_v14, %v4951_v15  ;;  %v6435_v14 = vld [vmem:[%s10101_s1 + $0x6f4] sm:$0xf]  ;;  %v5087_v15 = vld [vmem:[%s10101_s1 + $0x6f8] sm:$0xf0]  ;;  %v6433_v43 = vld [vmem:[%s10101_s1 + $0x6e4] sm:$0xf] }
 0x10b   :  { %2899 = vmatpush.bf16.msra.mxu3 %v4890_v36  ;;  %v2635_v36 = vadd.f32 %v2634_v22, %v2622_v6  ;;  %v5079_v55 = vld [vmem:[%s10101_s1 + $0x6e8] sm:$0xf0]  ;;  %v6449_v45 = vld [vmem:[%s10101_s1 + $0x764] sm:$0xf] }
 0x10c   :  { %2865 = vmatpush.bf16.msra.mxu0 %v4658_v47  ;;  %v2623_v47 = vpop.f32.mrf.mxu1 }
 0x10d   :  { %2874 = vmatpush.bf16.msra.mxu1 %v4754_v49  ;;  %v8564_v48 = vadd.f32 %v2647_v38, %v2635_v36  ;;  %v4794_v49 = vor.u32 %v6361_v30, %v4791_v34  ;;  %v5090_v30 = vor.u32 %v6435_v14, %v5087_v15  ;;  %v6393_v34 = vld [vmem:[%s10101_s1 + $0x5a4] sm:$0xf]  ;;  %v5143_v47 = vld [vmem:[%s10101_s1 + $0x768] sm:$0xf0]  ;;  %v6411_v15 = vld [vmem:[%s10101_s1 + $0x634] sm:$0xf] }
 0x10e   :  { %2887 = vmatpush.bf16.msra.mxu2 %v4818_v51  ;;  %v6343_v51 = vld [vmem:[%s10101_s1 + $0x414] sm:$0xf]  ;;  %v6417_v36 = vld [vmem:[%s10101_s1 + $0x664] sm:$0xf] }
 0x10f   :  { %2900 = vmatpush.bf16.msra.mxu3 %v4882_v46  ;;  %v6359_v46 = vld [vmem:[%s10101_s1 + $0x494] sm:$0xf]  ;;  %v4722_v61 = vor.u32 %v6343_v51, %v4719_v53  ;;  %v5082_v51 = vor.u32 %v6433_v43, %v5079_v55 }
 0x110   :  { %2866 = vmatpush.bf16.msra.mxu0 %v4650_v0  ;;  %v4786_v62 = vor.u32 %v6359_v46, %v4783_v56  ;;  %v4711_v0 = vld [vmem:[%s10101_s1 + $0x408] sm:$0xf0]  ;;  %v6391_v53 = vld [vmem:[%s10101_s1 + $0x594] sm:$0xf]  ;;  %v5146_v46 = vor.u32 %v6449_v45, %v5143_v47  ;;  %v5007_v56 = vld [vmem:[%s10101_s1 + $0x658] sm:$0xf0] }
 0x111   :  { %2875 = vmatpush.bf16.msra.mxu1 %v4746_v2  ;;  %v4850_v2 = vor.u32 %v6375_v57, %v4847_v58  ;;  %v2636_v6 = vpop.f32.mrf.mxu2  ;;  %v2649_v11 = vpop.f32.mrf.mxu3  ;;  %v6431_v57 = vld [vmem:[%s10101_s1 + $0x6d4] sm:$0xf]  ;;  %v5071_v58 = vld [vmem:[%s10101_s1 + $0x6d8] sm:$0xf0]  ;;  %v6425_v47 = vld [vmem:[%s10101_s1 + $0x6a4] sm:$0xf] }
 0x112   :  { %2888 = vmatpush.bf16.msra.mxu2 %v4810_v3  ;;  %v4938_v3 = vor.u32 %v6397_v59, %v4935_v60  ;;  %v5135_v59 = vld [vmem:[%s10101_s1 + $0x758] sm:$0xf0]  ;;  %v6467_v6 = vld [vmem:[%s10101_s1 + $0x7f4] sm:$0xf] }
 0x113   :  { %2901 = vmatpush.bf16.msra.mxu3 %v4874_v5  ;;  %2867 = vmatmul.bf16.vlgmr.msra.gmra.mxu0 %v7149_v54  ;;  %v4730_v54 = vor.u32 %v6345_v23, %v4727_v24  ;;  %v4839_v5 = vld [vmem:[%s10101_s1 + $0x508] sm:$0xf0]  ;;  %v6451_v23 = vld [vmem:[%s10101_s1 + $0x774] sm:$0xf]  ;;  %v5151_v24 = vld [vmem:[%s10101_s1 + $0x778] sm:$0xf0] }
 0x114   :  { %2911 = vmatpush.bf16.msrb.mxu0 %v4962_v8  ;;  %v6395_v8 = vld [vmem:[%s10101_s1 + $0x5b4] sm:$0xf]  ;;  %v5154_v38 = vor.u32 %v6451_v23, %v5151_v24 }
 0x115   :  { %2876 = vmatpush.bf16.msra.mxu1 %v4738_v21  ;;  %v4714_v21 = vor.u32 %v6341_v63, %v4711_v0  ;;  %v4930_v22 = vor.u32 %v6395_v8, %v4927_v20  ;;  %v6413_v63 = vld [vmem:[%s10101_s1 + $0x644] sm:$0xf]  ;;  %v4999_v0 = vld [vmem:[%s10101_s1 + $0x648] sm:$0xf0]  ;;  %v5215_v8 = vld [vmem:[%s10101_s1 + $0x7f8] sm:$0xf0] }
 0x116   :  { %2889 = vmatpush.bf16.msra.mxu2 %v4802_v19  ;;  %v4778_v19 = vor.u32 %v6357_v1, %v4775_v44  ;;  %v6445_v44 = vld [vmem:[%s10101_s1 + $0x744] sm:$0xf]  ;;  %v5218_v24 = vor.u32 %v6467_v6, %v5215_v8 }
 0x117   :  { %2902 = vmatpush.bf16.msra.mxu3 %v4866_v27  ;;  %v4842_v27 = vor.u32 %v6373_v4, %v4839_v5  ;;  %v5127_v5 = vld [vmem:[%s10101_s1 + $0x748] sm:$0xf0]  ;;  %v6421_v6 = vld [vmem:[%s10101_s1 + $0x684] sm:$0xf] }
 0x118   :  { %2912 = vmatpush.bf16.msrb.mxu0 %v4954_v29  ;;  %v5026_v29 = vor.u32 %v6419_v10, %v5023_v26  ;;  %v5002_v26 = vor.u32 %v6413_v63, %v4999_v0  ;;  %v6439_v63 = vld [vmem:[%s10101_s1 + $0x714] sm:$0xf]  ;;  %v5103_v0 = vld [vmem:[%s10101_s1 + $0x718] sm:$0xf0] }
 0x119   :  { %2877 = vmatpush.bf16.msra.mxu1 %v4730_v54  ;;  %v4922_v54 = vor.u32 %v6393_v34, %v4919_v35  ;;  %v5207_v34 = vld [vmem:[%s10101_s1 + $0x7e8] sm:$0xf0]  ;;  %v5106_v8 = vor.u32 %v6439_v63, %v5103_v0  ;;  %v6453_v63 = vld [vmem:[%s10101_s1 + $0x784] sm:$0xf] }
 0x11a   :  { %2890 = vmatpush.bf16.msra.mxu2 %v4794_v49  ;;  %v5018_v49 = vor.u32 %v6417_v36, %v5015_v39  ;;  %v4983_v39 = vld [vmem:[%s10101_s1 + $0x628] sm:$0xf0] }
 0x11b   :  { %2903 = vmatpush.bf16.msra.mxu3 %v4858_v50  ;;  %v4911_v50 = vld [vmem:[%s10101_s1 + $0x598] sm:$0xf0] }
 0x11c   :  { %2913 = vmatpush.bf16.msrb.mxu0 %v4946_v52  ;;  %v6415_v52 = vld [vmem:[%s10101_s1 + $0x654] sm:$0xf]  ;;  %v4914_v60 = vor.u32 %v6391_v53, %v4911_v50  ;;  %v5111_v50 = vld [vmem:[%s10101_s1 + $0x728] sm:$0xf0] }
 0x11d   :  { %2878 = vmatpush.bf16.msra.mxu1 %v4722_v61  ;;  %v6389_v61 = vld [vmem:[%s10101_s1 + $0x584] sm:$0xf] }
 0x11e   :  { %2891 = vmatpush.bf16.msra.mxu2 %v4786_v62  ;;  %v5010_v62 = vor.u32 %v6415_v52, %v5007_v56  ;;  %v6463_v52 = vld [vmem:[%s10101_s1 + $0x7d4] sm:$0xf] }
 0x11f   :  { %2904 = vmatpush.bf16.msra.mxu3 %v4850_v2  ;;  %v6429_v2 = vld [vmem:[%s10101_s1 + $0x6c4] sm:$0xf] }
 0x120   :  { %2914 = vmatpush.bf16.msrb.mxu0 %v4938_v3  ;;  %v5063_v3 = vld [vmem:[%s10101_s1 + $0x6c8] sm:$0xf0]  ;;  %v2660_v4 = vpop.f32.mrf.mxu0 }
 0x121   :  { %2879 = vmatpush.bf16.msra.mxu1 %v4714_v21  ;;  %v2661_v20 = vadd.f32 %v2660_v4, %v8564_v48  ;;  %v2673_v11 = vpop.f32.mrf.mxu1  ;;  %v5066_v14 = vor.u32 %v6429_v2, %v5063_v3  ;;  %v4991_v21 = vld [vmem:[%s10101_s1 + $0x638] sm:$0xf0]  ;;  %v6427_v48 = vld [vmem:[%s10101_s1 + $0x6b4] sm:$0xf]  ;;  %v5191_v2 = vld [vmem:[%s10101_s1 + $0x7c8] sm:$0xf0] }
 0x122   :  { %2892 = vmatpush.bf16.msra.mxu2 %v4778_v19  ;;  %v5130_v19 = vor.u32 %v6445_v44, %v5127_v5  ;;  %v4994_v35 = vor.u32 %v6411_v15, %v4991_v21  ;;  %v6405_v4 = vld [vmem:[%s10101_s1 + $0x604] sm:$0xf]  ;;  %v4967_v5 = vld [vmem:[%s10101_s1 + $0x608] sm:$0xf0]  ;;  %v6459_v15 = vld [vmem:[%s10101_s1 + $0x7b4] sm:$0xf] }
 0x123   :  { %2905 = vmatpush.bf16.msra.mxu3 %v4842_v27  ;;  %v2674_v23 = vadd.f32 %v2673_v11, %v2661_v20  ;;  %v5055_v27 = vld [vmem:[%s10101_s1 + $0x6b8] sm:$0xf0]  ;;  %v6437_v11 = vld [vmem:[%s10101_s1 + $0x704] sm:$0xf] }
 0x124   :  { %2915 = vmatpush.bf16.msrb.mxu0 %v4930_v22  ;;  %2880 = vmatmul.bf16.vlgmr.msra.gmra.mxu1 %v7409_v7  ;;  %v6447_v7 = vld [vmem:[%s10101_s1 + $0x754] sm:$0xf]  ;;  %v5058_v36 = vor.u32 %v6427_v48, %v5055_v27  ;;  %v5183_v21 = vld [vmem:[%s10101_s1 + $0x7b8] sm:$0xf0] }
 0x125   :  { %2924 = vmatpush.bf16.msrb.mxu1 %v5026_v29  ;;  %2893 = vmatmul.bf16.vlgmr.msra.gmra.mxu2 %v7422_v13  ;;  %v5074_v13 = vor.u32 %v6431_v57, %v5071_v58  ;;  %v5138_v1 = vor.u32 %v6447_v7, %v5135_v59  ;;  %v6443_v22 = vld [vmem:[%s10101_s1 + $0x734] sm:$0xf]  ;;  %v5119_v29 = vld [vmem:[%s10101_s1 + $0x738] sm:$0xf0] }
 0x126   :  { %2937 = vmatpush.bf16.msrb.mxu2 %v5090_v30  ;;  %2906 = vmatmul.bf16.vlgmr.msra.gmra.mxu3 %v7420_v12  ;;  %v4903_v12 = vld [vmem:[%s10101_s1 + $0x588] sm:$0xf0]  ;;  %v6465_v30 = vld [vmem:[%s10101_s1 + $0x7e4] sm:$0xf]  ;;  %v5122_v43 = vor.u32 %v6443_v22, %v5119_v29  ;;  %v6407_v59 = vld [vmem:[%s10101_s1 + $0x614] sm:$0xf]  ;;  %v4970_v22 = vor.u32 %v6405_v4, %v4967_v5 }
 0x127   :  { %2950 = vmatpush.bf16.msrb.mxu3 %v5154_v38  ;;  %v4906_v10 = vor.u32 %v6389_v61, %v4903_v12  ;;  %v6409_v38 = vld [vmem:[%s10101_s1 + $0x624] sm:$0xf]  ;;  %v5210_v45 = vor.u32 %v6465_v30, %v5207_v34  ;;  %v5039_v12 = vld [vmem:[%s10101_s1 + $0x698] sm:$0xf0]  ;;  %v6499_v48 = vld [vmem:[%s10101_s1 + $0x8f4] sm:$0xf] }
 0x128   :  { %2916 = vmatpush.bf16.msrb.mxu0 %v4922_v54  ;;  %v2686_v55 = vpop.f32.mrf.mxu2  ;;  %v5047_v54 = vld [vmem:[%s10101_s1 + $0x6a8] sm:$0xf0]  ;;  %v2662_v56 = vpop.f32.mrf.mxu0  ;;  %v5343_v27 = vld [vmem:[%s10101_s1 + $0x8f8] sm:$0xf0]  ;;  %v6515_v30 = vld [vmem:[%s10101_s1 + $0x974] sm:$0xf] }
 0x129   :  { %2925 = vmatpush.bf16.msrb.mxu1 %v5018_v49  ;;  %v6441_v49 = vld [vmem:[%s10101_s1 + $0x724] sm:$0xf]  ;;  %v2699_v53 = vpop.f32.mrf.mxu3  ;;  %v2675_v57 = vpop.f32.mrf.mxu1  ;;  %v5050_v7 = vor.u32 %v6425_v47, %v5047_v54  ;;  %v5407_v34 = vld [vmem:[%s10101_s1 + $0x978] sm:$0xf0]  ;;  %v5271_v54 = vld [vmem:[%s10101_s1 + $0x868] sm:$0xf0] }
 0x12a   :  { %2938 = vmatpush.bf16.msrb.mxu2 %v5082_v51  ;;  %v2687_v51 = vadd.f32 %v2686_v55, %v2674_v23  ;;  %v5114_v61 = vor.u32 %v6441_v49, %v5111_v50  ;;  %v5175_v55 = vld [vmem:[%s10101_s1 + $0x7a8] sm:$0xf0]  ;;  %v5410_v47 = vor.u32 %v6515_v30, %v5407_v34  ;;  %v6497_v49 = vld [vmem:[%s10101_s1 + $0x8e4] sm:$0xf]  ;;  %v6455_v57 = vld [vmem:[%s10101_s1 + $0x794] sm:$0xf] }
 0x12b   :  { %2951 = vmatpush.bf16.msrb.mxu3 %v5146_v46  ;;  %v5199_v46 = vld [vmem:[%s10101_s1 + $0x7d8] sm:$0xf0]  ;;  %v5399_v50 = vld [vmem:[%s10101_s1 + $0x968] sm:$0xf0]  ;;  %v6509_v5 = vld [vmem:[%s10101_s1 + $0x944] sm:$0xf] }
 0x12c   :  { %2917 = vmatpush.bf16.msrb.mxu0 %v4914_v60  ;;  %v8763_v58 = vadd.f32 %v2699_v53, %v2687_v51  ;;  %v4975_v60 = vld [vmem:[%s10101_s1 + $0x618] sm:$0xf0]  ;;  %v5335_v51 = vld [vmem:[%s10101_s1 + $0x8e8] sm:$0xf0]  ;;  %v6513_v53 = vld [vmem:[%s10101_s1 + $0x964] sm:$0xf] }
 0x12d   :  { %2926 = vmatpush.bf16.msrb.mxu1 %v5010_v62  ;;  %v5202_v62 = vor.u32 %v6463_v52, %v5199_v46  ;;  %v4978_v3 = vor.u32 %v6407_v59, %v4975_v60  ;;  %v5338_v56 = vor.u32 %v6497_v49, %v5335_v51  ;;  %v5402_v59 = vor.u32 %v6513_v53, %v5399_v50  ;;  %v5263_v60 = vld [vmem:[%s10101_s1 + $0x858] sm:$0xf0]  ;;  %v5319_v4 = vld [vmem:[%s10101_s1 + $0x8c8] sm:$0xf0]  ;;  %v6529_v34 = vld [vmem:[%s10101_s1 + $0x9e4] sm:$0xf] }
 0x12e   :  { %2939 = vmatpush.bf16.msrb.mxu2 %v5074_v13  ;;  %v6423_v13 = vld [vmem:[%s10101_s1 + $0x694] sm:$0xf]  ;;  %v5375_v30 = vld [vmem:[%s10101_s1 + $0x938] sm:$0xf0]  ;;  %v5303_v49 = vld [vmem:[%s10101_s1 + $0x8a8] sm:$0xf0] }
 0x12f   :  { %2952 = vmatpush.bf16.msrb.mxu3 %v5138_v1  ;;  %v6461_v1 = vld [vmem:[%s10101_s1 + $0x7c4] sm:$0xf]  ;;  %v5042_v44 = vor.u32 %v6423_v13, %v5039_v12  ;;  %v5391_v13 = vld [vmem:[%s10101_s1 + $0x958] sm:$0xf0] }
 0x130   :  { %2918 = vmatpush.bf16.msrb.mxu0 %v4906_v10  ;;  %v5194_v20 = vor.u32 %v6461_v1, %v5191_v2  ;;  %v5031_v10 = vld [vmem:[%s10101_s1 + $0x688] sm:$0xf0]  ;;  %v6477_v1 = vld [vmem:[%s10101_s1 + $0x844] sm:$0xf] }
 0x131   :  { %2927 = vmatpush.bf16.msrb.mxu1 %v5002_v26  ;;  %v5095_v26 = vld [vmem:[%s10101_s1 + $0x708] sm:$0xf0]  ;;  %v2701_v23 = vpop.f32.mrf.mxu3  ;;  %v5034_v29 = vor.u32 %v6421_v6, %v5031_v10  ;;  %v5471_v10 = vld [vmem:[%s10101_s1 + $0x9f8] sm:$0xf0]  ;;  %v6505_v51 = vld [vmem:[%s10101_s1 + $0x924] sm:$0xf] }
 0x132   :  { %2940 = vmatpush.bf16.msrb.mxu2 %v5066_v14  ;;  %v2688_v14 = vpop.f32.mrf.mxu2  ;;  %v5255_v2 = vld [vmem:[%s10101_s1 + $0x848] sm:$0xf0]  ;;  %v5247_v23 = vld [vmem:[%s10101_s1 + $0x838] sm:$0xf0] }
 0x133   :  { %2953 = vmatpush.bf16.msrb.mxu3 %v5130_v19  ;;  %2919 = vmatmul.bf16.vlgmr.msrb.gmra.mxu0 %v7433_v17  ;;  %v4986_v17 = vor.u32 %v6409_v38, %v4983_v39  ;;  %v6483_v19 = vld [vmem:[%s10101_s1 + $0x874] sm:$0xf]  ;;  %v5346_v39 = vor.u32 %v6499_v48, %v5343_v27 }
 0x134   :  { %2963 = vmatpush.bf16.msra.mxu0 %v5218_v24  ;;  %v5279_v24 = vld [vmem:[%s10101_s1 + $0x878] sm:$0xf0] }
 0x135   :  { %2928 = vmatpush.bf16.msrb.mxu1 %v4994_v35  ;;  %v5098_v35 = vor.u32 %v6437_v11, %v5095_v26  ;;  %v5282_v38 = vor.u32 %v6483_v19, %v5279_v24  ;;  %v6475_v19 = vld [vmem:[%s10101_s1 + $0x834] sm:$0xf] }
 0x136   :  { %2941 = vmatpush.bf16.msrb.mxu2 %v5058_v36  ;;  %v5186_v36 = vor.u32 %v6459_v15, %v5183_v21  ;;  %v5258_v15 = vor.u32 %v6477_v1, %v5255_v2 }
 0x137   :  { %2954 = vmatpush.bf16.msrb.mxu3 %v5122_v43  ;;  %v6457_v43 = vld [vmem:[%s10101_s1 + $0x7a4] sm:$0xf] }
 0x138   :  { %2964 = vmatpush.bf16.msra.mxu0 %v5210_v45  ;;  %v6481_v45 = vld [vmem:[%s10101_s1 + $0x864] sm:$0xf]  ;;  %v5178_v52 = vor.u32 %v6457_v43, %v5175_v55  ;;  %v5239_v43 = vld [vmem:[%s10101_s1 + $0x828] sm:$0xf0] }
 0x139   :  { %2929 = vmatpush.bf16.msrb.mxu1 %v4986_v17  ;;  %v5274_v46 = vor.u32 %v6481_v45, %v5271_v54  ;;  %v5167_v17 = vld [vmem:[%s10101_s1 + $0x798] sm:$0xf0]  ;;  %v6489_v54 = vld [vmem:[%s10101_s1 + $0x8a4] sm:$0xf] }
 0x13a   :  { %2942 = vmatpush.bf16.msrb.mxu2 %v5050_v7  ;;  %v6479_v7 = vld [vmem:[%s10101_s1 + $0x854] sm:$0xf]  ;;  %v5170_v12 = vor.u32 %v6455_v57, %v5167_v17  ;;  %v5455_v57 = vld [vmem:[%s10101_s1 + $0x9d8] sm:$0xf0] }
 0x13b   :  { %2955 = vmatpush.bf16.msrb.mxu3 %v5114_v61  ;;  %v6495_v61 = vld [vmem:[%s10101_s1 + $0x8d4] sm:$0xf]  ;;  %v5266_v0 = vor.u32 %v6479_v7, %v5263_v60 }
 0x13c   :  { %2965 = vmatpush.bf16.msra.mxu0 %v5202_v62  ;;  %v5327_v62 = vld [vmem:[%s10101_s1 + $0x8d8] sm:$0xf0]  ;;  %v6471_v60 = vld [vmem:[%s10101_s1 + $0x814] sm:$0xf] }
 0x13d   :  { %2930 = vmatpush.bf16.msrb.mxu1 %v4978_v3 }
 0x13e   :  { %2943 = vmatpush.bf16.msrb.mxu2 %v5042_v44  ;;  %v6493_v44 = vld [vmem:[%s10101_s1 + $0x8c4] sm:$0xf] }
 0x13f   :  { %2956 = vmatpush.bf16.msrb.mxu3 %v5106_v8  ;;  %v5383_v8 = vld [vmem:[%s10101_s1 + $0x948] sm:$0xf0]  ;;  %v5322_v21 = vor.u32 %v6493_v44, %v5319_v4  ;;  %v6485_v4 = vld [vmem:[%s10101_s1 + $0x884] sm:$0xf] }
 0x140   :  { %2966 = vmatpush.bf16.msra.mxu0 %v5194_v20  ;;  %v2712_v6 = vpop.f32.mrf.mxu0  ;;  %v6531_v20 = vld [vmem:[%s10101_s1 + $0x9f4] sm:$0xf]  ;;  %v5386_v24 = vor.u32 %v6509_v5, %v5383_v8  ;;  %v5223_v44 = vld [vmem:[%s10101_s1 + $0x808] sm:$0xf0] }
 0x141   :  { %2931 = vmatpush.bf16.msrb.mxu1 %v4970_v22  ;;  %v2713_v11 = vadd.f32 %v2712_v6, %v8763_v58  ;;  %v2725_v14 = vpop.f32.mrf.mxu1  ;;  %v5474_v27 = vor.u32 %v6531_v20, %v5471_v10  ;;  %v6491_v58 = vld [vmem:[%s10101_s1 + $0x8b4] sm:$0xf]  ;;  %v5311_v22 = vld [vmem:[%s10101_s1 + $0x8b8] sm:$0xf0]  ;;  %v5287_v8 = vld [vmem:[%s10101_s1 + $0x888] sm:$0xf0] }
 0x142   :  { %2944 = vmatpush.bf16.msrb.mxu2 %v5034_v29  ;;  %v6507_v29 = vld [vmem:[%s10101_s1 + $0x934] sm:$0xf]  ;;  %v6501_v20 = vld [vmem:[%s10101_s1 + $0x904] sm:$0xf]  ;;  %v5351_v10 = vld [vmem:[%s10101_s1 + $0x908] sm:$0xf0] }
 0x143   :  { %2957 = vmatpush.bf16.msrb.mxu3 %v5098_v35  ;;  %v2726_v48 = vadd.f32 %v2725_v14, %v2713_v11  ;;  %v5463_v35 = vld [vmem:[%s10101_s1 + $0x9e8] sm:$0xf0]  ;;  %v5378_v55 = vor.u32 %v6507_v29, %v5375_v30  ;;  %v5439_v14 = vld [vmem:[%s10101_s1 + $0x9b8] sm:$0xf0]  ;;  %v5354_v30 = vor.u32 %v6501_v20, %v5351_v10 }
 0x144   :  { %2967 = vmatpush.bf16.msra.mxu0 %v5186_v36  ;;  %2932 = vmatmul.bf16.vlgmr.msrb.gmra.mxu1 %v7450_v28  ;;  %v6511_v28 = vld [vmem:[%s10101_s1 + $0x954] sm:$0xf]  ;;  %v5250_v36 = vor.u32 %v6475_v19, %v5247_v23  ;;  %v5535_v23 = vld [vmem:[%s10101_s1 + $0xa78] sm:$0xf0] }
 0x145   :  { %2976 = vmatpush.bf16.msra.mxu1 %v5282_v38  ;;  %2945 = vmatmul.bf16.vlgmr.msrb.gmra.mxu2 %v7454_v32  ;;  %v5330_v32 = vor.u32 %v6495_v61, %v5327_v62  ;;  %v5394_v3 = vor.u32 %v6511_v28, %v5391_v13  ;;  %v5314_v38 = vor.u32 %v6491_v58, %v5311_v22  ;;  %v5231_v61 = vld [vmem:[%s10101_s1 + $0x818] sm:$0xf0]  ;;  %v6487_v13 = vld [vmem:[%s10101_s1 + $0x894] sm:$0xf] }
 0x146   :  { %2989 = vmatpush.bf16.msra.mxu2 %v5346_v39  ;;  %2958 = vmatmul.bf16.vlgmr.msrb.gmra.mxu3 %v7452_v31  ;;  %v5159_v31 = vld [vmem:[%s10101_s1 + $0x788] sm:$0xf0]  ;;  %v6473_v39 = vld [vmem:[%s10101_s1 + $0x824] sm:$0xf]  ;;  %v5234_v1 = vor.u32 %v6471_v60, %v5231_v61  ;;  %v5290_v58 = vor.u32 %v6485_v4, %v5287_v8  ;;  %v6579_v22 = vld [vmem:[%s10101_s1 + $0xb74] sm:$0xf] }
 0x147   :  { %3002 = vmatpush.bf16.msra.mxu3 %v5410_v47  ;;  %v5162_v26 = vor.u32 %v6453_v63, %v5159_v31  ;;  %v5466_v47 = vor.u32 %v6529_v34, %v5463_v35  ;;  %v6503_v63 = vld [vmem:[%s10101_s1 + $0x914] sm:$0xf]  ;;  %v5447_v31 = vld [vmem:[%s10101_s1 + $0x9c8] sm:$0xf0]  ;;  %v5663_v29 = vld [vmem:[%s10101_s1 + $0xb78] sm:$0xf0] }
 0x148   :  { %2968 = vmatpush.bf16.msra.mxu0 %v5178_v52  ;;  %v2738_v45 = vpop.f32.mrf.mxu2  ;;  %v2714_v50 = vpop.f32.mrf.mxu0  ;;  %v5583_v60 = vld [vmem:[%s10101_s1 + $0xad8] sm:$0xf0]  ;;  %v5639_v4 = vld [vmem:[%s10101_s1 + $0xb48] sm:$0xf0] }
 0x149   :  { %2977 = vmatpush.bf16.msra.mxu1 %v5274_v46  ;;  %v2739_v53 = vadd.f32 %v2738_v45, %v2726_v48  ;;  %v2751_v52 = vpop.f32.mrf.mxu3  ;;  %v5367_v46 = vld [vmem:[%s10101_s1 + $0x928] sm:$0xf0]  ;;  %v2727_v17 = vpop.f32.mrf.mxu1  ;;  %v5599_v48 = vld [vmem:[%s10101_s1 + $0xaf8] sm:$0xf0] }
 0x14a   :  { %2990 = vmatpush.bf16.msra.mxu2 %v5338_v56  ;;  %v6527_v56 = vld [vmem:[%s10101_s1 + $0x9d4] sm:$0xf]  ;;  %v5370_v62 = vor.u32 %v6505_v51, %v5367_v46  ;;  %v5527_v45 = vld [vmem:[%s10101_s1 + $0xa68] sm:$0xf0] }
 0x14b   :  { %3003 = vmatpush.bf16.msra.mxu3 %v5402_v59  ;;  %v8962_v7 = vadd.f32 %v2751_v52, %v2739_v53  ;;  %v5306_v59 = vor.u32 %v6489_v54, %v5303_v49  ;;  %v5458_v28 = vor.u32 %v6527_v56, %v5455_v57  ;;  %v5591_v54 = vld [vmem:[%s10101_s1 + $0xae8] sm:$0xf0]  ;;  %v6577_v49 = vld [vmem:[%s10101_s1 + $0xb64] sm:$0xf]  ;;  %v6519_v46 = vld [vmem:[%s10101_s1 + $0x994] sm:$0xf] }
 0x14c   :  { %2969 = vmatpush.bf16.msra.mxu0 %v5170_v12  ;;  %v5295_v12 = vld [vmem:[%s10101_s1 + $0x898] sm:$0xf0]  ;;  %v5655_v51 = vld [vmem:[%s10101_s1 + $0xb68] sm:$0xf0]  ;;  %v6543_v57 = vld [vmem:[%s10101_s1 + $0xa54] sm:$0xf] }
 0x14d   :  { %2978 = vmatpush.bf16.msra.mxu1 %v5266_v0  ;;  %v5359_v0 = vld [vmem:[%s10101_s1 + $0x918] sm:$0xf0]  ;;  %v5298_v2 = vor.u32 %v6487_v13, %v5295_v12  ;;  %v5658_v17 = vor.u32 %v6577_v49, %v5655_v51  ;;  %v6517_v13 = vld [vmem:[%s10101_s1 + $0x984] sm:$0xf]  ;;  %v5623_v51 = vld [vmem:[%s10101_s1 + $0xb28] sm:$0xf0] }
 0x14e   :  { %2991 = vmatpush.bf16.msra.mxu2 %v5330_v32  ;;  %v6525_v32 = vld [vmem:[%s10101_s1 + $0x9c4] sm:$0xf]  ;;  %v5362_v5 = vor.u32 %v6503_v63, %v5359_v0  ;;  %v5423_v56 = vld [vmem:[%s10101_s1 + $0x998] sm:$0xf0]  ;;  %v5511_v0 = vld [vmem:[%s10101_s1 + $0xa48] sm:$0xf0] }
 0x14f   :  { %3004 = vmatpush.bf16.msra.mxu3 %v5394_v3  ;;  %v6469_v3 = vld [vmem:[%s10101_s1 + $0x804] sm:$0xf]  ;;  %v5450_v6 = vor.u32 %v6525_v32, %v5447_v31 }
 0x150   :  { %2970 = vmatpush.bf16.msra.mxu0 %v5162_v26  ;;  %v2740_v11 = vpop.f32.mrf.mxu2  ;;  %v6523_v26 = vld [vmem:[%s10101_s1 + $0x9b4] sm:$0xf]  ;;  %v9015_v19 = vpop.f32.mrf.mxu0  ;;  %v6541_v63 = vld [vmem:[%s10101_s1 + $0xa44] sm:$0xf] }
 0x151   :  { %2979 = vmatpush.bf16.msra.mxu1 %v5258_v15  ;;  %v6547_v15 = vld [vmem:[%s10101_s1 + $0xa74] sm:$0xf]  ;;  %v5442_v34 = vor.u32 %v6523_v26, %v5439_v14  ;;  %v6557_v32 = vld [vmem:[%s10101_s1 + $0xac4] sm:$0xf]  ;;  %v5514_v10 = vor.u32 %v6541_v63, %v5511_v0  ;;  %v5503_v14 = vld [vmem:[%s10101_s1 + $0xa38] sm:$0xf0] }
 0x152   :  { %2992 = vmatpush.bf16.msra.mxu2 %v5322_v21  ;;  %v2753_v21 = vpop.f32.mrf.mxu3  ;;  %v5538_v35 = vor.u32 %v6547_v15, %v5535_v23  ;;  %v6539_v26 = vld [vmem:[%s10101_s1 + $0xa34] sm:$0xf]  ;;  %v6533_v63 = vld [vmem:[%s10101_s1 + $0xa04] sm:$0xf]  ;;  %v5479_v0 = vld [vmem:[%s10101_s1 + $0xa08] sm:$0xf0] }
 0x153   :  { %3005 = vmatpush.bf16.msra.mxu3 %v5386_v24  ;;  %2971 = vmatmul.bf16.vlgmr.msra.gmra.mxu0 %v7456_v33  ;;  %v5242_v33 = vor.u32 %v6473_v39, %v5239_v43  ;;  %v6563_v24 = vld [vmem:[%s10101_s1 + $0xaf4] sm:$0xf]  ;;  %v5431_v39 = vld [vmem:[%s10101_s1 + $0x9a8] sm:$0xf0]  ;;  %v6545_v43 = vld [vmem:[%s10101_s1 + $0xa64] sm:$0xf] }
 0x154   :  { %3015 = vmatpush.bf16.msrb.mxu0 %v5474_v27  ;;  %v5226_v27 = vor.u32 %v6469_v3, %v5223_v44  ;;  %v5530_v50 = vor.u32 %v6545_v43, %v5527_v45  ;;  %v6741_v3 = vld [vmem:[%s10103_s2] sm:$0x3]  ;;  %v6555_v23 = vld [vmem:[%s10101_s1 + $0xab4] sm:$0xf]  ;;  %v5559_v45 = vld [vmem:[%s10101_s1 + $0xaa8] sm:$0xf0] }
 0x155   :  { %2980 = vmatpush.bf16.msra.mxu1 %v5250_v36  ;;  %v5602_v36 = vor.u32 %v6563_v24, %v5599_v48  ;;  %v420_v44 = vperm.slane %v6741_v3, 1  ;;  %v5567_v24 = vld [vmem:[%s10101_s1 + $0xab8] sm:$0xf0]  ;;  %v6571_v48 = vld [vmem:[%s10101_s1 + $0xb34] sm:$0xf] }
 0x156   :  { %2993 = vmatpush.bf16.msra.mxu2 %v5314_v38  ;;  %v6521_v38 = vld [vmem:[%s10101_s1 + $0x9a4] sm:$0xf] }
 0x157   :  { %3006 = vmatpush.bf16.msra.mxu3 %v5378_v55  ;;  %v5666_v55 = vor.u32 %v6579_v22, %v5663_v29  ;;  %v5434_v53 = vor.u32 %v6521_v38, %v5431_v39  ;;  %v6593_v22 = vld [vmem:[%s10101_s1 + $0xbe4] sm:$0xf]  ;;  %v5719_v29 = vld [vmem:[%s10101_s1 + $0xbe8] sm:$0xf0] }
 0x158   :  { %3016 = vmatpush.bf16.msrb.mxu0 %v5466_v47  ;;  %v6561_v47 = vld [vmem:[%s10101_s1 + $0xae4] sm:$0xf]  ;;  %v2766_v61 = vpop.f32.mrf.mxu0  ;;  %v5722_v43 = vor.u32 %v6593_v22, %v5719_v29  ;;  %v5687_v22 = vld [vmem:[%s10101_s1 + $0xba8] sm:$0xf0]  ;;  %v5935_v29 = vld [vmem:[%s10104_s3 + $0x150] sm:$0xf] }
 0x159   :  { %2981 = vmatpush.bf16.msra.mxu1 %v5242_v33  ;;  %v5594_v52 = vor.u32 %v6561_v47, %v5591_v54  ;;  %v5519_v33 = vld [vmem:[%s10101_s1 + $0xa58] sm:$0xf0]  ;;  %v6569_v47 = vld [vmem:[%s10101_s1 + $0xb24] sm:$0xf] }
 0x15a   :  { %2994 = vmatpush.bf16.msra.mxu2 %v5306_v59  ;;  %v6559_v59 = vld [vmem:[%s10101_s1 + $0xad4] sm:$0xf]  ;;  %v5551_v61 = vld [vmem:[%s10101_s1 + $0xa98] sm:$0xf0] }
 0x15b   :  { %3007 = vmatpush.bf16.msra.mxu3 %v5370_v62  ;;  %v5647_v62 = vld [vmem:[%s10101_s1 + $0xb58] sm:$0xf0]  ;;  %v5586_v12 = vor.u32 %v6559_v59, %v5583_v60  ;;  %v6551_v60 = vld [vmem:[%s10101_s1 + $0xa94] sm:$0xf] }
 0x15c   :  { %3017 = vmatpush.bf16.msrb.mxu0 %v5458_v28  ;;  %v5426_v28 = vor.u32 %v6519_v46, %v5423_v56 }
 0x15d   :  { %2982 = vmatpush.bf16.msra.mxu1 %v5234_v1  ;;  %v5575_v1 = vld [vmem:[%s10101_s1 + $0xac8] sm:$0xf0] }
 0x15e   :  { %2995 = vmatpush.bf16.msra.mxu2 %v5298_v2  ;;  %v6573_v2 = vld [vmem:[%s10101_s1 + $0xb44] sm:$0xf]  ;;  %v5578_v11 = vor.u32 %v6557_v32, %v5575_v1 }
 0x15f   :  { %3008 = vmatpush.bf16.msra.mxu3 %v5362_v5  ;;  %v6595_v5 = vld [vmem:[%s10101_s1 + $0xbf4] sm:$0xf]  ;;  %v5642_v15 = vor.u32 %v6573_v2, %v5639_v4  ;;  %v6549_v32 = vld [vmem:[%s10101_s1 + $0xa84] sm:$0xf] }
 0x160   :  { %3018 = vmatpush.bf16.msrb.mxu0 %v5450_v6  ;;  %v5727_v6 = vld [vmem:[%s10101_s1 + $0xbf8] sm:$0xf0]  ;;  %v6565_v4 = vld [vmem:[%s10101_s1 + $0xb04] sm:$0xf] }
 0x161   :  { %2983 = vmatpush.bf16.msra.mxu1 %v5226_v27  ;;  %v2777_v20 = vpop.f32.mrf.mxu1  ;;  %v5730_v21 = vor.u32 %v6595_v5, %v5727_v6  ;;  %v5607_v5 = vld [vmem:[%s10101_s1 + $0xb08] sm:$0xf0] }
 0x162   :  { %2996 = vmatpush.bf16.msra.mxu2 %v5290_v58  ;;  %v2778_v27 = vadd.f32 %v2777_v20, %v420_v44  ;;  %v5631_v58 = vld [vmem:[%s10101_s1 + $0xb38] sm:$0xf0]  ;;  %v5543_v44 = vld [vmem:[%s10101_s1 + $0xa88] sm:$0xf0] }
 0x163   :  { %3009 = vmatpush.bf16.msra.mxu3 %v5354_v30  ;;  %v5506_v30 = vor.u32 %v6539_v26, %v5503_v14  ;;  %v5634_v39 = vor.u32 %v6571_v48, %v5631_v58  ;;  %v5695_v20 = vld [vmem:[%s10101_s1 + $0xbb8] sm:$0xf0]  ;;  %v6603_v26 = vld [vmem:[%s10101_s1 + $0xc34] sm:$0xf]  ;;  %v6585_v58 = vld [vmem:[%s10101_s1 + $0xba4] sm:$0xf] }
 0x164   :  { %3019 = vmatpush.bf16.msrb.mxu0 %v5442_v34  ;;  %2984 = vmatmul.bf16.vlgmr.msra.gmra.mxu1 %v7820_v9  ;;  %v6575_v9 = vld [vmem:[%s10101_s1 + $0xb54] sm:$0xf]  ;;  %v5570_v34 = vor.u32 %v6555_v23, %v5567_v24  ;;  %v5759_v14 = vld [vmem:[%s10101_s1 + $0xc38] sm:$0xf0]  ;;  %v5610_v23 = vor.u32 %v6565_v4, %v5607_v5 }
 0x165   :  { %3028 = vmatpush.bf16.msrb.mxu1 %v5538_v35  ;;  %2997 = vmatmul.bf16.vlgmr.msra.gmra.mxu2 %v7833_v18  ;;  %v5415_v18 = vld [vmem:[%s10101_s1 + $0x988] sm:$0xf0]  ;;  %v5650_v31 = vor.u32 %v6575_v9, %v5647_v62  ;;  %v6537_v35 = vld [vmem:[%s10101_s1 + $0xa24] sm:$0xf]  ;;  %v6567_v9 = vld [vmem:[%s10101_s1 + $0xb14] sm:$0xf] }
 0x166   :  { %3041 = vmatpush.bf16.msrb.mxu2 %v5602_v36  ;;  %3010 = vmatmul.bf16.vlgmr.msra.gmra.mxu3 %v7831_v16  ;;  %v5522_v16 = vor.u32 %v6543_v57, %v5519_v33  ;;  %v5418_v8 = vor.u32 %v6517_v13, %v5415_v18  ;;  %v5495_v36 = vld [vmem:[%s10101_s1 + $0xa28] sm:$0xf0]  ;;  %v5626_v33 = vor.u32 %v6569_v47, %v5623_v51  ;;  %v5615_v62 = vld [vmem:[%s10101_s1 + $0xb18] sm:$0xf0]  ;;  %v5907_v47 = vld [vmem:[%s10104_s3 + $0x118] sm:$0xf] }
 0x167   :  { %3054 = vmatpush.bf16.msrb.mxu3 %v5666_v55  ;;  %v6553_v55 = vld [vmem:[%s10101_s1 + $0xaa4] sm:$0xf]  ;;  %v5498_v56 = vor.u32 %v6537_v35, %v5495_v36  ;;  %v5703_v13 = vld [vmem:[%s10101_s1 + $0xbc8] sm:$0xf0]  ;;  %v5618_v2 = vor.u32 %v6567_v9, %v5615_v62  ;;  %v5743_v51 = vld [vmem:[%s10101_s1 + $0xc18] sm:$0xf0] }
 0x168   :  { %3020 = vmatpush.bf16.msrb.mxu0 %v5434_v53  ;;  %v2790_v38 = vpop.f32.mrf.mxu2  ;;  %v6591_v53 = vld [vmem:[%s10101_s1 + $0xbd4] sm:$0xf]  ;;  %v5562_v57 = vor.u32 %v6553_v55, %v5559_v45  ;;  %v5751_v35 = vld [vmem:[%s10101_s1 + $0xc28] sm:$0xf0]  ;;  %v5679_v45 = vld [vmem:[%s10101_s1 + $0xb98] sm:$0xf0] }
 0x169   :  { %3029 = vmatpush.bf16.msrb.mxu1 %v5530_v50  ;;  %v2791_v54 = vadd.f32 %v2790_v38, %v2778_v27  ;;  %v2803_v49 = vpop.f32.mrf.mxu3  ;;  %v5711_v50 = vld [vmem:[%s10101_s1 + $0xbd8] sm:$0xf0]  ;;  %v2779_v46 = vpop.f32.mrf.mxu1  ;;  %v5762_v27 = vor.u32 %v6603_v26, %v5759_v14  ;;  %v5690_v38 = vor.u32 %v6585_v58, %v5687_v22  ;;  %v6583_v55 = vld [vmem:[%s10101_s1 + $0xb94] sm:$0xf]  ;;  %v5851_v9 = vld [vmem:[%s10104_s3 + $0xa8] sm:$0xf] }
 0x16a   :  { %3042 = vmatpush.bf16.msrb.mxu2 %v5594_v52  ;;  %v5714_v59 = vor.u32 %v6591_v53, %v5711_v50  ;;  %v5682_v53 = vor.u32 %v6583_v55, %v5679_v45  ;;  %v6581_v50 = vld [vmem:[%s10101_s1 + $0xb84] sm:$0xf]  ;;  %v5879_v46 = vld [vmem:[%s10104_s3 + $0xe0] sm:$0xf]  ;;  %v6608_v58 = vld [vmem:[%s10104_s3 + $0x18] sm:$0xf0] }
 0x16b   :  { %3055 = vmatpush.bf16.msrb.mxu3 %v5658_v17  ;;  %v2804_v52 = vadd.f32 %v2803_v49, %v2791_v54  ;;  %v5487_v17 = vld [vmem:[%s10101_s1 + $0xa18] sm:$0xf0]  ;;  %v6643_v54 = vld [vmem:[%s10104_s3 + $0x130] sm:$0xf0]  ;;  %v5881_v26 = vld [vmem:[%s10104_s3 + $0xfc] sm:$0xf0] }
 0x16c   :  { %3021 = vmatpush.bf16.msrb.mxu0 %v5426_v28  ;;  %v6589_v28 = vld [vmem:[%s10101_s1 + $0xbc4] sm:$0xf]  ;;  %v6599_v49 = vld [vmem:[%s10101_s1 + $0xc14] sm:$0xf]  ;;  %v6626_v22 = vld [vmem:[%s10104_s3 + $0xac] sm:$0xf] }
 0x16d   :  { %3030 = vmatpush.bf16.msrb.mxu1 %v5522_v16  ;;  %v5706_v3 = vor.u32 %v6589_v28, %v5703_v13  ;;  %v6629_v13 = vld [vmem:[%s10104_s3 + $0xc0] sm:$0xf0]  ;;  %v5943_v55 = vld [vmem:[%s10104_s3 + $0x158] sm:$0xf]  ;;  %v6651_v45 = vld [vmem:[%s10104_s3 + $0x170] sm:$0xf0] }
 0x16e   :  { %3043 = vmatpush.bf16.msrb.mxu2 %v5586_v12  ;;  %v5554_v12 = vor.u32 %v6551_v60, %v5551_v61 }
 0x16f   :  { %3056 = vmatpush.bf16.msrb.mxu3 %v5650_v31 }
 0x170   :  { %3022 = vmatpush.bf16.msrb.mxu0 %v5418_v8  ;;  %v2816_v18 = vpop.f32.mrf.mxu0  ;;  %v2792_v1 = vpop.f32.mrf.mxu2  ;;  %v6587_v8 = vld [vmem:[%s10101_s1 + $0xbb4] sm:$0xf] }
 0x171   :  { %3031 = vmatpush.bf16.msrb.mxu1 %v5514_v10  ;;  %v9198_v31 = vadd.f32 %v2816_v18, %v2804_v52  ;;  %v2805_v6 = vpop.f32.mrf.mxu3  ;;  %v5963_v10 = vld [vmem:[%s10104_s3 + $0x188] sm:$0xf]  ;;  %v5698_v24 = vor.u32 %v6587_v8, %v5695_v20  ;;  %v5671_v52 = vld [vmem:[%s10101_s1 + $0xb88] sm:$0xf0]  ;;  %v6647_v18 = vld [vmem:[%s10104_s3 + $0x154] sm:$0xf] }
 0x172   :  { %3044 = vmatpush.bf16.msrb.mxu2 %v5578_v11  ;;  %v6657_v11 = vld [vmem:[%s10104_s3 + $0x1a0] sm:$0xf0]  ;;  %v6622_v1 = vld [vmem:[%s10104_s3 + $0x88] sm:$0xf0]  ;;  %v5795_v20 = vld [vmem:[%s10104_s3 + $0x38] sm:$0xf] }
 0x173   :  { %3057 = vmatpush.bf16.msrb.mxu3 %v5642_v15  ;;  %3023 = vmatmul.bf16.vlgmr.msrb.gmra.mxu0 %v7844_v25  ;;  %v6535_v25 = vld [vmem:[%s10101_s1 + $0xa14] sm:$0xf]  ;;  %v5482_v15 = vor.u32 %v6533_v63, %v5479_v0  ;;  %v5964_v48 = vor.u32 %v6657_v11, %v5963_v10  ;;  %v6742_v10 = vld [vmem:[#allocation1] sm:$0xff] }
 0x174   :  { %3067 = vmatpush.bf16.msra.mxu0 %v5730_v21  ;;  %v5490_v16 = vor.u32 %v6535_v25, %v5487_v17  ;;  %v5546_v21 = vor.u32 %v6549_v32, %v5543_v44  ;;  %v6597_v25 = vld [vmem:[%s10101_s1 + $0xc04] sm:$0xf]  ;;  %v5735_v17 = vld [vmem:[%s10101_s1 + $0xc08] sm:$0xf0]  ;;  %v5823_v32 = vld [vmem:[%s10104_s3 + $0x70] sm:$0xf] }
 0x175   :  { %3032 = vmatpush.bf16.msrb.mxu1 %v5506_v30  ;;  %v6650_v30 = vld [vmem:[%s10104_s3 + $0x168] sm:$0xf0]  ;;  %v5738_v28 = vor.u32 %v6597_v25, %v5735_v17  ;;  %v5909_v44 = vld [vmem:[%s10104_s3 + $0x134] sm:$0xf0]  ;;  %v5824_v6 = vor.u32 %v6622_v1, %v5823_v32  ;;  %v6615_v11 = vld [vmem:[%s10104_s3 + $0x50] sm:$0xf0] }
 0x176   :  { %3045 = vmatpush.bf16.msrb.mxu2 %v5570_v34  ;;  %v6601_v34 = vld [vmem:[%s10101_s1 + $0xc24] sm:$0xf]  ;;  %v6655_v17 = vld [vmem:[%s10104_s3 + $0x194] sm:$0xf]  ;;  %v5917_v1 = vld [vmem:[%s10104_s3 + $0x13c] sm:$0xf0] }
 0x177   :  { %3058 = vmatpush.bf16.msrb.mxu3 %v5634_v39  ;;  %v5936_v39 = vor.u32 %v6650_v30, %v5935_v29  ;;  %v5853_v29 = vld [vmem:[%s10104_s3 + $0xc4] sm:$0xf0]  ;;  %v6637_v25 = vld [vmem:[%s10104_s3 + $0x100] sm:$0xf0]  ;;  %v6623_v32 = vld [vmem:[%s10104_s3 + $0x90] sm:$0xf0] }
 0x178   :  { %3068 = vmatpush.bf16.msra.mxu0 %v5722_v43  ;;  %v2818_v36 = vpop.f32.mrf.mxu0  ;;  %v5754_v43 = vor.u32 %v6601_v34, %v5751_v35  ;;  %v5971_v34 = vld [vmem:[%s10104_s3 + $0x190] sm:$0xf]  ;;  %v5856_v35 = vor.u32 %v6626_v22, %v5853_v29  ;;  %v6659_v22 = vld [vmem:[%s10104_s3 + $0x1b0] sm:$0xf0] }
 0x179   :  { %3033 = vmatpush.bf16.msrb.mxu1 %v5498_v56  ;;  %v6654_v56 = vld [vmem:[%s10104_s3 + $0x18c] sm:$0xf] }
 0x17a   :  { %3046 = vmatpush.bf16.msrb.mxu2 %v5562_v57  ;;  %v5965_v57 = vld [vmem:[%s10104_s3 + $0x1a4] sm:$0xf0] }
 0x17b   :  { %3059 = vmatpush.bf16.msrb.mxu3 %v5626_v33  ;;  %v5674_v33 = vor.u32 %v6581_v50, %v5671_v52  ;;  %v5968_v61 = vor.u32 %v6654_v56, %v5965_v57  ;;  %v6644_v50 = vld [vmem:[%s10104_s3 + $0x138] sm:$0xf0]  ;;  %v5769_v56 = vld [vmem:[%s10104_s3 + $0x1c] sm:$0xf0]  ;;  %v5887_v57 = vld [vmem:[%s10104_s3 + $0xe8] sm:$0xf] }
 0x17c   :  { %3069 = vmatpush.bf16.msra.mxu0 %v5714_v59 }
 0x17d   :  { %3034 = vmatpush.bf16.msrb.mxu1 %v5490_v16  ;;  %v5937_v16 = vld [vmem:[%s10104_s3 + $0x16c] sm:$0xf0] }
 0x17e   :  { %3047 = vmatpush.bf16.msrb.mxu2 %v5554_v12  ;;  %v5852_v12 = vor.u32 %v6629_v13, %v5851_v9  ;;  %v5940_v63 = vor.u32 %v6647_v18, %v5937_v16  ;;  %v5888_v9 = vor.u32 %v6637_v25, %v5887_v57  ;;  %v6630_v13 = vld [vmem:[%s10104_s3 + $0xc8] sm:$0xf0]  ;;  %v6648_v18 = vld [vmem:[%s10104_s3 + $0x15c] sm:$0xf]  ;;  %v5945_v16 = vld [vmem:[%s10104_s3 + $0x174] sm:$0xf0] }
 0x17f   :  { %3060 = vmatpush.bf16.msrb.mxu3 %v5618_v2  ;;  %v5777_v25 = vld [vmem:[%s10104_s3 + $0x24] sm:$0xf0] }
 0x180   :  { %3070 = vmatpush.bf16.msra.mxu0 %v5706_v3  ;;  %v6640_v3 = vld [vmem:[%s10104_s3 + $0x11c] sm:$0xf] }
 0x181   :  { %3035 = vmatpush.bf16.msrb.mxu1 %v5482_v15  ;;  %v2829_v59 = vpop.f32.mrf.mxu1  ;;  %v5912_v8 = vor.u32 %v6640_v3, %v5909_v44 }
 0x182   :  { %3048 = vmatpush.bf16.msrb.mxu2 %v5546_v21  ;;  %v2830_v62 = vadd.f32 %v2829_v59, %v9198_v31  ;;  %v5796_v21 = vor.u32 %v6615_v11, %v5795_v20  ;;  %v6634_v11 = vld [vmem:[%s10104_s3 + $0xec] sm:$0xf] }
 0x183   :  { %3061 = vmatpush.bf16.msrb.mxu3 %v5610_v23 }
 0x184   :  { %3071 = vmatpush.bf16.msra.mxu0 %v5698_v24  ;;  %3036 = vmatmul.bf16.vlgmr.msrb.gmra.mxu1 %v7861_v37  ;;  %v5908_v37 = vor.u32 %v6643_v54, %v5907_v47  ;;  %v5767_v24 = vld [vmem:[%s10104_s3] sm:$0xf] }
 0x185   :  { %3084 = vmatpush.bf16.msra.mxu1 %v5762_v27  ;;  %3049 = vmatmul.bf16.vlgmr.msrb.gmra.mxu2 %v7865_v41  ;;  %v5746_v41 = vor.u32 %v6599_v49, %v5743_v51  ;;  %v2765_v27 = vadd.f32 %v9015_v19, %v8962_v7  ;;  %v6658_v7 = vld [vmem:[%s10104_s3 + $0x1a8] sm:$0xf0]  ;;  %v5768_v19 = vor.u32 %v6608_v58, %v5767_v24  ;;  %v6609_v24 = vld [vmem:[%s10104_s3 + $0x20] sm:$0xf0]  ;;  %v5979_v58 = vld [vmem:[%s10104_s3 + $0x198] sm:$0xf] }
 0x186   :  { %3817 = vmatpush.bf16.msra.mxu2 %v5964_v48  ;;  %3062 = vmatmul.bf16.vlgmr.msrb.gmra.mxu3 %v7863_v40  ;;  %v6636_v40 = vld [vmem:[%s10104_s3 + $0xf8] sm:$0xf0]  ;;  %v5944_v51 = vor.u32 %v6651_v45, %v5943_v55  ;;  %v6613_v55 = vld [vmem:[%s10104_s3 + $0x44] sm:$0xf] }
 0x187   :  { %v5880_v60 = vor.u32 %v6636_v40, %v5879_v46  ;;  %v3093_v36 = vmax.f32 %v2765_v27, 0.0  ;;  %v6605_v40 = vld [vmem:[%s10104_s3 + $0x4] sm:$0xf]  ;;  %v5861_v27 = vld [vmem:[%s10104_s3 + $0xcc] sm:$0xf0] }
 0x188   :  { %3072 = vmatpush.bf16.msra.mxu0 %v5690_v38  ;;  %v2842_v0 = vpop.f32.mrf.mxu2  ;;  %v5972_v38 = vor.u32 %v6658_v7, %v5971_v34 }
 0x189   :  { %3085 = vmatpush.bf16.msra.mxu1 %v5754_v43  ;;  %v2843_v31 = vadd.f32 %v2842_v0, %v2830_v62  ;;  %v2855_v2 = vpop.f32.mrf.mxu3  ;;  %v2831_v5 = vpop.f32.mrf.mxu1  ;;  %v5825_v43 = vld [vmem:[%s10104_s3 + $0x8c] sm:$0xf0]  ;;  %v9361_v49 = vpack.c.bf16 %v3093_v36, %v3093_v36  ;;  %v5831_v0 = vld [vmem:[%s10104_s3 + $0x78] sm:$0xf] }
 0x18a   :  { %3818 = vmatpush.bf16.msra.mxu2 %v5936_v39  ;;  %v6619_v39 = vld [vmem:[%s10104_s3 + $0x74] sm:$0xf]  ;;  %v5832_v5 = vor.u32 %v6623_v32, %v5831_v0  ;;  %v5833_v36 = vld [vmem:[%s10104_s3 + $0x94] sm:$0xf0] }
 0x18b   :  { %v2856_v4 = vadd.f32 %v2855_v2, %v2843_v31  ;;  %v5828_v54 = vor.u32 %v6619_v39, %v5825_v43  ;;  %v6641_v31 = vld [vmem:[%s10104_s3 + $0x124] sm:$0xf]  ;;  %v6652_v39 = vld [vmem:[%s10104_s3 + $0x178] sm:$0xf0]  ;;  %v6699_v0 = vld [vmem:[%s10104_s3 + $0x2f0] sm:$0xf0] }
 0x18c   :  { %3073 = vmatpush.bf16.msra.mxu0 %v5682_v53  ;;  %v6612_v53 = vld [vmem:[%s10104_s3 + $0x3c] sm:$0xf] }
 0x18d   :  { %3086 = vmatpush.bf16.msra.mxu1 %v5746_v41  ;;  %v5915_v41 = vld [vmem:[%s10104_s3 + $0x120] sm:$0xf] }
 0x18e   :  { %3819 = vmatpush.bf16.msra.mxu2 %v5908_v37  ;;  %v5797_v37 = vld [vmem:[%s10104_s3 + $0x54] sm:$0xf0]  ;;  %v5916_v46 = vor.u32 %v6644_v50, %v5915_v41  ;;  %v6710_v41 = vld [vmem:[%s10104_s3 + $0x34c] sm:$0xf]  ;;  %v6189_v50 = vld [vmem:[%s10104_s3 + $0x364] sm:$0xf0] }
 0x18f   :  { %v5800_v52 = vor.u32 %v6612_v53, %v5797_v37  ;;  %v5805_v53 = vld [vmem:[%s10104_s3 + $0x5c] sm:$0xf0] }
 0x190   :  { %3074 = vmatpush.bf16.msra.mxu0 %v5674_v33  ;;  %v2868_v14 = vpop.f32.mrf.mxu0  ;;  %v2844_v48 = vpop.f32.mrf.mxu2  ;;  %v5973_v33 = vld [vmem:[%s10104_s3 + $0x1ac] sm:$0xf0]  ;;  %v5808_v57 = vor.u32 %v6613_v55, %v5805_v53  ;;  %v6077_v55 = vld [vmem:[%s10104_s3 + $0x284] sm:$0xf0] }
 0x191   :  { %3087 = vmatpush.bf16.msra.mxu1 %v5738_v28  ;;  %v2869_v15 = vadd.f32 %v2868_v14, %v2856_v4  ;;  %v2857_v30 = vpop.f32.mrf.mxu3  ;;  %v5976_v62 = vor.u32 %v6655_v17, %v5973_v33  ;;  %v5859_v28 = vld [vmem:[%s10104_s3 + $0xb0] sm:$0xf]  ;;  %v6627_v48 = vld [vmem:[%s10104_s3 + $0xb4] sm:$0xf]  ;;  %v6706_v33 = vld [vmem:[%s10104_s3 + $0x328] sm:$0xf0] }
 0x192   :  { %3820 = vmatpush.bf16.msra.mxu2 %v5880_v60  ;;  %v5772_v60 = vor.u32 %v6605_v40, %v5769_v56  ;;  %v5864_v7 = vor.u32 %v6627_v48, %v5861_v27  ;;  %v6192_v40 = vor.u32 %v6710_v41, %v6189_v50  ;;  %v6606_v56 = vld [vmem:[%s10104_s3 + $0xc] sm:$0xf]  ;;  %v6159_v17 = vld [vmem:[%s10104_s3 + $0x310] sm:$0xf]  ;;  %v6624_v48 = vld [vmem:[%s10104_s3 + $0x98] sm:$0xf0] }
 0x193   :  { %3075 = vmatmul.bf16.vlgmr.msra.gmra.mxu0 %v7867_v42  ;;  %v6633_v42 = vld [vmem:[%s10104_s3 + $0xe4] sm:$0xf]  ;;  %v6642_v27 = vld [vmem:[%s10104_s3 + $0x12c] sm:$0xf]  ;;  %v6047_v53 = vld [vmem:[%s10104_s3 + $0x230] sm:$0xf] }
 0x194   :  { %3843 = vmatpush.bf16.msrb.mxu0 %v5968_v61  ;;  %5764 = vmatmul.msk.bf16.vlgmr.msra.gmra.mxu1 %vm2440_vm0, %v6742_v10  ;;  %v5884_v23 = vor.u32 %v6633_v42, %v5881_v26  ;;  %v6616_v10 = vld [vmem:[%s10104_s3 + $0x58] sm:$0xf0]  ;;  %v5889_v42 = vld [vmem:[%s10104_s3 + $0x104] sm:$0xf0] }
 0x195   :  { %3856 = vmatpush.bf16.msrb.mxu1 %v6192_v40  ;;  %v6675_v40 = vld [vmem:[%s10104_s3 + $0x234] sm:$0xf] }
 0x196   :  { %3821 = vmatpush.bf16.msra.mxu2 %v5852_v12  ;;  %v5860_v12 = vor.u32 %v6630_v13, %v5859_v28  ;;  %v6638_v28 = vld [vmem:[%s10104_s3 + $0x108] sm:$0xf0]  ;;  %v6656_v13 = vld [vmem:[%s10104_s3 + $0x19c] sm:$0xf] }
 0x198   :  { %3844 = vmatpush.bf16.msrb.mxu0 %v5940_v63  ;;  %v2870_v47 = vpop.f32.mrf.mxu0  ;;  %v5948_v63 = vor.u32 %v6648_v18, %v5945_v16  ;;  %v5981_v18 = vld [vmem:[%s10104_s3 + $0x1b4] sm:$0xf0] }
 0x199   :  { %v6187_v47 = vld [vmem:[%s10104_s3 + $0x348] sm:$0xf] }
 0x19a   :  { %3822 = vmatpush.bf16.msra.mxu2 %v5824_v6  ;;  %v5920_v6 = vor.u32 %v6641_v31, %v5917_v1  ;;  %v5984_v1 = vor.u32 %v6656_v13, %v5981_v18  ;;  %v6671_v13 = vld [vmem:[%s10104_s3 + $0x210] sm:$0xf0] }
 0x19c   :  { %3845 = vmatpush.bf16.msrb.mxu0 %v5912_v8  ;;  %v5803_v8 = vld [vmem:[%s10104_s3 + $0x40] sm:$0xf] }
 0x19d   :  { %v5804_v14 = vor.u32 %v6616_v10, %v5803_v8  ;;  %v5953_v8 = vld [vmem:[%s10104_s3 + $0x17c] sm:$0xf0] }
 0x19e   :  { %3823 = vmatpush.bf16.msra.mxu2 %v5796_v21  ;;  %v5775_v21 = vld [vmem:[%s10104_s3 + $0x8] sm:$0xf]  ;;  %v6103_v10 = vld [vmem:[%s10104_s3 + $0x2a0] sm:$0xf] }
 0x19f   :  { %v5776_v34 = vor.u32 %v6609_v24, %v5775_v21  ;;  %v6689_v21 = vld [vmem:[%s10104_s3 + $0x2a4] sm:$0xf]  ;;  %v6105_v24 = vld [vmem:[%s10104_s3 + $0x2bc] sm:$0xf0] }
 0x1a0   :  { %3846 = vmatpush.bf16.msrb.mxu0 %v5884_v23 }
 0x1a1   :  { %v2881_v59 = vpop.f32.mrf.mxu1 }
 0x1a2   :  { %3824 = vmatpush.bf16.msra.mxu2 %v5768_v19  ;;  %v2882_v61 = vadd.f32 %v2881_v59, %v2869_v15  ;;  %v5892_v15 = vor.u32 %v6634_v11, %v5889_v42  ;;  %v5980_v19 = vor.u32 %v6659_v22, %v5979_v58  ;;  %v6692_v11 = vld [vmem:[%s10104_s3 + $0x2b8] sm:$0xf0]  ;;  %v5925_v58 = vld [vmem:[%s10104_s3 + $0x144] sm:$0xf0]  ;;  %v6108_v22 = vor.u32 %v6689_v21, %v6105_v24  ;;  %v6195_v21 = vld [vmem:[%s10104_s3 + $0x350] sm:$0xf] }
 0x1a4   :  { %3847 = vmatpush.bf16.msrb.mxu0 %v5856_v35  ;;  %v6620_v35 = vld [vmem:[%s10104_s3 + $0x7c] sm:$0xf] }
 0x1a5   :  { %3825 = vmatmul.bf16.vlgmr.msra.gmra.mxu2 %v9361_v49  ;;  %v5836_v43 = vor.u32 %v6620_v35, %v5833_v36  ;;  %v5928_v35 = vor.u32 %v6642_v27, %v5925_v58  ;;  %v5811_v36 = vld [vmem:[%s10104_s3 + $0x48] sm:$0xf]  ;;  %v6714_v58 = vld [vmem:[%s10104_s3 + $0x368] sm:$0xf0] }
 0x1a6   :  { %3869 = vmatpush.bf16.msrb.mxu2 %v5972_v38  ;;  %v5951_v38 = vld [vmem:[%s10104_s3 + $0x160] sm:$0xf] }
 0x1a8   :  { %3848 = vmatpush.bf16.msrb.mxu0 %v5828_v54  ;;  %v2894_v2 = vpop.f32.mrf.mxu2  ;;  %v6713_v54 = vld [vmem:[%s10104_s3 + $0x360] sm:$0xf0] }
 0x1a9   :  { %v2907_v3 = vpop.f32.mrf.mxu3  ;;  %v2895_v44 = vadd.f32 %v2894_v2, %v2882_v61  ;;  %v2883_v4 = vpop.f32.mrf.mxu1  ;;  %v6188_v37 = vor.u32 %v6713_v54, %v6187_v47  ;;  %v6160_v61 = vor.u32 %v6706_v33, %v6159_v17  ;;  %v5867_v2 = vld [vmem:[%s10104_s3 + $0xb8] sm:$0xf]  ;;  %v6635_v47 = vld [vmem:[%s10104_s3 + $0xf4] sm:$0xf]  ;;  %v5897_v54 = vld [vmem:[%s10104_s3 + $0x10c] sm:$0xf0] }
 0x1aa   :  { %3870 = vmatpush.bf16.msrb.mxu2 %v5944_v51  ;;  %v5952_v51 = vor.u32 %v6652_v39, %v5951_v38  ;;  %v6133_v4 = vld [vmem:[%s10104_s3 + $0x2f4] sm:$0xf0]  ;;  %v5900_v50 = vor.u32 %v6635_v47, %v5897_v54  ;;  %v6628_v17 = vld [vmem:[%s10104_s3 + $0xbc] sm:$0xf]  ;;  %v6607_v47 = vld [vmem:[%s10104_s3 + $0x14] sm:$0xf] }
 0x1ab   :  { %v2908_v20 = vadd.f32 %v2907_v3, %v2895_v44  ;;  %3830 = vmatpush.bf16.msra.mxu3 %v6188_v37  ;;  %v6696_v44 = vld [vmem:[%s10104_s3 + $0x2dc] sm:$0xf]  ;;  %v6678_v37 = vld [vmem:[%s10104_s3 + $0x248] sm:$0xf0]  ;;  %v5869_v33 = vld [vmem:[%s10104_s3 + $0xd4] sm:$0xf0] }
 0x1ac   :  { %3849 = vmatpush.bf16.msrb.mxu0 %v5800_v52  ;;  %v5923_v52 = vld [vmem:[%s10104_s3 + $0x128] sm:$0xf]  ;;  %v5785_v54 = vld [vmem:[%s10104_s3 + $0x2c] sm:$0xf0] }
 0x1ae   :  { %3871 = vmatpush.bf16.msrb.mxu2 %v5916_v46  ;;  %v6645_v46 = vld [vmem:[%s10104_s3 + $0x140] sm:$0xf0] }
 0x1af   :  { %v5924_v59 = vor.u32 %v6645_v46, %v5923_v52  ;;  %3831 = vmatpush.bf16.msra.mxu3 %v6160_v61  ;;  %v5783_v52 = vld [vmem:[%s10104_s3 + $0x10] sm:$0xf]  ;;  %v6048_v46 = vor.u32 %v6678_v37, %v6047_v53  ;;  %v6660_v61 = vld [vmem:[%s10104_s3 + $0x1b8] sm:$0xf0]  ;;  %v5903_v53 = vld [vmem:[%s10104_s3 + $0xf8] sm:$0xf] }
 0x1b0   :  { %3850 = vmatpush.bf16.msrb.mxu0 %v5772_v60  ;;  %v2920_v26 = vpop.f32.mrf.mxu0  ;;  %v2896_v29 = vpop.f32.mrf.mxu2  ;;  %v5895_v60 = vld [vmem:[%s10104_s3 + $0xf0] sm:$0xf]  ;;  %v6639_v37 = vld [vmem:[%s10104_s3 + $0x110] sm:$0xf0] }
 0x1b1   :  { %v9434_v23 = vadd.f32 %v2920_v26, %v2908_v20  ;;  %v2909_v30 = vpop.f32.mrf.mxu3  ;;  %v5896_v31 = vor.u32 %v6638_v28, %v5895_v60  ;;  %v6136_v20 = vor.u32 %v6696_v44, %v6133_v4  ;;  %v5987_v60 = vld [vmem:[%s10104_s3 + $0x1a0] sm:$0xf]  ;;  %v6019_v28 = vld [vmem:[%s10104_s3 + $0x1f8] sm:$0xf]  ;;  %v5959_v44 = vld [vmem:[%s10104_s3 + $0x168] sm:$0xf] }
 0x1b2   :  { %3872 = vmatpush.bf16.msrb.mxu2 %v5888_v9  ;;  %v6703_v9 = vld [vmem:[%s10104_s3 + $0x314] sm:$0xf]  ;;  %v6653_v4 = vld [vmem:[%s10104_s3 + $0x180] sm:$0xf0] }
 0x1b3   :  { %3851 = vmatmul.bf16.vlgmr.msrb.gmra.mxu0 %v9361_v49  ;;  %v5960_v24 = vor.u32 %v6653_v4, %v5959_v44  ;;  %v6683_v4 = vld [vmem:[%s10104_s3 + $0x274] sm:$0xf] }
 0x1b4   :  { %3895 = vmatpush.bf16.msra.mxu0 %v5976_v62  ;;  %v6161_v62 = vld [vmem:[%s10104_s3 + $0x32c] sm:$0xf0] }
 0x1b5   :  { %v6164_v16 = vor.u32 %v6703_v9, %v6161_v62 }
 0x1b6   :  { %3873 = vmatpush.bf16.msrb.mxu2 %v5860_v12  ;;  %v5780_v12 = vor.u32 %v6606_v56, %v5777_v25  ;;  %v6049_v56 = vld [vmem:[%s10104_s3 + $0x24c] sm:$0xf0]  ;;  %v6610_v25 = vld [vmem:[%s10104_s3 + $0x28] sm:$0xf0] }
 0x1b7   :  { %3857 = vmatpush.bf16.msrb.mxu1 %v6164_v16  ;;  %v5784_v18 = vor.u32 %v6610_v25, %v5783_v52  ;;  %v5872_v16 = vor.u32 %v6628_v17, %v5869_v33  ;;  %v6700_v52 = vld [vmem:[%s10104_s3 + $0x2f8] sm:$0xf0]  ;;  %v6141_v25 = vld [vmem:[%s10104_s3 + $0x2fc] sm:$0xf0] }
 0x1b8   :  { %3896 = vmatpush.bf16.msra.mxu0 %v5948_v63  ;;  %v2922_v45 = vpop.f32.mrf.mxu0  ;;  %v6131_v63 = vld [vmem:[%s10104_s3 + $0x2d8] sm:$0xf]  ;;  %v5875_v33 = vld [vmem:[%s10104_s3 + $0xc0] sm:$0xf] }
 0x1b9   :  { %v6132_v3 = vor.u32 %v6699_v0, %v6131_v63  ;;  %v6617_v45 = vld [vmem:[%s10104_s3 + $0x60] sm:$0xf0]  ;;  %v6668_v63 = vld [vmem:[%s10104_s3 + $0x1fc] sm:$0xf]  ;;  %v6021_v0 = vld [vmem:[%s10104_s3 + $0x214] sm:$0xf0] }
 0x1ba   :  { %3874 = vmatpush.bf16.msrb.mxu2 %v5832_v5  ;;  %v6631_v5 = vld [vmem:[%s10104_s3 + $0xd0] sm:$0xf0]  ;;  %v5812_v41 = vor.u32 %v6617_v45, %v5811_v36 }
 0x1bb   :  { %3832 = vmatpush.bf16.msra.mxu3 %v6132_v3  ;;  %3858 = vmatpush.bf16.msrb.mxu1 %v6136_v20  ;;  %v5868_v42 = vor.u32 %v6631_v5, %v5867_v2  ;;  %v5841_v2 = vld [vmem:[%s10104_s3 + $0x9c] sm:$0xf0]  ;;  %v6024_v3 = vor.u32 %v6668_v63, %v6021_v0  ;;  %v6614_v5 = vld [vmem:[%s10104_s3 + $0x4c] sm:$0xf]  ;;  %v6664_v20 = vld [vmem:[%s10104_s3 + $0x1d8] sm:$0xf0] }
 0x1bc   :  { %3897 = vmatpush.bf16.msra.mxu0 %v5920_v6  ;;  %v6649_v6 = vld [vmem:[%s10104_s3 + $0x164] sm:$0xf]  ;;  %v6707_v36 = vld [vmem:[%s10104_s3 + $0x330] sm:$0xf0]  ;;  %v6083_v0 = vld [vmem:[%s10104_s3 + $0x270] sm:$0xf] }
 0x1bd   :  { %v5956_v26 = vor.u32 %v6649_v6, %v5953_v8  ;;  %v5813_v6 = vld [vmem:[%s10104_s3 + $0x64] sm:$0xf0]  ;;  %v5991_v8 = vld [vmem:[%s10104_s3 + $0x1c0] sm:$0xf] }
 0x1be   :  { %3875 = vmatpush.bf16.msrb.mxu2 %v5804_v14  ;;  %v5839_v14 = vld [vmem:[%s10104_s3 + $0x80] sm:$0xf] }
 0x1bf   :  { %3859 = vmatpush.bf16.msrb.mxu1 %v6108_v22  ;;  %v6711_v22 = vld [vmem:[%s10104_s3 + $0x354] sm:$0xf] }
 0x1c0   :  { %3898 = vmatpush.bf16.msra.mxu0 %v5892_v15  ;;  %v6104_v15 = vor.u32 %v6692_v11, %v6103_v10  ;;  %v5931_v11 = vld [vmem:[%s10104_s3 + $0x130] sm:$0xf] }
 0x1c1   :  { %v9524_v32 = vpop.f32.mrf.mxu1 }
 0x1c2   :  { %3876 = vmatpush.bf16.msrb.mxu2 %v5776_v34  ;;  %3833 = vmatpush.bf16.msra.mxu3 %v6104_v15  ;;  %v6075_v34 = vld [vmem:[%s10104_s3 + $0x268] sm:$0xf]  ;;  %v5993_v15 = vld [vmem:[%s10104_s3 + $0x1dc] sm:$0xf0] }
 0x1c4   :  { %3899 = vmatpush.bf16.msra.mxu0 %v5864_v7  ;;  %v6685_v7 = vld [vmem:[%s10104_s3 + $0x280] sm:$0xf0] }
 0x1c5   :  { %3877 = vmatmul.bf16.vlgmr.msrb.gmra.mxu2 %v9361_v49  ;;  %v6076_v39 = vor.u32 %v6685_v7, %v6075_v34  ;;  %v6197_v34 = vld [vmem:[%s10104_s3 + $0x36c] sm:$0xf0]  ;;  %v6196_v7 = vor.u32 %v6714_v58, %v6195_v21  ;;  %v6057_v21 = vld [vmem:[%s10104_s3 + $0x254] sm:$0xf0] }
 0x1c6   :  { %3921 = vmatpush.bf16.msra.mxu2 %v5980_v19  ;;  %v5840_v19 = vor.u32 %v6624_v48, %v5839_v14  ;;  %v6661_v14 = vld [vmem:[%s10104_s3 + $0x1c4] sm:$0xf] }
 0x1c7   :  { %3834 = vmatpush.bf16.msra.mxu3 %v6076_v39  ;;  %v5996_v27 = vor.u32 %v6661_v14, %v5993_v15  ;;  %v6169_v39 = vld [vmem:[%s10104_s3 + $0x334] sm:$0xf0]  ;;  %v6676_v15 = vld [vmem:[%s10104_s3 + $0x23c] sm:$0xf] }
 0x1c8   :  { %3900 = vmatpush.bf16.msra.mxu0 %v5836_v43  ;;  %v9569_v29 = vpop.f32.mrf.mxu2  ;;  %v6682_v43 = vld [vmem:[%s10104_s3 + $0x26c] sm:$0xf] }
 0x1c9   :  { %v9571_v30 = vpop.f32.mrf.mxu3  ;;  %v2935_v38 = vpop.f32.mrf.mxu1 }
 0x1ca   :  { %3922 = vmatpush.bf16.msra.mxu2 %v5952_v51  ;;  %v6080_v51 = vor.u32 %v6682_v43, %v6077_v55  ;;  %v6704_v38 = vld [vmem:[%s10104_s3 + $0x31c] sm:$0xf]  ;;  %v5816_v43 = vor.u32 %v6614_v5, %v5813_v6  ;;  %v6085_v5 = vld [vmem:[%s10104_s3 + $0x28c] sm:$0xf0] }
 0x1cb   :  { %3835 = vmatpush.bf16.msra.mxu3 %v6048_v46  ;;  %v5904_v46 = vor.u32 %v6639_v37, %v5903_v53  ;;  %v6662_v53 = vld [vmem:[%s10104_s3 + $0x1cc] sm:$0xf] }
 0x1cc   :  { %3901 = vmatpush.bf16.msra.mxu0 %v5808_v57  ;;  %3860 = vmatpush.bf16.msrb.mxu1 %v6080_v51  ;;  %v6172_v51 = vor.u32 %v6704_v38, %v6169_v39  ;;  %v6669_v38 = vld [vmem:[%s10104_s3 + $0x204] sm:$0xf]  ;;  %v6029_v39 = vld [vmem:[%s10104_s3 + $0x21c] sm:$0xf0] }
 0x1ce   :  { %3923 = vmatpush.bf16.msra.mxu2 %v5924_v59  ;;  %v6052_v59 = vor.u32 %v6675_v40, %v6049_v56  ;;  %v6697_v56 = vld [vmem:[%s10104_s3 + $0x2e4] sm:$0xf] }
 0x1d0   :  { %3902 = vmatpush.bf16.msra.mxu0 %v5780_v12  ;;  %v9612_v57 = vpop.f32.mrf.mxu0  ;;  %v2948_v9 = vpop.f32.mrf.mxu2  ;;  %3861 = vmatpush.bf16.msrb.mxu1 %v6052_v59  ;;  %v6020_v12 = vor.u32 %v6671_v13, %v6019_v28  ;;  %v6632_v59 = vld [vmem:[%s10104_s3 + $0xd8] sm:$0xf0]  ;;  %v6690_v13 = vld [vmem:[%s10104_s3 + $0x2ac] sm:$0xf] }
 0x1d1   :  { %v2961_v62 = vpop.f32.mrf.mxu3  ;;  %v6693_v9 = vld [vmem:[%s10104_s3 + $0x2c0] sm:$0xf0] }
 0x1d2   :  { %3924 = vmatpush.bf16.msra.mxu2 %v5896_v31  ;;  %v5988_v31 = vor.u32 %v6660_v61, %v5987_v60  ;;  %3836 = vmatpush.bf16.msra.mxu3 %v6020_v12  ;;  %v6144_v60 = vor.u32 %v6697_v56, %v6141_v25  ;;  %v6111_v61 = vld [vmem:[%s10104_s3 + $0x2a8] sm:$0xf]  ;;  %v5876_v62 = vor.u32 %v6632_v59, %v5875_v33  ;;  %v6625_v12 = vld [vmem:[%s10104_s3 + $0xa0] sm:$0xf0] }
 0x1d3   :  { %3903 = vmatmul.bf16.vlgmr.msra.gmra.mxu0 %v9361_v49  ;;  %v6112_v28 = vor.u32 %v6693_v9, %v6111_v61 }
 0x1d4   :  { %3947 = vmatpush.bf16.msrb.mxu0 %v5984_v1  ;;  %v6621_v1 = vld [vmem:[%s10104_s3 + $0x84] sm:$0xf]  ;;  %3862 = vmatpush.bf16.msrb.mxu1 %v6024_v3 }
 0x1d5   :  { %v5844_v10 = vor.u32 %v6621_v1, %v5841_v2 }
 0x1d6   :  { %3925 = vmatpush.bf16.msra.mxu2 %v5868_v42  ;;  %v6646_v42 = vld [vmem:[%s10104_s3 + $0x148] sm:$0xf0] }
 0x1d7   :  { %v5932_v45 = vor.u32 %v6646_v42, %v5931_v11  ;;  %v6055_v11 = vld [vmem:[%s10104_s3 + $0x238] sm:$0xf]  ;;  %v6679_v42 = vld [vmem:[%s10104_s3 + $0x250] sm:$0xf0] }
 0x1d8   :  { %3948 = vmatpush.bf16.msrb.mxu0 %v5956_v26  ;;  %v5992_v26 = vor.u32 %v6664_v20, %v5991_v8  ;;  %v2974_v48 = vpop.f32.mrf.mxu0  ;;  %3863 = vmatpush.bf16.msrb.mxu1 %v5996_v27  ;;  %v5819_v8 = vld [vmem:[%s10104_s3 + $0x50] sm:$0xf]  ;;  %v6618_v20 = vld [vmem:[%s10104_s3 + $0x68] sm:$0xf0]  ;;  %v6056_v14 = vor.u32 %v6679_v42, %v6055_v11  ;;  %v6060_v27 = vor.u32 %v6676_v15, %v6057_v21  ;;  %v6701_v11 = vld [vmem:[%s10104_s3 + $0x300] sm:$0xf0] }
 0x1d9   :  { %v6611_v48 = vld [vmem:[%s10104_s3 + $0x30] sm:$0xf0]  ;;  %v6698_v42 = vld [vmem:[%s10104_s3 + $0x2ec] sm:$0xf]  ;;  %v6119_v21 = vld [vmem:[%s10104_s3 + $0x2b0] sm:$0xf] }
 0x1da   :  { %3926 = vmatpush.bf16.msra.mxu2 %v5840_v19  ;;  %3837 = vmatpush.bf16.msra.mxu3 %v5992_v26  ;;  %v6200_v19 = vor.u32 %v6711_v22, %v6197_v34  ;;  %v5820_v26 = vor.u32 %v6618_v20, %v5819_v8  ;;  %v6027_v22 = vld [vmem:[%s10104_s3 + $0x200] sm:$0xf]  ;;  %v6672_v34 = vld [vmem:[%s10104_s3 + $0x218] sm:$0xf0] }
 0x1dc   :  { %3949 = vmatpush.bf16.msrb.mxu0 %v5928_v35  ;;  %v6167_v35 = vld [vmem:[%s10104_s3 + $0x318] sm:$0xf]  ;;  %3908 = vmatpush.bf16.msra.mxu1 %v6200_v19 }
 0x1dd   :  { %v6168_v55 = vor.u32 %v6707_v36, %v6167_v35  ;;  %v6028_v36 = vor.u32 %v6672_v34, %v6027_v22  ;;  %v6091_v34 = vld [vmem:[%s10104_s3 + $0x278] sm:$0xf] }
 0x1de   :  { %3927 = vmatpush.bf16.msra.mxu2 %v5812_v41  ;;  %3882 = vmatpush.bf16.msrb.mxu3 %v6196_v7  ;;  %v5788_v41 = vor.u32 %v6607_v47, %v5785_v54  ;;  %v5999_v47 = vld [vmem:[%s10104_s3 + $0x1c8] sm:$0xf]  ;;  %v6665_v54 = vld [vmem:[%s10104_s3 + $0x1e0] sm:$0xf0] }
 0x1e0   :  { %3950 = vmatpush.bf16.msrb.mxu0 %v5900_v50  ;;  %v6139_v50 = vld [vmem:[%s10104_s3 + $0x2e0] sm:$0xf]  ;;  %3909 = vmatpush.bf16.msra.mxu1 %v6172_v51  ;;  %v6000_v51 = vor.u32 %v6665_v54, %v5999_v47 }
 0x1e1   :  { %v6140_v40 = vor.u32 %v6700_v52, %v6139_v50  ;;  %v9726_v17 = vpop.f32.mrf.mxu1  ;;  %v6065_v47 = vld [vmem:[%s10104_s3 + $0x25c] sm:$0xf0] }
 0x1e2   :  { %3928 = vmatpush.bf16.msra.mxu2 %v5784_v18  ;;  %3883 = vmatpush.bf16.msrb.mxu3 %v6168_v55  ;;  %v6113_v18 = vld [vmem:[%s10104_s3 + $0x2c4] sm:$0xf0]  ;;  %v6032_v55 = vor.u32 %v6669_v38, %v6029_v39 }
 0x1e3   :  { %v6116_v63 = vor.u32 %v6690_v13, %v6113_v18  ;;  %v6715_v18 = vld [vmem:[%s10104_s3 + $0x370] sm:$0xf0] }
 0x1e4   :  { %3951 = vmatpush.bf16.msrb.mxu0 %v5872_v16  ;;  %3910 = vmatpush.bf16.msra.mxu1 %v6144_v60  ;;  %v5847_v16 = vld [vmem:[%s10104_s3 + $0x88] sm:$0xf] }
 0x1e5   :  { %3929 = vmatmul.bf16.vlgmr.msra.gmra.mxu2 %v9361_v49  ;;  %v5848_v3 = vor.u32 %v6625_v12, %v5847_v16  ;;  %v6712_v16 = vld [vmem:[%s10104_s3 + $0x35c] sm:$0xf]  ;;  %v6205_v12 = vld [vmem:[%s10104_s3 + $0x374] sm:$0xf0] }
 0x1e6   :  { %3973 = vmatpush.bf16.msrb.mxu2 %v5988_v31  ;;  %3884 = vmatpush.bf16.msrb.mxu3 %v6140_v40  ;;  %v6686_v31 = vld [vmem:[%s10104_s3 + $0x288] sm:$0xf0] }
 0x1e7   :  { %v6084_v44 = vor.u32 %v6686_v31, %v6083_v0  ;;  %v6208_v31 = vor.u32 %v6712_v16, %v6205_v12  ;;  %v6695_v16 = vld [vmem:[%s10104_s3 + $0x2d0] sm:$0xf0] }
 0x1e8   :  { %3952 = vmatpush.bf16.msrb.mxu0 %v5844_v10  ;;  %v2998_v1 = vpop.f32.mrf.mxu2  ;;  %3911 = vmatpush.bf16.msra.mxu1 %v6116_v63  ;;  %v6088_v10 = vor.u32 %v6683_v4, %v6085_v5  ;;  %v6705_v4 = vld [vmem:[%s10104_s3 + $0x324] sm:$0xf]  ;;  %v6177_v5 = vld [vmem:[%s10104_s3 + $0x33c] sm:$0xf0] }
 0x1e9   :  { %v3011_v2 = vpop.f32.mrf.mxu3  ;;  %v2987_v6 = vpop.f32.mrf.mxu1  ;;  %v6180_v20 = vor.u32 %v6705_v4, %v6177_v5  ;;  %v6043_v5 = vld [vmem:[%s10104_s3 + $0x210] sm:$0xf] }
 0x1ea   :  { %3974 = vmatpush.bf16.msrb.mxu2 %v5960_v24  ;;  %3885 = vmatpush.bf16.msrb.mxu3 %v6112_v28  ;;  %v5791_v24 = vld [vmem:[%s10104_s3 + $0x18] sm:$0xf] }
 0x1eb   :  { %v5792_v7 = vor.u32 %v6611_v48, %v5791_v24  ;;  %v6694_v24 = vld [vmem:[%s10104_s3 + $0x2c8] sm:$0xf0]  ;;  %v6691_v48 = vld [vmem:[%s10104_s3 + $0x2b4] sm:$0xf] }
 0x1ec   :  { %3953 = vmatpush.bf16.msrb.mxu0 %v5816_v43  ;;  %3912 = vmatpush.bf16.msra.mxu1 %v6088_v10  ;;  %v2934_v43 = vadd.f32 %v9524_v32, %v9434_v23  ;;  %v6001_v23 = vld [vmem:[%s10104_s3 + $0x1e4] sm:$0xf0] }
 0x1ed   :  { %v6004_v32 = vor.u32 %v6662_v53, %v6001_v23  ;;  %v6147_v10 = vld [vmem:[%s10104_s3 + $0x2e8] sm:$0xf]  ;;  %v6673_v23 = vld [vmem:[%s10104_s3 + $0x220] sm:$0xf0] }
 0x1ee   :  { %3975 = vmatpush.bf16.msrb.mxu2 %v5932_v45  ;;  %3886 = vmatpush.bf16.msrb.mxu3 %v6084_v44  ;;  %v2947_v45 = vadd.f32 %v9569_v29, %v2934_v43  ;;  %v6708_v44 = vld [vmem:[%s10104_s3 + $0x338] sm:$0xf0]  ;;  %v6063_v43 = vld [vmem:[%s10104_s3 + $0x240] sm:$0xf]  ;;  %v6035_v53 = vld [vmem:[%s10104_s3 + $0x208] sm:$0xf] }
 0x1f0   :  { %3954 = vmatpush.bf16.msrb.mxu0 %v5788_v41  ;;  %v3024_v58 = vpop.f32.mrf.mxu0  ;;  %v3000_v19 = vpop.f32.mrf.mxu2  ;;  %3913 = vmatpush.bf16.msra.mxu1 %v6060_v27  ;;  %v2960_v37 = vadd.f32 %v9571_v30, %v2947_v45  ;;  %v6121_v27 = vld [vmem:[%s10104_s3 + $0x2cc] sm:$0xf0]  ;;  %v6677_v45 = vld [vmem:[%s10104_s3 + $0x244] sm:$0xf] }
 0x1f1   :  { %v3013_v35 = vpop.f32.mrf.mxu3  ;;  %v6124_v22 = vor.u32 %v6691_v48, %v6121_v27  ;;  %v6684_v19 = vld [vmem:[%s10104_s3 + $0x27c] sm:$0xf] }
 0x1f2   :  { %3976 = vmatpush.bf16.msrb.mxu2 %v5904_v46  ;;  %3887 = vmatpush.bf16.msrb.mxu3 %v6056_v14  ;;  %v2973_v41 = vadd.f32 %v9612_v57, %v2960_v37  ;;  %v6203_v57 = vld [vmem:[%s10104_s3 + $0x358] sm:$0xf]  ;;  %v6148_v14 = vor.u32 %v6701_v11, %v6147_v10 }
 0x1f3   :  { %3955 = vmatmul.bf16.vlgmr.msrb.gmra.mxu0 %v9361_v49  ;;  %v6204_v0 = vor.u32 %v6715_v18, %v6203_v57  ;;  %v6093_v35 = vld [vmem:[%s10104_s3 + $0x294] sm:$0xf0]  ;;  %v6702_v57 = vld [vmem:[%s10104_s3 + $0x308] sm:$0xf0] }
 0x1f4   :  { %3914 = vmatpush.bf16.msra.mxu1 %v6032_v55  ;;  %v2986_v50 = vadd.f32 %v9726_v17, %v2973_v41  ;;  %v6096_v39 = vor.u32 %v6684_v19, %v6093_v35  ;;  %v6680_v55 = vld [vmem:[%s10104_s3 + $0x258] sm:$0xf0]  ;;  %v6127_v18 = vld [vmem:[%s10104_s3 + $0x2b8] sm:$0xf] }
 0x1f5   :  { %v6064_v54 = vor.u32 %v6680_v55, %v6063_v43  ;;  %v6128_v12 = vor.u32 %v6695_v16, %v6127_v18  ;;  %v6015_v11 = vld [vmem:[%s10104_s3 + $0x1d8] sm:$0xf] }
 0x1f6   :  { %3977 = vmatpush.bf16.msrb.mxu2 %v5876_v62  ;;  %3888 = vmatpush.bf16.msrb.mxu3 %v6028_v36  ;;  %v2999_v52 = vadd.f32 %v2998_v1, %v2986_v50  ;;  %v6175_v1 = vld [vmem:[%s10104_s3 + $0x320] sm:$0xf]  ;;  %v6036_v50 = vor.u32 %v6673_v23, %v6035_v53 }
 0x1f7   :  { %v6176_v8 = vor.u32 %v6708_v44, %v6175_v1  ;;  %v6681_v44 = vld [vmem:[%s10104_s3 + $0x260] sm:$0xf0] }
 0x1f8   :  { %v3026_v29 = vpop.f32.mrf.mxu0  ;;  %3915 = vmatpush.bf16.msra.mxu1 %v6004_v32  ;;  %v3012_v40 = vadd.f32 %v3011_v2, %v2999_v52  ;;  %v6670_v32 = vld [vmem:[%s10104_s3 + $0x20c] sm:$0xf] }
 0x1f9   :  { %v6037_v29 = vld [vmem:[%s10104_s3 + $0x224] sm:$0xf0] }
 0x1fa   :  { %3978 = vmatpush.bf16.msrb.mxu2 %v5848_v3  ;;  %3889 = vmatpush.bf16.msrb.mxu3 %v6000_v51  ;;  %v3025_v56 = vadd.f32 %v3024_v58, %v3012_v40  ;;  %v6120_v58 = vor.u32 %v6694_v24, %v6119_v21  ;;  %v6068_v51 = vor.u32 %v6677_v45, %v6065_v47  ;;  %v6666_v40 = vld [vmem:[%s10104_s3 + $0x1e8] sm:$0xf0] }
 0x1fb   :  { %v6040_v52 = vor.u32 %v6670_v32, %v6037_v29 }
 0x1fe   :  { %3979 = vmatpush.bf16.msrb.mxu2 %v5820_v26  ;;  %v6149_v26 = vld [vmem:[%s10104_s3 + $0x304] sm:$0xf0] }
 0x1ff   :  { %v6152_v15 = vor.u32 %v6698_v42, %v6149_v26  ;;  %v6667_v42 = vld [vmem:[%s10104_s3 + $0x1f0] sm:$0xf0] }
 0x200   :  { %v6016_v26 = vor.u32 %v6667_v42, %v6015_v11 }
 0x201   :  { %v3037_v46 = vpop.f32.mrf.mxu1 }
 0x202   :  { %3980 = vmatpush.bf16.msrb.mxu2 %v5792_v7  ;;  %v3038_v25 = vadd.f32 %v3037_v46, %v3025_v56  ;;  %v6687_v7 = vld [vmem:[%s10104_s3 + $0x290] sm:$0xf0]  ;;  %v6007_v46 = vld [vmem:[%s10104_s3 + $0x1d0] sm:$0xf] }
 0x203   :  { %v6092_v38 = vor.u32 %v6687_v7, %v6091_v34  ;;  %v6663_v56 = vld [vmem:[%s10104_s3 + $0x1d4] sm:$0xf] }
 0x205   :  { %3981 = vmatmul.bf16.vlgmr.msrb.gmra.mxu2 %v9361_v49 }
 0x208   :  { %v3050_v33 = vpop.f32.mrf.mxu2 }
 0x209   :  { %v3063_v59 = vpop.f32.mrf.mxu3  ;;  %v3051_v60 = vadd.f32 %v3050_v33, %v3038_v25  ;;  %v3039_v61 = vpop.f32.mrf.mxu1  ;;  %v6009_v25 = vld [vmem:[%s10104_s3 + $0x1ec] sm:$0xf0]  ;;  %v6211_v33 = vld [vmem:[%s10104_s3 + $0x360] sm:$0xf] }
 0x20a   :  { %v6012_v61 = vor.u32 %v6663_v56, %v6009_v25 }
 0x20b   :  { %v3064_v9 = vadd.f32 %v3063_v59, %v3051_v60  ;;  %v6716_v59 = vld [vmem:[%s10104_s3 + $0x378] sm:$0xf0]  ;;  %v6008_v60 = vor.u32 %v6666_v40, %v6007_v46 }
 0x210   :  { %v3076_v62 = vpop.f32.mrf.mxu0  ;;  %v3052_v28 = vpop.f32.mrf.mxu2 }
 0x211   :  { %v3077_v30 = vadd.f32 %v3076_v62, %v3064_v9  ;;  %v3065_v49 = vpop.f32.mrf.mxu3  ;;  %v3089_v13 = vpop.f32.mrf.mxu1  ;;  %v6212_v9 = vor.u32 %v6716_v59, %v6211_v33  ;;  %v6709_v28 = vld [vmem:[%s10104_s3 + $0x340] sm:$0xf0] }
 0x213   :  { %v3090_v17 = vadd.f32 %v3089_v13, %v3077_v30  ;;  %v6183_v30 = vld [vmem:[%s10104_s3 + $0x328] sm:$0xf]  ;;  %v6155_v13 = vld [vmem:[%s10104_s3 + $0x2f0] sm:$0xf] }
 0x214   :  { %v6184_v49 = vor.u32 %v6709_v28, %v6183_v30 }
 0x215   :  { %v3094_v63 = vmax.f32 %v3090_v17, 0.0  ;;  %v6156_v17 = vor.u32 %v6702_v57, %v6155_v13 }
 0x217   :  { %v9835_v2 = vpack.c.bf16 %v3094_v63, %v3094_v63  ;;  %v6099_v63 = vld [vmem:[%s10104_s3 + $0x280] sm:$0xf] }
 0x218   :  { %v3078_v3 = vpop.f32.mrf.mxu0 }
 0x219   :  { %3838 = vmatmul.bf16.vlgmr.msra.gmra.mxu3 %v9835_v2  ;;  %3864 = vmatmul.bf16.vlgmr.msrb.gmra.mxu1 %v9835_v2  ;;  %v3091_v6 = vpop.f32.mrf.mxu1  ;;  %v6071_v3 = vld [vmem:[%s10104_s3 + $0x248] sm:$0xf] }
 0x21a   :  { %3934 = vmatpush.bf16.msra.mxu3 %v6204_v0  ;;  %3960 = vmatpush.bf16.msrb.mxu1 %v6208_v31  ;;  %v6688_v0 = vld [vmem:[%s10104_s3 + $0x298] sm:$0xf0]  ;;  %v6072_v4 = vor.u32 %v6681_v44, %v6071_v3  ;;  %v6674_v6 = vld [vmem:[%s10104_s3 + $0x228] sm:$0xf0] }
 0x21b   :  { %v6100_v1 = vor.u32 %v6688_v0, %v6099_v63  ;;  %v6044_v10 = vor.u32 %v6674_v6, %v6043_v5 }
 0x21e   :  { %3935 = vmatpush.bf16.msra.mxu3 %v6176_v8  ;;  %3961 = vmatpush.bf16.msrb.mxu1 %v6180_v20 }
 0x222   :  { %3936 = vmatpush.bf16.msra.mxu3 %v6148_v14  ;;  %3962 = vmatpush.bf16.msrb.mxu1 %v6152_v15 }
 0x226   :  { %3937 = vmatpush.bf16.msra.mxu3 %v6120_v58  ;;  %3963 = vmatpush.bf16.msrb.mxu1 %v6124_v22  ;;  %v3225_v22 = vld [vmem:[%s10105_s4] sm:$0xff] }
 0x227   :  { %v3227_v7 = vperm.slane %v3225_v22, 0  ;;  %v3228_v19 = vperm.slane %v3225_v22, 1  ;;  %v3230_v47 = vperm.slane %v3225_v22, 3  ;;  %v3229_v23 = vperm.slane %v3225_v22, 2 }
 0x228   :  { %v9884_v36 = vpop.f32.mrf.mxu2  ;;  %v3232_v56 = vperm.slane %v3225_v22, 5  ;;  %v3233_v16 = vperm.slane %v3225_v22, 6 }
 0x229   :  { %3890 = vmatmul.bf16.vlgmr.msrb.gmra.mxu3 %v9835_v2  ;;  %3916 = vmatmul.bf16.vlgmr.msra.gmra.mxu1 %v9835_v2  ;;  %v3827_v35 = vadd.f32 %v9884_v36, %v3227_v7 }
 0x22a   :  { %3938 = vmatpush.bf16.msra.mxu3 %v6092_v38  ;;  %3964 = vmatpush.bf16.msrb.mxu1 %v6096_v39 }
 0x22e   :  { %3939 = vmatpush.bf16.msra.mxu3 %v6064_v54  ;;  %3965 = vmatpush.bf16.msrb.mxu1 %v6068_v51 }
 0x230   :  { %v9912_v37 = vpop.f32.mrf.mxu0  ;;  %v3828_v41 = vpop.f32.mrf.mxu2 }
 0x231   :  { %v3853_v38 = vadd.f32 %v9912_v37, %v3228_v19 }
 0x232   :  { %3940 = vmatpush.bf16.msra.mxu3 %v6036_v50  ;;  %3966 = vmatpush.bf16.msrb.mxu1 %v6040_v52 }
 0x236   :  { %3941 = vmatpush.bf16.msra.mxu3 %v6008_v60  ;;  %3967 = vmatpush.bf16.msrb.mxu1 %v6012_v61  ;;  %v3231_v60 = vperm.slane %v3225_v22, 4 }
 0x238   :  { %v3854_v62 = vpop.f32.mrf.mxu0 }
 0x239   :  { %3942 = vmatmul.bf16.vlgmr.msra.gmra.mxu3 %v9835_v2  ;;  %3968 = vmatmul.bf16.vlgmr.msrb.gmra.mxu1 %v9835_v2 }
 0x23a   :  { %3986 = vmatpush.bf16.msrb.mxu3 %v6212_v9 }
 0x23e   :  { %3987 = vmatpush.bf16.msrb.mxu3 %v6184_v49 }
 0x242   :  { %3988 = vmatpush.bf16.msrb.mxu3 %v6156_v17 }
 0x246   :  { %3989 = vmatpush.bf16.msrb.mxu3 %v6128_v12  ;;  %v4005_v12 = vlaneseq }
 0x248   :  { %v3878_v31 = vpop.f32.mrf.mxu2 }
 0x249   :  { %v3879_v41 = vadd.f32 %v3878_v31, %v3229_v23 }
 0x24a   :  { %3990 = vmatpush.bf16.msrb.mxu3 %v6100_v1  ;;  %v4006_v1 = vand.u32 127, %v4005_v12 }
 0x24c   :  { %vm4007_vm1 = vcmp.lt.s32.totalorder %v4006_v1, 51 }
 0x24e   :  { %3991 = vmatpush.bf16.msrb.mxu3 %v6072_v4 }
 0x250   :  { %v3904_v8 = vpop.f32.mrf.mxu0  ;;  %v3880_v20 = vpop.f32.mrf.mxu2 }
 0x251   :  { %v3905_v51 = vadd.f32 %v3904_v8, %v3230_v47 }
 0x252   :  { %3992 = vmatpush.bf16.msrb.mxu3 %v6044_v10 }
 0x256   :  { %3993 = vmatpush.bf16.msrb.mxu3 %v6016_v26 }
 0x258   :  { %v3906_v14 = vpop.f32.mrf.mxu0 }
 0x259   :  { %3994 = vmatmul.bf16.vlgmr.msrb.gmra.mxu3 %v9835_v2 }
 0x268   :  { %v3930_v15 = vpop.f32.mrf.mxu2 }
 0x269   :  { %v3931_v62 = vadd.f32 %v3930_v15, %v3231_v60 }
 0x270   :  { %v3956_v21 = vpop.f32.mrf.mxu0  ;;  %v3932_v24 = vpop.f32.mrf.mxu2 }
 0x271   :  { %v3957_v33 = vadd.f32 %v3956_v21, %v3232_v56 }
 0x278   :  { %v3958_v48 = vpop.f32.mrf.mxu0 }
 0x288   :  { %v3982_v27 = vpop.f32.mrf.mxu2 }
 0x289   :  { %v3983_v63 = vadd.f32 %v3982_v27, %v3233_v16 }
 0x290   :  { %v3984_v58 = vpop.f32.mrf.mxu2 }
 0x296   :  { %v3865_v34 = vpop.f32.mrf.mxu1 }
 0x297   :  { %v3866_v43 = vadd.f32 %v3865_v34, %v3853_v38 }
 0x29c   :  { %v3839_v39 = vpop.f32.mrf.mxu3 }
 0x29d   :  { %v3840_v2 = vadd.f32 %v3839_v39, %v3827_v35 }
 0x29e   :  { %v3867_v55 = vpop.f32.mrf.mxu1 }
 0x29f   :  { %v4008_v45 = vadd.f32 %v3866_v43, %v3840_v2 }
 0x2a4   :  { %v3841_v54 = vpop.f32.mrf.mxu3 }
 0x2a6   :  { %v3917_v53 = vpop.f32.mrf.mxu1 }
 0x2a7   :  { %v3918_v32 = vadd.f32 %v3917_v53, %v3905_v51 }
 0x2a9   :  { %v4063_v29 = vadd.f32 %v3918_v32, %v3840_v2 }
 0x2ac   :  { %v3891_v50 = vpop.f32.mrf.mxu3 }
 0x2ad   :  { %v3892_v52 = vadd.f32 %v3891_v50, %v3879_v41 }
 0x2ae   :  { %v3919_v46 = vpop.f32.mrf.mxu1 }
 0x2af   :  { %v3999_v40 = vadd.f32 %v3892_v52, %v3866_v43  ;;  %v4036_v36 = vadd.f32 %v3892_v52, %v3840_v2 }
 0x2b1   :  { %v4000_v37 = vadd.f32 %v3999_v40, %v3918_v32 }
 0x2b4   :  { %v3893_v25 = vpop.f32.mrf.mxu3 }
 0x2b6   :  { %v3969_v59 = vpop.f32.mrf.mxu1 }
 0x2b7   :  { %v3970_v61 = vadd.f32 %v3969_v59, %v3957_v33 }
 0x2b9   :  { %v4117_v9 = vadd.f32 %v3970_v61, %v3840_v2 }
 0x2bc   :  { %v3943_v30 = vpop.f32.mrf.mxu3 }
 0x2bd   :  { %v3944_v28 = vadd.f32 %v3943_v30, %v3931_v62 }
 0x2be   :  { %v3971_v49 = vpop.f32.mrf.mxu1 }
 0x2bf   :  { %v4001_v13 = vadd.f32 %v4000_v37, %v3944_v28  ;;  %v4090_v57 = vadd.f32 %v3944_v28, %v3840_v2 }
 0x2c1   :  { %v4002_v17 = vadd.f32 %v4001_v13, %v3970_v61 }
 0x2c4   :  { %v3945_v18 = vpop.f32.mrf.mxu3 }
 0x2dc   :  { %v3995_v0 = vpop.f32.mrf.mxu3 }
 0x2dd   :  { %v3996_v31 = vadd.f32 %v3995_v0, %v3983_v63 }
 0x2df   :  { %v4003_v3 = vadd.f32 %v4002_v17, %v3996_v31  ;;  %v4144_v44 = vadd.f32 %v3996_v31, %v3840_v2 }
 0x2e1   :  { %v4004_v4 = vmul.f32 0.16666667, %v4003_v3 }
 0x2e3   :  { %v4091_v5 = vsub.f32 %v4090_v57, %v4004_v4  ;;  %v4037_v6 = vsub.f32 %v4036_v36, %v4004_v4  ;;  %v4009_v8 = vsub.f32 %v4008_v45, %v4004_v4  ;;  %v4145_v20 = vsub.f32 %v4144_v44, %v4004_v4 }
 0x2e4   :  { %v3997_v10 = vpop.f32.mrf.mxu3  ;;  %v4064_v11 = vsub.f32 %v4063_v29, %v4004_v4  ;;  %v4118_v42 = vsub.f32 %v4117_v9, %v4004_v4 }
 0x2e5   :  { %v4092_v26 = vsel %vm4007_vm1, %v4091_v5, -1e+30  ;;  %v4038_v14 = vsel %vm4007_vm1, %v4037_v6, -1e+30  ;;  %v4010_v15 = vsel %vm4007_vm1, %v4009_v8, -1e+30 }
 0x2e6   :  { %v4093_v21 = vsel %vm4011_vm2, %v4092_v26, -inf  ;;  %v4039_v24 = vsel %vm4011_vm2, %v4038_v14, -inf  ;;  %v4012_v48 = vsel %vm4011_vm2, %v4010_v15, -inf  ;;  %v4146_v27 = vsel %vm4007_vm1, %v4145_v20, -1e+30 }
 0x2e7   :  { %4094 = vmax.xlane.f32.xlu1 %v4093_v21  ;;  %4040 = vmax.xlane.f32.xlu0 %v4039_v24  ;;  %v4065_v58 = vsel %vm4007_vm1, %v4064_v11, -1e+30  ;;  %v4119_v22 = vsel %vm4007_vm1, %v4118_v42, -1e+30  ;;  %v4147_v34 = vsel %vm4011_vm2, %v4146_v27, -inf }
 0x2e8   :  { %4013 = vmax.xlane.f32.xlu2 %v4012_v48  ;;  %v4066_v7 = vsel %vm4011_vm2, %v4065_v58, -inf  ;;  %v4120_v19 = vsel %vm4011_vm2, %v4119_v22, -inf }
 0x2ef   :  { %4148 = vmax.xlane.f32.xlu1 %v4147_v34  ;;  %4067 = vmax.xlane.f32.xlu0 %v4066_v7 }
 0x2f0   :  { %4121 = vmax.xlane.f32.xlu2 %v4120_v19 }
 0x35a   :  { %v4095_v35 = vpop.xlane.xlu1 %4094  ;;  %v4041_v38 = vpop.xlane.xlu0 %4040 }
 0x35b   :  { %v4096_v39 = vsub.f32 %v4092_v26, %v4095_v35  ;;  %v4042_v43 = vsub.f32 %v4038_v14, %v4041_v38  ;;  %v4014_v2 = vpop.xlane.xlu2 %4013 }
 0x35c   :  { %v4015_v46 = vsub.f32 %v4010_v15, %v4014_v2 }
 0x35d   :  { %v4097_v55 = vmul.f32 1.442695, %v4096_v39  ;;  %v4043_v45 = vmul.f32 1.442695, %v4042_v43 }
 0x35e   :  { %v4016_v37 = vmul.f32 1.442695, %v4015_v46 }
 0x35f   :  { %6717 = vpow2.f32 %v4097_v55 }
 0x360   :  { %6719 = vpow2.f32 %v4043_v45 }
 0x362   :  { %v4149_v47 = vpop.xlane.xlu1 %4148  ;;  %v4068_v54 = vpop.xlane.xlu0 %4067 }
 0x363   :  { %v4150_v51 = vsub.f32 %v4146_v27, %v4149_v47  ;;  %v4069_v53 = vsub.f32 %v4065_v58, %v4068_v54  ;;  %v4122_v23 = vpop.xlane.xlu2 %4121 }
 0x364   :  { %v4123_v32 = vsub.f32 %v4119_v22, %v4122_v23 }
 0x365   :  { %v9994_v29 = vpop.eup %6717  ;;  %v4151_v41 = vmul.f32 1.442695, %v4150_v51  ;;  %v4070_v50 = vmul.f32 1.442695, %v4069_v53 }
 0x366   :  { %v9996_v52 = vpop.eup %6719  ;;  %v4124_v40 = vmul.f32 1.442695, %v4123_v32  ;;  %v4099_v36 = vsel %vm4011_vm2, %v9994_v29, 0.0 }
 0x367   :  { %6721 = vpow2.f32 %v4151_v41  ;;  %v4045_v56 = vsel %vm4011_vm2, %v9996_v52, 0.0  ;;  %4100 = vadd.xlane.f32.xlu2 %v4099_v36 }
 0x368   :  { %6723 = vpow2.f32 %v4070_v50  ;;  %4046 = vadd.xlane.f32.xlu0 %v4045_v56 }
 0x369   :  { %6725 = vpow2.f32 %v4124_v40 }
 0x36a   :  { %6727 = vpow2.f32 %v4016_v37 }
 0x36d   :  { %v10002_v25 = vpop.eup %6721 }
 0x36e   :  { %v10004_v33 = vpop.eup %6723  ;;  %v4153_v59 = vsel %vm4011_vm2, %v10002_v25, 0.0 }
 0x36f   :  { %v10008_v60 = vpop.eup %6725  ;;  %v4072_v61 = vsel %vm4011_vm2, %v10004_v33, 0.0 }
 0x370   :  { %4154 = vadd.xlane.f32.xlu0 %v4153_v59  ;;  %4073 = vadd.xlane.f32.xlu1 %v4072_v61  ;;  %v4126_v9 = vsel %vm4011_vm2, %v10008_v60, 0.0  ;;  %v10014_v62 = vpop.eup %6727 }
 0x371   :  { %4127 = vadd.xlane.f32.xlu2 %v4126_v9  ;;  %v4018_v30 = vsel %vm4011_vm2, %v10014_v62, 0.0 }
 0x378   :  { %4019 = vadd.xlane.f32.xlu1 %v4018_v30 }
 0x3da   :  { %v4101_v28 = vpop.xlane.xlu2 %4100 }
 0x3db   :  { %v4047_v49 = vpop.xlane.xlu0 %4046  ;;  %6729 = vrcp.f32 %v4101_v28  ;;  %v4113_v31 = vand.u32 2147483648, %v4101_v28  ;;  %v4111_v44 = vand.u32 2147483647, %v4101_v28  ;;  %vm4107_vm4 = vweird.f32 %v4101_v28 }
 0x3dc   :  { %6731 = vrcp.f32 %v4047_v49  ;;  %v4059_v3 = vand.u32 2147483648, %v4047_v49  ;;  %v4057_v4 = vand.u32 2147483647, %v4047_v49  ;;  %vm4053_vm3 = vweird.f32 %v4047_v49 }
 0x3dd   :  { %v4114_v20 = vor.u32 1.1754944e-38, %v4113_v31  ;;  %vm10033_vm7 = vcmp.eq.f32.partialorder %v4111_v44, 8.507059e+37 }
 0x3de   :  { %v4060_v42 = vor.u32 1.1754944e-38, %v4059_v3  ;;  %vm10037_vm9 = vcmp.eq.f32.partialorder %v4057_v4, 8.507059e+37 }
 0x3e1   :  { %v10018_v13 = vpop.eup %6729 }
 0x3e2   :  { %v10020_v57 = vpop.eup %6731  ;;  %v4103_v17 = vmul.f32 %v10018_v13, %v4101_v28  ;;  %vm4108_vm5 = vweird.f32 %v10018_v13 }
 0x3e3   :  { %v4049_v18 = vmul.f32 %v10020_v57, %v4047_v49  ;;  %v4074_v16 = vpop.xlane.xlu1 %4073  ;;  %v4155_v12 = vpop.xlane.xlu0 %4154  ;;  %vm4054_vm6 = vweird.f32 %v10020_v57  ;;  %vm10052_vm13 = vmor %vm4107_vm4, %vm4108_vm5 }
 0x3e4   :  { %6733 = vrcp.f32 %v4074_v16  ;;  %v10024_v63 = vpop.xlane.xlu2 %4127  ;;  %v4104_v0 = vsub.f32 1.0, %v4103_v17  ;;  %v4084_v5 = vand.u32 2147483647, %v4074_v16  ;;  %vm4080_vm8 = vweird.f32 %v4074_v16  ;;  %vm10059_vm15 = vmor %vm4053_vm3, %vm4054_vm6 }
 0x3e5   :  { %6735 = vrcp.f32 %v4155_v12  ;;  %v4050_v1 = vsub.f32 1.0, %v4049_v18  ;;  %v4086_v21 = vand.u32 2147483648, %v4074_v16  ;;  %vm4161_vm11 = vweird.f32 %v4155_v12 }
 0x3e6   :  { %6737 = vrcp.f32 %v10024_v63  ;;  %v4105_v8 = vmul.f32 %v10018_v13, %v4104_v0  ;;  %vm10041_vm10 = vcmp.eq.f32.partialorder %v4084_v5, 8.507059e+37  ;;  %v4165_v19 = vand.u32 2147483647, %v4155_v12 }
 0x3e7   :  { %v4051_v11 = vmul.f32 %v10020_v57, %v4050_v1  ;;  %v4167_v43 = vand.u32 2147483648, %v4155_v12  ;;  %v4087_v55 = vor.u32 1.1754944e-38, %v4086_v21  ;;  %vm4134_vm0 = vweird.f32 %v10024_v63 }
 0x3e8   :  { %v4106_v34 = vadd.f32 %v10018_v13, %v4105_v8  ;;  %v4138_v53 = vand.u32 2147483647, %v10024_v63  ;;  %v4140_v23 = vand.u32 2147483648, %v10024_v63  ;;  %vm4166_vm5 = vcmp.eq.f32.partialorder %v4165_v19, 8.507059e+37 }
 0x3e9   :  { %v4052_v38 = vadd.f32 %v10020_v57, %v4051_v11  ;;  %v4168_v56 = vor.u32 1.1754944e-38, %v4167_v43 }
 0x3ea   :  { %v6734_v6 = vpop.eup %6733  ;;  %v4110_v32 = vsel %vm10052_vm13, %v10018_v13, %v4106_v34  ;;  %v4141_v49 = vor.u32 1.1754944e-38, %v4140_v23  ;;  %vm4184_vm13 = vcmask 1043456  }
 0x3eb   :  { %v6736_v10 = vpop.eup %6735  ;;  %v4076_v26 = vmul.f32 %v6734_v6, %v4074_v16  ;;  %v10030_v14 = vpop.xlane.xlu1 %4019  ;;  %vm4081_vm12 = vweird.f32 %v6734_v6  ;;  %v4056_v40 = vsel %vm10059_vm15, %v10020_v57, %v4052_v38  ;;  %v4115_v30 = vsel %vm10033_vm7, %v4114_v20, %v4110_v32 }
 0x3ec   :  { %v4157_v24 = vmul.f32 %v6736_v10, %v4155_v12  ;;  %v6738_v48 = vpop.eup %6737  ;;  %6739 = vrcp.f32 %v10030_v14  ;;  %vm4162_vm14 = vweird.f32 %v6736_v10  ;;  %vm4082_vm1 = vmor %vm4080_vm8, %vm4081_vm12  ;;  %vm4139_vm8 = vcmp.eq.f32.partialorder %v4138_v53, 8.507059e+37 }
 0x3ed   :  { %v4077_v58 = vsub.f32 1.0, %v4076_v26  ;;  %v4130_v35 = vmul.f32 %v6738_v48, %v10024_v63  ;;  %vm4135_vm4 = vweird.f32 %v6738_v48  ;;  %vm4163_vm3 = vmor %vm4161_vm11, %vm4162_vm14  ;;  %v4061_v13 = vsel %vm10037_vm9, %v4060_v42, %v4056_v40 }
 0x3ee   :  { %v4158_v7 = vsub.f32 1.0, %v4157_v24  ;;  %vm4136_vm6 = vmor %vm4134_vm0, %vm4135_vm4  ;;  %v4030_v0 = vand.u32 2147483647, %v10030_v14  ;;  %v4032_v31 = vand.u32 2147483648, %v10030_v14  ;;  %v4116_v44 = vmul.f32 %v9994_v29, %v4115_v30 }
 0x3ef   :  { %v4078_v39 = vmul.f32 %v6734_v6, %v4077_v58  ;;  %v4131_v47 = vsub.f32 1.0, %v4130_v35  ;;  %v4062_v4 = vmul.f32 %v9996_v52, %v4061_v13  ;;  %vm4026_vm9 = vweird.f32 %v10030_v14 }
 0x3f0   :  { %v4159_v45 = vmul.f32 %v6736_v10, %v4158_v7  ;;  %vm4031_vm11 = vcmp.eq.f32.partialorder %v4030_v0, 8.507059e+37  ;;  %vm4182_vm12 = vcmask 1045508   ;;  %v4179_v29 = vrot.slane %v4116_v44, 2 }
 0x3f1   :  { %v4079_v51 = vadd.f32 %v6734_v6, %v4078_v39  ;;  %v4132_v50 = vmul.f32 %v6738_v48, %v4131_v47  ;;  %v4177_v20 = vrot.slane %v4062_v4, 6 }
 0x3f2   :  { %v4160_v41 = vadd.f32 %v6736_v10, %v4159_v45  ;;  %v6740_v46 = vpop.eup %6739 }
 0x3f3   :  { %v4083_v36 = vsel %vm4082_vm1, %v6734_v6, %v4079_v51  ;;  %v4133_v61 = vadd.f32 %v6738_v48, %v4132_v50  ;;  %v4022_v9 = vmul.f32 %v6740_v46, %v10030_v14  ;;  %vm4027_vm7 = vweird.f32 %v6740_v46 }
 0x3f4   :  { %v4088_v37 = vsel %vm10041_vm10, %v4087_v55, %v4083_v36  ;;  %v4164_v59 = vsel %vm4163_vm3, %v6736_v10, %v4160_v41  ;;  %vm4028_vm10 = vmor %vm4026_vm9, %vm4027_vm7 }
 0x3f5   :  { %v4169_v28 = vsel %vm4166_vm5, %v4168_v56, %v4164_v59  ;;  %v4137_v17 = vsel %vm4136_vm6, %v6738_v48, %v4133_v61  ;;  %v4023_v18 = vsub.f32 1.0, %v4022_v9  ;;  %v4089_v16 = vmul.f32 %v10004_v33, %v4088_v37 }
 0x3f6   :  { %v4170_v57 = vmul.f32 %v10002_v25, %v4169_v28  ;;  %v4142_v12 = vsel %vm4139_vm8, %v4141_v49, %v4137_v17  ;;  %v4033_v33 = vor.u32 1.1754944e-38, %v4032_v31 }
 0x3f7   :  { %v4143_v63 = vmul.f32 %v10008_v60, %v4142_v12  ;;  %v4024_v3 = vmul.f32 %v6740_v46, %v4023_v18  ;;  %v4178_v6 = vrot.slane %v4089_v16, 4 }
 0x3f8   :  { %v4180_v1 = vrot.slane %v4170_v57, 6 }
 0x3f9   :  { %v4025_v5 = vadd.f32 %v6740_v46, %v4024_v3  ;;  %v4183_v10 = vsel %vm4182_vm12, %v4178_v6, %v4179_v29 }
 0x3fa   :  { %v4186_v25 = vsel %vm4011_vm2, %v4143_v63, %v4180_v1 }
 0x3fb   :  { %4190 = vst [vmem:[%s10106_s5 + $0x8] sm:$0xf] %v4186_v25  ;;  %v4029_v8 = vsel %vm4028_vm10, %v6740_v46, %v4025_v5 }
 0x3fc   :  { %v4034_v60 = vsel %vm4031_vm11, %v4033_v33, %v4029_v8 }
 0x3fd   :  { %v4035_v52 = vmul.f32 %v10014_v62, %v4034_v60 }
 0x3ff   :  { %v4181_v11 = vsel %vm4011_vm2, %v4035_v52, %v4177_v20 }
 0x400   :  { %v4185_v42 = vsel %vm4184_vm13, %v4181_v11, %v4183_v10 }
 0x401   :  { %4189 = vst [vmem:[%s10106_s5] sm:$0xff] %v4185_v42 }

</bundles_post_ra>
